<compile_context>
chip_gen: v7x
topology: tpu7x:2x2x1
jax: 0.10.0
libtpu: 0.0.40
codegen_flags: <defaults>
</compile_context>

<pallas_src>
import jax
import jax.numpy as jnp
from jax import lax
from jax.experimental import pallas as pl
from jax.experimental.pallas import tpu as pltpu

C = 128                                                   # internal feature width
TAPS = [(dy, dx) for dy in range(3) for dx in range(3)]   # t = dy*3 + dx


# ----------------------------------------------------------------------------
# Fused kernel: one batch element per grid step, all 15 layers in one body.
# ----------------------------------------------------------------------------
def fused_net_kernel(x_ref, convw_ref, daw_ref, dab_ref, dk_ref, att_ref,
                     o_ref, pad_ref):
    """
    x_ref    : (1, H, W, 128) f32  input, channels zero-padded 3 -> 128 (not ReLU'd)
    convw_ref: (72, 128, 128) bf16 per-tap folded 3x3 conv weights,
               index = layer*9 + tap; layer 0=input, 1..6=conv1..6, 7=output
    daw_ref  : (6, 128, 128)  bf16 DA 1x1 conv weights, (Cin, Cout) layout
    dab_ref  : (6, 1, 128)    f32  DA 1x1 conv biases
    dk_ref   : (6, 9, 128)    f32  per-sample depthwise 3x3 kernels (tap-major)
    att_ref  : (6, 1, 128)    f32  per-sample sigmoid channel attention
    o_ref    : (1, H, W, 128) f32  output (+ residual), channels >=3 are dummies
    pad_ref  : ((H+2)*W, 128) f32  VMEM scratch: activation with one zero
                                    row-band (W rows) above and below, flattened
    """
    H, W = o_ref.shape[1], o_ref.shape[2]
    HW = H * W

    # Zero only the two halo row-bands; the interior is overwritten before use.
    pad_ref[:W, :] = jnp.zeros((W, C), jnp.float32)
    pad_ref[W + HW:(H + 2) * W, :] = jnp.zeros((W, C), jnp.float32)

    # Column-edge masks for the horizontal (w +- 1) taps, built once.
    wcol = lax.broadcasted_iota(jnp.int32, (HW, C), 0) % W
    has_left = wcol != 0            # a left  neighbour exists (w > 0)
    has_right = wcol != (W - 1)     # a right neighbour exists (w < W-1)

    def accum_taps(act, use_tap):
        """sum_t use_tap(t, shifted_t(act)) over the 9 taps of a 3x3 stencil.

        act: (HW, C) f32.  The dy shift comes from an aligned slab slice of the
        H-padded scratch; the dx shift is a sublane roll of the flattened slab
        (wrapped elements are exactly the ones the edge mask zeroes).
        """
        pad_ref[W:W + HW, :] = act
        acc = None
        for t, (dy, dx) in enumerate(TAPS):
            slab = pad_ref[dy * W:dy * W + HW, :]          # aligned (HW, C) slice
            if dx == 0:      # needs value at w-1: roll down by 1, mask col 0
                slab = jnp.where(has_left,
                                 pltpu.roll(slab, shift=1, axis=0), 0.0)
            elif dx == 2:    # needs value at w+1: roll up by 1, mask col W-1
                slab = jnp.where(has_right,
                                 pltpu.roll(slab, shift=HW - 1, axis=0), 0.0)
            term = use_tap(t, slab)
            acc = term if acc is None else acc + term
        return acc

    def conv3x3(act_relu, layer):
        """3x3 conv (padding=1) = 9 accumulating bf16 MXU matmuls, f32 accumulate."""
        return accum_taps(
            act_relu,
            lambda t, slab: jnp.dot(slab.astype(jnp.bfloat16),
                                    convw_ref[layer * 9 + t],
                                    preferred_element_type=jnp.float32))

    # self.input(self.relu(x)).  relu(x) is also the residual (see TODO below).
    rx = jnp.maximum(x_ref[0].reshape(HW, C), 0.0)
    out = conv3x3(rx, 0)

    # 6 x (DA_conv -> 3x3 conv), layer-indexed weights, fori_loop over layers.
    def layer_body(i, out):
        z = jnp.maximum(out, 0.0)                          # relu(out) == DA input
        dkl = dk_ref[i]                                    # (9, C) per-sample kernel
        # per-sample per-channel depthwise 3x3 conv (f32 elementwise), then ReLU
        dw = accum_taps(z, lambda t, slab: slab * dkl[t:t + 1])
        dw = jnp.maximum(dw, 0.0)
        # 1x1 conv (+bias)  +  CA: z * sigmoid(MLP(altitude))
        da = (jnp.dot(dw.astype(jnp.bfloat16), daw_ref[i],
                      preferred_element_type=jnp.float32)
              + dab_ref[i] + z * att_ref[i])
        # conv_i(self.relu(da))
        return conv3x3(jnp.maximum(da, 0.0), i + 1)

    out = lax.fori_loop(0, 6, layer_body, out)

    # self.output(self.relu(out)) + residual.
    y = conv3x3(jnp.maximum(out, 0.0), 7)
    # TODO(synk): PyTorch's inplace ReLU aliases `residual`, so the module as
    # written adds relu(x); replace `rx` with the raw input if the non-inplace
    # semantics (out + x) is what is actually intended.
    o_ref[...] = (y + rx).reshape(1, H, W, C)


def _fused_net(x_pad, conv_taps, da_w1, da_b1, dk, att):
    B, H, W, _ = x_pad.shape
    HW = H * W
    flops = 2 * B * HW * C * (8 * 9 * C + 6 * C + 6 * 9)   # convs + DA 1x1 + depthwise
    bytes_accessed = (2 * x_pad.size * 4 + conv_taps.size * 2 + da_w1.size * 2
                      + da_b1.size * 4 + dk.size * 4 + att.size * 4)
    return pl.pallas_call(
        fused_net_kernel,
        out_shape=jax.ShapeDtypeStruct((B, H, W, C), jnp.float32),
        grid=(B,),
        in_specs=[
            pl.BlockSpec((1, H, W, C), lambda b: (b, 0, 0, 0)),
            pl.BlockSpec(conv_taps.shape, lambda b: (0, 0, 0)),   # resident weights
            pl.BlockSpec(da_w1.shape, lambda b: (0, 0, 0)),
            pl.BlockSpec(da_b1.shape, lambda b: (0, 0, 0)),
            pl.BlockSpec((6, 9, C), lambda b: (b, 0, 0)),         # per-sample dk
            pl.BlockSpec((6, 1, C), lambda b: (b, 0, 0)),         # per-sample att
        ],
        out_specs=pl.BlockSpec((1, H, W, C), lambda b: (b, 0, 0, 0)),
        scratch_shapes=[
            pltpu.VMEM(((H + 2) * W, C), jnp.float32),            # H-padded activation
        ],
        compiler_params=pltpu.CompilerParams(
            dimension_semantics=("parallel",),                    # batch feeds the TCs
            vmem_limit_bytes=32 * 1024 * 1024,
        ),
        cost_estimate=pl.CostEstimate(flops=flops, transcendentals=0,
                                      bytes_accessed=bytes_accessed),
    )(x_pad, conv_taps, da_w1, da_b1, dk, att)


# ----------------------------------------------------------------------------
# Parameters (deterministic synthetic init, mirrors the module's __init__)
# ----------------------------------------------------------------------------
def init_params(key, in_channels=3):
    keys = iter(jax.random.split(key, 64))

    def conv_w(cout, cin, k):
        std = (2.0 / (k * k * cout)) ** 0.5                 # m.weight.normal_(0, sqrt(2/n))
        return std * jax.random.normal(next(keys), (cout, cin, k, k), jnp.float32)

    def lin_w(cout, cin):
        bound = 1.0 / (cin ** 0.5)
        return jax.random.uniform(next(keys), (cout, cin), jnp.float32, -bound, bound)

    def lin_b(cout, fan_in):
        bound = 1.0 / (fan_in ** 0.5)
        return jax.random.uniform(next(keys), (cout,), jnp.float32, -bound, bound)

    params = {
        "input_w": conv_w(128, in_channels, 3),
        "enc_w1": lin_w(128, 1), "enc_b1": lin_b(128, 1),
        "enc_w2": lin_w(128, 128), "enc_b2": lin_b(128, 128),
        "output_w": conv_w(in_channels, 128, 3),
    }
    for i in range(1, 7):
        params[f"da{i}"] = {
            "k_w1": lin_w(128, 128),                          # Linear(128,128, no bias)
            "k_w2": lin_w(128 * 9, 128),                      # Linear(128,128*9, no bias)
            "conv_w": conv_w(128, 128, 1).reshape(128, 128),  # 1x1 conv (Cout, Cin)
            "conv_b": lin_b(128, 128),                        # 1x1 conv bias
            "ca_w1": conv_w(16, 128, 1).reshape(16, 128),     # CA 1x1, no bias
            "ca_w2": conv_w(128, 16, 1).reshape(128, 16),     # CA 1x1, no bias
        }
        params[f"conv{i}_w"] = conv_w(128, 128, 3)
    return params


def prepare(params):
    """One-time (outside jit) weight folding / stacking / bf16 cast for the kernel."""
    def fold_taps(w_oihw):                                  # (Cout,Cin,3,3) -> (9,128,128)
        cout, cin = w_oihw.shape[0], w_oihw.shape[1]
        w = jnp.transpose(w_oihw, (2, 3, 1, 0))             # (ky,kx,Cin,Cout), t = ky*3+kx
        w = jnp.pad(w, ((0, 0), (0, 0), (0, C - cin), (0, C - cout)))
        return w.reshape(9, C, C)

    conv_taps = jnp.concatenate(
        [fold_taps(params["input_w"])]
        + [fold_taps(params[f"conv{i}_w"]) for i in range(1, 7)]
        + [fold_taps(params["output_w"])], axis=0).astype(jnp.bfloat16)    # (72,128,128)

    return {
        "conv_taps": conv_taps,
        "da_w1": jnp.stack([params[f"da{i}"]["conv_w"].T
                            for i in range(1, 7)]).astype(jnp.bfloat16),   # (6,128,128)
        "da_b1": jnp.stack([params[f"da{i}"]["conv_b"][None, :]
                            for i in range(1, 7)]).astype(jnp.float32),    # (6,1,128)
        "k_w1": jnp.stack([params[f"da{i}"]["k_w1"] for i in range(1, 7)]),
        "k_w2": jnp.stack([params[f"da{i}"]["k_w2"] for i in range(1, 7)]),
        "ca_w1": jnp.stack([params[f"da{i}"]["ca_w1"] for i in range(1, 7)]),
        "ca_w2": jnp.stack([params[f"da{i}"]["ca_w2"] for i in range(1, 7)]),
        "enc_w1": params["enc_w1"], "enc_b1": params["enc_b1"],
        "enc_w2": params["enc_w2"], "enc_b2": params["enc_b2"],
    }


# ----------------------------------------------------------------------------
# Forward pass (NCHW in / NCHW out, like the PyTorch module)
# ----------------------------------------------------------------------------
@jax.jit
def forward(prep, x_nchw, altitude):
    B, cin = x_nchw.shape[0], x_nchw.shape[1]
    x = jnp.transpose(x_nchw, (0, 2, 3, 1)).astype(jnp.float32)           # NHWC
    x_pad = jnp.pad(x, ((0, 0), (0, 0), (0, 0), (0, C - cin)))            # lane-dense

    # altitude encoder: Linear(1,128) -> ReLU -> Linear(128,128)   (tiny glue)
    a = altitude[:, None].astype(jnp.float32)
    h = jnp.maximum(a @ prep["enc_w1"].T + prep["enc_b1"], 0.0)
    alt = h @ prep["enc_w2"].T + prep["enc_b2"]                           # (B,128)

    # per-layer per-sample depthwise kernels + channel attention    (tiny glue)
    y = jnp.einsum("bi,loi->blo", alt, prep["k_w1"])
    y = jnp.where(y > 0, y, 0.1 * y)                                      # LeakyReLU(0.1)
    kflat = jnp.einsum("blh,lkh->blk", y, prep["k_w2"])                   # (B,6,1152)
    dk = kflat.reshape(B, 6, C, 9).transpose(0, 1, 3, 2)                  # (B,6,9,128)
    dk = dk.reshape(B * 6, 9, C)

    g = jnp.einsum("bi,lri->blr", alt, prep["ca_w1"])
    g = jnp.where(g > 0, g, 0.1 * g)
    att = jax.nn.sigmoid(jnp.einsum("blr,lcr->blc", g, prep["ca_w2"]))    # (B,6,128)
    att = att.reshape(B * 6, 1, C)

    out = _fused_net(x_pad, prep["conv_taps"], prep["da_w1"], prep["da_b1"], dk, att)
    return jnp.transpose(out[..., :cin], (0, 3, 1, 2))                    # -> NCHW


# ----------------------------------------------------------------------------
# Plain-XLA f32 reference (for an in-script correctness cross-check)
# ----------------------------------------------------------------------------
def reference_forward(params, x_nchw, altitude):
    def conv3(x, w):
        return lax.conv_general_dilated(x, w, (1, 1), ((1, 1), (1, 1)),
                                        dimension_numbers=("NCHW", "OIHW", "NCHW"))
    a = altitude[:, None].astype(jnp.float32)
    h = jnp.maximum(a @ params["enc_w1"].T + params["enc_b1"], 0.0)
    alt = h @ params["enc_w2"].T + params["enc_b2"]
    x = x_nchw.astype(jnp.float32)
    # TODO(synk): residual == relu(x) because PyTorch's inplace ReLU aliases the input.
    residual = jnp.maximum(x, 0.0)
    out = conv3(residual, params["input_w"])
    for i in range(1, 7):
        p = params[f"da{i}"]
        z = jnp.maximum(out, 0.0)
        B, Ch, H, W = z.shape
        y = alt @ p["k_w1"].T
        y = jnp.where(y > 0, y, 0.1 * y)
        kflat = y @ p["k_w2"].T
        dkw = kflat.reshape(B * Ch, 1, 3, 3)
        dw = lax.conv_general_dilated(z.reshape(1, B * Ch, H, W), dkw, (1, 1),
                                      ((1, 1), (1, 1)), feature_group_count=B * Ch,
                                      dimension_numbers=("NCHW", "OIHW", "NCHW"))
        dw = jnp.maximum(dw, 0.0).reshape(B, Ch, H, W)
        da = jnp.einsum("bchw,oc->bohw", dw, p["conv_w"]) + p["conv_b"][None, :, None, None]
        g = alt @ p["ca_w1"].T
        g = jnp.where(g > 0, g, 0.1 * g)
        att = jax.nn.sigmoid(g @ p["ca_w2"].T)
        da = da + z * att[:, :, None, None]
        out = conv3(jnp.maximum(da, 0.0), params[f"conv{i}_w"])
    out = conv3(jnp.maximum(out, 0.0), params["output_w"])
    return out + residual


if __name__ == "__main__":
    key = jax.random.PRNGKey(0)
    kp, kx, ka = jax.random.split(key, 3)

    in_channels = 3
    params = init_params(kp, in_channels=in_channels)
    prep = prepare(params)

    x = jax.random.normal(kx, (2, in_channels, 16, 16), jnp.float32)   # NCHW
    altitude = jax.random.normal(ka, (2,), jnp.float32)                # (B,)

    out = jax.block_until_ready(forward(prep, x, altitude))
    assert out.shape == x.shape and out.dtype == jnp.float32
    assert bool(jnp.all(jnp.isfinite(out)))

    ref = reference_forward(params, x, altitude)
    scale = float(jnp.max(jnp.abs(ref)))
    err = float(jnp.max(jnp.abs(out - ref)))
    # bf16 matmul operands over 14 stacked convs -> scale-relative tolerance.
    assert err <= 0.06 * scale + 0.06, f"mismatch vs reference: {err} (scale={scale})"

    print("KERNEL_OK")
</pallas_src>

<mosaic_0001>
module attributes {stable_mosaic.version = 11 : i64} {
  func.func @fused_net_kernel(%arg0: i32, %arg1: memref<1x16x16x128xf32, #tpu.memory_space<vmem>>, %arg2: memref<72x128x128xbf16, #tpu.memory_space<vmem>>, %arg3: memref<6x128x128xbf16, #tpu.memory_space<vmem>>, %arg4: memref<6x1x128xf32, #tpu.memory_space<vmem>>, %arg5: memref<6x9x128xf32, #tpu.memory_space<vmem>>, %arg6: memref<6x1x128xf32, #tpu.memory_space<vmem>>, %arg7: memref<1x16x16x128xf32, #tpu.memory_space<vmem>>, %arg8: memref<288x128xf32, #tpu.memory_space<vmem>>) attributes {dimension_semantics = [#tpu.dimension_semantics<parallel>], iteration_bounds = array<i64: 2>, scalar_prefetch = 0 : i64, scratch_operands = 1 : i64, tpu.core_type = #tpu.core_type<tc>, window_params = [{transform_indices = @transform_0, window_bounds = array<i64: 1, 16, 16, 128>}, {pipeline_mode = #tpu.pipeline_mode<synchronous>, transform_indices = @transform_1, window_bounds = array<i64: 72, 128, 128>}, {pipeline_mode = #tpu.pipeline_mode<synchronous>, transform_indices = @transform_2, window_bounds = array<i64: 6, 128, 128>}, {pipeline_mode = #tpu.pipeline_mode<synchronous>, transform_indices = @transform_3, window_bounds = array<i64: 6, 1, 128>}, {transform_indices = @transform_4, window_bounds = array<i64: 6, 9, 128>}, {transform_indices = @transform_5, window_bounds = array<i64: 6, 1, 128>}, {transform_indices = @transform_6, window_bounds = array<i64: 1, 16, 16, 128>}]} {
    %cst = arith.constant 0.000000e+00 : f32
    %0 = vector.broadcast %cst : f32 to vector<16x128xf32>
    %c0 = arith.constant 0 : index
    %c0_0 = arith.constant 0 : index
    %1 = vector.load %arg8[%c0, %c0_0] : memref<288x128xf32, #tpu.memory_space<vmem>>, vector<16x128xf32>
    tpu.vector_store %arg8[%c0, %c0_0], %0 {strides = array<i32>} : memref<288x128xf32, #tpu.memory_space<vmem>>, vector<16x128xf32>,
    %cst_1 = arith.constant 0.000000e+00 : f32
    %2 = vector.broadcast %cst_1 : f32 to vector<16x128xf32>
    %c272 = arith.constant 272 : index
    %c0_2 = arith.constant 0 : index
    %3 = vector.load %arg8[%c272, %c0_2] : memref<288x128xf32, #tpu.memory_space<vmem>>, vector<16x128xf32>
    tpu.vector_store %arg8[%c272, %c0_2], %2 {strides = array<i32>} : memref<288x128xf32, #tpu.memory_space<vmem>>, vector<16x128xf32>,
    %4 = tpu.iota {dimensions = array<i32: 0>} : vector<256x128xi32>
    %c16_i32 = arith.constant 16 : i32
    %c0_i32 = arith.constant 0 : i32
    %5 = arith.cmpi eq, %c16_i32, %c0_i32 : i32
    %c1_i32 = arith.constant 1 : i32
    %6 = arith.select %5, %c1_i32, %c16_i32 : i32
    %7 = vector.broadcast %6 : i32 to vector<256x128xi32>
    %8 = arith.remsi %4, %7 : vector<256x128xi32>
    %c0_i32_3 = arith.constant 0 : i32
    %9 = vector.broadcast %c0_i32_3 : i32 to vector<256x128xi32>
    %10 = arith.cmpi ne, %8, %9 : vector<256x128xi32>
    %c0_i32_4 = arith.constant 0 : i32
    %11 = vector.broadcast %c0_i32_4 : i32 to vector<256x128xi32>
    %12 = arith.cmpi slt, %8, %11 : vector<256x128xi32>
    %c0_i32_5 = arith.constant 0 : i32
    %13 = arith.cmpi slt, %6, %c0_i32_5 : i32
    %14 = vector.broadcast %13 : i1 to vector<256x128xi1>
    %15 = vector.broadcast %14 : vector<256x128xi1> to vector<256x128xi1>
    %16 = arith.xori %12, %15 : vector<256x128xi1>
    %17 = arith.andi %16, %10 : vector<256x128xi1>
    %18 = vector.broadcast %6 : i32 to vector<256x128xi32>
    %19 = arith.addi %8, %18 : vector<256x128xi32>
    %20 = arith.select %17, %19, %8 : vector<256x128xi1>, vector<256x128xi32>
    %c0_i32_6 = arith.constant 0 : i32
    %21 = vector.broadcast %c0_i32_6 : i32 to vector<256x128xi32>
    %22 = arith.cmpi ne, %20, %21 : vector<256x128xi32>
    %c15_i32 = arith.constant 15 : i32
    %23 = vector.broadcast %c15_i32 : i32 to vector<256x128xi32>
    %24 = arith.cmpi ne, %20, %23 : vector<256x128xi32>
    %c0_7 = arith.constant 0 : index
    %c0_8 = arith.constant 0 : index
    %c0_9 = arith.constant 0 : index
    %c0_10 = arith.constant 0 : index
    %25 = vector.load %arg1[%c0_7, %c0_8, %c0_9, %c0_10] : memref<1x16x16x128xf32, #tpu.memory_space<vmem>>, vector<1x16x16x128xf32>
    %26 = vector.shape_cast %25 : vector<1x16x16x128xf32> to vector<16x16x128xf32>
    %27 = vector.shape_cast %26 : vector<16x16x128xf32> to vector<256x128xf32>
    %cst_11 = arith.constant 0.000000e+00 : f32
    %28 = vector.broadcast %cst_11 : f32 to vector<256x128xf32>
    %29 = arith.maximumf %27, %28 : vector<256x128xf32>
    %c16 = arith.constant 16 : index
    %c0_12 = arith.constant 0 : index
    %30 = vector.load %arg8[%c16, %c0_12] : memref<288x128xf32, #tpu.memory_space<vmem>>, vector<256x128xf32>
    tpu.vector_store %arg8[%c16, %c0_12], %29 {strides = array<i32>} : memref<288x128xf32, #tpu.memory_space<vmem>>, vector<256x128xf32>,
    %c0_13 = arith.constant 0 : index
    %c0_14 = arith.constant 0 : index
    %31 = vector.load %arg8[%c0_13, %c0_14] : memref<288x128xf32, #tpu.memory_space<vmem>>, vector<256x128xf32>
    %c1_i32_15 = arith.constant 1 : i32
    %32 = tpu.dynamic_rotate %31 by %c1_i32_15 dim 0 : vector<256x128xf32>, i32 -> vector<256x128xf32>
    %cst_16 = arith.constant 0.000000e+00 : f32
    %33 = vector.broadcast %cst_16 : f32 to vector<256x128xf32>
    %34 = arith.select %22, %32, %33 : vector<256x128xi1>, vector<256x128xf32>
    %35 = arith.truncf %34 : vector<256x128xf32> to vector<256x128xbf16>
    %c0_17 = arith.constant 0 : index
    %c0_18 = arith.constant 0 : index
    %c0_19 = arith.constant 0 : index
    %36 = vector.load %arg2[%c0_17, %c0_18, %c0_19] : memref<72x128x128xbf16, #tpu.memory_space<vmem>>, vector<1x128x128xbf16>
    %37 = vector.shape_cast %36 : vector<1x128x128xbf16> to vector<128x128xbf16>
    %cst_20 = arith.constant dense<0.000000e+00> : vector<256x128xf32>
    %38 = tpu.matmul %35, %37, %cst_20 {dimension_numbers = #tpu.dot_dimension_numbers<[1], [0], [0], [1], [0, 0, 1, 1], [], []>} : vector<256x128xbf16>, vector<128x128xbf16>, vector<256x128xf32> -> vector<256x128xf32>
    %c0_21 = arith.constant 0 : index
    %c0_22 = arith.constant 0 : index
    %39 = vector.load %arg8[%c0_21, %c0_22] : memref<288x128xf32, #tpu.memory_space<vmem>>, vector<256x128xf32>
    %40 = arith.truncf %39 : vector<256x128xf32> to vector<256x128xbf16>
    %c1 = arith.constant 1 : index
    %c0_23 = arith.constant 0 : index
    %c0_24 = arith.constant 0 : index
    %41 = vector.load %arg2[%c1, %c0_23, %c0_24] : memref<72x128x128xbf16, #tpu.memory_space<vmem>>, vector<1x128x128xbf16>
    %42 = vector.shape_cast %41 : vector<1x128x128xbf16> to vector<128x128xbf16>
    %cst_25 = arith.constant dense<0.000000e+00> : vector<256x128xf32>
    %43 = tpu.matmul %40, %42, %cst_25 {dimension_numbers = #tpu.dot_dimension_numbers<[1], [0], [0], [1], [0, 0, 1, 1], [], []>} : vector<256x128xbf16>, vector<128x128xbf16>, vector<256x128xf32> -> vector<256x128xf32>
    %44 = arith.addf %38, %43 : vector<256x128xf32>
    %c0_26 = arith.constant 0 : index
    %c0_27 = arith.constant 0 : index
    %45 = vector.load %arg8[%c0_26, %c0_27] : memref<288x128xf32, #tpu.memory_space<vmem>>, vector<256x128xf32>
    %c255_i32 = arith.constant 255 : i32
    %46 = tpu.dynamic_rotate %45 by %c255_i32 dim 0 : vector<256x128xf32>, i32 -> vector<256x128xf32>
    %cst_28 = arith.constant 0.000000e+00 : f32
    %47 = vector.broadcast %cst_28 : f32 to vector<256x128xf32>
    %48 = arith.select %24, %46, %47 : vector<256x128xi1>, vector<256x128xf32>
    %49 = arith.truncf %48 : vector<256x128xf32> to vector<256x128xbf16>
    %c2 = arith.constant 2 : index
    %c0_29 = arith.constant 0 : index
    %c0_30 = arith.constant 0 : index
    %50 = vector.load %arg2[%c2, %c0_29, %c0_30] : memref<72x128x128xbf16, #tpu.memory_space<vmem>>, vector<1x128x128xbf16>
    %51 = vector.shape_cast %50 : vector<1x128x128xbf16> to vector<128x128xbf16>
    %cst_31 = arith.constant dense<0.000000e+00> : vector<256x128xf32>
    %52 = tpu.matmul %49, %51, %cst_31 {dimension_numbers = #tpu.dot_dimension_numbers<[1], [0], [0], [1], [0, 0, 1, 1], [], []>} : vector<256x128xbf16>, vector<128x128xbf16>, vector<256x128xf32> -> vector<256x128xf32>
    %53 = arith.addf %44, %52 : vector<256x128xf32>
    %c16_32 = arith.constant 16 : index
    %c0_33 = arith.constant 0 : index
    %54 = vector.load %arg8[%c16_32, %c0_33] : memref<288x128xf32, #tpu.memory_space<vmem>>, vector<256x128xf32>
    %c1_i32_34 = arith.constant 1 : i32
    %55 = tpu.dynamic_rotate %54 by %c1_i32_34 dim 0 : vector<256x128xf32>, i32 -> vector<256x128xf32>
    %cst_35 = arith.constant 0.000000e+00 : f32
    %56 = vector.broadcast %cst_35 : f32 to vector<256x128xf32>
    %57 = arith.select %22, %55, %56 : vector<256x128xi1>, vector<256x128xf32>
    %58 = arith.truncf %57 : vector<256x128xf32> to vector<256x128xbf16>
    %c3 = arith.constant 3 : index
    %c0_36 = arith.constant 0 : index
    %c0_37 = arith.constant 0 : index
    %59 = vector.load %arg2[%c3, %c0_36, %c0_37] : memref<72x128x128xbf16, #tpu.memory_space<vmem>>, vector<1x128x128xbf16>
    %60 = vector.shape_cast %59 : vector<1x128x128xbf16> to vector<128x128xbf16>
    %cst_38 = arith.constant dense<0.000000e+00> : vector<256x128xf32>
    %61 = tpu.matmul %58, %60, %cst_38 {dimension_numbers = #tpu.dot_dimension_numbers<[1], [0], [0], [1], [0, 0, 1, 1], [], []>} : vector<256x128xbf16>, vector<128x128xbf16>, vector<256x128xf32> -> vector<256x128xf32>
    %62 = arith.addf %53, %61 : vector<256x128xf32>
    %c16_39 = arith.constant 16 : index
    %c0_40 = arith.constant 0 : index
    %63 = vector.load %arg8[%c16_39, %c0_40] : memref<288x128xf32, #tpu.memory_space<vmem>>, vector<256x128xf32>
    %64 = arith.truncf %63 : vector<256x128xf32> to vector<256x128xbf16>
    %c4 = arith.constant 4 : index
    %c0_41 = arith.constant 0 : index
    %c0_42 = arith.constant 0 : index
    %65 = vector.load %arg2[%c4, %c0_41, %c0_42] : memref<72x128x128xbf16, #tpu.memory_space<vmem>>, vector<1x128x128xbf16>
    %66 = vector.shape_cast %65 : vector<1x128x128xbf16> to vector<128x128xbf16>
    %cst_43 = arith.constant dense<0.000000e+00> : vector<256x128xf32>
    %67 = tpu.matmul %64, %66, %cst_43 {dimension_numbers = #tpu.dot_dimension_numbers<[1], [0], [0], [1], [0, 0, 1, 1], [], []>} : vector<256x128xbf16>, vector<128x128xbf16>, vector<256x128xf32> -> vector<256x128xf32>
    %68 = arith.addf %62, %67 : vector<256x128xf32>
    %c16_44 = arith.constant 16 : index
    %c0_45 = arith.constant 0 : index
    %69 = vector.load %arg8[%c16_44, %c0_45] : memref<288x128xf32, #tpu.memory_space<vmem>>, vector<256x128xf32>
    %c255_i32_46 = arith.constant 255 : i32
    %70 = tpu.dynamic_rotate %69 by %c255_i32_46 dim 0 : vector<256x128xf32>, i32 -> vector<256x128xf32>
    %cst_47 = arith.constant 0.000000e+00 : f32
    %71 = vector.broadcast %cst_47 : f32 to vector<256x128xf32>
    %72 = arith.select %24, %70, %71 : vector<256x128xi1>, vector<256x128xf32>
    %73 = arith.truncf %72 : vector<256x128xf32> to vector<256x128xbf16>
    %c5 = arith.constant 5 : index
    %c0_48 = arith.constant 0 : index
    %c0_49 = arith.constant 0 : index
    %74 = vector.load %arg2[%c5, %c0_48, %c0_49] : memref<72x128x128xbf16, #tpu.memory_space<vmem>>, vector<1x128x128xbf16>
    %75 = vector.shape_cast %74 : vector<1x128x128xbf16> to vector<128x128xbf16>
    %cst_50 = arith.constant dense<0.000000e+00> : vector<256x128xf32>
    %76 = tpu.matmul %73, %75, %cst_50 {dimension_numbers = #tpu.dot_dimension_numbers<[1], [0], [0], [1], [0, 0, 1, 1], [], []>} : vector<256x128xbf16>, vector<128x128xbf16>, vector<256x128xf32> -> vector<256x128xf32>
    %77 = arith.addf %68, %76 : vector<256x128xf32>
    %c32 = arith.constant 32 : index
    %c0_51 = arith.constant 0 : index
    %78 = vector.load %arg8[%c32, %c0_51] : memref<288x128xf32, #tpu.memory_space<vmem>>, vector<256x128xf32>
    %c1_i32_52 = arith.constant 1 : i32
    %79 = tpu.dynamic_rotate %78 by %c1_i32_52 dim 0 : vector<256x128xf32>, i32 -> vector<256x128xf32>
    %cst_53 = arith.constant 0.000000e+00 : f32
    %80 = vector.broadcast %cst_53 : f32 to vector<256x128xf32>
    %81 = arith.select %22, %79, %80 : vector<256x128xi1>, vector<256x128xf32>
    %82 = arith.truncf %81 : vector<256x128xf32> to vector<256x128xbf16>
    %c6 = arith.constant 6 : index
    %c0_54 = arith.constant 0 : index
    %c0_55 = arith.constant 0 : index
    %83 = vector.load %arg2[%c6, %c0_54, %c0_55] : memref<72x128x128xbf16, #tpu.memory_space<vmem>>, vector<1x128x128xbf16>
    %84 = vector.shape_cast %83 : vector<1x128x128xbf16> to vector<128x128xbf16>
    %cst_56 = arith.constant dense<0.000000e+00> : vector<256x128xf32>
    %85 = tpu.matmul %82, %84, %cst_56 {dimension_numbers = #tpu.dot_dimension_numbers<[1], [0], [0], [1], [0, 0, 1, 1], [], []>} : vector<256x128xbf16>, vector<128x128xbf16>, vector<256x128xf32> -> vector<256x128xf32>
    %86 = arith.addf %77, %85 : vector<256x128xf32>
    %c32_57 = arith.constant 32 : index
    %c0_58 = arith.constant 0 : index
    %87 = vector.load %arg8[%c32_57, %c0_58] : memref<288x128xf32, #tpu.memory_space<vmem>>, vector<256x128xf32>
    %88 = arith.truncf %87 : vector<256x128xf32> to vector<256x128xbf16>
    %c7 = arith.constant 7 : index
    %c0_59 = arith.constant 0 : index
    %c0_60 = arith.constant 0 : index
    %89 = vector.load %arg2[%c7, %c0_59, %c0_60] : memref<72x128x128xbf16, #tpu.memory_space<vmem>>, vector<1x128x128xbf16>
    %90 = vector.shape_cast %89 : vector<1x128x128xbf16> to vector<128x128xbf16>
    %cst_61 = arith.constant dense<0.000000e+00> : vector<256x128xf32>
    %91 = tpu.matmul %88, %90, %cst_61 {dimension_numbers = #tpu.dot_dimension_numbers<[1], [0], [0], [1], [0, 0, 1, 1], [], []>} : vector<256x128xbf16>, vector<128x128xbf16>, vector<256x128xf32> -> vector<256x128xf32>
    %92 = arith.addf %86, %91 : vector<256x128xf32>
    %c32_62 = arith.constant 32 : index
    %c0_63 = arith.constant 0 : index
    %93 = vector.load %arg8[%c32_62, %c0_63] : memref<288x128xf32, #tpu.memory_space<vmem>>, vector<256x128xf32>
    %c255_i32_64 = arith.constant 255 : i32
    %94 = tpu.dynamic_rotate %93 by %c255_i32_64 dim 0 : vector<256x128xf32>, i32 -> vector<256x128xf32>
    %cst_65 = arith.constant 0.000000e+00 : f32
    %95 = vector.broadcast %cst_65 : f32 to vector<256x128xf32>
    %96 = arith.select %24, %94, %95 : vector<256x128xi1>, vector<256x128xf32>
    %97 = arith.truncf %96 : vector<256x128xf32> to vector<256x128xbf16>
    %c8 = arith.constant 8 : index
    %c0_66 = arith.constant 0 : index
    %c0_67 = arith.constant 0 : index
    %98 = vector.load %arg2[%c8, %c0_66, %c0_67] : memref<72x128x128xbf16, #tpu.memory_space<vmem>>, vector<1x128x128xbf16>
    %99 = vector.shape_cast %98 : vector<1x128x128xbf16> to vector<128x128xbf16>
    %cst_68 = arith.constant dense<0.000000e+00> : vector<256x128xf32>
    %100 = tpu.matmul %97, %99, %cst_68 {dimension_numbers = #tpu.dot_dimension_numbers<[1], [0], [0], [1], [0, 0, 1, 1], [], []>} : vector<256x128xbf16>, vector<128x128xbf16>, vector<256x128xf32> -> vector<256x128xf32>
    %101 = arith.addf %92, %100 : vector<256x128xf32>
    %c0_i32_69 = arith.constant 0 : i32
    %c6_i32 = arith.constant 6 : i32
    %102 = arith.addi %c0_i32_69, %c6_i32 : i32
    %c1_i32_70 = arith.constant 1 : i32
    %103 = scf.for %arg9 = %c0_i32_69 to %102 step %c1_i32_70 iter_args(%arg10 = %101) -> (vector<256x128xf32>)  : i32 {
      %cst_136 = arith.constant 0.000000e+00 : f32
      %181 = vector.broadcast %cst_136 : f32 to vector<256x128xf32>
      %182 = arith.maximumf %arg10, %181 : vector<256x128xf32>
      %183 = arith.index_cast %arg9 : i32 to index
      %c0_137 = arith.constant 0 : index
      %c0_138 = arith.constant 0 : index
      %184 = vector.load %arg5[%183, %c0_137, %c0_138] : memref<6x9x128xf32, #tpu.memory_space<vmem>>, vector<1x9x128xf32>
      %185 = vector.shape_cast %184 : vector<1x9x128xf32> to vector<9x128xf32>
      %c16_139 = arith.constant 16 : index
      %c0_140 = arith.constant 0 : index
      %186 = vector.load %arg8[%c16_139, %c0_140] : memref<288x128xf32, #tpu.memory_space<vmem>>, vector<256x128xf32>
      tpu.vector_store %arg8[%c16_139, %c0_140], %182 {strides = array<i32>} : memref<288x128xf32, #tpu.memory_space<vmem>>, vector<256x128xf32>,
      %c0_141 = arith.constant 0 : index
      %c0_142 = arith.constant 0 : index
      %187 = vector.load %arg8[%c0_141, %c0_142] : memref<288x128xf32, #tpu.memory_space<vmem>>, vector<256x128xf32>
      %c1_i32_143 = arith.constant 1 : i32
      %188 = tpu.dynamic_rotate %187 by %c1_i32_143 dim 0 : vector<256x128xf32>, i32 -> vector<256x128xf32>
      %cst_144 = arith.constant 0.000000e+00 : f32
      %189 = vector.broadcast %cst_144 : f32 to vector<256x128xf32>
      %190 = arith.select %22, %188, %189 : vector<256x128xi1>, vector<256x128xf32>
      %191 = vector.extract_strided_slice %185 {offsets = [0, 0], sizes = [1, 128], strides = [1, 1]} : vector<9x128xf32> to vector<1x128xf32>
      %192 = vector.broadcast %191 : vector<1x128xf32> to vector<256x128xf32>
      %193 = arith.mulf %190, %192 : vector<256x128xf32>
      %c0_145 = arith.constant 0 : index
      %c0_146 = arith.constant 0 : index
      %194 = vector.load %arg8[%c0_145, %c0_146] : memref<288x128xf32, #tpu.memory_space<vmem>>, vector<256x128xf32>
      %195 = vector.extract_strided_slice %185 {offsets = [1, 0], sizes = [1, 128], strides = [1, 1]} : vector<9x128xf32> to vector<1x128xf32>
      %196 = vector.broadcast %195 : vector<1x128xf32> to vector<256x128xf32>
      %197 = arith.mulf %194, %196 : vector<256x128xf32>
      %198 = arith.addf %193, %197 : vector<256x128xf32>
      %c0_147 = arith.constant 0 : index
      %c0_148 = arith.constant 0 : index
      %199 = vector.load %arg8[%c0_147, %c0_148] : memref<288x128xf32, #tpu.memory_space<vmem>>, vector<256x128xf32>
      %c255_i32_149 = arith.constant 255 : i32
      %200 = tpu.dynamic_rotate %199 by %c255_i32_149 dim 0 : vector<256x128xf32>, i32 -> vector<256x128xf32>
      %cst_150 = arith.constant 0.000000e+00 : f32
      %201 = vector.broadcast %cst_150 : f32 to vector<256x128xf32>
      %202 = arith.select %24, %200, %201 : vector<256x128xi1>, vector<256x128xf32>
      %203 = vector.extract_strided_slice %185 {offsets = [2, 0], sizes = [1, 128], strides = [1, 1]} : vector<9x128xf32> to vector<1x128xf32>
      %204 = vector.broadcast %203 : vector<1x128xf32> to vector<256x128xf32>
      %205 = arith.mulf %202, %204 : vector<256x128xf32>
      %206 = arith.addf %198, %205 : vector<256x128xf32>
      %c16_151 = arith.constant 16 : index
      %c0_152 = arith.constant 0 : index
      %207 = vector.load %arg8[%c16_151, %c0_152] : memref<288x128xf32, #tpu.memory_space<vmem>>, vector<256x128xf32>
      %c1_i32_153 = arith.constant 1 : i32
      %208 = tpu.dynamic_rotate %207 by %c1_i32_153 dim 0 : vector<256x128xf32>, i32 -> vector<256x128xf32>
      %cst_154 = arith.constant 0.000000e+00 : f32
      %209 = vector.broadcast %cst_154 : f32 to vector<256x128xf32>
      %210 = arith.select %22, %208, %209 : vector<256x128xi1>, vector<256x128xf32>
      %211 = vector.extract_strided_slice %185 {offsets = [3, 0], sizes = [1, 128], strides = [1, 1]} : vector<9x128xf32> to vector<1x128xf32>
      %212 = vector.broadcast %211 : vector<1x128xf32> to vector<256x128xf32>
      %213 = arith.mulf %210, %212 : vector<256x128xf32>
      %214 = arith.addf %206, %213 : vector<256x128xf32>
      %c16_155 = arith.constant 16 : index
      %c0_156 = arith.constant 0 : index
      %215 = vector.load %arg8[%c16_155, %c0_156] : memref<288x128xf32, #tpu.memory_space<vmem>>, vector<256x128xf32>
      %216 = vector.extract_strided_slice %185 {offsets = [4, 0], sizes = [1, 128], strides = [1, 1]} : vector<9x128xf32> to vector<1x128xf32>
      %217 = vector.broadcast %216 : vector<1x128xf32> to vector<256x128xf32>
      %218 = arith.mulf %215, %217 : vector<256x128xf32>
      %219 = arith.addf %214, %218 : vector<256x128xf32>
      %c16_157 = arith.constant 16 : index
      %c0_158 = arith.constant 0 : index
      %220 = vector.load %arg8[%c16_157, %c0_158] : memref<288x128xf32, #tpu.memory_space<vmem>>, vector<256x128xf32>
      %c255_i32_159 = arith.constant 255 : i32
      %221 = tpu.dynamic_rotate %220 by %c255_i32_159 dim 0 : vector<256x128xf32>, i32 -> vector<256x128xf32>
      %cst_160 = arith.constant 0.000000e+00 : f32
      %222 = vector.broadcast %cst_160 : f32 to vector<256x128xf32>
      %223 = arith.select %24, %221, %222 : vector<256x128xi1>, vector<256x128xf32>
      %224 = vector.extract_strided_slice %185 {offsets = [5, 0], sizes = [1, 128], strides = [1, 1]} : vector<9x128xf32> to vector<1x128xf32>
      %225 = vector.broadcast %224 : vector<1x128xf32> to vector<256x128xf32>
      %226 = arith.mulf %223, %225 : vector<256x128xf32>
      %227 = arith.addf %219, %226 : vector<256x128xf32>
      %c32_161 = arith.constant 32 : index
      %c0_162 = arith.constant 0 : index
      %228 = vector.load %arg8[%c32_161, %c0_162] : memref<288x128xf32, #tpu.memory_space<vmem>>, vector<256x128xf32>
      %c1_i32_163 = arith.constant 1 : i32
      %229 = tpu.dynamic_rotate %228 by %c1_i32_163 dim 0 : vector<256x128xf32>, i32 -> vector<256x128xf32>
      %cst_164 = arith.constant 0.000000e+00 : f32
      %230 = vector.broadcast %cst_164 : f32 to vector<256x128xf32>
      %231 = arith.select %22, %229, %230 : vector<256x128xi1>, vector<256x128xf32>
      %232 = vector.extract_strided_slice %185 {offsets = [6, 0], sizes = [1, 128], strides = [1, 1]} : vector<9x128xf32> to vector<1x128xf32>
      %233 = vector.broadcast %232 : vector<1x128xf32> to vector<256x128xf32>
      %234 = arith.mulf %231, %233 : vector<256x128xf32>
      %235 = arith.addf %227, %234 : vector<256x128xf32>
      %c32_165 = arith.constant 32 : index
      %c0_166 = arith.constant 0 : index
      %236 = vector.load %arg8[%c32_165, %c0_166] : memref<288x128xf32, #tpu.memory_space<vmem>>, vector<256x128xf32>
      %237 = vector.extract_strided_slice %185 {offsets = [7, 0], sizes = [1, 128], strides = [1, 1]} : vector<9x128xf32> to vector<1x128xf32>
      %238 = vector.broadcast %237 : vector<1x128xf32> to vector<256x128xf32>
      %239 = arith.mulf %236, %238 : vector<256x128xf32>
      %240 = arith.addf %235, %239 : vector<256x128xf32>
      %c32_167 = arith.constant 32 : index
      %c0_168 = arith.constant 0 : index
      %241 = vector.load %arg8[%c32_167, %c0_168] : memref<288x128xf32, #tpu.memory_space<vmem>>, vector<256x128xf32>
      %c255_i32_169 = arith.constant 255 : i32
      %242 = tpu.dynamic_rotate %241 by %c255_i32_169 dim 0 : vector<256x128xf32>, i32 -> vector<256x128xf32>
      %cst_170 = arith.constant 0.000000e+00 : f32
      %243 = vector.broadcast %cst_170 : f32 to vector<256x128xf32>
      %244 = arith.select %24, %242, %243 : vector<256x128xi1>, vector<256x128xf32>
      %245 = vector.extract_strided_slice %185 {offsets = [8, 0], sizes = [1, 128], strides = [1, 1]} : vector<9x128xf32> to vector<1x128xf32>
      %246 = vector.broadcast %245 : vector<1x128xf32> to vector<256x128xf32>
      %247 = arith.mulf %244, %246 : vector<256x128xf32>
      %248 = arith.addf %240, %247 : vector<256x128xf32>
      %cst_171 = arith.constant 0.000000e+00 : f32
      %249 = vector.broadcast %cst_171 : f32 to vector<256x128xf32>
      %250 = arith.maximumf %248, %249 : vector<256x128xf32>
      %251 = arith.truncf %250 : vector<256x128xf32> to vector<256x128xbf16>
      %252 = arith.index_cast %arg9 : i32 to index
      %c0_172 = arith.constant 0 : index
      %c0_173 = arith.constant 0 : index
      %253 = vector.load %arg3[%252, %c0_172, %c0_173] : memref<6x128x128xbf16, #tpu.memory_space<vmem>>, vector<1x128x128xbf16>
      %254 = vector.shape_cast %253 : vector<1x128x128xbf16> to vector<128x128xbf16>
      %cst_174 = arith.constant dense<0.000000e+00> : vector<256x128xf32>
      %255 = tpu.matmul %251, %254, %cst_174 {dimension_numbers = #tpu.dot_dimension_numbers<[1], [0], [0], [1], [0, 0, 1, 1], [], []>} : vector<256x128xbf16>, vector<128x128xbf16>, vector<256x128xf32> -> vector<256x128xf32>
      %256 = arith.index_cast %arg9 : i32 to index
      %c0_175 = arith.constant 0 : index
      %c0_176 = arith.constant 0 : index
      %257 = vector.load %arg4[%256, %c0_175, %c0_176] : memref<6x1x128xf32, #tpu.memory_space<vmem>>, vector<1x1x128xf32>
      %258 = vector.shape_cast %257 : vector<1x1x128xf32> to vector<1x128xf32>
      %259 = vector.broadcast %258 : vector<1x128xf32> to vector<256x128xf32>
      %260 = arith.addf %255, %259 : vector<256x128xf32>
      %261 = arith.index_cast %arg9 : i32 to index
      %c0_177 = arith.constant 0 : index
      %c0_178 = arith.constant 0 : index
      %262 = vector.load %arg6[%261, %c0_177, %c0_178] : memref<6x1x128xf32, #tpu.memory_space<vmem>>, vector<1x1x128xf32>
      %263 = vector.shape_cast %262 : vector<1x1x128xf32> to vector<1x128xf32>
      %264 = vector.broadcast %263 : vector<1x128xf32> to vector<256x128xf32>
      %265 = arith.mulf %182, %264 : vector<256x128xf32>
      %266 = arith.addf %260, %265 : vector<256x128xf32>
      %cst_179 = arith.constant 0.000000e+00 : f32
      %267 = vector.broadcast %cst_179 : f32 to vector<256x128xf32>
      %268 = arith.maximumf %266, %267 : vector<256x128xf32>
      %c1_i32_180 = arith.constant 1 : i32
      %269 = arith.addi %arg9, %c1_i32_180 : i32
      %c16_181 = arith.constant 16 : index
      %c0_182 = arith.constant 0 : index
      %270 = vector.load %arg8[%c16_181, %c0_182] : memref<288x128xf32, #tpu.memory_space<vmem>>, vector<256x128xf32>
      tpu.vector_store %arg8[%c16_181, %c0_182], %268 {strides = array<i32>} : memref<288x128xf32, #tpu.memory_space<vmem>>, vector<256x128xf32>,
      %c0_183 = arith.constant 0 : index
      %c0_184 = arith.constant 0 : index
      %271 = vector.load %arg8[%c0_183, %c0_184] : memref<288x128xf32, #tpu.memory_space<vmem>>, vector<256x128xf32>
      %c1_i32_185 = arith.constant 1 : i32
      %272 = tpu.dynamic_rotate %271 by %c1_i32_185 dim 0 : vector<256x128xf32>, i32 -> vector<256x128xf32>
      %cst_186 = arith.constant 0.000000e+00 : f32
      %273 = vector.broadcast %cst_186 : f32 to vector<256x128xf32>
      %274 = arith.select %22, %272, %273 : vector<256x128xi1>, vector<256x128xf32>
      %275 = arith.truncf %274 : vector<256x128xf32> to vector<256x128xbf16>
      %c9_i32 = arith.constant 9 : i32
      %276 = arith.muli %269, %c9_i32 : i32
      %c0_i32_187 = arith.constant 0 : i32
      %277 = arith.addi %276, %c0_i32_187 : i32
      %278 = arith.index_cast %277 : i32 to index
      %c0_188 = arith.constant 0 : index
      %c0_189 = arith.constant 0 : index
      %279 = vector.load %arg2[%278, %c0_188, %c0_189] : memref<72x128x128xbf16, #tpu.memory_space<vmem>>, vector<1x128x128xbf16>
      %280 = vector.shape_cast %279 : vector<1x128x128xbf16> to vector<128x128xbf16>
      %cst_190 = arith.constant dense<0.000000e+00> : vector<256x128xf32>
      %281 = tpu.matmul %275, %280, %cst_190 {dimension_numbers = #tpu.dot_dimension_numbers<[1], [0], [0], [1], [0, 0, 1, 1], [], []>} : vector<256x128xbf16>, vector<128x128xbf16>, vector<256x128xf32> -> vector<256x128xf32>
      %c0_191 = arith.constant 0 : index
      %c0_192 = arith.constant 0 : index
      %282 = vector.load %arg8[%c0_191, %c0_192] : memref<288x128xf32, #tpu.memory_space<vmem>>, vector<256x128xf32>
      %283 = arith.truncf %282 : vector<256x128xf32> to vector<256x128xbf16>
      %c9_i32_193 = arith.constant 9 : i32
      %284 = arith.muli %269, %c9_i32_193 : i32
      %c1_i32_194 = arith.constant 1 : i32
      %285 = arith.addi %284, %c1_i32_194 : i32
      %286 = arith.index_cast %285 : i32 to index
      %c0_195 = arith.constant 0 : index
      %c0_196 = arith.constant 0 : index
      %287 = vector.load %arg2[%286, %c0_195, %c0_196] : memref<72x128x128xbf16, #tpu.memory_space<vmem>>, vector<1x128x128xbf16>
      %288 = vector.shape_cast %287 : vector<1x128x128xbf16> to vector<128x128xbf16>
      %cst_197 = arith.constant dense<0.000000e+00> : vector<256x128xf32>
      %289 = tpu.matmul %283, %288, %cst_197 {dimension_numbers = #tpu.dot_dimension_numbers<[1], [0], [0], [1], [0, 0, 1, 1], [], []>} : vector<256x128xbf16>, vector<128x128xbf16>, vector<256x128xf32> -> vector<256x128xf32>
      %290 = arith.addf %281, %289 : vector<256x128xf32>
      %c0_198 = arith.constant 0 : index
      %c0_199 = arith.constant 0 : index
      %291 = vector.load %arg8[%c0_198, %c0_199] : memref<288x128xf32, #tpu.memory_space<vmem>>, vector<256x128xf32>
      %c255_i32_200 = arith.constant 255 : i32
      %292 = tpu.dynamic_rotate %291 by %c255_i32_200 dim 0 : vector<256x128xf32>, i32 -> vector<256x128xf32>
      %cst_201 = arith.constant 0.000000e+00 : f32
      %293 = vector.broadcast %cst_201 : f32 to vector<256x128xf32>
      %294 = arith.select %24, %292, %293 : vector<256x128xi1>, vector<256x128xf32>
      %295 = arith.truncf %294 : vector<256x128xf32> to vector<256x128xbf16>
      %c9_i32_202 = arith.constant 9 : i32
      %296 = arith.muli %269, %c9_i32_202 : i32
      %c2_i32 = arith.constant 2 : i32
      %297 = arith.addi %296, %c2_i32 : i32
      %298 = arith.index_cast %297 : i32 to index
      %c0_203 = arith.constant 0 : index
      %c0_204 = arith.constant 0 : index
      %299 = vector.load %arg2[%298, %c0_203, %c0_204] : memref<72x128x128xbf16, #tpu.memory_space<vmem>>, vector<1x128x128xbf16>
      %300 = vector.shape_cast %299 : vector<1x128x128xbf16> to vector<128x128xbf16>
      %cst_205 = arith.constant dense<0.000000e+00> : vector<256x128xf32>
      %301 = tpu.matmul %295, %300, %cst_205 {dimension_numbers = #tpu.dot_dimension_numbers<[1], [0], [0], [1], [0, 0, 1, 1], [], []>} : vector<256x128xbf16>, vector<128x128xbf16>, vector<256x128xf32> -> vector<256x128xf32>
      %302 = arith.addf %290, %301 : vector<256x128xf32>
      %c16_206 = arith.constant 16 : index
      %c0_207 = arith.constant 0 : index
      %303 = vector.load %arg8[%c16_206, %c0_207] : memref<288x128xf32, #tpu.memory_space<vmem>>, vector<256x128xf32>
      %c1_i32_208 = arith.constant 1 : i32
      %304 = tpu.dynamic_rotate %303 by %c1_i32_208 dim 0 : vector<256x128xf32>, i32 -> vector<256x128xf32>
      %cst_209 = arith.constant 0.000000e+00 : f32
      %305 = vector.broadcast %cst_209 : f32 to vector<256x128xf32>
      %306 = arith.select %22, %304, %305 : vector<256x128xi1>, vector<256x128xf32>
      %307 = arith.truncf %306 : vector<256x128xf32> to vector<256x128xbf16>
      %c9_i32_210 = arith.constant 9 : i32
      %308 = arith.muli %269, %c9_i32_210 : i32
      %c3_i32 = arith.constant 3 : i32
      %309 = arith.addi %308, %c3_i32 : i32
      %310 = arith.index_cast %309 : i32 to index
      %c0_211 = arith.constant 0 : index
      %c0_212 = arith.constant 0 : index
      %311 = vector.load %arg2[%310, %c0_211, %c0_212] : memref<72x128x128xbf16, #tpu.memory_space<vmem>>, vector<1x128x128xbf16>
      %312 = vector.shape_cast %311 : vector<1x128x128xbf16> to vector<128x128xbf16>
      %cst_213 = arith.constant dense<0.000000e+00> : vector<256x128xf32>
      %313 = tpu.matmul %307, %312, %cst_213 {dimension_numbers = #tpu.dot_dimension_numbers<[1], [0], [0], [1], [0, 0, 1, 1], [], []>} : vector<256x128xbf16>, vector<128x128xbf16>, vector<256x128xf32> -> vector<256x128xf32>
      %314 = arith.addf %302, %313 : vector<256x128xf32>
      %c16_214 = arith.constant 16 : index
      %c0_215 = arith.constant 0 : index
      %315 = vector.load %arg8[%c16_214, %c0_215] : memref<288x128xf32, #tpu.memory_space<vmem>>, vector<256x128xf32>
      %316 = arith.truncf %315 : vector<256x128xf32> to vector<256x128xbf16>
      %c9_i32_216 = arith.constant 9 : i32
      %317 = arith.muli %269, %c9_i32_216 : i32
      %c4_i32 = arith.constant 4 : i32
      %318 = arith.addi %317, %c4_i32 : i32
      %319 = arith.index_cast %318 : i32 to index
      %c0_217 = arith.constant 0 : index
      %c0_218 = arith.constant 0 : index
      %320 = vector.load %arg2[%319, %c0_217, %c0_218] : memref<72x128x128xbf16, #tpu.memory_space<vmem>>, vector<1x128x128xbf16>
      %321 = vector.shape_cast %320 : vector<1x128x128xbf16> to vector<128x128xbf16>
      %cst_219 = arith.constant dense<0.000000e+00> : vector<256x128xf32>
      %322 = tpu.matmul %316, %321, %cst_219 {dimension_numbers = #tpu.dot_dimension_numbers<[1], [0], [0], [1], [0, 0, 1, 1], [], []>} : vector<256x128xbf16>, vector<128x128xbf16>, vector<256x128xf32> -> vector<256x128xf32>
      %323 = arith.addf %314, %322 : vector<256x128xf32>
      %c16_220 = arith.constant 16 : index
      %c0_221 = arith.constant 0 : index
      %324 = vector.load %arg8[%c16_220, %c0_221] : memref<288x128xf32, #tpu.memory_space<vmem>>, vector<256x128xf32>
      %c255_i32_222 = arith.constant 255 : i32
      %325 = tpu.dynamic_rotate %324 by %c255_i32_222 dim 0 : vector<256x128xf32>, i32 -> vector<256x128xf32>
      %cst_223 = arith.constant 0.000000e+00 : f32
      %326 = vector.broadcast %cst_223 : f32 to vector<256x128xf32>
      %327 = arith.select %24, %325, %326 : vector<256x128xi1>, vector<256x128xf32>
      %328 = arith.truncf %327 : vector<256x128xf32> to vector<256x128xbf16>
      %c9_i32_224 = arith.constant 9 : i32
      %329 = arith.muli %269, %c9_i32_224 : i32
      %c5_i32 = arith.constant 5 : i32
      %330 = arith.addi %329, %c5_i32 : i32
      %331 = arith.index_cast %330 : i32 to index
      %c0_225 = arith.constant 0 : index
      %c0_226 = arith.constant 0 : index
      %332 = vector.load %arg2[%331, %c0_225, %c0_226] : memref<72x128x128xbf16, #tpu.memory_space<vmem>>, vector<1x128x128xbf16>
      %333 = vector.shape_cast %332 : vector<1x128x128xbf16> to vector<128x128xbf16>
      %cst_227 = arith.constant dense<0.000000e+00> : vector<256x128xf32>
      %334 = tpu.matmul %328, %333, %cst_227 {dimension_numbers = #tpu.dot_dimension_numbers<[1], [0], [0], [1], [0, 0, 1, 1], [], []>} : vector<256x128xbf16>, vector<128x128xbf16>, vector<256x128xf32> -> vector<256x128xf32>
      %335 = arith.addf %323, %334 : vector<256x128xf32>
      %c32_228 = arith.constant 32 : index
      %c0_229 = arith.constant 0 : index
      %336 = vector.load %arg8[%c32_228, %c0_229] : memref<288x128xf32, #tpu.memory_space<vmem>>, vector<256x128xf32>
      %c1_i32_230 = arith.constant 1 : i32
      %337 = tpu.dynamic_rotate %336 by %c1_i32_230 dim 0 : vector<256x128xf32>, i32 -> vector<256x128xf32>
      %cst_231 = arith.constant 0.000000e+00 : f32
      %338 = vector.broadcast %cst_231 : f32 to vector<256x128xf32>
      %339 = arith.select %22, %337, %338 : vector<256x128xi1>, vector<256x128xf32>
      %340 = arith.truncf %339 : vector<256x128xf32> to vector<256x128xbf16>
      %c9_i32_232 = arith.constant 9 : i32
      %341 = arith.muli %269, %c9_i32_232 : i32
      %c6_i32_233 = arith.constant 6 : i32
      %342 = arith.addi %341, %c6_i32_233 : i32
      %343 = arith.index_cast %342 : i32 to index
      %c0_234 = arith.constant 0 : index
      %c0_235 = arith.constant 0 : index
      %344 = vector.load %arg2[%343, %c0_234, %c0_235] : memref<72x128x128xbf16, #tpu.memory_space<vmem>>, vector<1x128x128xbf16>
      %345 = vector.shape_cast %344 : vector<1x128x128xbf16> to vector<128x128xbf16>
      %cst_236 = arith.constant dense<0.000000e+00> : vector<256x128xf32>
      %346 = tpu.matmul %340, %345, %cst_236 {dimension_numbers = #tpu.dot_dimension_numbers<[1], [0], [0], [1], [0, 0, 1, 1], [], []>} : vector<256x128xbf16>, vector<128x128xbf16>, vector<256x128xf32> -> vector<256x128xf32>
      %347 = arith.addf %335, %346 : vector<256x128xf32>
      %c32_237 = arith.constant 32 : index
      %c0_238 = arith.constant 0 : index
      %348 = vector.load %arg8[%c32_237, %c0_238] : memref<288x128xf32, #tpu.memory_space<vmem>>, vector<256x128xf32>
      %349 = arith.truncf %348 : vector<256x128xf32> to vector<256x128xbf16>
      %c9_i32_239 = arith.constant 9 : i32
      %350 = arith.muli %269, %c9_i32_239 : i32
      %c7_i32 = arith.constant 7 : i32
      %351 = arith.addi %350, %c7_i32 : i32
      %352 = arith.index_cast %351 : i32 to index
      %c0_240 = arith.constant 0 : index
      %c0_241 = arith.constant 0 : index
      %353 = vector.load %arg2[%352, %c0_240, %c0_241] : memref<72x128x128xbf16, #tpu.memory_space<vmem>>, vector<1x128x128xbf16>
      %354 = vector.shape_cast %353 : vector<1x128x128xbf16> to vector<128x128xbf16>
      %cst_242 = arith.constant dense<0.000000e+00> : vector<256x128xf32>
      %355 = tpu.matmul %349, %354, %cst_242 {dimension_numbers = #tpu.dot_dimension_numbers<[1], [0], [0], [1], [0, 0, 1, 1], [], []>} : vector<256x128xbf16>, vector<128x128xbf16>, vector<256x128xf32> -> vector<256x128xf32>
      %356 = arith.addf %347, %355 : vector<256x128xf32>
      %c32_243 = arith.constant 32 : index
      %c0_244 = arith.constant 0 : index
      %357 = vector.load %arg8[%c32_243, %c0_244] : memref<288x128xf32, #tpu.memory_space<vmem>>, vector<256x128xf32>
      %c255_i32_245 = arith.constant 255 : i32
      %358 = tpu.dynamic_rotate %357 by %c255_i32_245 dim 0 : vector<256x128xf32>, i32 -> vector<256x128xf32>
      %cst_246 = arith.constant 0.000000e+00 : f32
      %359 = vector.broadcast %cst_246 : f32 to vector<256x128xf32>
      %360 = arith.select %24, %358, %359 : vector<256x128xi1>, vector<256x128xf32>
      %361 = arith.truncf %360 : vector<256x128xf32> to vector<256x128xbf16>
      %c9_i32_247 = arith.constant 9 : i32
      %362 = arith.muli %269, %c9_i32_247 : i32
      %c8_i32 = arith.constant 8 : i32
      %363 = arith.addi %362, %c8_i32 : i32
      %364 = arith.index_cast %363 : i32 to index
      %c0_248 = arith.constant 0 : index
      %c0_249 = arith.constant 0 : index
      %365 = vector.load %arg2[%364, %c0_248, %c0_249] : memref<72x128x128xbf16, #tpu.memory_space<vmem>>, vector<1x128x128xbf16>
      %366 = vector.shape_cast %365 : vector<1x128x128xbf16> to vector<128x128xbf16>
      %cst_250 = arith.constant dense<0.000000e+00> : vector<256x128xf32>
      %367 = tpu.matmul %361, %366, %cst_250 {dimension_numbers = #tpu.dot_dimension_numbers<[1], [0], [0], [1], [0, 0, 1, 1], [], []>} : vector<256x128xbf16>, vector<128x128xbf16>, vector<256x128xf32> -> vector<256x128xf32>
      %368 = arith.addf %356, %367 : vector<256x128xf32>
      scf.yield %368 : vector<256x128xf32>
    }
    %c6_i32_71 = arith.constant 6 : i32
    %cst_72 = arith.constant 0.000000e+00 : f32
    %104 = vector.broadcast %cst_72 : f32 to vector<256x128xf32>
    %105 = arith.maximumf %103, %104 : vector<256x128xf32>
    %c16_73 = arith.constant 16 : index
    %c0_74 = arith.constant 0 : index
    %106 = vector.load %arg8[%c16_73, %c0_74] : memref<288x128xf32, #tpu.memory_space<vmem>>, vector<256x128xf32>
    tpu.vector_store %arg8[%c16_73, %c0_74], %105 {strides = array<i32>} : memref<288x128xf32, #tpu.memory_space<vmem>>, vector<256x128xf32>,
    %c0_75 = arith.constant 0 : index
    %c0_76 = arith.constant 0 : index
    %107 = vector.load %arg8[%c0_75, %c0_76] : memref<288x128xf32, #tpu.memory_space<vmem>>, vector<256x128xf32>
    %c1_i32_77 = arith.constant 1 : i32
    %108 = tpu.dynamic_rotate %107 by %c1_i32_77 dim 0 : vector<256x128xf32>, i32 -> vector<256x128xf32>
    %cst_78 = arith.constant 0.000000e+00 : f32
    %109 = vector.broadcast %cst_78 : f32 to vector<256x128xf32>
    %110 = arith.select %22, %108, %109 : vector<256x128xi1>, vector<256x128xf32>
    %111 = arith.truncf %110 : vector<256x128xf32> to vector<256x128xbf16>
    %c63 = arith.constant 63 : index
    %c0_79 = arith.constant 0 : index
    %c0_80 = arith.constant 0 : index
    %112 = vector.load %arg2[%c63, %c0_79, %c0_80] : memref<72x128x128xbf16, #tpu.memory_space<vmem>>, vector<1x128x128xbf16>
    %113 = vector.shape_cast %112 : vector<1x128x128xbf16> to vector<128x128xbf16>
    %cst_81 = arith.constant dense<0.000000e+00> : vector<256x128xf32>
    %114 = tpu.matmul %111, %113, %cst_81 {dimension_numbers = #tpu.dot_dimension_numbers<[1], [0], [0], [1], [0, 0, 1, 1], [], []>} : vector<256x128xbf16>, vector<128x128xbf16>, vector<256x128xf32> -> vector<256x128xf32>
    %c0_82 = arith.constant 0 : index
    %c0_83 = arith.constant 0 : index
    %115 = vector.load %arg8[%c0_82, %c0_83] : memref<288x128xf32, #tpu.memory_space<vmem>>, vector<256x128xf32>
    %116 = arith.truncf %115 : vector<256x128xf32> to vector<256x128xbf16>
    %c64 = arith.constant 64 : index
    %c0_84 = arith.constant 0 : index
    %c0_85 = arith.constant 0 : index
    %117 = vector.load %arg2[%c64, %c0_84, %c0_85] : memref<72x128x128xbf16, #tpu.memory_space<vmem>>, vector<1x128x128xbf16>
    %118 = vector.shape_cast %117 : vector<1x128x128xbf16> to vector<128x128xbf16>
    %cst_86 = arith.constant dense<0.000000e+00> : vector<256x128xf32>
    %119 = tpu.matmul %116, %118, %cst_86 {dimension_numbers = #tpu.dot_dimension_numbers<[1], [0], [0], [1], [0, 0, 1, 1], [], []>} : vector<256x128xbf16>, vector<128x128xbf16>, vector<256x128xf32> -> vector<256x128xf32>
    %120 = arith.addf %114, %119 : vector<256x128xf32>
    %c0_87 = arith.constant 0 : index
    %c0_88 = arith.constant 0 : index
    %121 = vector.load %arg8[%c0_87, %c0_88] : memref<288x128xf32, #tpu.memory_space<vmem>>, vector<256x128xf32>
    %c255_i32_89 = arith.constant 255 : i32
    %122 = tpu.dynamic_rotate %121 by %c255_i32_89 dim 0 : vector<256x128xf32>, i32 -> vector<256x128xf32>
    %cst_90 = arith.constant 0.000000e+00 : f32
    %123 = vector.broadcast %cst_90 : f32 to vector<256x128xf32>
    %124 = arith.select %24, %122, %123 : vector<256x128xi1>, vector<256x128xf32>
    %125 = arith.truncf %124 : vector<256x128xf32> to vector<256x128xbf16>
    %c65 = arith.constant 65 : index
    %c0_91 = arith.constant 0 : index
    %c0_92 = arith.constant 0 : index
    %126 = vector.load %arg2[%c65, %c0_91, %c0_92] : memref<72x128x128xbf16, #tpu.memory_space<vmem>>, vector<1x128x128xbf16>
    %127 = vector.shape_cast %126 : vector<1x128x128xbf16> to vector<128x128xbf16>
    %cst_93 = arith.constant dense<0.000000e+00> : vector<256x128xf32>
    %128 = tpu.matmul %125, %127, %cst_93 {dimension_numbers = #tpu.dot_dimension_numbers<[1], [0], [0], [1], [0, 0, 1, 1], [], []>} : vector<256x128xbf16>, vector<128x128xbf16>, vector<256x128xf32> -> vector<256x128xf32>
    %129 = arith.addf %120, %128 : vector<256x128xf32>
    %c16_94 = arith.constant 16 : index
    %c0_95 = arith.constant 0 : index
    %130 = vector.load %arg8[%c16_94, %c0_95] : memref<288x128xf32, #tpu.memory_space<vmem>>, vector<256x128xf32>
    %c1_i32_96 = arith.constant 1 : i32
    %131 = tpu.dynamic_rotate %130 by %c1_i32_96 dim 0 : vector<256x128xf32>, i32 -> vector<256x128xf32>
    %cst_97 = arith.constant 0.000000e+00 : f32
    %132 = vector.broadcast %cst_97 : f32 to vector<256x128xf32>
    %133 = arith.select %22, %131, %132 : vector<256x128xi1>, vector<256x128xf32>
    %134 = arith.truncf %133 : vector<256x128xf32> to vector<256x128xbf16>
    %c66 = arith.constant 66 : index
    %c0_98 = arith.constant 0 : index
    %c0_99 = arith.constant 0 : index
    %135 = vector.load %arg2[%c66, %c0_98, %c0_99] : memref<72x128x128xbf16, #tpu.memory_space<vmem>>, vector<1x128x128xbf16>
    %136 = vector.shape_cast %135 : vector<1x128x128xbf16> to vector<128x128xbf16>
    %cst_100 = arith.constant dense<0.000000e+00> : vector<256x128xf32>
    %137 = tpu.matmul %134, %136, %cst_100 {dimension_numbers = #tpu.dot_dimension_numbers<[1], [0], [0], [1], [0, 0, 1, 1], [], []>} : vector<256x128xbf16>, vector<128x128xbf16>, vector<256x128xf32> -> vector<256x128xf32>
    %138 = arith.addf %129, %137 : vector<256x128xf32>
    %c16_101 = arith.constant 16 : index
    %c0_102 = arith.constant 0 : index
    %139 = vector.load %arg8[%c16_101, %c0_102] : memref<288x128xf32, #tpu.memory_space<vmem>>, vector<256x128xf32>
    %140 = arith.truncf %139 : vector<256x128xf32> to vector<256x128xbf16>
    %c67 = arith.constant 67 : index
    %c0_103 = arith.constant 0 : index
    %c0_104 = arith.constant 0 : index
    %141 = vector.load %arg2[%c67, %c0_103, %c0_104] : memref<72x128x128xbf16, #tpu.memory_space<vmem>>, vector<1x128x128xbf16>
    %142 = vector.shape_cast %141 : vector<1x128x128xbf16> to vector<128x128xbf16>
    %cst_105 = arith.constant dense<0.000000e+00> : vector<256x128xf32>
    %143 = tpu.matmul %140, %142, %cst_105 {dimension_numbers = #tpu.dot_dimension_numbers<[1], [0], [0], [1], [0, 0, 1, 1], [], []>} : vector<256x128xbf16>, vector<128x128xbf16>, vector<256x128xf32> -> vector<256x128xf32>
    %144 = arith.addf %138, %143 : vector<256x128xf32>
    %c16_106 = arith.constant 16 : index
    %c0_107 = arith.constant 0 : index
    %145 = vector.load %arg8[%c16_106, %c0_107] : memref<288x128xf32, #tpu.memory_space<vmem>>, vector<256x128xf32>
    %c255_i32_108 = arith.constant 255 : i32
    %146 = tpu.dynamic_rotate %145 by %c255_i32_108 dim 0 : vector<256x128xf32>, i32 -> vector<256x128xf32>
    %cst_109 = arith.constant 0.000000e+00 : f32
    %147 = vector.broadcast %cst_109 : f32 to vector<256x128xf32>
    %148 = arith.select %24, %146, %147 : vector<256x128xi1>, vector<256x128xf32>
    %149 = arith.truncf %148 : vector<256x128xf32> to vector<256x128xbf16>
    %c68 = arith.constant 68 : index
    %c0_110 = arith.constant 0 : index
    %c0_111 = arith.constant 0 : index
    %150 = vector.load %arg2[%c68, %c0_110, %c0_111] : memref<72x128x128xbf16, #tpu.memory_space<vmem>>, vector<1x128x128xbf16>
    %151 = vector.shape_cast %150 : vector<1x128x128xbf16> to vector<128x128xbf16>
    %cst_112 = arith.constant dense<0.000000e+00> : vector<256x128xf32>
    %152 = tpu.matmul %149, %151, %cst_112 {dimension_numbers = #tpu.dot_dimension_numbers<[1], [0], [0], [1], [0, 0, 1, 1], [], []>} : vector<256x128xbf16>, vector<128x128xbf16>, vector<256x128xf32> -> vector<256x128xf32>
    %153 = arith.addf %144, %152 : vector<256x128xf32>
    %c32_113 = arith.constant 32 : index
    %c0_114 = arith.constant 0 : index
    %154 = vector.load %arg8[%c32_113, %c0_114] : memref<288x128xf32, #tpu.memory_space<vmem>>, vector<256x128xf32>
    %c1_i32_115 = arith.constant 1 : i32
    %155 = tpu.dynamic_rotate %154 by %c1_i32_115 dim 0 : vector<256x128xf32>, i32 -> vector<256x128xf32>
    %cst_116 = arith.constant 0.000000e+00 : f32
    %156 = vector.broadcast %cst_116 : f32 to vector<256x128xf32>
    %157 = arith.select %22, %155, %156 : vector<256x128xi1>, vector<256x128xf32>
    %158 = arith.truncf %157 : vector<256x128xf32> to vector<256x128xbf16>
    %c69 = arith.constant 69 : index
    %c0_117 = arith.constant 0 : index
    %c0_118 = arith.constant 0 : index
    %159 = vector.load %arg2[%c69, %c0_117, %c0_118] : memref<72x128x128xbf16, #tpu.memory_space<vmem>>, vector<1x128x128xbf16>
    %160 = vector.shape_cast %159 : vector<1x128x128xbf16> to vector<128x128xbf16>
    %cst_119 = arith.constant dense<0.000000e+00> : vector<256x128xf32>
    %161 = tpu.matmul %158, %160, %cst_119 {dimension_numbers = #tpu.dot_dimension_numbers<[1], [0], [0], [1], [0, 0, 1, 1], [], []>} : vector<256x128xbf16>, vector<128x128xbf16>, vector<256x128xf32> -> vector<256x128xf32>
    %162 = arith.addf %153, %161 : vector<256x128xf32>
    %c32_120 = arith.constant 32 : index
    %c0_121 = arith.constant 0 : index
    %163 = vector.load %arg8[%c32_120, %c0_121] : memref<288x128xf32, #tpu.memory_space<vmem>>, vector<256x128xf32>
    %164 = arith.truncf %163 : vector<256x128xf32> to vector<256x128xbf16>
    %c70 = arith.constant 70 : index
    %c0_122 = arith.constant 0 : index
    %c0_123 = arith.constant 0 : index
    %165 = vector.load %arg2[%c70, %c0_122, %c0_123] : memref<72x128x128xbf16, #tpu.memory_space<vmem>>, vector<1x128x128xbf16>
    %166 = vector.shape_cast %165 : vector<1x128x128xbf16> to vector<128x128xbf16>
    %cst_124 = arith.constant dense<0.000000e+00> : vector<256x128xf32>
    %167 = tpu.matmul %164, %166, %cst_124 {dimension_numbers = #tpu.dot_dimension_numbers<[1], [0], [0], [1], [0, 0, 1, 1], [], []>} : vector<256x128xbf16>, vector<128x128xbf16>, vector<256x128xf32> -> vector<256x128xf32>
    %168 = arith.addf %162, %167 : vector<256x128xf32>
    %c32_125 = arith.constant 32 : index
    %c0_126 = arith.constant 0 : index
    %169 = vector.load %arg8[%c32_125, %c0_126] : memref<288x128xf32, #tpu.memory_space<vmem>>, vector<256x128xf32>
    %c255_i32_127 = arith.constant 255 : i32
    %170 = tpu.dynamic_rotate %169 by %c255_i32_127 dim 0 : vector<256x128xf32>, i32 -> vector<256x128xf32>
    %cst_128 = arith.constant 0.000000e+00 : f32
    %171 = vector.broadcast %cst_128 : f32 to vector<256x128xf32>
    %172 = arith.select %24, %170, %171 : vector<256x128xi1>, vector<256x128xf32>
    %173 = arith.truncf %172 : vector<256x128xf32> to vector<256x128xbf16>
    %c71 = arith.constant 71 : index
    %c0_129 = arith.constant 0 : index
    %c0_130 = arith.constant 0 : index
    %174 = vector.load %arg2[%c71, %c0_129, %c0_130] : memref<72x128x128xbf16, #tpu.memory_space<vmem>>, vector<1x128x128xbf16>
    %175 = vector.shape_cast %174 : vector<1x128x128xbf16> to vector<128x128xbf16>
    %cst_131 = arith.constant dense<0.000000e+00> : vector<256x128xf32>
    %176 = tpu.matmul %173, %175, %cst_131 {dimension_numbers = #tpu.dot_dimension_numbers<[1], [0], [0], [1], [0, 0, 1, 1], [], []>} : vector<256x128xbf16>, vector<128x128xbf16>, vector<256x128xf32> -> vector<256x128xf32>
    %177 = arith.addf %168, %176 : vector<256x128xf32>
    %178 = arith.addf %177, %29 : vector<256x128xf32>
    %179 = vector.shape_cast %178 : vector<256x128xf32> to vector<1x16x16x128xf32>
    %c0_132 = arith.constant 0 : index
    %c0_133 = arith.constant 0 : index
    %c0_134 = arith.constant 0 : index
    %c0_135 = arith.constant 0 : index
    %180 = vector.load %arg7[%c0_132, %c0_133, %c0_134, %c0_135] : memref<1x16x16x128xf32, #tpu.memory_space<vmem>>, vector<1x16x16x128xf32>
    tpu.vector_store %arg7[%c0_132, %c0_133, %c0_134, %c0_135], %179 {strides = array<i32>} : memref<1x16x16x128xf32, #tpu.memory_space<vmem>>, vector<1x16x16x128xf32>,
    return
  }
  func.func @transform_0(%arg0: i32) -> (i32, i32, i32, i32) {
    %c0_i32 = arith.constant 0 : i32
    %c0_i32_0 = arith.constant 0 : i32
    %c0_i32_1 = arith.constant 0 : i32
    %c0_i32_2 = arith.constant 0 : i32
    return %arg0, %c0_i32, %c0_i32_0, %c0_i32_1 : i32, i32, i32, i32
  }
  func.func @transform_1(%arg0: i32) -> (i32, i32, i32) {
    %c0_i32 = arith.constant 0 : i32
    %c0_i32_0 = arith.constant 0 : i32
    %c0_i32_1 = arith.constant 0 : i32
    %c0_i32_2 = arith.constant 0 : i32
    return %c0_i32, %c0_i32_0, %c0_i32_1 : i32, i32, i32
  }
  func.func @transform_2(%arg0: i32) -> (i32, i32, i32) {
    %c0_i32 = arith.constant 0 : i32
    %c0_i32_0 = arith.constant 0 : i32
    %c0_i32_1 = arith.constant 0 : i32
    %c0_i32_2 = arith.constant 0 : i32
    return %c0_i32, %c0_i32_0, %c0_i32_1 : i32, i32, i32
  }
  func.func @transform_3(%arg0: i32) -> (i32, i32, i32) {
    %c0_i32 = arith.constant 0 : i32
    %c0_i32_0 = arith.constant 0 : i32
    %c0_i32_1 = arith.constant 0 : i32
    %c0_i32_2 = arith.constant 0 : i32
    return %c0_i32, %c0_i32_0, %c0_i32_1 : i32, i32, i32
  }
  func.func @transform_4(%arg0: i32) -> (i32, i32, i32) {
    %c0_i32 = arith.constant 0 : i32
    %c0_i32_0 = arith.constant 0 : i32
    %c0_i32_1 = arith.constant 0 : i32
    return %arg0, %c0_i32, %c0_i32_0 : i32, i32, i32
  }
  func.func @transform_5(%arg0: i32) -> (i32, i32, i32) {
    %c0_i32 = arith.constant 0 : i32
    %c0_i32_0 = arith.constant 0 : i32
    %c0_i32_1 = arith.constant 0 : i32
    return %arg0, %c0_i32, %c0_i32_0 : i32, i32, i32
  }
  func.func @transform_6(%arg0: i32) -> (i32, i32, i32, i32) {
    %c0_i32 = arith.constant 0 : i32
    %c0_i32_0 = arith.constant 0 : i32
    %c0_i32_1 = arith.constant 0 : i32
    %c0_i32_2 = arith.constant 0 : i32
    return %arg0, %c0_i32, %c0_i32_0, %c0_i32_1 : i32, i32, i32, i32
  }
}

</mosaic_0001>

<bundles_post_ra>
// kernel: forward.1
= control target key start
LH: loop header
LB: loop body
LE: loop exit
PB: predicated region body
PF: predicated region fallthrough
CT: control target
= control target key end

     0   :  { %s17344_s21 = smov 0   ;;  %s23862_s0 = inlined_call_operand.vmem [shape: f32[2,16,16,128], index: 0, kind: input, shape index: {}]   ;;  %s23863_s1 = inlined_call_operand.vmem [shape: bf16[72,128,128], index: 1, kind: input, shape index: {}]   ;;  %s23864_s2 = inlined_call_operand.vmem [shape: bf16[6,128,128], index: 2, kind: input, shape index: {}]   ;;  %s23865_s3 = inlined_call_operand.vmem [shape: f32[6,1,128], index: 3, kind: input, shape index: {}]   ;;  %s23866_s4 = inlined_call_operand.vmem [shape: f32[12,9,128], index: 4, kind: input, shape index: {}]   ;;  %s23867_s5 = inlined_call_operand.vmem [shape: f32[12,1,128], index: 5, kind: input, shape index: {}]   ;;  %s23868_s6 = inlined_call_operand.vmem [shape: f32[2,16,16,128], index: 6, kind: output, shape index: {}]  }
   0x1 LB: > { %s17350_s22 = sadd.s32 4294967295, %s17172_s21   ;;  %p12108_p0 = scmp.ge.s32.totalorder %s17172_s21, 1  ;;  %s17172_s21 = sphi %s17344_s21, %s16_s21  }
   0x2   : > { %p234_p1 = scmp.lt.s32.totalorder %s17172_s21, 3 }
   0x4   : > { %p235_p2 = pnand %p12108_p0, %p234_p1 }
   0x6   : > { %238 = sbr.rel (%p235_p2) target bundleno = 2056 (0x808), region = 44 }
   0xd   : > { %s279_s23 = smul.u32 6, %s17350_s22  ;;  %v16728_v0 = vld [vmem:[%s23863_s1 + $0x40] sm:$0xff]   ;;  %v16730_v2 = vld [vmem:[%s23863_s1 + $0x48] sm:$0xff]   ;;  %v17306_v3 = vmov 0.0   ;;  %v16732_v5 = vld [vmem:[%s23863_s1 + $0x50] sm:$0xff]   ;;  %v17307_v7 = vmov 0.0|0.0   ;;  %v301_v49 = vlaneseq }
   0xe   : > { %v16729_v1 = vld [vmem:[%s23863_s1 + $0x100] sm:$0xff]   ;;  %14310 = vmatprep.subr.bf16.mxu1 %v16728_v0  ;;  %297 = vst [vmem:[#allocation2] sm:$0xff] %v17306_v3  ;;  %298 = vst [vmem:[#allocation2 + $0x8] sm:$0xff] %v17306_v3  ;;  %v16731_v4 = vld [vmem:[%s23863_s1 + $0x108] sm:$0xff]   ;;  %14326 = vmatprep.mubr.bf16.mxu1 %v17307_v7  ;;  %p274_p4 = scmp.lt.s32.totalorder %s17350_s22, 1  ;;  %vm23901_vm3 = vmmov 1  }
   0xf   : > { %p280_p3 = scmp.lt.s32.totalorder %s279_s23, 11  ;;  %299 = vst [vmem:[#allocation2 + $0x110] sm:$0xff] %v17306_v3  ;;  %300 = vst [vmem:[#allocation2 + $0x118] sm:$0xff] %v17306_v3  ;;  %14502 = vmatprep.subr.bf16.mxu0 %v16729_v1  ;;  %14311 = vmatpush3.bf16.msra.mxu1 %v16728_v0  ;;  %v16733_v6 = vld [vmem:[%s23863_s1 + $0x110] sm:$0xff]   ;;  %v16734_v8 = vld [vmem:[%s23863_s1 + $0x58] sm:$0xff]   ;;  %v17513_v59 = vshrl.u32 %v301_v49, 7 }
  0x10   : > { %14503 = vmatpush3.bf16.msra.mxu0 %v16729_v1  ;;  %14312 = vmatprep.subr.bf16.mxu1 %v16730_v2  ;;  %v16735_v9 = vld [vmem:[%s23863_s1 + $0x118] sm:$0xff]   ;;  %s26269_s22 = smov (!%p274_p4, %s17350_s22), 1  ;;  %v16736_v10 = vld [vmem:[%s23863_s1 + $0x60] sm:$0xff]   ;;  %v16738_v12 = vld [vmem:[%s23863_s1 + $0x68] sm:$0xff]  }
  0x11   : > { %s26267_s23 = smov (!%p280_p3, %s279_s23), 11  ;;  %14504 = vmatprep.subr.bf16.mxu0 %v16731_v4  ;;  %s13634_s26 = sshll.u32 %s26269_s22, 8  ;;  %v16737_v11 = vld [vmem:[%s23863_s1 + $0x120] sm:$0xff]   ;;  %v16739_v15 = vld [vmem:[%s23863_s1 + $0x128] sm:$0xff]   ;;  %v16740_v22 = vld [vmem:[%s23863_s1 + $0x70] sm:$0xff]   ;;  %24624 = vst [vmem:[#allocation19_spill] sm:$0xff] %v17513_v59 }
  0x12   : > { %s13635_s12 = sshll.u32 %s26267_s23, 4  ;;  %s289_s15 = scalar_lea.vmem %s23867_s5, %s26267_s23  ;;  %v16741_v24 = vld [vmem:[%s23863_s1 + $0x130] sm:$0xff]   ;;  %v16742_v30 = vld [vmem:[%s23863_s1 + $0x78] sm:$0xff]   ;;  %v16744_v39 = vld [vmem:[%s23863_s1] sm:$0xff]   ;;  %v303_v7 = vadd.s32 8, %v17513_v59  ;;  %vm23900_vm0 = vcmp.lt.s32.totalorder %v17513_v59, 7 }
  0x13   : > { %s17387_s18 = scalar_lea.vmem %s23866_s4, %s13635_s12  ;;  %14313 = vmatpush3.bf16.msra.mxu1 %v16730_v2  ;;  %s17403_s7 = scalar_lea.vmem %s23868_s6, %s13634_s26  ;;  %v16743_v33 = vld [vmem:[%s23863_s1 + $0x138] sm:$0xff]   ;;  %v16745_v41 = vld [vmem:[%s23863_s1 + $0x140] sm:$0xff]   ;;  %v16746_v47 = vld [vmem:[%s23863_s1 + $0x148] sm:$0xff]   ;;  %vm23904_vm2 = vcmp.lt.s32.totalorder %v17513_v59, 1 }
  0x14   : > { %14505 = vmatpush3.bf16.msra.mxu0 %v16731_v4  ;;  %14314 = vmatprep.subr.bf16.mxu1 %v16732_v5  ;;  %s17411_s22 = scalar_lea.vmem %s23862_s0, %s13634_s26  ;;  %v16747_v51 = vld [vmem:[%s23863_s1 + $0x8] sm:$0xff]   ;;  %v16750_v57 = vld [vmem:[%s23863_s1 + $0x10] sm:$0xff]   ;;  %s19606_s26 = smov 0  }
  0x15   : > { %14506 = vmatprep.subr.bf16.mxu0 %v16733_v6  ;;  %v782_v13 = vld [vmem:[%s17411_s22] sm:$0xff]  ;;  %v783_v14 = vld [vmem:[%s17411_s22 + $0x8] sm:$0xff]  ;;  %v784_v18 = vld [vmem:[%s17411_s22 + $0x10] sm:$0xff] }
  0x16   : > { %v17421_v16 = vmax.f32 %v782_v13, 0.0  ;;  %v17423_v17 = vmax.f32 %v783_v14, 0.0  ;;  %v785_v19 = vld [vmem:[%s17411_s22 + $0x18] sm:$0xff]  ;;  %v17427_v20 = vmax.f32 %v784_v18, 0.0  ;;  %v786_v25 = vld [vmem:[%s17411_s22 + $0x20] sm:$0xff]  ;;  %v787_v26 = vld [vmem:[%s17411_s22 + $0x28] sm:$0xff] }
  0x17   : > { %14315 = vmatpush3.bf16.msra.mxu1 %v16732_v5  ;;  %v17434_v23 = vmax.f32 %v785_v19, 0.0  ;;  %v17443_v27 = vmax.f32 %v786_v25, 0.0  ;;  %v788_v28 = vld [vmem:[%s17411_s22 + $0x30] sm:$0xff]  ;;  %v789_v29 = vld [vmem:[%s17411_s22 + $0x38] sm:$0xff]  ;;  %v17450_v31 = vmax.f32 %v787_v26, 0.0  ;;  %v790_v35 = vld [vmem:[%s17411_s22 + $0x40] sm:$0xff] }
  0x18   : > { %14507 = vmatpush3.bf16.msra.mxu0 %v16733_v6  ;;  %14316 = vmatprep.subr.bf16.mxu1 %v16734_v8  ;;  %24608 = vst [vmem:[#allocation3_spill] sm:$0xff] %v17421_v16  ;;  %24609 = vst [vmem:[#allocation4_spill] sm:$0xff] %v17423_v17  ;;  %v2263_v21 = vpack.c.bf16 %v17423_v17, %v17421_v16  ;;  %v17452_v32 = vmax.f32 %v788_v28, 0.0  ;;  %v17459_v34 = vmax.f32 %v789_v29, 0.0  ;;  %v791_v36 = vld [vmem:[%s17411_s22 + $0x48] sm:$0xff]  ;;  %v17464_v37 = vmax.f32 %v790_v35, 0.0 }
  0x19   : > { %14508 = vmatprep.subr.bf16.mxu0 %v16735_v9  ;;  %24610 = vst [vmem:[#allocation5_spill] sm:$0xff] %v17427_v20  ;;  %24611 = vst [vmem:[#allocation6_spill] sm:$0xff] %v17434_v23  ;;  %v792_v38 = vld [vmem:[%s17411_s22 + $0x50] sm:$0xff]  ;;  %v793_v40 = vld [vmem:[%s17411_s22 + $0x58] sm:$0xff]  ;;  %v17475_v42 = vmax.f32 %v791_v36, 0.0  ;;  %v2264_v45 = vpack.c.bf16 %v17434_v23, %v17427_v20  ;;  %v2265_v50 = vpack.c.bf16 %v17450_v31, %v17443_v27  ;;  %v17555_v18 = vrot.slane %v17306_v3, 1 }
  0x1a   : > { %848 = vst [vmem:[#allocation2 + $0x20] sm:$0xff] %v17427_v20  ;;  %14518 = vmatprep.mubr.bf16.mxu0 %v2263_v21  ;;  %849 = vst [vmem:[#allocation2 + $0x28] sm:$0xff] %v17434_v23  ;;  %v17478_v43 = vmax.f32 %v792_v38, 0.0  ;;  %v17480_v44 = vmax.f32 %v793_v40, 0.0  ;;  %v794_v46 = vld [vmem:[%s17411_s22 + $0x60] sm:$0xff]  ;;  %v795_v48 = vld [vmem:[%s17411_s22 + $0x68] sm:$0xff]  ;;  %v2266_v0 = vpack.c.bf16 %v17459_v34, %v17452_v32 }
  0x1b   : > { %14317 = vmatpush3.bf16.msra.mxu1 %v16734_v8  ;;  %24612 = vst [vmem:[#allocation7_spill] sm:$0xff] %v17443_v27  ;;  %24613 = vst [vmem:[#allocation8_spill] sm:$0xff] %v17450_v31  ;;  %v17497_v52 = vmax.f32 %v794_v46, 0.0  ;;  %v17499_v53 = vmax.f32 %v795_v48, 0.0  ;;  %v796_v54 = vld [vmem:[%s17411_s22 + $0x70] sm:$0xff]  ;;  %v797_v55 = vld [vmem:[%s17411_s22 + $0x78] sm:$0xff]  ;;  %v2267_v2 = vpack.c.bf16 %v17475_v42, %v17464_v37 }
  0x1c   : > { %14509 = vmatpush3.bf16.msra.mxu0 %v16735_v9  ;;  %14318 = vmatprep.subr.bf16.mxu1 %v16736_v10  ;;  %24614 = vst [vmem:[#allocation9_spill] sm:$0xff] %v17452_v32  ;;  %850 = vst [vmem:[#allocation2 + $0x30] sm:$0xff] %v17443_v27  ;;  %v17503_v56 = vmax.f32 %v796_v54, 0.0  ;;  %v17510_v58 = vmax.f32 %v797_v55, 0.0  ;;  %v16748_v60 = vld [vmem:[%s23863_s1 + $0x150] sm:$0xff]   ;;  %v798_v61 = vld [vmem:[%s17411_s22 + $0x80] sm:$0xff]  ;;  %v2268_v35 = vpack.c.bf16 %v17480_v44, %v17478_v43 }
  0x1d   : > { %14510 = vmatprep.subr.bf16.mxu0 %v16737_v11  ;;  %851 = vst [vmem:[#allocation2 + $0x38] sm:$0xff] %v17450_v31  ;;  %24615 = vst [vmem:[#allocation10_spill] sm:$0xff] %v17459_v34  ;;  %v799_v62 = vld [vmem:[%s17411_s22 + $0x88] sm:$0xff]  ;;  %v17521_v63 = vmax.f32 %v798_v61, 0.0  ;;  %v800_v4 = vld [vmem:[%s17411_s22 + $0x90] sm:$0xff]  ;;  %v17573_v26 = vadd.s32 40, %v17513_v59 }
  0x1e   : > { %852 = vst [vmem:[#allocation2 + $0x40] sm:$0xff] %v17452_v32  ;;  %24616 = vst [vmem:[#allocation11_spill] sm:$0xff] %v17464_v37  ;;  %v17525_v1 = vmax.f32 %v799_v62, 0.0  ;;  %v801_v5 = vld [vmem:[%s17411_s22 + $0x98] sm:$0xff]  ;;  %v17537_v8 = vmax.f32 %v800_v4, 0.0  ;;  %v802_v9 = vld [vmem:[%s17411_s22 + $0xa0] sm:$0xff] }
  0x1f   : > { %14319 = vmatpush3.bf16.msra.mxu1 %v16736_v10  ;;  %853 = vst [vmem:[#allocation2 + $0x48] sm:$0xff] %v17459_v34  ;;  %24617 = vst [vmem:[#allocation12_spill] sm:$0xff] %v17475_v42  ;;  %v16749_v6 = vld [vmem:[%s23863_s1 + $0x158] sm:$0xff]   ;;  %v803_v10 = vld [vmem:[%s17411_s22 + $0xa8] sm:$0xff]  ;;  %v17546_v13 = vmax.f32 %v802_v9, 0.0  ;;  %v2538_v46 = vrot.slane %v17423_v17, 1 }
  0x20   : > { %14511 = vmatpush3.bf16.msra.mxu0 %v16737_v11  ;;  %14320 = vmatprep.subr.bf16.mxu1 %v16738_v12  ;;  %854 = vst [vmem:[#allocation2 + $0x50] sm:$0xff] %v17464_v37  ;;  %24618 = vst [vmem:[#allocation13_spill] sm:$0xff] %v17478_v43  ;;  %v16753_v11 = vld [vmem:[%s23863_s1 + $0x18] sm:$0xff]   ;;  %v17548_v14 = vmax.f32 %v803_v10, 0.0  ;;  %v804_v19 = vld [vmem:[%s17411_s22 + $0xb0] sm:$0xff]  ;;  %v2539_v48 = vrot.slane %v17427_v20, 1 }
  0x21   : > { %14512 = vmatprep.subr.bf16.mxu0 %v16739_v15  ;;  %24619 = vst [vmem:[#allocation14_spill] sm:$0xff] %v17480_v44  ;;  %855 = vst [vmem:[#allocation2 + $0x58] sm:$0xff] %v17475_v42  ;;  %v16756_v25 = vld [vmem:[%s23863_s1 + $0x20] sm:$0xff]   ;;  %v17575_v28 = vmax.f32 %v804_v19, 0.0  ;;  %v16752_v49 = vld [vmem:[%s23863_s1 + $0x168] sm:$0xff]   ;;  %v2540_v61 = vrot.slane %v17434_v23, 1 }
  0x22   : > { %856 = vst [vmem:[#allocation2 + $0x60] sm:$0xff] %v17478_v43  ;;  %857 = vst [vmem:[#allocation2 + $0x68] sm:$0xff] %v17480_v44  ;;  %v16758_v55 = vld [vmem:[%s23863_s1 + $0x28] sm:$0xff]   ;;  %v1897_v62 = vrot.slane %v17443_v27, 7  ;;  %v810_v4 = vld [vmem:[%s17411_s22 + $0xe0] sm:$0xff]  ;;  %v24645_v40 = vmov 0 }
  0x23   : > { %14321 = vmatpush3.bf16.msra.mxu1 %v16738_v12  ;;  %24620 = vst [vmem:[#allocation15_spill] sm:$0xff] %v17497_v52  ;;  %24621 = vst [vmem:[#allocation16_spill] sm:$0xff] %v17499_v53  ;;  %v17544_v12 = vmax.f32 %v801_v5, 0.0  ;;  %v811_v5 = vld [vmem:[%s17411_s22 + $0xe8] sm:$0xff]  ;;  %v17630_v9 = vmax.f32 %v810_v4, 0.0  ;;  %v2270_v4 = vpack.c.bf16 %v17510_v58, %v17503_v56  ;;  %v16755_v19 = vld [vmem:[%s23863_s1 + $0x178] sm:$0xff]  }
  0x24   : > { %14513 = vmatpush3.bf16.msra.mxu0 %v16739_v15  ;;  %14322 = vmatprep.subr.bf16.mxu1 %v16740_v22  ;;  %24622 = vst [vmem:[#allocation17_spill] sm:$0xff] %v17503_v56  ;;  %858 = vst [vmem:[#allocation2 + $0x70] sm:$0xff] %v17497_v52  ;;  %v17552_v15 = vrot.slane %v17306_v3, 7  ;;  %v345_v3 = vand.u32 15, %v303_v7  ;;  %v2541_v7 = vrot.slane %v17443_v27, 1  ;;  %v17632_v10 = vmax.f32 %v811_v5, 0.0 }
  0x25   : > { %14514 = vmatprep.subr.bf16.mxu0 %v16741_v24  ;;  %859 = vst [vmem:[#allocation2 + $0x78] sm:$0xff] %v17499_v53  ;;  %24623 = vst [vmem:[#allocation18_spill] sm:$0xff] %v17510_v58 }
  0x26   : > { %860 = vst [vmem:[#allocation2 + $0x80] sm:$0xff] %v17503_v56  ;;  %861 = vst [vmem:[#allocation2 + $0x88] sm:$0xff] %v17510_v58  ;;  %vm17609_vm1 = vcmp.ne.s32.totalorder %v345_v3, 15  ;;  %v16754_v3 = vld [vmem:[%s23863_s1 + $0x170] sm:$0xff]  }
  0x27   : > { %14323 = vmatpush3.bf16.msra.mxu1 %v16740_v22  ;;  %24625 = vst [vmem:[#allocation20_spill] sm:$0xff] %v17521_v63  ;;  %24626 = vst [vmem:[#allocation21_spill] sm:$0xff] %v17525_v1  ;;  %v17566_v22 = vadd.s32 24, %v17513_v59 }
  0x28   : > { %14515 = vmatpush3.bf16.msra.mxu0 %v16741_v24  ;;  %14324 = vmatprep.subr.bf16.mxu1 %v16742_v30  ;;  %862 = vst [vmem:[#allocation2 + $0x90] sm:$0xff] %v17521_v63  ;;  %863 = vst [vmem:[#allocation2 + $0x98] sm:$0xff] %v17525_v1  ;;  %v805_v24 = vld [vmem:[%s17411_s22 + $0xb8] sm:$0xff] }
  0x29   : > { %14516 = vmatprep.subr.bf16.mxu0 %v16743_v33  ;;  %24627 = vst [vmem:[#allocation22_spill] sm:$0xff] %v17537_v8  ;;  %24628 = vst [vmem:[#allocation23_spill] sm:$0xff] %v17544_v12  ;;  %v17577_v29 = vmax.f32 %v805_v24, 0.0  ;;  %v359_v54 = vand.u32 15, %v17566_v22  ;;  %v2598_v24 = vsel %vm23900_vm0, %v2538_v46, %v2539_v48  ;;  %v24653_v22 = vmov 0 }
  0x2a   : > { %24629 = vst [vmem:[#allocation24_spill] sm:$0xff] %v17546_v13  ;;  %24630 = vst [vmem:[#allocation25_spill] sm:$0xff] %v17548_v14 }
  0x2b   : > { %14325 = vmatpush3.bf16.msra.mxu1 %v16742_v30  ;;  %864 = vst [vmem:[#allocation2 + $0xa0] sm:$0xff] %v17537_v8  ;;  %24631 = vst [vmem:[#allocation26_spill] sm:$0xff] %v17555_v18  ;;  %v806_v30 = vld [vmem:[%s17411_s22 + $0xc0] sm:$0xff]  ;;  %vm17704_vm5 = vcmp.ne.s32.totalorder %v359_v54, 15 }
  0x2c   : > { %14517 = vmatpush3.bf16.msra.mxu0 %v16743_v33  ;;  %14358 = vmatprep.subr.bf16.mxu1 %v16744_v39  ;;  %865 = vst [vmem:[#allocation2 + $0xa8] sm:$0xff] %v17544_v12  ;;  %866 = vst [vmem:[#allocation2 + $0xb0] sm:$0xff] %v17546_v13  ;;  %v807_v33 = vld [vmem:[%s17411_s22 + $0xc8] sm:$0xff]  ;;  %v17583_v36 = vmax.f32 %v806_v30, 0.0  ;;  %v373_v30 = vand.u32 15, %v17573_v26 }
  0x2d   : > { %14550 = vmatprep.subr.bf16.mxu0 %v16745_v41  ;;  %867 = vst [vmem:[#allocation2 + $0xb8] sm:$0xff] %v17548_v14  ;;  %24632 = vst [vmem:[#allocation27_spill] sm:$0xff] %v17575_v28  ;;  %v17585_v38 = vmax.f32 %v807_v33, 0.0  ;;  %v2543_v33 = vrot.slane %v17452_v32, 1 }
  0x2e   : > { %14327 = vmatmul.mubr.bf16.vlgmr.msra.gmra.mrb[0].mxu1 %v2263_v21  ;;  %v16751_v21 = vld [vmem:[%s23863_s1 + $0x160] sm:$0xff]   ;;  %24633 = vst [vmem:[#allocation28_spill] sm:$0xff] %v17577_v29  ;;  %24634 = vst [vmem:[#allocation29_spill] sm:$0xff] %v17583_v36  ;;  %vm17718_vm6 = vcmp.ne.s32.totalorder %v373_v30, 15  ;;  %v17734_v30 = vrot.slane %v17510_v58, 7 }
  0x2f   : > { %14519 = vmatmul.mubr.bf16.vlgmr.msra.gmra.mrb[0].mxu0 %v2264_v45  ;;  %14359 = vmatpush3.bf16.msra.mxu1 %v16744_v39  ;;  %24635 = vst [vmem:[#allocation30_spill] sm:$0xff] %v17585_v38  ;;  %v17588_v39 = vrot.slane %v17421_v16, 7  ;;  %868 = vst [vmem:[#allocation2 + $0xc0] sm:$0xff] %v17575_v28  ;;  %v24654_v22 = vsel %vm17718_vm6, 4294967295, %v24653_v22 }
  0x30   : > { %14551 = vmatpush3.bf16.msra.mxu0 %v16745_v41  ;;  %14330 = vmatprep.mubr.bf16.mxu1 %v2264_v45  ;;  %v17592_v41 = vrot.slane %v17421_v16, 1  ;;  %v17596_v45 = vpack.c.bf16 %v17499_v53, %v17497_v52  ;;  %869 = vst [vmem:[#allocation2 + $0xc8] sm:$0xff] %v17577_v29  ;;  %870 = vst [vmem:[#allocation2 + $0xd0] sm:$0xff] %v17583_v36  ;;  %v24668_v16 = vrot.slane %v17464_v37, 1 }
  0x31   : > { %14552 = vmatprep.subr.bf16.mxu0 %v16746_v47  ;;  %14522 = vmatprep.mubr.bf16.mxu0 %v2265_v50  ;;  %24636 = vst [vmem:[#allocation31_spill] sm:$0xff] %v17588_v39  ;;  %871 = vst [vmem:[#allocation2 + $0xd8] sm:$0xff] %v17585_v38 }
  0x32   : > { %14360 = vmatprep.subr.bf16.mxu1 %v16747_v51  ;;  %24637 = vst [vmem:[#allocation32_spill] sm:$0xff] %v17592_v41  ;;  %24643 = vst [vmem:[#allocation36_spill] sm:$0xff] %v17630_v9 }
  0x33   : > { %14361 = vmatpush3.bf16.msra.mxu1 %v16747_v51  ;;  %v24638_v51 = vmov 0  ;;  %24644 = vst [vmem:[#allocation37_spill] sm:$0xff] %v17632_v10  ;;  %874 = vst [vmem:[#allocation2 + $0xf0] sm:$0xff] %v17630_v9 }
  0x34   : > { %14553 = vmatpush3.bf16.msra.mxu0 %v16746_v47  ;;  %14362 = vmatprep.subr.bf16.mxu1 %v16750_v57  ;;  %v24639_v51 = vsel %vm17609_vm1, 4294967295, %v24638_v51  ;;  %875 = vst [vmem:[#allocation2 + $0xf8] sm:$0xff] %v17632_v10  ;;  %vm17665_vm4 = vmpackc.low %vm17609_vm1, %vm23901_vm3  ;;  %v2596_v47 = vsel %vm23900_vm0, %v2540_v61, %v2541_v7 }
  0x35   : > { %14554 = vmatprep.subr.bf16.mxu0 %v16748_v60  ;;  %24640 = vst [vmem:[#allocation33_spill] sm:$0xff] %v24639_v51  ;;  %v24646_v40 = vsel %vm17665_vm4, 4294967295, %v24645_v40  ;;  %24655 = vst [vmem:[#allocation42_spill] sm:$0xff] %v24654_v22  ;;  %v24669_v22 = vrot.slane %v17497_v52, 1  ;;  %v24694_v51 = vrot.slane %v17480_v44, 7 }
  0x36   : > { %14331 = vmatmul.mubr.bf16.gmra.mrb[4].mxu1 %v2265_v50  ;;  %v23870_v50 = vrot.slane %v17434_v23, 7  ;;  %24647 = vst [vmem:[#allocation38_spill] sm:$0xff] %v24646_v40  ;;  %24657 = vst [vmem:[#allocation44_spill] sm:$0xff] %v17734_v30 }
  0x37   : > { %14523 = vmatmul.mubr.bf16.gmra.mrb[4].mxu0 %v2266_v0  ;;  %14334 = vmatprep.mubr.bf16.mxu1 %v2266_v0  ;;  %vm17739_vm7 = vmpackc.low %vm17704_vm5, %vm23901_vm3 }
  0x38   : > { %14555 = vmatpush3.bf16.msra.mxu0 %v16748_v60  ;;  %14526 = vmatprep.mubr.bf16.mxu0 %v2267_v2  ;;  %v809_v60 = vld [vmem:[%s17411_s22 + $0xd8] sm:$0xff]  ;;  %vm17761_vm8 = vmpackc.low %vm17718_vm6, %vm23901_vm3 }
  0x39   : > { %14556 = vmatprep.subr.bf16.mxu0 %v16749_v6  ;;  %14363 = vmatpush3.bf16.msra.mxu1 %v16750_v57  ;;  %v808_v57 = vld [vmem:[%s17411_s22 + $0xd0] sm:$0xff] }
  0x3a   : > { %14364 = vmatprep.subr.bf16.mxu1 %v16753_v11  ;;  %v17621_v0 = vmax.f32 %v808_v57, 0.0  ;;  %v16760_v57 = vld [vmem:[%s23863_s1 + $0x30] sm:$0xff]  }
  0x3c   : > { %14557 = vmatpush3.bf16.msra.mxu0 %v16749_v6  ;;  %24641 = vst [vmem:[#allocation34_spill] sm:$0xff] %v17621_v0  ;;  %v23871_v6 = vrot.slane %v17450_v31, 7  ;;  %872 = vst [vmem:[#allocation2 + $0xe0] sm:$0xff] %v17621_v0 }
  0x3d   : > { %14558 = vmatprep.subr.bf16.mxu0 %v16751_v21  ;;  %14365 = vmatpush3.bf16.msra.mxu1 %v16753_v11  ;;  %v2542_v11 = vrot.slane %v17450_v31, 1 }
  0x3e   : > { %14335 = vmatmul.mubr.bf16.gmra.mrb[8].mxu1 %v2267_v2  ;;  %14366 = vmatprep.subr.bf16.mxu1 %v16756_v25  ;;  %v17623_v2 = vmax.f32 %v809_v60, 0.0  ;;  %v23869_v60 = vrot.slane %v17464_v37, 1 }
  0x3f   : > { %14527 = vmatmul.mubr.bf16.gmra.mrb[8].mxu0 %v2268_v35  ;;  %14338 = vmatprep.mubr.bf16.mxu1 %v2268_v35  ;;  %v2544_v35 = vrot.slane %v17459_v34, 1 }
  0x40   : > { %24642 = vst [vmem:[#allocation35_spill] sm:$0xff] %v17623_v2  ;;  %14559 = vmatpush3.bf16.msra.mxu0 %v16751_v21  ;;  %14530 = vmatprep.mubr.bf16.mxu0 %v17596_v45  ;;  %v2599_v21 = vsel %vm23900_vm0, %v17592_v41, %v2538_v46  ;;  %873 = vst [vmem:[#allocation2 + $0xe8] sm:$0xff] %v17623_v2  ;;  %v2548_v46 = vrot.slane %v17480_v44, 1 }
  0x41   : > { %14560 = vmatprep.subr.bf16.mxu0 %v16752_v49  ;;  %14367 = vmatpush3.bf16.msra.mxu1 %v16756_v25  ;;  %v17669_v25 = vpack.c.bf16 %v2598_v24, %v2599_v21  ;;  %v2594_v24 = vsel %vm23900_vm0, %v2542_v11, %v2543_v33  ;;  %v16762_v21 = vld [vmem:[%s23863_s1 + $0x38] sm:$0xff]   ;;  %v2593_v26 = vsel %vm23900_vm0, %v2543_v33, %v2544_v35 }
  0x42   : > { %14368 = vmatprep.subr.bf16.mxu1 %v16758_v55 }
  0x43   : > { %24648 = vst [vmem:[#allocation39_spill] sm:$0xff] %v17669_v25 }
  0x44   : > { %14561 = vmatpush3.bf16.msra.mxu0 %v16752_v49  ;;  %v2597_v49 = vsel %vm23900_vm0, %v2539_v48, %v2540_v61  ;;  %v2595_v48 = vsel %vm23900_vm0, %v2541_v7, %v2542_v11  ;;  %v24649_v11 = vmov 0  ;;  %v311_v61 = vadd.s32 72, %v17513_v59 }
  0x45   : > { %14562 = vmatprep.subr.bf16.mxu0 %v16754_v3  ;;  %14369 = vmatpush3.bf16.msra.mxu1 %v16758_v55  ;;  %v2547_v55 = vrot.slane %v17478_v43, 1  ;;  %v24650_v11 = vsel %vm17704_vm5, 4294967295, %v24649_v11  ;;  %v17714_v5 = vpack.c.bf16 %v2596_v47, %v2597_v49  ;;  %v1048_v7 = vpack.c.bf16 %v17525_v1, %v17521_v63 }
  0x46   : > { %14339 = vmatmul.mubr.bf16.gmra.mrb[12].mxu1 %v17596_v45  ;;  %14370 = vmatprep.subr.bf16.mxu1 %v16760_v57  ;;  %v309_v45 = vadd.s32 56, %v17513_v59  ;;  %24651 = vst [vmem:[#allocation40_spill] sm:$0xff] %v24650_v11  ;;  %v17722_v54 = vpack.c.bf16 %v2594_v24, %v2595_v48  ;;  %v24658_v49 = vmov 0  ;;  %v967_v48 = vsel %vm23904_vm2, %v1897_v62, %v23871_v6  ;;  %v812_v11 = vld [vmem:[%s17411_s22 + $0xf0] sm:$0xff] }
  0x47   : > { %14531 = vmatmul.mubr.bf16.gmra.mrb[12].mxu0 %v2270_v4  ;;  %14342 = vmatprep.mubr.bf16.mxu1 %v2270_v4  ;;  %v2592_v4 = vsel %vm23900_vm0, %v2544_v35, %v23869_v60  ;;  %24652 = vst [vmem:[#allocation41_spill] sm:$0xff] %v17714_v5  ;;  %v17727_v60 = vld [vmem:[%s23863_s1 + $0x80] sm:$0xff]   ;;  %v1049_v35 = vpack.c.bf16 %v17544_v12, %v17537_v8  ;;  %v24659_v49 = vsel %vm17739_vm7, 4294967295, %v24658_v49  ;;  %v401_v33 = vand.u32 15, %v311_v61 }
  0x48   : > { %14563 = vmatpush3.bf16.msra.mxu0 %v16754_v3  ;;  %14566 = vmatprep.mubr.msk.bf16.mxu0 %vm17665_vm4, %v17669_v25  ;;  %v16757_v3 = vld [vmem:[%s23863_s1 + $0x180] sm:$0xff]   ;;  %24656 = vst [vmem:[#allocation43_spill] sm:$0xff] %v17722_v54  ;;  %24660 = vst [vmem:[#allocation45_spill] sm:$0xff] %v24659_v49  ;;  %v17743_v24 = vpack.c.bf16 %v2592_v4, %v2593_v26  ;;  %v24662_v26 = vmov 0  ;;  %v16759_v4 = vld [vmem:[%s23863_s1 + $0x188] sm:$0xff]   ;;  %v24665_v47 = vrot.slane %v17475_v42, 1 }
  0x49   : > { %14564 = vmatprep.subr.bf16.mxu0 %v16755_v19  ;;  %14371 = vmatpush3.bf16.msra.mxu1 %v16760_v57  ;;  %v387_v57 = vand.u32 15, %v309_v45  ;;  %v24663_v26 = vsel %vm17761_vm8, 4294967295, %v24662_v26  ;;  %vm17816_vm10 = vcmp.ne.s32.totalorder %v401_v33, 15  ;;  %v16761_v45 = vld [vmem:[%s23863_s1 + $0x190] sm:$0xff]   ;;  %v24681_v33 = vmov 0 }
  0x4a   : > { %14372 = vmatprep.subr.bf16.mxu1 %v16762_v21  ;;  %24661 = vst [vmem:[#allocation46_spill] sm:$0xff] %v17743_v24  ;;  %24664 = vst [vmem:[#allocation47_spill] sm:$0xff] %v24663_v26  ;;  %v24667_v27 = vmov %v24665_v47  ;;  %v24838_v26 = vrot.slane %v17621_v0, 1  ;;  %v24848_v49 = vmov 0 }
  0x4b   : > { %v2591_v61 = vsel %vm23900_vm0, %v24668_v16, %v24667_v27  ;;  %vm17791_vm9 = vcmp.ne.s32.totalorder %v387_v57, 15  ;;  %v2589_v16 = vsel %vm23900_vm0, %v2547_v55, %v2548_v46  ;;  %v24673_v27 = vrot.slane %v17459_v34, 7  ;;  %vm17861_vm12 = vmpackc.low %vm17816_vm10, %vm23901_vm3 }
  0x4c   : > { %14565 = vmatpush3.bf16.msra.mxu0 %v16755_v19  ;;  %v968_v19 = vsel %vm23904_vm2, %v23870_v50, %v1897_v62  ;;  %v2590_v62 = vsel %vm23900_vm0, %v24665_v47, %v2547_v55  ;;  %v2588_v47 = vsel %vm23900_vm0, %v2548_v46, %v24669_v22  ;;  %v24674_v22 = vrot.slane %v17452_v32, 7  ;;  %vm17832_vm11 = vmpackc.low %vm17791_vm9, %vm23901_vm3 }
  0x4d   : > { %14598 = vmatprep.subr.bf16.mxu0 %v16757_v3  ;;  %14373 = vmatpush3.bf16.msra.mxu1 %v16762_v21  ;;  %v17772_v50 = vpack.c.bf16 %v967_v48, %v968_v19  ;;  %v24676_v55 = vrot.slane %v17450_v31, 7  ;;  %v24682_v33 = vsel %vm17832_vm11, 4294967295, %v24681_v33  ;;  %v1051_v19 = vpack.c.bf16 %v17577_v29, %v17575_v28 }
  0x4e   : > { %14343 = vmatmul.mubr.bf16.gmra.mrb[16].mxu1 %v1048_v7  ;;  %14406 = vmatprep.subr.bf16.mxu1 %v17727_v60  ;;  %v24670_v7 = vmov 0  ;;  %v965_v48 = vsel %vm23904_vm2, %v24674_v22, %v24673_v27  ;;  %v24675_v46 = vmov %v24674_v22  ;;  %v313_v22 = vadd.s32 88, %v17513_v59  ;;  %24683 = vst [vmem:[#allocation52_spill] sm:$0xff] %v24682_v33 }
  0x4f   : > { %24666 = vst [vmem:[#allocation48_spill] sm:$0xff] %v17772_v50  ;;  %14567 = vmatmul.mubr.msk.bf16.vlgmr.msra.gmra.mrb[0].mxu0 %vm17739_vm7, %v17714_v5  ;;  %14346 = vmatprep.mubr.bf16.mxu1 %v1049_v35  ;;  %v24671_v7 = vsel %vm17791_vm9, 4294967295, %v24670_v7  ;;  %v966_v57 = vsel %vm23904_vm2, %v24676_v55, %v24675_v46  ;;  %v1050_v46 = vpack.c.bf16 %v17548_v14, %v17546_v13  ;;  %v315_v55 = vadd.s32 104, %v17513_v59 }
  0x50   : > { %24672 = vst [vmem:[#allocation49_spill] sm:$0xff] %v24671_v7  ;;  %14599 = vmatpush3.bf16.msra.mxu0 %v16757_v3  ;;  %14570 = vmatprep.mubr.msk.bf16.mxu0 %vm17761_vm8, %v17722_v54  ;;  %v24677_v3 = vmov 0  ;;  %v17824_v21 = vpack.c.bf16 %v965_v48, %v966_v57  ;;  %v24684_v27 = vrot.slane %v17475_v42, 7  ;;  %v24685_v35 = vrot.slane %v17464_v37, 7 }
  0x51   : > { %14600 = vmatprep.subr.bf16.mxu0 %v16759_v4  ;;  %v24678_v3 = vsel %vm17816_vm10, 4294967295, %v24677_v3  ;;  %v17846_v6 = vpack.c.bf16 %v2590_v62, %v2591_v61  ;;  %v24688_v32 = vrot.slane %v17459_v34, 7  ;;  %v24689_v62 = vmov 0 }
  0x52   : > { %24679 = vst [vmem:[#allocation50_spill] sm:$0xff] %v24678_v3  ;;  %24680 = vst [vmem:[#allocation51_spill] sm:$0xff] %v17824_v21  ;;  %v963_v48 = vsel %vm23904_vm2, %v24685_v35, %v24684_v27  ;;  %v24687_v31 = vmov %v24685_v35  ;;  %v24690_v62 = vsel %vm17861_vm12, 4294967295, %v24689_v62  ;;  %v415_v57 = vand.u32 15, %v313_v22  ;;  %v813_v3 = vld [vmem:[%s17411_s22 + $0xf8] sm:$0xff] }
  0x53   : > { %24686 = vst [vmem:[#allocation53_spill] sm:$0xff] %v17846_v6  ;;  %v964_v7 = vsel %vm23904_vm2, %v24688_v32, %v24687_v31  ;;  %24691 = vst [vmem:[#allocation54_spill] sm:$0xff] %v24690_v62  ;;  %v17867_v31 = vpack.c.bf16 %v2588_v47, %v2589_v16  ;;  %v16763_v32 = vld [vmem:[%s23863_s1 + $0x198] sm:$0xff]   ;;  %v429_v35 = vand.u32 15, %v315_v55  ;;  %v24697_v22 = vrot.slane %v17499_v53, 1 }
  0x54   : > { %14601 = vmatpush3.bf16.msra.mxu0 %v16759_v4  ;;  %v17865_v61 = vpack.c.bf16 %v963_v48, %v964_v7  ;;  %v24695_v4 = vrot.slane %v17478_v43, 7  ;;  %v24696_v7 = vrot.slane %v17503_v56, 1  ;;  %v24699_v48 = vrot.slane %v17475_v42, 7 }
  0x55   : > { %24693 = vst [vmem:[#allocation56_spill] sm:$0xff] %v17867_v31  ;;  %14602 = vmatprep.subr.bf16.mxu0 %v16761_v45  ;;  %v17890_v34 = vmax.f32 %v812_v11, 0.0  ;;  %v24702_v55 = vrot.slane %v17497_v52, 1  ;;  %vm17921_vm13 = vcmp.ne.s32.totalorder %v415_v57, 15  ;;  %v17935_v42 = vmax.f32 %v813_v3, 0.0 }
  0x56   : > { %24692 = vst [vmem:[#allocation55_spill] sm:$0xff] %v17865_v61  ;;  %v961_v27 = vsel %vm23904_vm2, %v24695_v4, %v24694_v51  ;;  %14347 = vmatmul.mubr.bf16.gmra.mrb[20].mxu1 %v1050_v46  ;;  %v2586_v47 = vsel %vm23900_vm0, %v24697_v22, %v24696_v7  ;;  %v24698_v16 = vmov %v24695_v4  ;;  %v17897_v51 = vrot.slane %v17575_v28, 7  ;;  %vm17957_vm15 = vmpackc.low %vm17921_vm13, %vm23901_vm3 }
  0x57   : > { %v962_v37 = vsel %vm23904_vm2, %v24699_v48, %v24698_v16  ;;  %24700 = vst [vmem:[#allocation57_spill] sm:$0xff] %v17890_v34  ;;  %14571 = vmatmul.mubr.msk.bf16.gmra.mrb[4].mxu0 %vm17832_vm11, %v17743_v24  ;;  %14350 = vmatprep.mubr.bf16.mxu1 %v1051_v19  ;;  %v24701_v46 = vmov %v24697_v22  ;;  %v317_v7 = vadd.s32 120, %v17513_v59  ;;  %876 = vst [vmem:[#allocation2 + $0x100] sm:$0xff] %v17890_v34  ;;  %v24704_v19 = vrot.slane %v17499_v53, 7 }
  0x58   : > { %v2587_v4 = vsel %vm23900_vm0, %v24702_v55, %v24701_v46  ;;  %v17906_v11 = vpack.c.bf16 %v961_v27, %v962_v37  ;;  %14574 = vmatprep.mubr.msk.bf16.mxu0 %vm17861_vm12, %v17846_v6  ;;  %14603 = vmatpush3.bf16.msra.mxu0 %v16761_v45  ;;  %v24705_v46 = vrot.slane %v17497_v52, 7  ;;  %v24706_v27 = vmov 0  ;;  %v16765_v45 = vld [vmem:[%s23863_s1 + $0x1a0] sm:$0xff]   ;;  %24711 = vst [vmem:[#allocation60_spill] sm:$0xff] %v17935_v42  ;;  %877 = vst [vmem:[#allocation2 + $0x108] sm:$0xff] %v17935_v42 }
  0x59   : > { %v24707_v27 = vsel %vm17921_vm13, 4294967295, %v24706_v27  ;;  %14604 = vmatprep.subr.bf16.mxu0 %v16763_v32  ;;  %v319_v55 = vadd.s32 136, %v17513_v59  ;;  %v24710_v48 = vrot.slane %v17480_v44, 7  ;;  %v1052_v57 = vpack.c.bf16 %v17585_v38, %v17583_v36 }
  0x5a   : > { %24703 = vst [vmem:[#allocation58_spill] sm:$0xff] %v17906_v11  ;;  %v959_v37 = vsel %vm23904_vm2, %v24705_v46, %v24704_v19  ;;  %24708 = vst [vmem:[#allocation59_spill] sm:$0xff] %v24707_v27  ;;  %v24709_v22 = vmov %v24705_v46  ;;  %vm17939_vm14 = vcmp.ne.s32.totalorder %v429_v35, 15  ;;  %v24712_v19 = vmov 0 }
  0x5b   : > { %v960_v16 = vsel %vm23904_vm2, %v24710_v48, %v24709_v22  ;;  %v24713_v19 = vsel %vm17939_vm14, 4294967295, %v24712_v19  ;;  %v17944_v46 = vrot.slane %v17632_v10, 7  ;;  %v1053_v52 = vpack.c.bf16 %v17623_v2, %v17621_v0  ;;  %vm17979_vm0 = vmpackc.low %vm17939_vm14, %vm23901_vm3 }
  0x5c   : > { %24714 = vst [vmem:[#allocation61_spill] sm:$0xff] %v24713_v19  ;;  %v17946_v43 = vpack.c.bf16 %v959_v37, %v960_v16  ;;  %v443_v44 = vand.u32 15, %v317_v7  ;;  %v338_v22 = vand.u32 15, %v17513_v59  ;;  %v304_v3 = vadd.s32 16, %v17513_v59  ;;  %14605 = vmatpush3.bf16.msra.mxu0 %v16763_v32 }
  0x5d   : > { %24715 = vst [vmem:[#allocation62_spill] sm:$0xff] %v17944_v46  ;;  %v24717_v48 = vmov 0  ;;  %v17961_v16 = vpack.c.bf16 %v2586_v47, %v2587_v4  ;;  %v24721_v7 = vrot.slane %v17503_v56, 7  ;;  %v24723_v35 = vrot.slane %v17499_v53, 7  ;;  %14606 = vmatprep.subr.bf16.mxu0 %v16765_v45  ;;  %v16767_v4 = vld [vmem:[%s23863_s1 + $0x1a8] sm:$0xff]  }
  0x5e   : > { %24716 = vst [vmem:[#allocation63_spill] sm:$0xff] %v17946_v43  ;;  %v24718_v48 = vsel %vm17957_vm15, 4294967295, %v24717_v48  ;;  %v24724_v32 = vmov 0  ;;  %v457_v47 = vand.u32 15, %v319_v55  ;;  %14351 = vmatmul.mubr.bf16.gmra.mrb[24].mxu1 %v1052_v57  ;;  %v24729_v62 = vrot.slane %v17510_v58, 1 }
  0x5f   : > { %24719 = vst [vmem:[#allocation64_spill] sm:$0xff] %v24718_v48  ;;  %24720 = vst [vmem:[#allocation65_spill] sm:$0xff] %v17961_v16  ;;  %v957_v37 = vsel %vm23904_vm2, %v24721_v7, %v17734_v30  ;;  %v24722_v6 = vmov %v24721_v7  ;;  %v24725_v32 = vsel %vm17979_vm0, 4294967295, %v24724_v32  ;;  %vm24730_vm3 = vcmp.lt.s32.totalorder %v17513_v59, 7  ;;  %14575 = vmatmul.mubr.msk.bf16.gmra.mrb[8].mxu0 %vm17957_vm15, %v17867_v31  ;;  %14354 = vmatprep.mubr.bf16.mxu1 %v1053_v52 }
  0x60   : > { %v958_v27 = vsel %vm23904_vm2, %v24723_v35, %v24722_v6  ;;  %24726 = vst [vmem:[#allocation66_spill] sm:$0xff] %v24725_v32  ;;  %v24728_v35 = vrot.slane %v17521_v63, 1  ;;  %v24731_v53 = vmov %v24729_v62  ;;  %v24732_v55 = vrot.slane %v17503_v56, 1  ;;  %vm24733_vm2 = vmmov %vm24730_vm3  ;;  %14578 = vmatprep.mubr.msk.bf16.mxu0 %vm17979_vm0, %v17961_v16  ;;  %14607 = vmatpush3.bf16.msra.mxu0 %v16765_v45 }
  0x61   : > { %v17986_v7 = vpack.c.bf16 %v957_v37, %v958_v27  ;;  %vm24734_vm14 = vcmp.lt.s32.totalorder %v17513_v59, 1  ;;  %vm18008_vm13 = vcmp.ne.s32.totalorder %v443_v44, 15  ;;  %v24735_v57 = vmov 0  ;;  %14608 = vmatprep.subr.bf16.mxu0 %v16767_v4 }
  0x62   : > { %v2584_v24 = vsel %vm24730_vm3, %v24729_v62, %v24728_v35  ;;  %v2585_v19 = vsel %vm24733_vm2, %v24732_v55, %v24731_v53  ;;  %v974_v27 = vsel %vm24734_vm14, %v17944_v46, %v17552_v15  ;;  %v24736_v57 = vsel %vm18008_vm13, 4294967295, %v24735_v57  ;;  %vm24745_vm14 = vmmov %vm24733_vm2  ;;  %v18385_v46 = vld [vmem:[#allocation2 + $0x48] sm:$0xff] }
  0x63   : > { %24727 = vst [vmem:[#allocation67_spill] sm:$0xff] %v17986_v7  ;;  %24737 = vst [vmem:[#allocation68_spill] sm:$0xff] %v24736_v57  ;;  %vm18012_vm3 = vcmp.ne.s32.totalorder %v338_v22, 0  ;;  %v24738_v62 = vmov 0  ;;  %v352_v37 = vand.u32 15, %v304_v3  ;;  %v321_v53 = vadd.s32 152, %v17513_v59 }
  0x64   : > { %v24739_v62 = vsel %vm18012_vm3, 4294967295, %v24738_v62  ;;  %v24741_v35 = vrot.slane %v17537_v8, 1  ;;  %v24742_v55 = vrot.slane %v17525_v1, 1  ;;  %v24744_v22 = vrot.slane %v17521_v63, 1  ;;  %14609 = vmatpush3.bf16.msra.mxu0 %v16767_v4 }
  0x65   : > { %24740 = vst [vmem:[#allocation69_spill] sm:$0xff] %v24739_v62  ;;  %v306_v6 = vadd.s32 32, %v17513_v59  ;;  %v323_v58 = vadd.s32 168, %v17513_v59  ;;  %vm18036_vm10 = vcmp.ne.s32.totalorder %v457_v47, 15  ;;  %v24746_v32 = vmov 0 }
  0x66   : > { %v2582_v44 = vsel %vm24733_vm2, %v24742_v55, %v24741_v35  ;;  %v24743_v52 = vmov %v24742_v55  ;;  %v24747_v32 = vsel %vm18036_vm10, 4294967295, %v24746_v32  ;;  %v16769_v35 = vld [vmem:[%s23863_s1 + $0x1b0] sm:$0xff]   ;;  %vm24749_vm2 = vmmov 1  }
  0x67   : > { %v2583_v3 = vsel %vm24745_vm14, %v24744_v22, %v24743_v52  ;;  %24748 = vst [vmem:[#allocation70_spill] sm:$0xff] %v24747_v32  ;;  %v1054_v52 = vpack.c.bf16 %v17632_v10, %v17630_v9  ;;  %vm18051_vm14 = vmpackc.low %vm24749_vm2, %vm18012_vm3  ;;  %v24750_v47 = vmov 0  ;;  %v24753_v56 = vmov 0  ;;  %14610 = vmatprep.subr.bf16.mxu0 %v16769_v35 }
  0x68   : > { %v24751_v47 = vsel %vm18051_vm14, 4294967295, %v24750_v47  ;;  %vm18058_vm9 = vmpackc.low %vm18008_vm13, %vm24749_vm2  ;;  %v18062_v16 = vpack.c.bf16 %v2584_v24, %v2585_v19  ;;  %v12148_v45 = vpack.c.bf16 %v17552_v15, %v974_v27  ;;  %v18065_v55 = vpack.c.bf16 %v2582_v44, %v2583_v3  ;;  %14611 = vmatpush3.bf16.msra.mxu0 %v16769_v35  ;;  %v18164_v35 = vld [vmem:[%s23863_s1 + $0x1c0] sm:$0xff]  }
  0x69   : > { %24752 = vst [vmem:[#allocation71_spill] sm:$0xff] %v24751_v47  ;;  %v24754_v56 = vsel %vm18058_vm9, 4294967295, %v24753_v56  ;;  %v471_v22 = vand.u32 15, %v321_v53  ;;  %vm18070_vm6 = vmpackc.low %vm18036_vm10, %vm24749_vm2  ;;  %v24758_v62 = vmov 0  ;;  %vm18074_vm5 = vcmp.ne.s32.totalorder %v352_v37, 0  ;;  %14355 = vmatmul.mubr.bf16.gmra.mrb[28].mxu1 %v1054_v52 }
  0x6a   : > { %24755 = vst [vmem:[#allocation72_spill] sm:$0xff] %v24754_v56  ;;  %24756 = vst [vmem:[#allocation73_spill] sm:$0xff] %v18062_v16  ;;  %v24759_v62 = vsel %vm18070_vm6, 4294967295, %v24758_v62  ;;  %v24761_v57 = vmov 0  ;;  %v366_v31 = vand.u32 15, %v306_v6  ;;  %v485_v48 = vand.u32 15, %v323_v58  ;;  %14579 = vmatmul.mubr.msk.bf16.gmra.mrb[12].mxu0 %vm18058_vm9, %v18062_v16  ;;  %14374 = vmatprep.mubr.msk.bf16.mxu1 %vm18051_vm14, %v12148_v45 }
  0x6b   : > { %24757 = vst [vmem:[#allocation74_spill] sm:$0xff] %v18065_v55  ;;  %24760 = vst [vmem:[#allocation75_spill] sm:$0xff] %v24759_v62  ;;  %v24762_v57 = vsel %vm18074_vm5, 4294967295, %v24761_v57  ;;  %v308_v24 = vadd.s32 48, %v17513_v59  ;;  %v24764_v19 = vrot.slane %v17423_v17, 7  ;;  %vm24765_vm13 = vcmp.lt.s32.totalorder %v17513_v59, 1  ;;  %14582 = vmatprep.mubr.msk.bf16.mxu0 %vm18070_vm6, %v18065_v55 }
  0x6c   : > { %24763 = vst [vmem:[#allocation76_spill] sm:$0xff] %v24762_v57  ;;  %vm24767_vm10 = vmmov %vm24765_vm13  ;;  %v325_v53 = vadd.s32 184, %v17513_v59  ;;  %v16771_v58 = vld [vmem:[%s23863_s1 + $0x1b8] sm:$0xff]   ;;  %v24768_v4 = vrot.slane %v17434_v23, 7  ;;  %v24769_v6 = vrot.slane %v17427_v20, 7  ;;  %v310_v32 = vadd.s32 64, %v17513_v59 }
  0x6d   : > { %v18084_v27 = vsel %vm24765_vm13, %v17588_v39, %v24764_v19  ;;  %v972_v37 = vsel %vm24767_vm10, %v17552_v15, %v17588_v39  ;;  %vm24770_vm1 = vmmov %vm24767_vm10  ;;  %v327_v39 = vadd.s32 200, %v17513_v59  ;;  %vm24778_vm13 = vcmp.lt.s32.totalorder %v17513_v59, 7  ;;  %14612 = vmatprep.subr.bf16.mxu0 %v16771_v58 }
  0x6e   : > { %24766 = vst [vmem:[#allocation77_spill] sm:$0xff] %v18084_v27  ;;  %v1953_v44 = vsel %vm24770_vm1, %v24769_v6, %v24768_v4  ;;  %v24771_v3 = vmov %v24769_v6  ;;  %vm24772_vm10 = vmmov %vm24770_vm1  ;;  %vm18113_vm1 = vcmp.ne.s32.totalorder %v471_v22, 15  ;;  %v24773_v4 = vmov 0  ;;  %14613 = vmatpush3.bf16.msra.mxu0 %v16771_v58 }
  0x6f   : > { %v1954_v15 = vsel %vm24772_vm10, %v24764_v19, %v24771_v3  ;;  %v24774_v4 = vsel %vm18113_vm1, 4294967295, %v24773_v4  ;;  %v24776_v6 = vrot.slane %v17546_v13, 1  ;;  %v24777_v3 = vrot.slane %v17544_v12, 1  ;;  %vm24781_vm10 = vmmov %vm24778_vm13  ;;  %14646 = vmatprep.subr.bf16.mxu0 %v18164_v35 }
  0x70   : > { %24775 = vst [vmem:[#allocation78_spill] sm:$0xff] %v24774_v4  ;;  %v24780_v17 = vrot.slane %v17537_v8, 1  ;;  %v312_v45 = vadd.s32 80, %v17513_v59  ;;  %vm18136_vm3 = vmpackc.low %vm24749_vm2, %vm18074_vm5  ;;  %v24782_v22 = vmov 0  ;;  %vm18144_vm9 = vcmp.ne.s32.totalorder %v485_v48, 15 }
  0x71   : > { %v2580_v52 = vsel %vm24778_vm13, %v24777_v3, %v24776_v6  ;;  %v24779_v19 = vmov %v24777_v3  ;;  %v24783_v22 = vsel %vm18136_vm3, 4294967295, %v24782_v22  ;;  %vm18140_vm13 = vcmp.ne.s32.totalorder %v366_v31, 0  ;;  %vm24795_vm5 = vmmov %vm24781_vm10 }
  0x72   : > { %v2581_v23 = vsel %vm24781_vm10, %v24780_v17, %v24779_v19  ;;  %24784 = vst [vmem:[#allocation79_spill] sm:$0xff] %v24783_v22  ;;  %v24785_v6 = vmov 0  ;;  %v24788_v3 = vmov 0  ;;  %v380_v17 = vand.u32 15, %v308_v24 }
  0x73   : > { %v24786_v6 = vsel %vm18140_vm13, 4294967295, %v24785_v6  ;;  %v24789_v3 = vsel %vm18144_vm9, 4294967295, %v24788_v3  ;;  %v329_v19 = vadd.s32 216, %v17513_v59  ;;  %v24791_v20 = vrot.slane %v17575_v28, 1 }
  0x74   : > { %24787 = vst [vmem:[#allocation80_spill] sm:$0xff] %v24786_v6  ;;  %24790 = vst [vmem:[#allocation81_spill] sm:$0xff] %v24789_v3  ;;  %v24792_v57 = vrot.slane %v17548_v14, 1  ;;  %v24794_v62 = vrot.slane %v17546_v13, 1  ;;  %v499_v16 = vand.u32 15, %v325_v53  ;;  %v12151_v24 = vpack.c.bf16 %v18084_v27, %v972_v37  ;;  %v18222_v27 = vld [vmem:[#allocation2 + $0x20] sm:$0xff] }
  0x75   : > { %v18167_v56 = vpack.c.bf16 %v1953_v44, %v1954_v15  ;;  %v18177_v53 = vrot.slane %v17632_v10, 1  ;;  %v24801_v37 = vmov 0  ;;  %v408_v44 = vand.u32 15, %v312_v45  ;;  %24820 = vst [vmem:[#allocation90_spill] sm:$0xff] %v18222_v27 }
  0x76   : > { %v2578_v55 = vsel %vm24781_vm10, %v24792_v57, %v24791_v20  ;;  %v24793_v31 = vmov %v24792_v57  ;;  %vm18172_vm10 = vmpackc.low %vm18113_vm1, %vm24749_vm2  ;;  %v24797_v20 = vmov 0  ;;  %v394_v57 = vand.u32 15, %v310_v32  ;;  %14375 = vmatmul.mubr.msk.bf16.vlgmr.msra.gmra.mrb[0].mxu1 %vm18136_vm3, %v12151_v24 }
  0x77   : > { %v2579_v48 = vsel %vm24795_vm5, %v24794_v62, %v24793_v31  ;;  %24796 = vst [vmem:[#allocation82_spill] sm:$0xff] %v18167_v56  ;;  %v24798_v20 = vsel %vm18172_vm10, 4294967295, %v24797_v20  ;;  %v513_v62 = vand.u32 15, %v327_v39  ;;  %v18179_v31 = vpack.c.bf16 %v2580_v52, %v2581_v23  ;;  %vm18184_vm5 = vmpackc.low %vm24749_vm2, %vm18140_vm13  ;;  %v16766_v52 = vld [vmem:[%s23863_s1 + $0x88] sm:$0xff]   ;;  %14407 = vmatpush3.bf16.msra.mxu1 %v17727_v60  ;;  %v18274_v60 = vld [vmem:[#allocation2 + $0x38] sm:$0xff] }
  0x78   : > { %24799 = vst [vmem:[#allocation83_spill] sm:$0xff] %v24798_v20  ;;  %v24802_v37 = vsel %vm18184_vm5, 4294967295, %v24801_v37  ;;  %v314_v15 = vadd.s32 96, %v17513_v59  ;;  %vm18192_vm1 = vmpackc.low %vm18144_vm9, %vm24749_vm2  ;;  %v24804_v39 = vmov 0  ;;  %v18196_v32 = vpack.c.bf16 %v2578_v55, %v2579_v48  ;;  %14378 = vmatprep.mubr.msk.bf16.mxu1 %vm18184_vm5, %v18167_v56  ;;  %14408 = vmatprep.subr.bf16.mxu1 %v16766_v52 }
  0x79   : > { %24800 = vst [vmem:[#allocation84_spill] sm:$0xff] %v18179_v31  ;;  %24803 = vst [vmem:[#allocation85_spill] sm:$0xff] %v24802_v37  ;;  %v24805_v39 = vsel %vm18192_vm1, 4294967295, %v24804_v39  ;;  %vm18198_vm6 = vcmp.ne.s32.totalorder %v380_v17, 0  ;;  %v24808_v23 = vmov 0  ;;  %v527_v45 = vand.u32 15, %v329_v19  ;;  %14583 = vmatmul.mubr.msk.bf16.gmra.mrb[16].mxu0 %vm18172_vm10, %v18179_v31 }
  0x7a   : > { %24806 = vst [vmem:[#allocation86_spill] sm:$0xff] %v24805_v39  ;;  %24807 = vst [vmem:[#allocation87_spill] sm:$0xff] %v18196_v32  ;;  %v24809_v23 = vsel %vm18198_vm6, 4294967295, %v24808_v23  ;;  %v331_v10 = vadd.s32 232, %v17513_v59  ;;  %vm18206_vm13 = vcmp.ne.s32.totalorder %v499_v16, 15  ;;  %v24811_v3 = vmov 0  ;;  %14586 = vmatprep.mubr.msk.bf16.mxu0 %vm18192_vm1, %v18196_v32 }
  0x7b   : > { %24810 = vst [vmem:[#allocation88_spill] sm:$0xff] %v24809_v23  ;;  %v24812_v3 = vsel %vm18206_vm13, 4294967295, %v24811_v3  ;;  %v24814_v4 = vrot.slane %v17583_v36, 1  ;;  %v24815_v55 = vrot.slane %v17577_v29, 1  ;;  %vm24816_vm9 = vcmp.lt.s32.totalorder %v17513_v59, 7  ;;  %v18224_v16 = vld [vmem:[#allocation2 + $0x28] sm:$0xff]  ;;  %14409 = vmatpush3.bf16.msra.mxu1 %v16766_v52 }
  0x7c   : > { %24813 = vst [vmem:[#allocation89_spill] sm:$0xff] %v24812_v3  ;;  %v24818_v6 = vrot.slane %v17575_v28, 1  ;;  %vm24819_vm0 = vmmov %vm24816_vm9  ;;  %vm18229_vm15 = vcmp.ne.s32.totalorder %v394_v57, 0  ;;  %v24821_v58 = vmov 0  ;;  %v24830_v33 = vrot.slane %v17583_v36, 1  ;;  %v16768_v57 = vld [vmem:[%s23863_s1 + $0x90] sm:$0xff]  }
  0x7d   : > { %v2576_v17 = vsel %vm24816_vm9, %v24815_v55, %v24814_v4  ;;  %v24817_v48 = vmov %v24815_v55  ;;  %v24822_v58 = vsel %vm18229_vm15, 4294967295, %v24821_v58  ;;  %vm18233_vm9 = vcmp.ne.s32.totalorder %v513_v62, 15  ;;  %vm24831_vm12 = vmmov %vm24819_vm0  ;;  %v18252_v62 = vld [vmem:[#allocation2 + $0x30] sm:$0xff]  ;;  %v18324_v3 = vld [vmem:[#allocation2] sm:$0xff]  ;;  %14410 = vmatprep.subr.bf16.mxu1 %v16768_v57 }
  0x7e   : > { %v2577_v19 = vsel %vm24819_vm0, %v24818_v6, %v24817_v48  ;;  %24823 = vst [vmem:[#allocation91_spill] sm:$0xff] %v24822_v58  ;;  %v24824_v4 = vmov 0  ;;  %v24827_v55 = vrot.slane %v17621_v0, 1  ;;  %v24828_v6 = vrot.slane %v17585_v38, 1  ;;  %vm24839_vm11 = vmmov %vm24831_vm12 }
  0x7f   : > { %v24825_v4 = vsel %vm18233_vm9, 4294967295, %v24824_v4  ;;  %v422_v20 = vand.u32 15, %v314_v15  ;;  %vm18282_vm10 = vcmp.ne.s32.totalorder %v527_v45, 15  ;;  %v2568_v15 = vrot.slane %v17935_v42, 1  ;;  %24854 = vst [vmem:[#allocation100_spill] sm:$0xff] %v18324_v3  ;;  %vm18350_vm8 = vmpackc.low %vm18233_vm9, %vm24749_vm2  ;;  %14411 = vmatpush3.bf16.msra.mxu1 %v16768_v57 }
  0x80   : > { %24826 = vst [vmem:[#allocation92_spill] sm:$0xff] %v24825_v4  ;;  %v2574_v48 = vsel %vm24819_vm0, %v24828_v6, %v24827_v55  ;;  %v24829_v28 = vmov %v24828_v6  ;;  %vm18258_vm0 = vcmp.ne.s32.totalorder %v408_v44, 0  ;;  %v24832_v55 = vmov 0 }
  0x81   : > { %v2575_v24 = vsel %vm24831_vm12, %v24830_v33, %v24829_v28  ;;  %v24833_v55 = vsel %vm18258_vm0, 4294967295, %v24832_v55  ;;  %v24835_v6 = vrot.slane %v17630_v9, 1  ;;  %v24836_v28 = vrot.slane %v17623_v2, 1 }
  0x82   : > { %24834 = vst [vmem:[#allocation93_spill] sm:$0xff] %v24833_v55  ;;  %v24840_v44 = vmov 0  ;;  %v318_v56 = vadd.s32 128, %v17513_v59  ;;  %v24843_v45 = vmov 0  ;;  %v18298_v32 = vpack.c.bf16 %v2576_v17, %v2577_v19  ;;  %v18495_v55 = vld [vmem:[#allocation2 + $0x50] sm:$0xff] }
  0x83   : > { %v2572_v33 = vsel %vm24831_vm12, %v24836_v28, %v24835_v6  ;;  %v24837_v54 = vmov %v24836_v28  ;;  %v24841_v44 = vsel %vm18282_vm10, 4294967295, %v24840_v44  ;;  %v541_v6 = vand.u32 15, %v331_v10  ;;  %vm18307_vm12 = vmpackc.low %vm18206_vm13, %vm24749_vm2 }
  0x84   : > { %v2573_v31 = vsel %vm24839_vm11, %v24838_v26, %v24837_v54  ;;  %24842 = vst [vmem:[#allocation94_spill] sm:$0xff] %v24841_v44  ;;  %v2567_v28 = vrot.slane %v17890_v34, 1  ;;  %v316_v54 = vadd.s32 112, %v17513_v59  ;;  %v333_v26 = vadd.s32 248, %v17513_v59  ;;  %vm18294_vm11 = vmpackc.low %vm24749_vm2, %vm18198_vm6  ;;  %14587 = vmatmul.mubr.msk.bf16.gmra.mrb[20].mxu0 %vm18307_vm12, %v18298_v32 }
  0x85   : > { %v24844_v45 = vsel %vm18294_vm11, 4294967295, %v24843_v45  ;;  %24846 = vst [vmem:[#allocation96_spill] sm:$0xff] %v18298_v32  ;;  %v18300_v10 = vpack.c.bf16 %v2574_v48, %v2575_v24  ;;  %v2939_v39 = vrot.slane %v18222_v27, 7  ;;  %v2940_v5 = vrot.slane %v18224_v16, 7  ;;  %v16770_v48 = vld [vmem:[%s23863_s1 + $0x98] sm:$0xff]   ;;  %vm18334_vm13 = vmpackc.low %vm24749_vm2, %vm18229_vm15  ;;  %14379 = vmatmul.mubr.msk.bf16.gmra.mrb[4].mxu1 %vm18294_vm11, %v17772_v50 }
  0x86   : > { %24845 = vst [vmem:[#allocation95_spill] sm:$0xff] %v24844_v45  ;;  %v24849_v49 = vsel %vm18307_vm12, 4294967295, %v24848_v49  ;;  %v18311_v23 = vpack.c.bf16 %v2572_v33, %v2573_v31  ;;  %v24852_v17 = vrot.slane %v17630_v9, 1  ;;  %vm24853_vm6 = vcmp.lt.s32.totalorder %v17513_v59, 7  ;;  %v18329_v31 = vld [vmem:[#allocation2 + $0x40] sm:$0xff]  ;;  %14382 = vmatprep.mubr.msk.bf16.mxu1 %vm18334_vm13, %v17824_v21  ;;  %14412 = vmatprep.subr.bf16.mxu1 %v16770_v48  ;;  %v18617_v45 = vld [vmem:[#allocation2 + $0xb0] sm:$0xff] }
  0x87   : > { %24847 = vst [vmem:[#allocation97_spill] sm:$0xff] %v18300_v10  ;;  %24850 = vst [vmem:[#allocation98_spill] sm:$0xff] %v24849_v49  ;;  %v2941_v24 = vrot.slane %v18252_v62, 7  ;;  %v18327_v25 = vrot.slane %v18324_v3, 7  ;;  %v24856_v52 = vmov 0  ;;  %v24859_v33 = vmov 0  ;;  %14590 = vmatprep.mubr.msk.bf16.mxu0 %vm18350_vm8, %v18300_v10  ;;  %14413 = vmatpush3.bf16.msra.mxu1 %v16770_v48 }
  0x88   : > { %24851 = vst [vmem:[#allocation99_spill] sm:$0xff] %v18311_v23  ;;  %v18318_v19 = vsel %vm24853_vm6, %v24852_v17, %v18177_v53  ;;  %v24857_v52 = vsel %vm18334_vm13, 4294967295, %v24856_v52  ;;  %vm18338_vm6 = vcmp.ne.s32.totalorder %v422_v20, 0  ;;  %vm18342_vm1 = vcmp.ne.s32.totalorder %v541_v6, 15 }
  0x89   : > { %24855 = vst [vmem:[#allocation101_spill] sm:$0xff] %v18327_v25  ;;  %24858 = vst [vmem:[#allocation102_spill] sm:$0xff] %v24857_v52  ;;  %v24860_v33 = vsel %vm18338_vm6, 4294967295, %v24859_v33  ;;  %v24862_v17 = vmov 0  ;;  %v436_v9 = vand.u32 15, %v316_v54  ;;  %v2942_v3 = vrot.slane %v18274_v60, 7 }
  0x8a   : > { %24861 = vst [vmem:[#allocation103_spill] sm:$0xff] %v24860_v33  ;;  %v24863_v17 = vsel %vm18342_vm1, 4294967295, %v24862_v17  ;;  %v24865_v58 = vmov 0  ;;  %vm24868_vm15 = vcmp.lt.s32.totalorder %v17513_v59, 7  ;;  %v555_v40 = vand.u32 15, %v333_v26 }
  0x8b   : > { %24864 = vst [vmem:[#allocation104_spill] sm:$0xff] %v24863_v17  ;;  %v24866_v58 = vsel %vm18350_vm8, 4294967295, %v24865_v58  ;;  %v2570_v20 = vsel %vm24868_vm15, %v18177_v53, %v2567_v28  ;;  %vm24869_vm7 = vmmov %vm24868_vm15  ;;  %v450_v42 = vand.u32 15, %v318_v56  ;;  %v320_v4 = vadd.s32 144, %v17513_v59  ;;  %v16774_v17 = vld [vmem:[%s23863_s1 + $0xa8] sm:$0xff]  }
  0x8c   : > { %24867 = vst [vmem:[#allocation105_spill] sm:$0xff] %v24866_v58  ;;  %v18359_v6 = vsel %vm24869_vm7, %v2567_v28, %v2568_v15  ;;  %vm24870_vm9 = vmmov %vm24869_vm7  ;;  %v24871_v34 = vrot.slane %v17525_v1, 7  ;;  %v24872_v26 = vrot.slane %v17521_v63, 7  ;;  %vm24873_vm15 = vcmp.lt.s32.totalorder %v17513_v59, 1 }
  0x8d   : > { %v18367_v54 = vsel %vm24870_vm9, %v2568_v15, %v17592_v41  ;;  %vm24875_vm7 = vmmov %vm24873_vm15  ;;  %v24883_v32 = vrot.slane %v17525_v1, 7  ;;  %v2943_v57 = vrot.slane %v18329_v31, 7  ;;  %v24885_v58 = vmov 0  ;;  %v18546_v41 = vld [vmem:[#allocation2 + $0x60] sm:$0xff] }
  0x8e   : > { %v18376_v28 = vsel %vm24873_vm15, %v24872_v26, %v24871_v34  ;;  %v24874_v56 = vmov %v24872_v26  ;;  %vm24876_vm9 = vmmov %vm24875_vm7  ;;  %v18404_v26 = vsel %vm24875_vm7, %v18327_v25, %v2939_v39  ;;  %v24900_v1 = vmov 0  ;;  %v18521_v25 = vld [vmem:[#allocation2 + $0x58] sm:$0xff] }
  0x8f   : > { %v18383_v50 = vsel %vm24875_vm7, %v17734_v30, %v24874_v56  ;;  %v18395_v34 = vsel %vm24876_vm9, %v2940_v5, %v2941_v24  ;;  %vm24877_vm15 = vmmov %vm24875_vm7  ;;  %v322_v56 = vadd.s32 160, %v17513_v59  ;;  %v24879_v30 = vrot.slane %v17544_v12, 7 }
  0x90   : > { %v18399_v15 = vsel %vm24877_vm15, %v2939_v39, %v2940_v5  ;;  %vm24878_vm12 = vmmov %vm24875_vm7  ;;  %v24880_v5 = vrot.slane %v17537_v8, 7  ;;  %v24910_v48 = vrot.slane %v18385_v46, 7 }
  0x91   : > { %v18412_v63 = vsel %vm24878_vm12, %v2941_v24, %v2942_v3  ;;  %vm24881_vm9 = vmmov %vm24875_vm7  ;;  %v12430_v24 = vpack.c.bf16 %v2570_v20, %v18318_v19  ;;  %vm18432_vm12 = vcmp.ne.s32.totalorder %v436_v9, 0  ;;  %v24891_v20 = vmov 0 }
  0x92   : > { %v18420_v21 = vsel %vm24881_vm9, %v24880_v5, %v24879_v30  ;;  %v24882_v39 = vmov %v24880_v5  ;;  %vm24884_vm15 = vmmov %vm24875_vm7  ;;  %v24886_v58 = vsel %vm18432_vm12, 4294967295, %v24885_v58  ;;  %vm18436_vm7 = vcmp.ne.s32.totalorder %v555_v40, 15  ;;  %v16772_v5 = vld [vmem:[%s23863_s1 + $0xa0] sm:$0xff]  }
  0x93   : > { %v18428_v10 = vsel %vm24884_vm15, %v24883_v32, %v24882_v39  ;;  %24887 = vst [vmem:[#allocation106_spill] sm:$0xff] %v24886_v58  ;;  %v24888_v30 = vmov 0  ;;  %vm18447_vm9 = vmpackc.low %vm24749_vm2, %vm18258_vm0  ;;  %vm18453_vm15 = vcmp.ne.s32.totalorder %v450_v42, 0  ;;  %v24894_v40 = vmov 0  ;;  %14414 = vmatprep.subr.bf16.mxu1 %v16772_v5  ;;  %v18587_v58 = vld [vmem:[#allocation2 + $0x98] sm:$0xff] }
  0x94   : > { %v24889_v30 = vsel %vm18436_vm7, 4294967295, %v24888_v30  ;;  %v24892_v20 = vsel %vm18447_vm9, 4294967295, %v24891_v20  ;;  %v24895_v40 = vsel %vm18453_vm15, 4294967295, %v24894_v40  ;;  %v464_v39 = vand.u32 15, %v320_v4  ;;  %vm18462_vm8 = vmpackc.low %vm18282_vm10, %vm24749_vm2  ;;  %14383 = vmatmul.mubr.msk.bf16.gmra.mrb[8].mxu1 %vm18447_vm9, %v17865_v61  ;;  %v18574_v61 = vld [vmem:[#allocation2 + $0x88] sm:$0xff] }
  0x95   : > { %24890 = vst [vmem:[#allocation107_spill] sm:$0xff] %v24889_v30  ;;  %24893 = vst [vmem:[#allocation108_spill] sm:$0xff] %v24892_v20  ;;  %v24897_v32 = vmov 0  ;;  %v478_v9 = vand.u32 15, %v322_v56  ;;  %vm24903_vm10 = vcmp.lt.s32.totalorder %v17513_v59, 1  ;;  %v18485_v42 = vadd.s32 176, %v17513_v59  ;;  %14591 = vmatmul.mubr.msk.bf16.gmra.mrb[24].mxu0 %vm18462_vm8, %v18311_v23  ;;  %14415 = vmatpush3.bf16.msra.mxu1 %v16772_v5 }
  0x96   : > { %24896 = vst [vmem:[#allocation109_spill] sm:$0xff] %v24895_v40  ;;  %v24898_v32 = vsel %vm18462_vm8, 4294967295, %v24897_v32  ;;  %vm18475_vm0 = vmpackc.low %vm24749_vm2, %vm18338_vm6  ;;  %v18481_v44 = vsel %vm24903_vm10, %v2942_v3, %v2943_v57  ;;  %v24904_v56 = vrot.slane %v17548_v14, 7  ;;  %v24905_v4 = vrot.slane %v17546_v13, 7  ;;  %v18548_v13 = vld [vmem:[#allocation2 + $0x68] sm:$0xff]  ;;  %14416 = vmatprep.subr.bf16.mxu1 %v16774_v17  ;;  %v18561_v5 = vld [vmem:[#allocation2 + $0x78] sm:$0xff] }
  0x97   : > { %24899 = vst [vmem:[#allocation110_spill] sm:$0xff] %v24898_v32  ;;  %v24901_v1 = vsel %vm18475_vm0, 4294967295, %v24900_v1  ;;  %vm24906_vm4 = vmmov %vm24903_vm10  ;;  %v24907_v3 = vmov 0  ;;  %14386 = vmatprep.mubr.msk.bf16.mxu1 %vm18475_vm0, %v17906_v11  ;;  %v24917_v11 = vmov 0  ;;  %v24924_v23 = vmov 0  ;;  %v18600_v30 = vld [vmem:[#allocation2 + $0xa8] sm:$0xff] }
  0x98   : > { %24902 = vst [vmem:[#allocation111_spill] sm:$0xff] %v24901_v1  ;;  %v18493_v33 = vsel %vm24906_vm4, %v24905_v4, %v24904_v56  ;;  %vm18500_vm10 = vmpackc.low %vm18342_vm1, %vm24749_vm2  ;;  %v24912_v49 = vmov %v24905_v4  ;;  %v24913_v4 = vrot.slane %v17544_v12, 7  ;;  %v18572_v12 = vld [vmem:[#allocation2 + $0x80] sm:$0xff]  ;;  %v24927_v1 = vmov 0 }
  0x99   : > { %v24908_v3 = vsel %vm18500_vm10, 4294967295, %v24907_v3  ;;  %vm24911_vm6 = vmmov %vm24906_vm4  ;;  %14594 = vmatprep.mubr.msk.bf16.mxu0 %vm18500_vm10, %v12430_v24  ;;  %v16776_v24 = vld [vmem:[%s23863_s1 + $0xb0] sm:$0xff]   ;;  %24923 = vst [vmem:[#allocation116_spill] sm:$0xff] %v18574_v61  ;;  %14417 = vmatpush3.bf16.msra.mxu1 %v16774_v17  ;;  %v16778_v17 = vld [vmem:[%s23863_s1 + $0xb8] sm:$0xff]   ;;  %v492_v32 = vand.u32 15, %v18485_v42  ;;  %v24935_v52 = vpack.c.bf16 %v18399_v15, %v18404_v26  ;;  %v24939_v26 = vmov 0 }
  0x9a   : > { %24909 = vst [vmem:[#allocation112_spill] sm:$0xff] %v24908_v3  ;;  %v18508_v8 = vsel %vm24911_vm6, %v2943_v57, %v24910_v48  ;;  %v18516_v56 = vsel %vm24906_vm4, %v24913_v4, %v24912_v49  ;;  %v2945_v49 = vrot.slane %v18495_v55, 7  ;;  %vm18541_vm6 = vcmp.ne.s32.totalorder %v464_v39, 0  ;;  %v18559_v39 = vld [vmem:[#allocation2 + $0x70] sm:$0xff]  ;;  %vm18568_vm1 = vmpackc.low %vm24749_vm2, %vm18432_vm12  ;;  %v18598_v3 = vld [vmem:[#allocation2 + $0xa0] sm:$0xff]  ;;  %14418 = vmatprep.subr.bf16.mxu1 %v16776_v24 }
  0x9b   : > { %v24914_v4 = vmov 0  ;;  %v2946_v57 = vrot.slane %v18521_v25, 7  ;;  %vm18552_vm4 = vcmp.ne.s32.totalorder %v478_v9, 0  ;;  %v24920_v9 = vmov 0  ;;  %vm18581_vm10 = vmpackc.low %vm18436_vm7, %vm24749_vm2  ;;  %v18585_v48 = vld [vmem:[#allocation2 + $0x90] sm:$0xff]  ;;  %v18619_v61 = vld [vmem:[#allocation2 + $0xb8] sm:$0xff] }
  0x9c   : > { %v24915_v4 = vsel %vm18541_vm6, 4294967295, %v24914_v4  ;;  %v24918_v11 = vsel %vm18552_vm4, 4294967295, %v24917_v11  ;;  %v24921_v9 = vsel %vm18568_vm1, 4294967295, %v24920_v9  ;;  %v24925_v23 = vsel %vm18581_vm10, 4294967295, %v24924_v23  ;;  %vm18594_vm12 = vmpackc.low %vm24749_vm2, %vm18453_vm15  ;;  %14387 = vmatmul.mubr.msk.bf16.gmra.mrb[12].mxu1 %vm18568_vm1, %v17946_v43  ;;  %v18672_v15 = vld [vmem:[%s23863_s1 + $0xc0] sm:$0xff]  }
  0x9d   : > { %24916 = vst [vmem:[#allocation113_spill] sm:$0xff] %v24915_v4  ;;  %24919 = vst [vmem:[#allocation114_spill] sm:$0xff] %v24918_v11  ;;  %v24928_v1 = vsel %vm18594_vm12, 4294967295, %v24927_v1  ;;  %vm24930_vm7 = vcmp.lt.s32.totalorder %v17513_v59, 7  ;;  %v12466_v40 = vpack.c.bf16 %v18508_v8, %v18481_v44  ;;  %v24931_v8 = vrot.slane %v18385_v46, 7  ;;  %14390 = vmatprep.mubr.msk.bf16.mxu1 %vm18594_vm12, %v17986_v7  ;;  %14419 = vmatpush3.bf16.msra.mxu1 %v16776_v24 }
  0x9e   : > { %24922 = vst [vmem:[#allocation115_spill] sm:$0xff] %v24921_v9  ;;  %24926 = vst [vmem:[#allocation117_spill] sm:$0xff] %v24925_v23  ;;  %v18606_v20 = vsel %vm24930_vm7, %v18177_v53, %v17555_v18  ;;  %vm24932_vm7 = vcmp.lt.s32.totalorder %v17513_v59, 1  ;;  %v24933_v18 = vpack.c.bf16 %v18367_v54, %v18359_v6  ;;  %v24934_v53 = vrot.slane %v17577_v29, 7  ;;  %14420 = vmatprep.subr.bf16.mxu1 %v16778_v17 }
  0x9f   : > { %24929 = vst [vmem:[#allocation118_spill] sm:$0xff] %v24928_v1  ;;  %v18632_v44 = vsel %vm24932_vm7, %v24931_v8, %v2945_v49  ;;  %vm24936_vm15 = vmmov %vm24932_vm7  ;;  %v326_v6 = vadd.s32 192, %v17513_v59  ;;  %v24937_v54 = vrot.slane %v17548_v14, 7  ;;  %v24942_v24 = vmov 0  ;;  %v16775_v14 = vld [vmem:[%s23863_s1 + $0x1c8] sm:$0xff]  }
  0xa0   : > { %14595 = vmatmul.mubr.msk.bf16.gmra.mrb[28].mxu0 %vm18581_vm10, %v24933_v18  ;;  %v18650_v8 = vsel %vm24932_vm7, %v17897_v51, %v24934_v53  ;;  %v18659_v18 = vsel %vm24936_vm15, %v2945_v49, %v2946_v57  ;;  %vm24938_vm10 = vmmov %vm24932_vm7  ;;  %vm18690_vm7 = vcmp.ne.s32.totalorder %v492_v32, 0  ;;  %v24945_v53 = vmov 0 }
  0xa1   : > { %14614 = vmatprep.mubr.msk.bf16.mxu0 %vm18051_vm14, %v24935_v52  ;;  %v18667_v42 = vsel %vm24938_vm10, %v24937_v54, %v17897_v51  ;;  %v2947_v52 = vrot.slane %v18546_v41, 7  ;;  %vm18678_vm15 = vmpackc.low %vm24749_vm2, %vm18541_vm6  ;;  %v24946_v53 = vsel %vm18690_vm7, 4294967295, %v24945_v53  ;;  %v12469_v54 = vpack.c.bf16 %v18659_v18, %v18632_v44  ;;  %14421 = vmatpush3.bf16.msra.mxu1 %v16778_v17 }
  0xa2   : > { %v24940_v26 = vsel %vm18678_vm15, 4294967295, %v24939_v26  ;;  %vm18686_vm10 = vmpackc.low %vm24749_vm2, %vm18552_vm4  ;;  %24947 = vst [vmem:[#allocation121_spill] sm:$0xff] %v24946_v53  ;;  %v506_v49 = vand.u32 15, %v326_v6  ;;  %14454 = vmatprep.subr.bf16.mxu1 %v18672_v15  ;;  %v3584_v4 = vrot.slane %v18224_v16, 1  ;;  %v24948_v32 = vpack.c.bf16 %v18376_v28, %v18383_v50 }
  0xa3   : > { %24941 = vst [vmem:[#allocation119_spill] sm:$0xff] %v24940_v26  ;;  %v24943_v24 = vsel %vm18686_vm10, 4294967295, %v24942_v24  ;;  %v12184_v17 = vpack.c.bf16 %v18650_v8, %v18667_v42  ;;  %vm24949_vm4 = vcmp.lt.s32.totalorder %v17513_v59, 1  ;;  %v3585_v18 = vrot.slane %v18252_v62, 1 }
  0xa4   : > { %24944 = vst [vmem:[#allocation120_spill] sm:$0xff] %v24943_v24  ;;  %14391 = vmatmul.mubr.msk.bf16.gmra.mrb[16].mxu1 %vm18678_vm15, %v24948_v32  ;;  %v2994_v44 = vsel %vm24949_vm4, %v2946_v57, %v2947_v52  ;;  %v3586_v6 = vrot.slane %v18274_v60, 1  ;;  %v24950_v11 = vpack.c.bf16 %v18412_v63, %v18395_v34  ;;  %v24951_v50 = vpack.c.bf16 %v18420_v21, %v18428_v10  ;;  %vm24955_vm6 = vmmov %vm24949_vm4 }
  0xa5   : > { %v24952_v28 = vrot.slane %v18548_v13, 7  ;;  %v328_v42 = vadd.s32 208, %v17513_v59  ;;  %v24953_v32 = vrot.slane %v17585_v38, 7  ;;  %v24954_v63 = vrot.slane %v17583_v36, 7 }
  0xa6   : > { %14394 = vmatprep.mubr.msk.bf16.mxu1 %vm18686_vm10, %v24951_v50  ;;  %v24956_v34 = vrot.slane %v18222_v27, 1  ;;  %v24971_v7 = vmov 0 }
  0xa7   : > { %v2993_v57 = vsel %vm24949_vm4, %v2947_v52, %v24952_v28  ;;  %v24959_v10 = vmov %v24954_v63  ;;  %v24960_v52 = vrot.slane %v17577_v29, 7  ;;  %v3589_v29 = vrot.slane %v18495_v55, 1 }
  0xa8   : > { %14615 = vmatmul.mubr.msk.bf16.vlgmr.msra.gmra.mrb[0].mxu0 %vm18136_vm3, %v24950_v11  ;;  %v947_v11 = vsel %vm24955_vm6, %v24954_v63, %v24953_v32  ;;  %vm24957_vm3 = vcmp.lt.s32.totalorder %v17513_v59, 7  ;;  %v16777_v63 = vld [vmem:[%s23863_s1 + $0x1d0] sm:$0xff]  }
  0xa9   : > { %v18738_v21 = vsel %vm24957_vm3, %v24956_v34, %v3584_v4  ;;  %14647 = vmatpush3.bf16.msra.mxu0 %v18164_v35  ;;  %14618 = vmatprep.mubr.msk.bf16.mxu0 %vm18184_vm5, %v12466_v40  ;;  %v948_v50 = vsel %vm24949_vm4, %v24960_v52, %v24959_v10  ;;  %vm24961_vm6 = vmmov %vm24957_vm3  ;;  %v3588_v35 = vrot.slane %v18385_v46, 1  ;;  %v24965_v40 = vmov 0 }
  0xaa   : > { %24958 = vst [vmem:[#allocation122_spill] sm:$0xff] %v18738_v21  ;;  %v18751_v28 = vsel %vm24961_vm6, %v3585_v18, %v3586_v6  ;;  %vm24963_vm14 = vmmov %vm24957_vm3  ;;  %14648 = vmatprep.subr.bf16.mxu0 %v16775_v14  ;;  %vm18758_vm3 = vcmp.ne.s32.totalorder %v506_v49, 0  ;;  %v330_v34 = vadd.s32 224, %v17513_v59  ;;  %v24968_v52 = vrot.slane %v18329_v31, 1 }
  0xab   : > { %24962 = vst [vmem:[#allocation123_spill] sm:$0xff] %v18751_v28  ;;  %v18755_v32 = vsel %vm24963_vm14, %v3584_v4, %v3585_v18  ;;  %v24966_v40 = vsel %vm18758_vm3, 4294967295, %v24965_v40  ;;  %vm24969_vm14 = vmmov %vm24961_vm6  ;;  %v12472_v18 = vpack.c.bf16 %v2993_v57, %v2994_v44  ;;  %v2949_v49 = vrot.slane %v18559_v39, 7 }
  0xac   : > { %24964 = vst [vmem:[#allocation124_spill] sm:$0xff] %v18755_v32  ;;  %24967 = vst [vmem:[#allocation125_spill] sm:$0xff] %v24966_v40  ;;  %v18772_v4 = vsel %vm24969_vm14, %v3586_v6, %v24968_v52  ;;  %v520_v10 = vand.u32 15, %v328_v42  ;;  %v2950_v21 = vrot.slane %v18561_v5, 7  ;;  %v24974_v6 = vrot.slane %v17623_v2, 7  ;;  %v24985_v32 = vld [vmem:[#allocation116_spill] sm:$0xff] }
  0xad   : > { %24970 = vst [vmem:[#allocation126_spill] sm:$0xff] %v18772_v4  ;;  %vm18781_vm4 = vmpackc.low %vm24749_vm2, %vm18690_vm7  ;;  %v24975_v44 = vrot.slane %v17621_v0, 7  ;;  %vm24976_vm6 = vcmp.lt.s32.totalorder %v17513_v59, 1  ;;  %v18796_v36 = vsel %vm24969_vm14, %v24968_v52, %v3588_v35  ;;  %14649 = vmatpush3.bf16.msra.mxu0 %v16775_v14  ;;  %v24978_v42 = vmov 0 }
  0xae   : > { %v24972_v7 = vsel %vm18781_vm4, 4294967295, %v24971_v7  ;;  %24977 = vst [vmem:[#allocation128_spill] sm:$0xff] %v18796_v36  ;;  %vm18801_vm7 = vmpackc.low %vm24749_vm2, %vm18758_vm3  ;;  %v24982_v28 = vrot.slane %v17585_v38, 7  ;;  %v3590_v14 = vrot.slane %v18521_v25, 1  ;;  %v3591_v52 = vrot.slane %v18546_v41, 1  ;;  %14650 = vmatprep.subr.bf16.mxu0 %v16777_v63  ;;  %v16779_v38 = vld [vmem:[%s23863_s1 + $0x1d8] sm:$0xff]  }
  0xaf   : > { %24973 = vst [vmem:[#allocation127_spill] sm:$0xff] %v24972_v7  ;;  %v945_v57 = vsel %vm24976_vm6, %v24975_v44, %v24974_v6  ;;  %v24979_v42 = vsel %vm18801_vm7, 4294967295, %v24978_v42  ;;  %v24981_v53 = vmov %v24975_v44  ;;  %vm24983_vm5 = vmmov %vm24969_vm14  ;;  %v534_v40 = vand.u32 15, %v330_v34 }
  0xb0   : > { %24980 = vst [vmem:[#allocation129_spill] sm:$0xff] %v24979_v42  ;;  %v946_v6 = vsel %vm24976_vm6, %v24982_v28, %v24981_v53  ;;  %v18813_v44 = vsel %vm24983_vm5, %v3588_v35, %v3589_v29  ;;  %v2951_v4 = vrot.slane %v18572_v12, 7  ;;  %v2952_v43 = vrot.slane %v24985_v32, 7  ;;  %v18824_v28 = vld [vmem:[#allocation2 + $0xf0] sm:$0xff]  ;;  %vm24990_vm14 = vmmov %vm24983_vm5  ;;  %14619 = vmatmul.mubr.msk.bf16.gmra.mrb[4].mxu0 %vm18294_vm11, %v12469_v54 }
  0xb1   : > { %24984 = vst [vmem:[#allocation130_spill] sm:$0xff] %v18813_v44  ;;  %24986 = vst [vmem:[#allocation116_spill] sm:$0xff] %v18824_v28  ;;  %v18827_v35 = vrot.slane %v18824_v28, 7  ;;  %v24988_v0 = vpack.c.bf16 %v18493_v33, %v18516_v56  ;;  %v18834_v34 = vpack.c.bf16 %v947_v11, %v948_v50  ;;  %v18838_v37 = vsel %vm24983_vm5, %v3590_v14, %v3591_v52 }
  0xb2   : > { %24989 = vst [vmem:[#allocation132_spill] sm:$0xff] %v18838_v37  ;;  %v18842_v53 = vsel %vm24990_vm14, %v3589_v29, %v3590_v14  ;;  %v2991_v33 = vsel %vm24976_vm6, %v2949_v49, %v2950_v21  ;;  %vm24994_vm3 = vmmov %vm24976_vm6  ;;  %v3592_v29 = vrot.slane %v18548_v13, 1  ;;  %14622 = vmatprep.mubr.msk.bf16.mxu0 %vm18334_vm13, %v12472_v18  ;;  %vm18859_vm5 = vcmp.ne.s32.totalorder %v520_v10, 0  ;;  %14651 = vmatpush3.bf16.msra.mxu0 %v16777_v63  ;;  %v16781_v63 = vld [vmem:[%s23863_s1 + $0x1e0] sm:$0xff]  }
  0xb3   : > { %24987 = vst [vmem:[#allocation131_spill] sm:$0xff] %v18827_v35  ;;  %14395 = vmatmul.mubr.msk.bf16.gmra.mrb[20].mxu1 %vm18781_vm4, %v24988_v0  ;;  %24991 = vst [vmem:[#allocation133_spill] sm:$0xff] %v18842_v53  ;;  %v24993_v0 = vrot.slane %v18548_v13, 7  ;;  %v24996_v54 = vmov 0  ;;  %v332_v14 = vadd.s32 240, %v17513_v59  ;;  %v3593_v44 = vrot.slane %v18559_v39, 1  ;;  %14652 = vmatprep.subr.bf16.mxu0 %v16779_v38 }
  0xb4   : > { %14398 = vmatprep.mubr.msk.bf16.mxu1 %vm18801_vm7, %v12184_v17  ;;  %v24997_v54 = vsel %vm18859_vm5, 4294967295, %v24996_v54  ;;  %v18863_v17 = vpack.c.bf16 %v945_v57, %v946_v6  ;;  %vm25002_vm14 = vmmov %vm24976_vm6  ;;  %v2990_v10 = vsel %vm24976_vm6, %v2950_v21, %v2951_v4  ;;  %vm25003_vm13 = vcmp.lt.s32.totalorder %v17513_v59, 7 }
  0xb5   : > { %v2992_v56 = vsel %vm24994_vm3, %v24993_v0, %v2949_v49  ;;  %24998 = vst [vmem:[#allocation134_spill] sm:$0xff] %v24997_v54  ;;  %vm18867_vm3 = vcmp.ne.s32.totalorder %v534_v40, 0  ;;  %v24999_v49 = vmov 0  ;;  %v2989_v0 = vsel %vm25002_vm14, %v2951_v4, %v2952_v43  ;;  %v25005_v40 = vld [vmem:[#allocation62_spill] sm:$0xff]  ;;  %vm25006_vm11 = vmmov %vm24976_vm6 }
  0xb6   : > { %v25000_v49 = vsel %vm18867_vm3, 4294967295, %v24999_v49  ;;  %v18880_v18 = vsel %vm25003_vm13, %v3591_v52, %v3592_v29  ;;  %v12475_v57 = vpack.c.bf16 %v2991_v33, %v2992_v56  ;;  %v943_v6 = vsel %vm25006_vm11, %v18827_v35, %v25005_v40  ;;  %vm25008_vm14 = vmmov %vm24976_vm6  ;;  %14653 = vmatpush3.bf16.msra.mxu0 %v16779_v38 }
  0xb7   : > { %25001 = vst [vmem:[#allocation135_spill] sm:$0xff] %v25000_v49  ;;  %25004 = vst [vmem:[#allocation136_spill] sm:$0xff] %v18880_v18  ;;  %v25007_v11 = vrot.slane %v17623_v2, 7  ;;  %v25011_v52 = vmov 0  ;;  %v2953_v33 = vrot.slane %v18585_v48, 7  ;;  %v3594_v2 = vrot.slane %v18561_v5, 1  ;;  %14654 = vmatprep.subr.bf16.mxu0 %v16781_v63 }
  0xb8   : > { %vm25009_vm6 = vmmov %vm25003_vm13  ;;  %v12478_v54 = vpack.c.bf16 %v2989_v0, %v2990_v10  ;;  %v2954_v53 = vrot.slane %v18587_v58, 7  ;;  %v2955_v37 = vrot.slane %v18598_v3, 7  ;;  %v2956_v56 = vrot.slane %v18600_v30, 7  ;;  %v16783_v18 = vld [vmem:[%s23863_s1 + $0x1e8] sm:$0xff]   ;;  %14623 = vmatmul.mubr.msk.bf16.gmra.mrb[8].mxu0 %vm18447_vm9, %v12475_v57 }
  0xb9   : > { %v944_v21 = vsel %vm25008_vm14, %v25007_v11, %v18827_v35  ;;  %v18893_v4 = vsel %vm25009_vm6, %v3592_v29, %v3593_v44  ;;  %vm18898_vm13 = vmpackc.low %vm24749_vm2, %vm18859_vm5  ;;  %v3595_v11 = vrot.slane %v18572_v12, 1  ;;  %v25014_v29 = vmov 0 }
  0xba   : > { %25010 = vst [vmem:[#allocation62_spill] sm:$0xff] %v18893_v4  ;;  %v25012_v52 = vsel %vm18898_vm13, 4294967295, %v25011_v52  ;;  %vm18910_vm11 = vmpackc.low %vm24749_vm2, %vm18867_vm3  ;;  %v548_v35 = vand.u32 15, %v332_v14  ;;  %v18926_v0 = vsel %vm25009_vm6, %v3593_v44, %v3594_v2  ;;  %v18931_v38 = vpack.c.bf16 %v943_v6, %v944_v21  ;;  %v25020_v14 = vld [vmem:[#allocation57_spill] sm:$0xff]  ;;  %v25021_v4 = vld [vmem:[#allocation60_spill] sm:$0xff]  ;;  %14626 = vmatprep.mubr.msk.bf16.mxu0 %vm18475_vm0, %v12478_v54  ;;  %14655 = vmatpush3.bf16.msra.mxu0 %v16781_v63 }
  0xbb   : > { %25013 = vst [vmem:[#allocation137_spill] sm:$0xff] %v25012_v52  ;;  %v25015_v29 = vsel %vm18910_vm11, 4294967295, %v25014_v29  ;;  %vm25017_vm14 = vmmov %vm25009_vm6  ;;  %14399 = vmatmul.mubr.msk.bf16.gmra.mrb[24].mxu1 %vm18898_vm13, %v18834_v34  ;;  %v18934_v10 = vrot.slane %v25020_v14, 7  ;;  %v18937_v28 = vrot.slane %v25021_v4, 7  ;;  %v18948_v44 = vld [vmem:[#allocation2 + $0xf8] sm:$0xff]  ;;  %v3596_v21 = vrot.slane %v24985_v32, 1  ;;  %14656 = vmatprep.subr.bf16.mxu0 %v16783_v18 }
  0xbc   : > { %25016 = vst [vmem:[#allocation138_spill] sm:$0xff] %v25015_v29  ;;  %v18922_v49 = vsel %vm25017_vm14, %v3594_v2, %v3595_v11  ;;  %25019 = vst [vmem:[#allocation140_spill] sm:$0xff] %v18926_v0  ;;  %14402 = vmatprep.mubr.msk.bf16.mxu1 %vm18910_vm11, %v18863_v17  ;;  %vm25023_vm14 = vcmp.lt.s32.totalorder %v17513_v59, 1  ;;  %v3597_v4 = vrot.slane %v18585_v48, 1  ;;  %vm18955_vm6 = vcmp.ne.s32.totalorder %v548_v35, 0  ;;  %v25030_v0 = vld [vmem:[#allocation32_spill] sm:$0xff] }
  0xbd   : > { %25018 = vst [vmem:[#allocation139_spill] sm:$0xff] %v18922_v49  ;;  %v2988_v2 = vsel %vm25023_vm14, %v2952_v43, %v2953_v33  ;;  %25024 = vst [vmem:[#allocation141_spill] sm:$0xff] %v18948_v44  ;;  %v25026_v57 = vmov 0  ;;  %v25031_v43 = vld [vmem:[#allocation26_spill] sm:$0xff]  ;;  %v16785_v35 = vld [vmem:[%s23863_s1 + $0x1f0] sm:$0xff]   ;;  %v3598_v36 = vrot.slane %v18587_v58, 1 }
  0xbe   : > { %v25027_v57 = vsel %vm18955_vm6, 4294967295, %v25026_v57  ;;  %vm25029_vm3 = vmmov %vm25023_vm14  ;;  %vm25032_vm14 = vcmp.lt.s32.totalorder %v17513_v59, 7  ;;  %14657 = vmatpush3.bf16.msra.mxu0 %v16783_v18 }
  0xbf   : > { %25028 = vst [vmem:[#allocation142_spill] sm:$0xff] %v25027_v57  ;;  %v2987_v50 = vsel %vm25029_vm3, %v2953_v33, %v2954_v53  ;;  %v1552_v49 = vsel %vm25032_vm14, %v25031_v43, %v25030_v0  ;;  %vm25033_vm5 = vmmov %vm25029_vm3  ;;  %14658 = vmatprep.subr.bf16.mxu0 %v16785_v35 }
  0xc0   : > { %v2985_v6 = vsel %vm25033_vm5, %v2955_v37, %v2956_v56  ;;  %vm25034_vm9 = vmmov %vm25029_vm3  ;;  %v18984_v63 = vsel %vm25033_vm5, %v18934_v10, %v18937_v28  ;;  %v12220_v22 = vpack.c.bf16 %v1552_v49, %v25031_v43 }
  0xc1   : > { %v2986_v14 = vsel %vm25034_vm9, %v2954_v53, %v2955_v37  ;;  %vm25035_vm0 = vmmov %vm25032_vm14  ;;  %v25039_v53 = vrot.slane %v18948_v44, 7  ;;  %v2958_v44 = vrot.slane %v18619_v61, 7 }
  0xc2   : > { %v18974_v54 = vsel %vm25035_vm0, %v3596_v21, %v3597_v4  ;;  %vm25037_vm3 = vmmov %vm25035_vm0  ;;  %14659 = vmatpush3.bf16.msra.mxu0 %v16785_v35  ;;  %v3602_v35 = vrot.slane %v18619_v61, 1 }
  0xc3   : > { %25036 = vst [vmem:[#allocation32_spill] sm:$0xff] %v18974_v54  ;;  %v18978_v33 = vsel %vm25037_vm3, %v3595_v11, %v3596_v21  ;;  %vm25040_vm9 = vmmov %vm25033_vm5  ;;  %v25041_v11 = vmov 0  ;;  %v12481_v21 = vpack.c.bf16 %v2987_v50, %v2988_v2  ;;  %v12484_v54 = vpack.c.bf16 %v2985_v6, %v2986_v14  ;;  %v16787_v50 = vld [vmem:[%s23863_s1 + $0x1f8] sm:$0xff]  }
  0xc4   : > { %25038 = vst [vmem:[#allocation26_spill] sm:$0xff] %v18978_v33  ;;  %v18993_v0 = vsel %vm25040_vm9, %v25039_v53, %v18934_v10  ;;  %vm18999_vm0 = vmpackc.low %vm24749_vm2, %vm18955_vm6  ;;  %v3599_v33 = vrot.slane %v18598_v3, 1  ;;  %v2957_v53 = vrot.slane %v18617_v45, 7  ;;  %v25046_v2 = vld [vmem:[#allocation38_spill] sm:$0xff]  ;;  %v3600_v6 = vrot.slane %v18600_v30, 1  ;;  %14660 = vmatprep.subr.bf16.mxu0 %v16787_v50 }
  0xc5   : > { %v25042_v11 = vsel %vm18999_vm0, 4294967295, %v25041_v11  ;;  %vm25044_vm14 = vmmov %vm25037_vm3  ;;  %14403 = vmatmul.mubr.msk.bf16.gmra.mrb[28].mxu1 %vm18999_vm0, %v18931_v38  ;;  %14627 = vmatmul.mubr.msk.bf16.gmra.mrb[12].mxu0 %vm18568_vm1, %v12481_v21 }
  0xc6   : > { %25043 = vst [vmem:[#allocation143_spill] sm:$0xff] %v25042_v11  ;;  %v19011_v57 = vsel %vm25044_vm14, %v3597_v4, %v3598_v36  ;;  %vm25045_vm2 = vmmov %vm25037_vm3  ;;  %vm25047_vm3 = vnez %v25046_v2  ;;  %v3601_v4 = vrot.slane %v18617_v45, 1  ;;  %14630 = vmatprep.mubr.msk.bf16.mxu0 %vm18594_vm12, %v12484_v54  ;;  %14661 = vmatpush3.bf16.msra.mxu0 %v16787_v50  ;;  %v25054_v50 = vld [vmem:[#allocation45_spill] sm:$0xff] }
  0xc7   : > { %v19018_v49 = vsel %vm25045_vm2, %v3598_v36, %v3599_v33  ;;  %14422 = vmatprep.mubr.msk.bf16.mxu1 %vm25047_vm3, %v12220_v22  ;;  %v2983_v36 = vsel %vm25033_vm5, %v2957_v53, %v2958_v44  ;;  %vm25048_vm9 = vmmov %vm25033_vm5  ;;  %v16789_v22 = vld [vmem:[%s23863_s1 + $0x200] sm:$0xff]  }
  0xc8   : > { %v2984_v14 = vsel %vm25048_vm9, %v2956_v56, %v2957_v53  ;;  %vm25049_vm14 = vmmov %vm25033_vm5  ;;  %v19045_v21 = vsel %vm25045_vm2, %v3600_v6, %v3601_v4  ;;  %v19054_v53 = vld [vmem:[#allocation2 + $0xc0] sm:$0xff]  ;;  %14694 = vmatprep.subr.bf16.mxu0 %v16789_v22  ;;  %vm25055_vm9 = vnez %v25054_v50 }
  0xc9   : > { %v2982_v43 = vsel %vm25049_vm14, %v2958_v44, %v17897_v51  ;;  %vm25050_vm6 = vmmov %vm25045_vm2  ;;  %v24262_v51 = vrot.slane %v19054_v53, 1  ;;  %v12487_v44 = vpack.c.bf16 %v2983_v36, %v2984_v14  ;;  %v25056_v14 = vld [vmem:[#allocation41_spill] sm:$0xff]  ;;  %v25078_v36 = vld [vmem:[#allocation75_spill] sm:$0xff] }
  0xca   : > { %v19049_v54 = vsel %vm25050_vm6, %v3599_v33, %v3600_v6  ;;  %v12490_v18 = vpack.c.bf16 %v18650_v8, %v2982_v43  ;;  %vm25051_vm5 = vmmov %vm25045_vm2  ;;  %v16782_v6 = vld [vmem:[%s23863_s1 + $0xc8] sm:$0xff]   ;;  %v25053_v8 = vld [vmem:[#allocation39_spill] sm:$0xff] }
  0xcb   : > { %v19062_v37 = vsel %vm25051_vm5, %v3602_v35, %v24262_v51  ;;  %vm25052_vm6 = vmmov %vm25045_vm2  ;;  %v16784_v43 = vld [vmem:[%s23863_s1 + $0xd0] sm:$0xff]  }
  0xcc   : > { %v19066_v33 = vsel %vm25052_vm6, %v3601_v4, %v3602_v35  ;;  %v25057_v4 = vld [vmem:[#allocation47_spill] sm:$0xff]  ;;  %v16786_v35 = vld [vmem:[%s23863_s1 + $0xd8] sm:$0xff]   ;;  %vm25065_vm6 = vcmp.lt.s32.totalorder %v17513_v59, 1 }
  0xcd   : > { %14423 = vmatmul.mubr.msk.bf16.vlgmr.msra.gmra.mrb[0].mxu1 %vm25055_vm9, %v25053_v8  ;;  %14631 = vmatmul.mubr.msk.bf16.gmra.mrb[16].mxu0 %vm18678_vm15, %v12487_v44  ;;  %vm25058_vm14 = vnez %v25057_v4  ;;  %v25059_v44 = vld [vmem:[#allocation43_spill] sm:$0xff]  ;;  %v25063_v8 = vld [vmem:[#allocation54_spill] sm:$0xff] }
  0xce   : > { %14455 = vmatpush3.bf16.msra.mxu1 %v18672_v15  ;;  %14426 = vmatprep.mubr.msk.bf16.mxu1 %vm25058_vm14, %v25056_v14  ;;  %v25060_v15 = vld [vmem:[#allocation52_spill] sm:$0xff]  ;;  %vm25064_vm5 = vnez %v25063_v8  ;;  %v16788_v14 = vld [vmem:[%s23863_s1 + $0xe0] sm:$0xff]  }
  0xcf   : > { %14634 = vmatprep.mubr.msk.bf16.mxu0 %vm18686_vm10, %v12490_v18  ;;  %14456 = vmatprep.subr.bf16.mxu1 %v16782_v6  ;;  %vm25061_vm2 = vnez %v25060_v15  ;;  %v25062_v18 = vld [vmem:[#allocation46_spill] sm:$0xff] }
  0xd2   : > { %14457 = vmatpush3.bf16.msra.mxu1 %v16782_v6  ;;  %v2974_v6 = vsel %vm25065_vm6, %v25005_v40, %v18934_v10  ;;  %v25069_v40 = vld [vmem:[#allocation56_spill] sm:$0xff]  ;;  %v25070_v10 = vld [vmem:[#allocation66_spill] sm:$0xff] }
  0xd3   : > { %14458 = vmatprep.subr.bf16.mxu1 %v16784_v43  ;;  %vm25071_vm6 = vnez %v25070_v10 }
  0xd5   : > { %14427 = vmatmul.mubr.msk.bf16.gmra.mrb[4].mxu1 %vm25061_vm2, %v25059_v44  ;;  %14635 = vmatmul.mubr.msk.bf16.gmra.mrb[20].mxu0 %vm18781_vm4, %v18834_v34  ;;  %v12502_v34 = vpack.c.bf16 %v18984_v63, %v2974_v6  ;;  %v16790_v44 = vld [vmem:[%s23863_s1 + $0xe8] sm:$0xff]   ;;  %v16792_v6 = vld [vmem:[%s23863_s1 + $0xf0] sm:$0xff]  }
  0xd6   : > { %14430 = vmatprep.mubr.msk.bf16.mxu1 %vm25064_vm5, %v25062_v18  ;;  %14638 = vmatprep.mubr.msk.bf16.mxu0 %vm18801_vm7, %v18863_v17  ;;  %v25066_v17 = vld [vmem:[#allocation53_spill] sm:$0xff]  ;;  %vm25073_vm7 = vcmp.lt.s32.totalorder %v17513_v59, 1 }
  0xd7   : > { %14459 = vmatpush3.bf16.msra.mxu1 %v16784_v43  ;;  %v25067_v43 = vld [vmem:[#allocation64_spill] sm:$0xff] }
  0xd8   : > { %14460 = vmatprep.subr.bf16.mxu1 %v16786_v35  ;;  %vm25068_vm5 = vnez %v25067_v43  ;;  %v25176_v43 = vpack.c.bf16 %v18984_v63, %v18993_v0  ;;  %v25183_v63 = vrot.slane %v19054_v53, 1 }
  0xdb   : > { %14461 = vmatpush3.bf16.msra.mxu1 %v16786_v35  ;;  %v25072_v35 = vld [vmem:[#allocation101_spill] sm:$0xff] }
  0xdc   : > { %14462 = vmatprep.subr.bf16.mxu1 %v16788_v14  ;;  %v2972_v18 = vsel %vm25073_vm7, %v18937_v28, %v25072_v35  ;;  %vm25079_vm7 = vnez %v25078_v36 }
  0xdd   : > { %14431 = vmatmul.mubr.msk.bf16.gmra.mrb[8].mxu1 %vm25068_vm5, %v25066_v17  ;;  %14639 = vmatmul.mubr.msk.bf16.gmra.mrb[24].mxu0 %vm18898_vm13, %v18931_v38  ;;  %v12505_v38 = vpack.c.bf16 %v25072_v35, %v2972_v18  ;;  %v16794_v17 = vld [vmem:[%s23863_s1 + $0xf8] sm:$0xff]   ;;  %v25080_v35 = vpack.c.bf16 %v18224_v16, %v18222_v27  ;;  %v16804_v18 = vld [vmem:[%s23863_s1 + $0x100] sm:$0xff]   ;;  %v25084_v16 = vpack.c.bf16 %v18274_v60, %v18252_v62  ;;  %v19318_v27 = vld [vmem:[#allocation2 + $0xb0] sm:$0xff] }
  0xde   : > { %14434 = vmatprep.mubr.msk.bf16.mxu1 %vm25071_vm6, %v25069_v40  ;;  %14642 = vmatprep.mubr.msk.bf16.mxu0 %vm18910_vm11, %v12502_v34  ;;  %v25074_v34 = vld [vmem:[#allocation65_spill] sm:$0xff]  ;;  %v25075_v40 = vld [vmem:[#allocation72_spill] sm:$0xff]  ;;  %v16795_v62 = vld [vmem:[%s23863_s1 + $0x218] sm:$0xff]  }
  0xdf   : > { %14463 = vmatpush3.bf16.msra.mxu1 %v16788_v14  ;;  %vm25076_vm6 = vnez %v25075_v40  ;;  %v25077_v14 = vld [vmem:[#allocation73_spill] sm:$0xff]  ;;  %v25089_v60 = vld [vmem:[#allocation87_spill] sm:$0xff] }
  0xe0   : > { %14464 = vmatprep.subr.bf16.mxu1 %v16790_v44 }
  0xe3   : > { %14465 = vmatpush3.bf16.msra.mxu1 %v16790_v44  ;;  %v16791_v44 = vld [vmem:[%s23863_s1 + $0x208] sm:$0xff]  }
  0xe4   : > { %14466 = vmatprep.subr.bf16.mxu1 %v16792_v6 }
  0xe5   : > { %14435 = vmatmul.mubr.msk.bf16.gmra.mrb[12].mxu1 %vm25076_vm6, %v25074_v34  ;;  %14643 = vmatmul.mubr.msk.bf16.gmra.mrb[28].mxu0 %vm18999_vm0, %v12505_v38  ;;  %v25081_v38 = vld [vmem:[#allocation74_spill] sm:$0xff]  ;;  %v25082_v34 = vld [vmem:[#allocation83_spill] sm:$0xff] }
  0xe6   : > { %14438 = vmatprep.mubr.msk.bf16.mxu1 %vm25079_vm7, %v25077_v14  ;;  %14662 = vmatprep.mubr.bf16.mxu0 %v25080_v35  ;;  %vm25083_vm6 = vnez %v25082_v34  ;;  %v25086_v14 = vld [vmem:[#allocation86_spill] sm:$0xff]  ;;  %v16793_v35 = vld [vmem:[%s23863_s1 + $0x210] sm:$0xff]  }
  0xe7   : > { %14467 = vmatpush3.bf16.msra.mxu1 %v16792_v6  ;;  %v25085_v6 = vld [vmem:[#allocation84_spill] sm:$0xff]  ;;  %vm25087_vm7 = vnez %v25086_v14 }
  0xe8   : > { %14468 = vmatprep.subr.bf16.mxu1 %v16794_v17 }
  0xeb   : > { %14469 = vmatpush3.bf16.msra.mxu1 %v16794_v17  ;;  %v25088_v17 = vpack.c.bf16 %v18385_v46, %v18329_v31  ;;  %v25093_v46 = vld [vmem:[#allocation96_spill] sm:$0xff]  ;;  %v25094_v31 = vld [vmem:[#allocation105_spill] sm:$0xff] }
  0xec   : > { %15654 = vmatprep.subr.bf16.mxu1 %v16804_v18 }
  0xed   : > { %14439 = vmatmul.mubr.msk.bf16.gmra.mrb[16].mxu1 %vm25083_vm6, %v25081_v38  ;;  %14663 = vmatmul.mubr.bf16.vlgmr.msra.gmra.mrb[0].mxu0 %v25084_v16  ;;  %v25090_v38 = vld [vmem:[#allocation98_spill] sm:$0xff]  ;;  %v16796_v16 = vld [vmem:[%s23863_s1 + $0x220] sm:$0xff]  }
  0xee   : > { %14442 = vmatprep.mubr.msk.bf16.mxu1 %vm25087_vm7, %v25085_v6  ;;  %14695 = vmatpush3.bf16.msra.mxu0 %v16789_v22  ;;  %vm25091_vm6 = vnez %v25090_v38  ;;  %v25092_v22 = vpack.c.bf16 %v18521_v25, %v18495_v55  ;;  %vm25095_vm7 = vnez %v25094_v31  ;;  %v16797_v25 = vld [vmem:[%s23863_s1 + $0x228] sm:$0xff]   ;;  %v25097_v55 = vld [vmem:[#allocation97_spill] sm:$0xff] }
  0xef   : > { %14666 = vmatprep.mubr.bf16.mxu0 %v25088_v17  ;;  %14696 = vmatprep.subr.bf16.mxu0 %v16791_v44  ;;  %v25101_v17 = vld [vmem:[#allocation112_spill] sm:$0xff] }
  0xf2   : > { %14697 = vmatpush3.bf16.msra.mxu0 %v16791_v44  ;;  %v25096_v44 = vpack.c.bf16 %v18548_v13, %v18546_v41  ;;  %v25099_v13 = vpack.c.bf16 %v18561_v5, %v18559_v39  ;;  %v25100_v41 = vld [vmem:[#allocation99_spill] sm:$0xff]  ;;  %v16798_v39 = vld [vmem:[%s23863_s1 + $0x230] sm:$0xff]  }
  0xf3   : > { %14698 = vmatprep.subr.bf16.mxu0 %v16793_v35  ;;  %v25106_v5 = vld [vmem:[#allocation77_spill] sm:$0xff] }
  0xf5   : > { %14443 = vmatmul.mubr.msk.bf16.gmra.mrb[20].mxu1 %vm25091_vm6, %v25089_v60  ;;  %14667 = vmatmul.mubr.bf16.gmra.mrb[4].mxu0 %v25092_v22  ;;  %vm25105_vm6 = vcmp.lt.s32.totalorder %v17513_v59, 1 }
  0xf6   : > { %14446 = vmatprep.mubr.msk.bf16.mxu1 %vm25095_vm7, %v25093_v46  ;;  %14670 = vmatprep.mubr.bf16.mxu0 %v25096_v44  ;;  %vm25102_vm7 = vnez %v25101_v17  ;;  %v25111_v46 = vpack.c.bf16 %v18600_v30, %v18598_v3  ;;  %v19224_v44 = vld [vmem:[#allocation2 + $0xc8] sm:$0xff]  ;;  %v25117_v3 = vld [vmem:[#allocation85_spill] sm:$0xff] }
  0xf7   : > { %14699 = vmatpush3.bf16.msra.mxu0 %v16793_v35  ;;  %v25103_v35 = vpack.c.bf16 %v24985_v32, %v18572_v12  ;;  %v16799_v12 = vld [vmem:[%s23863_s1 + $0x238] sm:$0xff]   ;;  %v25107_v32 = vpack.c.bf16 %v18606_v20, %v18318_v19  ;;  %v19228_v19 = vpack.c.bf16 %v19224_v44, %v19054_v53  ;;  %v25116_v30 = vld [vmem:[#allocation48_spill] sm:$0xff] }
  0xf8   : > { %14700 = vmatprep.subr.bf16.mxu0 %v16795_v62  ;;  %v25112_v20 = vld [vmem:[#allocation82_spill] sm:$0xff] }
  0xfb   : > { %14701 = vmatpush3.bf16.msra.mxu0 %v16795_v62  ;;  %v25104_v62 = vld [vmem:[#allocation31_spill] sm:$0xff] }
  0xfc   : > { %14702 = vmatprep.subr.bf16.mxu0 %v16796_v16  ;;  %v1956_v60 = vsel %vm25105_vm6, %v18937_v28, %v25104_v62  ;;  %v25109_v28 = vpack.c.bf16 %v18587_v58, %v18585_v48  ;;  %vm25110_vm6 = vnez %v24751_v47  ;;  %v25115_v58 = vpack.c.bf16 %v18619_v61, %v18617_v45  ;;  %v16806_v48 = vld [vmem:[%s23863_s1 + $0x108] sm:$0xff]   ;;  %v19251_v45 = vld [vmem:[#allocation2 + $0xe0] sm:$0xff] }
  0xfd   : > { %14447 = vmatmul.mubr.msk.bf16.gmra.mrb[24].mxu1 %vm18462_vm8, %v25097_v55  ;;  %14671 = vmatmul.mubr.bf16.gmra.mrb[8].mxu0 %v25099_v13  ;;  %v12292_v22 = vpack.c.bf16 %v25106_v5, %v1956_v60  ;;  %v19245_v55 = vld [vmem:[#allocation2 + $0xd8] sm:$0xff]  ;;  %v25120_v62 = vld [vmem:[#allocation95_spill] sm:$0xff]  ;;  %vm25135_vm8 = vcmp.lt.s32.totalorder %v17513_v59, 1 }
  0xfe   : > { %14450 = vmatprep.mubr.msk.bf16.mxu1 %vm25102_vm7, %v25100_v41  ;;  %14674 = vmatprep.mubr.bf16.mxu0 %v25103_v35  ;;  %vm25108_vm7 = vnez %v24925_v23  ;;  %v16811_v41 = vld [vmem:[%s23863_s1 + $0x110] sm:$0xff]   ;;  %v25119_v35 = vld [vmem:[#allocation51_spill] sm:$0xff]  ;;  %v16812_v5 = vld [vmem:[%s23863_s1 + $0x118] sm:$0xff]  }
  0xff   : > { %14703 = vmatpush3.bf16.msra.mxu0 %v16796_v16  ;;  %v25113_v16 = vld [vmem:[#allocation79_spill] sm:$0xff]  ;;  %vm25137_vm0 = vmmov %vm25135_vm8  ;;  %v19315_v23 = vld [vmem:[#allocation2 + $0xa8] sm:$0xff] }
 0x100   : > { %14704 = vmatprep.subr.bf16.mxu0 %v16797_v25  ;;  %v25122_v60 = vld [vmem:[#allocation55_spill] sm:$0xff] }
 0x103   : > { %14705 = vmatpush3.bf16.msra.mxu0 %v16797_v25  ;;  %v19243_v25 = vld [vmem:[#allocation2 + $0xd0] sm:$0xff] }
 0x104   : > { %14706 = vmatprep.subr.bf16.mxu0 %v16798_v39  ;;  %v19249_v61 = vpack.c.bf16 %v19245_v55, %v19243_v25  ;;  %v1917_v2 = vrot.slane %v19243_v25, 7 }
 0x105   : > { %14451 = vmatmul.mubr.msk.bf16.gmra.mrb[28].mxu1 %vm25108_vm7, %v25107_v32  ;;  %14675 = vmatmul.mubr.bf16.gmra.mrb[12].mxu0 %v25109_v28  ;;  %vm25114_vm7 = vnez %v25113_v16  ;;  %v19277_v28 = vld [vmem:[#allocation2 + $0x100] sm:$0xff]  ;;  %v19285_v16 = vld [vmem:[#allocation2 + $0x90] sm:$0xff] }
 0x106   : > { %14470 = vmatprep.mubr.msk.bf16.mxu1 %vm25110_vm6, %v12292_v22  ;;  %14678 = vmatprep.mubr.bf16.mxu0 %v25111_v46  ;;  %vm25118_vm6 = vnez %v25117_v3  ;;  %v25125_v22 = vld [vmem:[#allocation116_spill] sm:$0xff] }
 0x107   : > { %14707 = vmatpush3.bf16.msra.mxu0 %v16798_v39  ;;  %v25123_v39 = vld [vmem:[#allocation102_spill] sm:$0xff]  ;;  %v19279_v46 = vld [vmem:[#allocation2 + $0x108] sm:$0xff] }
 0x108   : > { %14708 = vmatprep.subr.bf16.mxu0 %v16799_v12 }
 0x10b   : > { %14709 = vmatpush3.bf16.msra.mxu0 %v16799_v12  ;;  %v25126_v12 = vld [vmem:[#allocation141_spill] sm:$0xff] }
 0x10c   : > { %v19275_v32 = vpack.c.bf16 %v25126_v12, %v25125_v22 }
 0x10d   : > { %14471 = vmatmul.mubr.msk.bf16.vlgmr.msra.gmra.mrb[0].mxu1 %vm25114_vm7, %v25112_v20  ;;  %14679 = vmatmul.mubr.bf16.gmra.mrb[16].mxu0 %v25115_v58  ;;  %vm25121_vm7 = vnez %v25120_v62  ;;  %v19283_v20 = vpack.c.bf16 %v19279_v46, %v19277_v28  ;;  %v1909_v58 = vrot.slane %v19285_v16, 7  ;;  %v25132_v62 = vld [vmem:[#allocation63_spill] sm:$0xff] }
 0x10e   : > { %15662 = vmatpush3.bf16.msra.mxu1 %v16804_v18  ;;  %14474 = vmatprep.mubr.msk.bf16.mxu1 %vm25118_vm6, %v25116_v30  ;;  %v19253_v18 = vld [vmem:[#allocation2 + $0xe8] sm:$0xff]  ;;  %vm25124_vm6 = vnez %v25123_v39  ;;  %25127 = vst [vmem:[#allocation39_spill] sm:$0xff] %v19275_v32  ;;  %v19288_v30 = vld [vmem:[#allocation2 + $0x98] sm:$0xff] }
 0x10f   : > { %14682 = vmatprep.mubr.bf16.mxu0 %v19228_v19  ;;  %15655 = vmatprep.subr.bf16.mxu1 %v16806_v48  ;;  %v19257_v13 = vpack.c.bf16 %v19253_v18, %v19251_v45  ;;  %25128 = vst [vmem:[#allocation41_spill] sm:$0xff] %v19283_v20  ;;  %v1910_v3 = vrot.slane %v19288_v30, 7 }
 0x111   : > { %v1939_v39 = vsel %vm25135_vm8, %v1909_v58, %v1910_v3  ;;  %vm25140_vm8 = vmmov %vm25137_vm0 }
 0x112   : > { %15663 = vmatpush3.bf16.msra.mxu1 %v16806_v48  ;;  %v16817_v48 = vld [vmem:[%s23863_s1 + $0x120] sm:$0xff]  }
 0x113   : > { %15656 = vmatprep.subr.bf16.mxu1 %v16811_v41 }
 0x115   : > { %14475 = vmatmul.mubr.msk.bf16.gmra.mrb[4].mxu1 %vm25121_vm7, %v25119_v35  ;;  %14683 = vmatmul.mubr.bf16.gmra.mrb[20].mxu0 %v19249_v61  ;;  %v25130_v35 = vld [vmem:[#allocation108_spill] sm:$0xff] }
 0x116   : > { %14478 = vmatprep.mubr.msk.bf16.mxu1 %vm25124_vm6, %v25122_v60  ;;  %14686 = vmatprep.mubr.bf16.mxu0 %v19257_v13  ;;  %vm25131_vm7 = vnez %v25130_v35  ;;  %v25133_v60 = vld [vmem:[#allocation111_spill] sm:$0xff]  ;;  %v25138_v35 = vld [vmem:[#allocation100_spill] sm:$0xff] }
 0x117   : > { %15664 = vmatpush3.bf16.msra.mxu1 %v16811_v41  ;;  %v25129_v41 = vld [vmem:[#allocation58_spill] sm:$0xff]  ;;  %vm25134_vm6 = vnez %v25133_v60  ;;  %v3324_v56 = vpack.c.bf16 %v25138_v35, %v25138_v35 }
 0x118   : > { %15657 = vmatprep.subr.bf16.mxu1 %v16812_v5 }
 0x11b   : > { %15665 = vmatpush3.bf16.msra.mxu1 %v16812_v5  ;;  %v25136_v5 = vld [vmem:[#allocation44_spill] sm:$0xff] }
 0x11c   : > { %15658 = vmatprep.subr.bf16.mxu1 %v16817_v48  ;;  %v1940_v51 = vsel %vm25137_vm0, %v25136_v5, %v1909_v58  ;;  %v1913_v58 = vrot.slane %v19318_v27, 7 }
 0x11d   : > { %14479 = vmatmul.mubr.msk.bf16.gmra.mrb[8].mxu1 %vm25131_vm7, %v25129_v41  ;;  %14687 = vmatmul.mubr.bf16.gmra.mrb[24].mxu0 %v19275_v32  ;;  %v16818_v41 = vld [vmem:[%s23863_s1 + $0x128] sm:$0xff]   ;;  %v12316_v60 = vpack.c.bf16 %v1939_v39, %v1940_v51  ;;  %v16823_v51 = vld [vmem:[%s23863_s1 + $0x130] sm:$0xff]   ;;  %v25139_v39 = vld [vmem:[#allocation67_spill] sm:$0xff] }
 0x11e   : > { %14482 = vmatprep.mubr.msk.bf16.mxu1 %vm25134_vm6, %v25132_v62  ;;  %14690 = vmatprep.mubr.bf16.mxu0 %v19283_v20  ;;  %v19312_v62 = vld [vmem:[#allocation2 + $0xa0] sm:$0xff]  ;;  %v1912_v20 = vrot.slane %v19315_v23, 7  ;;  %v25142_v32 = vld [vmem:[#allocation122_spill] sm:$0xff]  ;;  %vm25144_vm7 = vmmov %vm25137_vm0 }
 0x11f   : > { %15666 = vmatpush3.bf16.msra.mxu1 %v16817_v48  ;;  %v1911_v47 = vrot.slane %v19312_v62, 7  ;;  %v19321_v48 = vld [vmem:[#allocation2 + $0xb8] sm:$0xff]  ;;  %vm25145_vm6 = vmmov %vm25137_vm0 }
 0x120   : > { %15659 = vmatprep.subr.bf16.mxu1 %v16818_v41  ;;  %v1914_v5 = vrot.slane %v19321_v48, 7 }
 0x121   : > { %v1937_v35 = vsel %vm25140_vm8, %v1911_v47, %v1912_v20  ;;  %v1938_v17 = vsel %vm25137_vm0, %v1910_v3, %v1911_v47  ;;  %v1915_v3 = vrot.slane %v19054_v53, 7  ;;  %vm25150_vm8 = vmmov %vm25137_vm0  ;;  %v25185_v53 = vpack.c.bf16 %v19062_v37, %v19066_v33 }
 0x122   : > { %v1935_v9 = vsel %vm25144_vm7, %v1913_v58, %v1914_v5  ;;  %vm25159_vm7 = vmmov %vm25137_vm0 }
 0x123   : > { %15667 = vmatpush3.bf16.msra.mxu1 %v16818_v41  ;;  %v25141_v41 = vld [vmem:[#allocation124_spill] sm:$0xff] }
 0x124   : > { %15660 = vmatprep.subr.bf16.mxu1 %v16823_v51  ;;  %v25143_v6 = vpack.c.bf16 %v25141_v41, %v25142_v32  ;;  %v1916_v32 = vrot.slane %v19224_v44, 7  ;;  %v25152_v41 = vld [vmem:[#allocation128_spill] sm:$0xff] }
 0x125   : > { %14483 = vmatmul.mubr.msk.bf16.gmra.mrb[12].mxu1 %vm18568_vm1, %v25139_v39  ;;  %14691 = vmatmul.mubr.bf16.gmra.mrb[28].mxu0 %v3324_v56  ;;  %v1936_v56 = vsel %vm25145_vm6, %v1912_v20, %v1913_v58  ;;  %v12319_v39 = vpack.c.bf16 %v1937_v35, %v1938_v17  ;;  %v25146_v20 = vld [vmem:[#allocation126_spill] sm:$0xff]  ;;  %v25147_v58 = vld [vmem:[#allocation123_spill] sm:$0xff]  ;;  %v1934_v17 = vsel %vm25150_vm8, %v1914_v5, %v1915_v3  ;;  %v25155_v5 = vld [vmem:[#allocation132_spill] sm:$0xff] }
 0x126   : > { %14486 = vmatprep.mubr.msk.bf16.mxu1 %vm18594_vm12, %v12316_v60  ;;  %14710 = vmatprep.mubr.msk.bf16.mxu0 %vm25047_vm3, %v25143_v6  ;;  %v16824_v60 = vld [vmem:[%s23863_s1 + $0x138] sm:$0xff]   ;;  %v12322_v47 = vpack.c.bf16 %v1935_v9, %v1936_v56  ;;  %v1918_v6 = vrot.slane %v19245_v55, 7  ;;  %vm25149_vm3 = vmmov %vm25137_vm0 }
 0x127   : > { %15668 = vmatpush3.bf16.msra.mxu1 %v16823_v51  ;;  %v25148_v51 = vpack.c.bf16 %v25146_v20, %v25147_v58  ;;  %v1933_v9 = vsel %vm25149_vm3, %v1915_v3, %v1916_v32  ;;  %v25151_v35 = vld [vmem:[#allocation130_spill] sm:$0xff]  ;;  %v1919_v20 = vrot.slane %v19251_v45, 7  ;;  %v1920_v58 = vrot.slane %v19253_v18, 7  ;;  %v25156_v3 = vld [vmem:[#allocation133_spill] sm:$0xff]  ;;  %vm25160_vm6 = vmmov %vm25137_vm0 }
 0x128   : > { %15661 = vmatprep.subr.bf16.mxu1 %v16824_v60  ;;  %v25153_v56 = vpack.c.bf16 %v25151_v35, %v25152_v41  ;;  %vm25164_vm3 = vnez %v25063_v8  ;;  %v25165_v35 = vrot.slane %v25126_v12, 7  ;;  %v25166_v41 = vld [vmem:[#allocation131_spill] sm:$0xff]  ;;  %vm25168_vm8 = vmmov %vm25137_vm0  ;;  %v25172_v8 = vld [vmem:[#allocation32_spill] sm:$0xff] }
 0x129   : > { %v1929_v4 = vsel %vm25159_vm7, %v1919_v20, %v1920_v58  ;;  %vm25182_vm7 = vcmp.lt.s32.totalorder %v17513_v59, 7 }
 0x12b   : > { %15669 = vmatpush3.bf16.msra.mxu1 %v16824_v60  ;;  %v1931_v60 = vsel %vm25137_vm0, %v1917_v2, %v1918_v6 }
 0x12d   : > { %14487 = vmatmul.mubr.msk.bf16.gmra.mrb[16].mxu1 %vm18678_vm15, %v12319_v39  ;;  %14711 = vmatmul.mubr.msk.bf16.vlgmr.msra.gmra.mrb[0].mxu0 %vm25055_vm9, %v25148_v51  ;;  %vm25154_vm9 = vmmov %vm25137_vm0  ;;  %v12325_v39 = vpack.c.bf16 %v1933_v9, %v1934_v17  ;;  %v25157_v51 = vpack.c.bf16 %v25155_v5, %v25156_v3  ;;  %v25162_v9 = vld [vmem:[#allocation136_spill] sm:$0xff]  ;;  %v3604_v3 = vrot.slane %v19224_v44, 1 }
 0x12e   : > { %14490 = vmatprep.mubr.msk.bf16.mxu1 %vm18686_vm10, %v12322_v47  ;;  %14714 = vmatprep.mubr.msk.bf16.mxu0 %vm25058_vm14, %v25153_v56  ;;  %v1932_v50 = vsel %vm25154_vm9, %v1916_v32, %v1917_v2  ;;  %vm25158_vm14 = vnez %v24979_v42  ;;  %v1930_v32 = vsel %vm25160_vm6, %v1918_v6, %v1919_v20  ;;  %v25161_v2 = vld [vmem:[#allocation62_spill] sm:$0xff]  ;;  %v1928_v56 = vsel %vm25168_vm8, %v1920_v58, %v25166_v41  ;;  %v25169_v6 = vld [vmem:[#allocation139_spill] sm:$0xff]  ;;  %vm25184_vm6 = vmmov %vm25182_vm7 }
 0x12f   : > { %v12328_v47 = vpack.c.bf16 %v1931_v60, %v1932_v50  ;;  %v25163_v17 = vpack.c.bf16 %v25161_v2, %v25162_v9  ;;  %v12331_v60 = vpack.c.bf16 %v1929_v4, %v1930_v32  ;;  %v25173_v20 = vld [vmem:[#allocation26_spill] sm:$0xff]  ;;  %v2271_v58 = vpack.c.bf16 %v19288_v30, %v19285_v16  ;;  %vm25188_vm8 = vmmov %vm25184_vm6 }
 0x130   : > { %v25174_v5 = vpack.c.bf16 %v25172_v8, %v25173_v20  ;;  %v25178_v4 = vpack.c.bf16 %v19018_v49, %v19011_v57  ;;  %vm25179_vm9 = vnez %v25075_v40  ;;  %v3625_v0 = vsel %vm25184_vm6, %v25183_v63, %v3604_v3 }
 0x131   : > { %v2272_v57 = vpack.c.bf16 %v19315_v23, %v19312_v62  ;;  %v2273_v49 = vpack.c.bf16 %v19321_v48, %v19318_v27  ;;  %v25201_v62 = vld [vmem:[#allocation112_spill] sm:$0xff]  ;;  %v25203_v48 = vld [vmem:[#allocation90_spill] sm:$0xff] }
 0x132   : > { %v25204_v32 = vrot.slane %v25203_v48, 1 }
 0x135   : > { %14491 = vmatmul.mubr.msk.bf16.gmra.mrb[20].mxu1 %vm18781_vm4, %v12325_v39  ;;  %14715 = vmatmul.mubr.msk.bf16.gmra.mrb[4].mxu0 %vm25061_vm2, %v25157_v51  ;;  %vm25167_vm2 = vmmov %vm25137_vm0  ;;  %v25170_v39 = vld [vmem:[#allocation140_spill] sm:$0xff]  ;;  %vm25175_vm0 = vnez %v25070_v10  ;;  %v3605_v51 = vrot.slane %v19243_v25, 1  ;;  %v25180_v10 = vpack.c.bf16 %v19045_v21, %v19049_v54  ;;  %v3606_v21 = vrot.slane %v19245_v55, 1 }
 0x136   : > { %14494 = vmatprep.mubr.msk.bf16.mxu1 %vm25158_vm14, %v12328_v47  ;;  %14718 = vmatprep.mubr.msk.bf16.mxu0 %vm25164_vm3, %v25163_v17  ;;  %v1927_v15 = vsel %vm25167_vm2, %v25166_v41, %v25165_v35  ;;  %v25171_v47 = vpack.c.bf16 %v25169_v6, %v25170_v39  ;;  %vm25181_vm14 = vnez %v25078_v36  ;;  %v3607_v54 = vrot.slane %v19251_v45, 1  ;;  %v25206_v17 = vld [vmem:[#allocation41_spill] sm:$0xff] }
 0x137   : > { %v12334_v50 = vpack.c.bf16 %v1927_v15, %v1928_v56  ;;  %v3624_v44 = vsel %vm25182_vm7, %v3604_v3, %v3605_v51  ;;  %v3608_v36 = vrot.slane %v19253_v18, 1  ;;  %v3609_v25 = vrot.slane %v25125_v22, 1  ;;  %v16825_v22 = vld [vmem:[#allocation2] sm:$0xff]  ;;  %v25207_v35 = vld [vmem:[#allocation117_spill] sm:$0xff] }
 0x138   : > { %v12586_v40 = vpack.c.bf16 %v3624_v44, %v3625_v0  ;;  %vm25186_vm3 = vnez %v25082_v34  ;;  %vm25187_vm2 = vnez %v25086_v14  ;;  %v3622_v27 = vsel %vm25188_vm8, %v3606_v21, %v3607_v54 }
 0x139   : > { %v3610_v34 = vrot.slane %v25126_v12, 1  ;;  %v3611_v18 = vrot.slane %v19277_v28, 1  ;;  %v3612_v14 = vrot.slane %v19279_v46, 1  ;;  %v3613_v16 = vrot.slane %v16825_v22, 1 }
 0x13a   : > { %vm25193_vm7 = vnez %v25094_v31  ;;  %v25200_v31 = vld [vmem:[#allocation39_spill] sm:$0xff] }
 0x13d   : > { %14495 = vmatmul.mubr.msk.bf16.gmra.mrb[24].mxu1 %vm18898_vm13, %v12331_v60  ;;  %14719 = vmatmul.mubr.msk.bf16.gmra.mrb[8].mxu0 %vm25068_vm5, %v25171_v47  ;;  %vm25177_vm5 = vnez %v25042_v11 }
 0x13e   : > { %14498 = vmatprep.mubr.msk.bf16.mxu1 %vm18910_vm11, %v12334_v50  ;;  %14722 = vmatprep.mubr.msk.bf16.mxu0 %vm25175_vm0, %v25174_v5  ;;  %vm25189_vm0 = vmmov %vm25184_vm6 }
 0x13f   : > { %v3623_v23 = vsel %vm25189_vm0, %v3605_v51, %v3606_v21  ;;  %vm25194_vm6 = vmmov %vm25189_vm0 }
 0x140   : > { %v12589_v37 = vpack.c.bf16 %v3622_v27, %v3623_v23  ;;  %v3618_v30 = vsel %vm25194_vm6, %v3610_v34, %v3611_v18  ;;  %vm25197_vm8 = vmmov %vm25189_vm0 }
 0x145   : > { %14499 = vmatmul.mubr.msk.bf16.gmra.mrb[28].mxu1 %vm25177_vm5, %v25176_v43  ;;  %14723 = vmatmul.mubr.msk.bf16.gmra.mrb[12].mxu0 %vm25179_vm9, %v25178_v4  ;;  %vm25190_vm5 = vmmov %vm25189_vm0 }
 0x146   : > { %14534 = vmatprep.mubr.bf16.mxu1 %v2271_v58  ;;  %14726 = vmatprep.mubr.msk.bf16.mxu0 %vm25181_vm14, %v25180_v10  ;;  %v3620_v55 = vsel %vm25190_vm5, %v3608_v36, %v3609_v25  ;;  %vm25191_vm9 = vmmov %vm25189_vm0  ;;  %vm25192_vm14 = vnez %v25090_v38  ;;  %vm25202_vm5 = vnez %v25201_v62 }
 0x147   : > { %v3621_v45 = vsel %vm25191_vm9, %v3607_v54, %v3608_v36 }
 0x148   : > { %v12592_v33 = vpack.c.bf16 %v3620_v55, %v3621_v45 }
 0x14d   : > { %14535 = vmatmul.mubr.bf16.vlgmr.msra.gmra.mrb[16].mxu1 %v2272_v57  ;;  %14727 = vmatmul.mubr.msk.bf16.gmra.mrb[16].mxu0 %vm25186_vm3, %v25185_v53  ;;  %vm25195_vm3 = vmmov %vm25189_vm0 }
 0x14e   : > { %14538 = vmatprep.mubr.bf16.mxu1 %v2273_v49  ;;  %14730 = vmatprep.mubr.msk.bf16.mxu0 %vm25187_vm2, %v12586_v40  ;;  %v3619_v12 = vsel %vm25195_vm3, %v3609_v25, %v3610_v34  ;;  %vm25196_vm2 = vmmov %vm25189_vm0 }
 0x14f   : > { %v3616_v28 = vsel %vm25196_vm2, %v3612_v14, %v3613_v16  ;;  %v12595_v46 = vpack.c.bf16 %v3618_v30, %v3619_v12  ;;  %vm25205_vm9 = vmmov %vm25196_vm2 }
 0x150   : > { %v3646_v2 = vsel %vm25205_vm9, %v3613_v16, %v25204_v32 }
 0x151   : > { %v12601_v9 = vpack.c.bf16 %v3646_v2, %v3613_v16 }
 0x155   : > { %14539 = vmatmul.mubr.bf16.gmra.mrb[20].mxu1 %v19228_v19  ;;  %14731 = vmatmul.mubr.msk.bf16.gmra.mrb[20].mxu0 %vm25192_vm14, %v12589_v37  ;;  %v3617_v19 = vsel %vm25197_vm8, %v3611_v18, %v3612_v14  ;;  %vm25208_vm14 = vnez %v25207_v35 }
 0x156   : > { %14542 = vmatprep.mubr.bf16.mxu1 %v19249_v61  ;;  %14734 = vmatprep.mubr.msk.bf16.mxu0 %vm25193_vm7, %v12592_v33  ;;  %v12598_v38 = vpack.c.bf16 %v3616_v28, %v3617_v19  ;;  %v25198_v61 = vld [vmem:[#allocation110_spill] sm:$0xff] }
 0x157   : > { %vm25199_vm0 = vnez %v25198_v61 }
 0x15d   : > { %14543 = vmatmul.mubr.bf16.gmra.mrb[24].mxu1 %v19257_v13  ;;  %14735 = vmatmul.mubr.msk.bf16.gmra.mrb[24].mxu0 %vm25199_vm0, %v12595_v46 }
 0x15e   : > { %14546 = vmatprep.mubr.bf16.mxu1 %v25200_v31  ;;  %14738 = vmatprep.mubr.msk.bf16.mxu0 %vm25202_vm5, %v12598_v38 }
 0x165   : > { %14547 = vmatmul.mubr.bf16.gmra.mrb[28].mxu1 %v25206_v17  ;;  %14739 = vmatmul.mubr.msk.bf16.gmra.mrb[28].mxu0 %vm25208_vm14, %v12601_v9 }
 0x1e0   : > { %v14472_v13 = vpop.f32.mrb[0].mxu1 }
 0x1e1   : > { %v2104_v41 = vpop.f32.mrb[1].mxu1 }
 0x1e2   : > { %v14473_v15 = vpop.f32.mrb[2].mxu1 }
 0x1e3   : > { %v2107_v56 = vpop.f32.mrb[3].mxu1 }
 0x1e8   : > { %v14476_v60 = vpop.f32.mrb[4].mxu1 }
 0x1e9   : > { %v2120_v50 = vpop.f32.mrb[5].mxu1 }
 0x1ea   : > { %v14477_v6 = vpop.f32.mrb[6].mxu1 }
 0x1eb   : > { %v2123_v39 = vpop.f32.mrb[7].mxu1 }
 0x1f0   : > { %v14480_v47 = vpop.f32.mrb[8].mxu1 }
 0x1f1   : > { %v2136_v8 = vpop.f32.mrb[9].mxu1 }
 0x1f2   : > { %v14481_v20 = vpop.f32.mrb[10].mxu1 }
 0x1f3   : > { %v2139_v5 = vpop.f32.mrb[11].mxu1 }
 0x1f8   : > { %v14484_v58 = vpop.f32.mrb[12].mxu1 }
 0x1f9   : > { %v2152_v3 = vpop.f32.mrb[13].mxu1 }
 0x1fa   : > { %v14485_v51 = vpop.f32.mrb[14].mxu1 }
 0x1fb   : > { %v2155_v43 = vpop.f32.mrb[15].mxu1 }
 0x200   : > { %v14712_v4 = vpop.f32.mrb[0].mxu0 }
 0x201   : > { %v19494_v10 = vadd.f32 %v14712_v4, %v14472_v13   ;;  %v3794_v44 = vpop.f32.mrb[1].mxu0 }
 0x202   : > { %v19496_v63 = vadd.f32 %v3794_v44, %v2104_v41   ;;  %v14713_v0 = vpop.f32.mrb[2].mxu0 }
 0x203   : > { %v19498_v57 = vadd.f32 %v14713_v0, %v14473_v15   ;;  %v3797_v49 = vpop.f32.mrb[3].mxu0 }
 0x204   : > { %v19500_v40 = vadd.f32 %v3797_v49, %v2107_v56  }
 0x208   : > { %v14716_v21 = vpop.f32.mrb[4].mxu0 }
 0x209   : > { %v19502_v54 = vadd.f32 %v14716_v21, %v14476_v60   ;;  %v3810_v36 = vpop.f32.mrb[5].mxu0 }
 0x20a   : > { %v19504_v25 = vadd.f32 %v3810_v36, %v2120_v50   ;;  %v14717_v53 = vpop.f32.mrb[6].mxu0 }
 0x20b   : > { %v19506_v27 = vadd.f32 %v14717_v53, %v14477_v6   ;;  %v3813_v23 = vpop.f32.mrb[7].mxu0  ;;  %25209 = vst [vmem:[#allocation43_spill] sm:$0xff] %v19502_v54 }
 0x20c   : > { %v19508_v55 = vadd.f32 %v3813_v23, %v2123_v39  }
 0x210   : > { %v14720_v45 = vpop.f32.mrb[8].mxu0 }
 0x211   : > { %v19510_v37 = vadd.f32 %v14720_v45, %v14480_v47   ;;  %v3826_v33 = vpop.f32.mrb[9].mxu0 }
 0x212   : > { %v19512_v34 = vadd.f32 %v3826_v33, %v2136_v8   ;;  %v14721_v18 = vpop.f32.mrb[10].mxu0 }
 0x213   : > { %v19514_v14 = vadd.f32 %v14721_v18, %v14481_v20   ;;  %v3829_v22 = vpop.f32.mrb[11].mxu0 }
 0x214   : > { %v19516_v16 = vadd.f32 %v3829_v22, %v2139_v5  }
 0x218   : > { %v14724_v30 = vpop.f32.mrb[12].mxu0 }
 0x219   : > { %v19518_v12 = vadd.f32 %v14724_v30, %v14484_v58   ;;  %v3842_v28 = vpop.f32.mrb[13].mxu0 }
 0x21a   : > { %v19520_v19 = vadd.f32 %v3842_v28, %v2152_v3   ;;  %v14725_v46 = vpop.f32.mrb[14].mxu0 }
 0x21b   : > { %v19522_v38 = vadd.f32 %v14725_v46, %v14485_v51   ;;  %v3845_v61 = vpop.f32.mrb[15].mxu0 }
 0x21c   : > { %v19524_v31 = vadd.f32 %v3845_v61, %v2155_v43  }
 0x220   : > { %v14536_v62 = vpop.f32.mrb[16].mxu1  ;;  %v14728_v48 = vpop.f32.mrb[16].mxu0 }
 0x221   : > { %v2442_v32 = vpop.f32.mrb[17].mxu1  ;;  %v15686_v2 = vadd.f32 %v14728_v48, %v14536_v62   ;;  %v3858_v9 = vpop.f32.mrb[17].mxu0 }
 0x222   : > { %v14537_v17 = vpop.f32.mrb[18].mxu1  ;;  %v15687_v35 = vadd.f32 %v3858_v9, %v2442_v32   ;;  %v14729_v13 = vpop.f32.mrb[18].mxu0 }
 0x223   : > { %v2445_v41 = vpop.f32.mrb[19].mxu1  ;;  %v15688_v15 = vadd.f32 %v14729_v13, %v14537_v17   ;;  %v3861_v56 = vpop.f32.mrb[19].mxu0 }
 0x224   : > { %v15689_v60 = vadd.f32 %v3861_v56, %v2445_v41  }
 0x228   : > { %v14540_v50 = vpop.f32.mrb[20].mxu1  ;;  %v14732_v6 = vpop.f32.mrb[20].mxu0 }
 0x229   : > { %v2458_v39 = vpop.f32.mrb[21].mxu1  ;;  %v15690_v47 = vadd.f32 %v14732_v6, %v14540_v50   ;;  %v3874_v8 = vpop.f32.mrb[21].mxu0 }
 0x22a   : > { %v14541_v20 = vpop.f32.mrb[22].mxu1  ;;  %v15691_v5 = vadd.f32 %v3874_v8, %v2458_v39   ;;  %v14733_v58 = vpop.f32.mrb[22].mxu0 }
 0x22b   : > { %v2461_v3 = vpop.f32.mrb[23].mxu1  ;;  %v15692_v51 = vadd.f32 %v14733_v58, %v14541_v20   ;;  %v3877_v43 = vpop.f32.mrb[23].mxu0 }
 0x22c   : > { %v15693_v4 = vadd.f32 %v3877_v43, %v2461_v3  }
 0x230   : > { %v14544_v44 = vpop.f32.mrb[24].mxu1  ;;  %v14736_v0 = vpop.f32.mrb[24].mxu0 }
 0x231   : > { %v2474_v49 = vpop.f32.mrb[25].mxu1  ;;  %v15694_v21 = vadd.f32 %v14736_v0, %v14544_v44   ;;  %v3890_v36 = vpop.f32.mrb[25].mxu0 }
 0x232   : > { %v14545_v53 = vpop.f32.mrb[26].mxu1  ;;  %v15695_v23 = vadd.f32 %v3890_v36, %v2474_v49   ;;  %v14737_v45 = vpop.f32.mrb[26].mxu0 }
 0x233   : > { %v2477_v33 = vpop.f32.mrb[27].mxu1  ;;  %v15696_v18 = vadd.f32 %v14737_v45, %v14545_v53   ;;  %v3893_v22 = vpop.f32.mrb[27].mxu0 }
 0x234   : > { %v15697_v30 = vadd.f32 %v3893_v22, %v2477_v33  }
 0x238   : > { %v14548_v28 = vpop.f32.mrb[28].mxu1  ;;  %v14740_v46 = vpop.f32.mrb[28].mxu0 }
 0x239   : > { %v2490_v61 = vpop.f32.mrb[29].mxu1  ;;  %v15698_v62 = vadd.f32 %v14740_v46, %v14548_v28   ;;  %v3906_v48 = vpop.f32.mrb[29].mxu0 }
 0x23a   : > { %v14549_v32 = vpop.f32.mrb[30].mxu1  ;;  %v15699_v9 = vadd.f32 %v3906_v48, %v2490_v61   ;;  %v14741_v17 = vpop.f32.mrb[30].mxu0 }
 0x23b   : > { %v2493_v13 = vpop.f32.mrb[31].mxu1  ;;  %v15700_v41 = vadd.f32 %v14741_v17, %v14549_v32   ;;  %v3909_v56 = vpop.f32.mrb[31].mxu0 }
 0x23c   : > { %v15701_v50 = vadd.f32 %v3909_v56, %v2493_v13  }
 0x23d LB: >> { %v25211_v59 = vld [vmem:[#allocation19_spill] sm:$0xff]  ;;  %25212 = vst [vmem:[#allocation144_spill] sm:$0xff] %v17180_v62  ;;  %25213 = vst [vmem:[#allocation145_spill] sm:$0xff] %v17188_v9  ;;  %s12603_s27 = sshll.u32 %s17304_s26, 4  ;;  %s13637_s28 = sshll.u32 %s17304_s26, 6  ;;  %v19733_v48 = vld [vmem:[#allocation2 + $0x8] sm:$0xff]  ;;  %v17176_v41 = vphi %v15700_v41, %v25918_v41   ;;  %s17304_s26 = sphi %s19606_s26, %s25950_s26   ;;  %v17300_v63 = vphi %v19496_v63, %v25949_v63   ;;  %v17296_v40 = vphi %v19500_v40, %v25948_v40   ;;  %v17292_v10 = vphi %v19494_v10, %v25947_v10   ;;  %v17288_v57 = vphi %v19498_v57, %v25946_v57   ;;  %v17284_v25 = vphi %v19504_v25, %v25945_v25   ;;  %v17280_v55 = vphi %v19508_v55, %v25944_v55   ;;  %v17272_v27 = vphi %v19506_v27, %v25942_v27   ;;  %v17268_v34 = vphi %v19512_v34, %v25941_v34   ;;  %v17264_v16 = vphi %v19516_v16, %v25940_v16   ;;  %v17260_v37 = vphi %v19510_v37, %v25939_v37   ;;  %v17256_v14 = vphi %v19514_v14, %v25938_v14   ;;  %v17252_v19 = vphi %v19520_v19, %v25937_v19   ;;  %v17248_v31 = vphi %v19524_v31, %v25936_v31   ;;  %v17244_v12 = vphi %v19518_v12, %v25935_v12   ;;  %v17240_v38 = vphi %v19522_v38, %v25934_v38   ;;  %v17236_v35 = vphi %v15687_v35, %v25933_v35   ;;  %v17232_v60 = vphi %v15689_v60, %v25932_v60   ;;  %v17228_v2 = vphi %v15686_v2, %v25931_v2   ;;  %v17224_v15 = vphi %v15688_v15, %v25930_v15   ;;  %v17220_v5 = vphi %v15691_v5, %v25929_v5   ;;  %v17216_v4 = vphi %v15693_v4, %v25928_v4   ;;  %v17212_v47 = vphi %v15690_v47, %v25927_v47   ;;  %v17208_v51 = vphi %v15692_v51, %v25926_v51   ;;  %v17204_v23 = vphi %v15695_v23, %v25925_v23   ;;  %v17200_v30 = vphi %v15697_v30, %v25924_v30   ;;  %v17196_v21 = vphi %v15694_v21, %v25923_v21   ;;  %v17192_v18 = vphi %v15696_v18, %v25922_v18   ;;  %v17188_v9 = vphi %v15699_v9, %v25921_v9   ;;  %v17184_v50 = vphi %v15701_v50, %v25920_v50   ;;  %v17180_v62 = vphi %v15698_v62, %v25919_v62  }
 0x23e   : >> { %25214 = vst [vmem:[#allocation146_spill] sm:$0xff] %v17192_v18  ;;  %25215 = vst [vmem:[#allocation147_spill] sm:$0xff] %v17196_v21  ;;  %v25224_v54 = vld [vmem:[#allocation43_spill] sm:$0xff]  ;;  %v4189_v6 = vsub.s32 0, %v25211_v59  ;;  %v4225_v39 = vsub.s32 1, %v25211_v59  ;;  %v4389_v8 = vsub.s32 2, %v25211_v59  ;;  %s19708_s29 = scalar_lea.vmem %s17387_s18, %s12603_s27  ;;  %s19713_s9 = scalar_lea.vmem %s23864_s2, %s13637_s28 }
 0x23f   : >> { %25216 = vst [vmem:[#allocation148_spill] sm:$0xff] %v17200_v30  ;;  %25217 = vst [vmem:[#allocation149_spill] sm:$0xff] %v17204_v23  ;;  %v4496_v20 = vsub.s32 3, %v25211_v59  ;;  %v4564_v58 = vsub.s32 4, %v25211_v59  ;;  %v4669_v3 = vsub.s32 5, %v25211_v59  ;;  %v4865_v43 = vsub.s32 6, %v25211_v59  ;;  %s21001_s16 = scalar_lea.vmem %s289_s15, %s17304_s26  ;;  %s21007_s20 = scalar_lea.vmem %s23865_s3, %s17304_s26 }
 0x240   : >> { %25218 = vst [vmem:[#allocation150_spill] sm:$0xff] %v17208_v51  ;;  %25219 = vst [vmem:[#allocation151_spill] sm:$0xff] %v17212_v47  ;;  %v4933_v44 = vsub.s32 7, %v25211_v59  ;;  %v4025_v0 = vld [vmem:[%s19708_s29] sm:$0xff]  ;;  %v16827_v17 = vld [vmem:[%s19713_s9 + $0x8] sm:$0xff]   ;;  %v19738_v13 = vmax.f32 %v17300_v63, 0.0 }
 0x241   : >> { %25220 = vst [vmem:[#allocation152_spill] sm:$0xff] %v17216_v4  ;;  %25221 = vst [vmem:[#allocation153_spill] sm:$0xff] %v17220_v5  ;;  %v19716_v49 = vrot.slane %v4025_v0, %v4189_v6  ;;  %v19718_v36 = vrot.slane %v4025_v0, %v4225_v39  ;;  %v19720_v53 = vrot.slane %v4025_v0, %v4389_v8  ;;  %v16826_v45 = vld [vmem:[%s19713_s9] sm:$0xff]   ;;  %s11932_s10 = smul.u32 576, %s17304_s26  ;;  %v19741_v56 = vmax.f32 %v17296_v40, 0.0  ;;  %v16828_v39 = vld [vmem:[%s19713_s9 + $0x10] sm:$0xff]  }
 0x242   : >> { %25222 = vst [vmem:[#allocation154_spill] sm:$0xff] %v17224_v15  ;;  %25223 = vst [vmem:[#allocation155_spill] sm:$0xff] %v17232_v60  ;;  %v19723_v33 = vld [vmem:[#allocation2] sm:$0xff]  ;;  %v19725_v22 = vrot.slane %v4025_v0, %v4496_v20  ;;  %v19727_v28 = vrot.slane %v4025_v0, %v4564_v58  ;;  %v19729_v46 = vrot.slane %v4025_v0, %v4669_v3  ;;  %14742 = vmatprep.subr.bf16.mxu0 %v16826_v45  ;;  %v25240_v21 = vld [vmem:[#allocation80_spill] sm:$0xff]  ;;  %s3958_s24 = sadd.s32 1, %s17304_s26  }
 0x243   : >> { %25225 = vst [vmem:[#allocation43_spill] sm:$0xff] %v19723_v33  ;;  %v19731_v61 = vrot.slane %v4025_v0, %v4865_v43  ;;  %v19735_v32 = vrot.slane %v4025_v0, %v4933_v44  ;;  %25227 = vst [vmem:[#allocation157_spill] sm:$0xff] %v19738_v13  ;;  %14743 = vmatpush3.bf16.msra.mxu0 %v16826_v45  ;;  %v4227_v6 = vmul.f32 %v19718_v36, %v19723_v33  ;;  %s19786_s12 = scalar_lea.vmem %s23863_s1, %s11932_s10  ;;  %v16830_v18 = vld [vmem:[%s19713_s9 + $0x20] sm:$0xff]   ;;  %v25247_v5 = vld [vmem:[#allocation33_spill] sm:$0xff]  ;;  %p22371_p5 = scmp.ge.s32.totalorder %s3958_s24, 6  }
 0x244   : >> { %25226 = vst [vmem:[#allocation156_spill] sm:$0xff] %v19727_v28  ;;  %25228 = vst [vmem:[#allocation158_spill] sm:$0xff] %v19741_v56  ;;  %14744 = vmatprep.subr.bf16.mxu0 %v16827_v17  ;;  %v19746_v8 = vmax.f32 %v17292_v10, 0.0  ;;  %v4228_v20 = vmul.f32 %v19718_v36, %v19733_v48  ;;  %v4229_v58 = vmul.f32 %v19718_v36, %v19738_v13  ;;  %v19756_v40 = vmax.f32 %v17288_v57, 0.0  ;;  %s25950_s26 = smov %s3958_s24 }
 0x245   : >> { %v19754_v63 = vmul.f32 %v19727_v28, %v19738_v13  ;;  %v4230_v3 = vmul.f32 %v19718_v36, %v19741_v56  ;;  %v19762_v10 = vmul.f32 %v19727_v28, %v19741_v56  ;;  %v19764_v43 = vmax.f32 %v17284_v25, 0.0  ;;  %v16829_v25 = vld [vmem:[%s19713_s9 + $0x18] sm:$0xff]  }
 0x246   : >> { %v19768_v44 = vmul.f32 %v19735_v32, %v19746_v8  ;;  %v19772_v0 = vmul.f32 %v19727_v28, %v19746_v8  ;;  %v4020_v57 = vmax.f32 %v17184_v50, 0.0  ;;  %v19777_v45 = vmul.f32 %v19735_v32, %v19756_v40 }
 0x247   : >> { %14745 = vmatpush3.bf16.msra.mxu0 %v16827_v17  ;;  %v19781_v11 = vmul.f32 %v19727_v28, %v19756_v40  ;;  %v4022_v17 = vmax.f32 %v17176_v41, 0.0  ;;  %v4091_v50 = vrot.slane %v19723_v33, 7  ;;  %v4092_v29 = vrot.slane %v19733_v48, 7 }
 0x248   : >> { %14746 = vmatprep.subr.bf16.mxu0 %v16828_v39  ;;  %v4093_v52 = vrot.slane %v19738_v13, 7  ;;  %4056 = vst [vmem:[#allocation2 + $0xf8] sm:$0xff] %v4020_v57  ;;  %v4094_v42 = vrot.slane %v19741_v56, 7  ;;  %v19795_v7 = vrot.slane %v19746_v8, 7  ;;  %v19797_v24 = vrot.slane %v4020_v57, 7 }
 0x249   : >> { %4058 = vst [vmem:[#allocation2 + $0x108] sm:$0xff] %v4022_v17  ;;  %vm25230_vm7 = vcmp.lt.s32.totalorder %v25211_v59, 1  ;;  %v4292_v62 = vrot.slane %v19733_v48, 1  ;;  %v19806_v9 = vrot.slane %v19738_v13, 1  ;;  %v25238_v13 = vld [vmem:[#allocation69_spill] sm:$0xff]  ;;  %vm25241_vm9 = vnez %v25240_v21 }
 0x24a   : >> { %25229 = vst [vmem:[#allocation159_spill] sm:$0xff] %v19797_v24  ;;  %v4152_v41 = vsel %vm25230_vm7, %v4092_v29, %v4093_v52  ;;  %vm25231_vm6 = vmmov %vm25230_vm7  ;;  %vm25239_vm5 = vnez %v25238_v13  ;;  %vm25242_vm14 = vcmp.lt.s32.totalorder %v25211_v59, 7 }
 0x24b   : >> { %v4153_v1 = vsel %vm25231_vm6, %v4091_v50, %v4092_v29  ;;  %25232 = vst [vmem:[#allocation160_spill] sm:$0xff] %v19806_v9  ;;  %14747 = vmatpush3.bf16.msra.mxu0 %v16828_v39  ;;  %vm25233_vm3 = vmmov %vm25231_vm6  ;;  %v25236_v29 = vld [vmem:[#allocation76_spill] sm:$0xff]  ;;  %v4352_v21 = vsel %vm25242_vm14, %v4292_v62, %v19806_v9 }
 0x24c   : >> { %v19812_v57 = vsel %vm25233_vm3, %v4094_v42, %v19795_v7  ;;  %vm25234_vm2 = vmmov %vm25233_vm3  ;;  %vm25237_vm0 = vnez %v25236_v29  ;;  %14748 = vmatprep.subr.bf16.mxu0 %v16829_v25  ;;  %v4192_v51 = vmul.f32 %v19716_v49, %v4153_v1 }
 0x24d   : >> { %v4151_v26 = vsel %vm25234_vm2, %v4093_v52, %v4094_v42  ;;  %vm25235_vm8 = vmmov %vm25234_vm2  ;;  %v4157_v48 = vsel %vm25237_vm0, %v4152_v41, 0.0  ;;  %v4159_v23 = vsel %vm25241_vm9, %v19812_v57, 0.0  ;;  %vm25249_vm2 = vnez %v25247_v5 }
 0x24e   : >> { %v4154_v30 = vsel %vm25235_vm8, %v19797_v24, %v4091_v50  ;;  %v4193_v42 = vmul.f32 %v19716_v49, %v4157_v48  ;;  %v4194_v50 = vmul.f32 %v19716_v49, %v4151_v26  ;;  %v4294_v24 = vrot.slane %v19741_v56, 1  ;;  %vm25243_vm7 = vmmov %vm25242_vm14 }
 0x24f   : >> { %v4155_v39 = vsel %vm25239_vm5, %v4154_v30, 0.0  ;;  %v19832_v41 = vmul.f32 %v19716_v49, %v4159_v23  ;;  %v4260_v4 = vadd.f32 %v4228_v20, %v4192_v51  ;;  %v19835_v30 = vrot.slane %v19746_v8, 1  ;;  %14749 = vmatpush3.bf16.msra.mxu0 %v16829_v25  ;;  %vm25245_vm6 = vmmov %vm25243_vm7  ;;  %v16831_v51 = vld [vmem:[%s19713_s9 + $0x28] sm:$0xff]  }
 0x250   : >> { %v4191_v47 = vmul.f32 %v19716_v49, %v4155_v39  ;;  %v4261_v48 = vadd.f32 %v4229_v58, %v4193_v42  ;;  %v4351_v39 = vsel %vm25243_vm7, %v19806_v9, %v4294_v24  ;;  %v25244_v56 = vrot.slane %v19723_v33, 1  ;;  %14750 = vmatprep.subr.bf16.mxu0 %v16830_v18  ;;  %vm25246_vm3 = vmmov %vm25245_vm6  ;;  %v25250_v58 = vld [vmem:[#allocation40_spill] sm:$0xff] }
 0x251   : >> { %v4350_v20 = vsel %vm25246_vm3, %v4294_v24, %v19835_v30  ;;  %v4356_v25 = vsel %vm25249_vm2, %v4352_v21, 0.0  ;;  %vm25251_vm8 = vnez %v25250_v58  ;;  %v4262_v33 = vadd.f32 %v4230_v3, %v4194_v50  ;;  %v16832_v3 = vld [vmem:[%s19713_s9 + $0x30] sm:$0xff]  }
 0x252   : >> { %v4259_v1 = vadd.f32 %v4227_v6, %v4191_v47  ;;  %v4353_v23 = vsel %vm25245_vm6, %v25244_v56, %v4292_v62  ;;  %v4393_v6 = vmul.f32 %v19720_v53, %v4351_v39  ;;  %v4358_v42 = vsel %vm25251_vm8, %v4350_v20, 0.0 }
 0x253   : >> { %v4391_v47 = vmul.f32 %v19720_v53, %v4353_v23  ;;  %v4392_v9 = vmul.f32 %v19720_v53, %v4356_v25  ;;  %v19858_v62 = vrot.slane %v4022_v17, 7  ;;  %v4499_v56 = vmul.f32 %v19725_v22, %v4151_v26  ;;  %v19864_v23 = vld [vmem:[#allocation2 + $0x118] sm:$0xff]  ;;  %14751 = vmatpush3.bf16.msra.mxu0 %v16830_v18  ;;  %v19877_v25 = vld [vmem:[%s19708_s29 + $0x8] ss:$0 sm:$0xff] }
 0x254   : >> { %v4394_v24 = vmul.f32 %v19720_v53, %v4358_v42  ;;  %v4636_v21 = vsel %vm25249_vm2, %v4350_v20, 0.0  ;;  %25252 = vst [vmem:[#allocation161_spill] sm:$0xff] %v19864_v23  ;;  %v4425_v60 = vadd.f32 %v4393_v6, %v4261_v48  ;;  %vm25253_vm14 = vcmp.lt.s32.totalorder %v25211_v59, 1  ;;  %14752 = vmatprep.subr.bf16.mxu0 %v16831_v51 }
 0x255   : >> { %v4423_v5 = vadd.f32 %v4391_v47, %v4259_v1  ;;  %v4424_v15 = vadd.f32 %v4392_v9, %v4260_v4  ;;  %v4461_v17 = vsel %vm25253_vm14, %v19858_v62, %v4093_v52  ;;  %v4671_v26 = vmul.f32 %v19729_v46, %v4351_v39  ;;  %v16833_v39 = vld [vmem:[%s19713_s9 + $0x38] sm:$0xff]   ;;  %vm25254_vm7 = vmmov %vm25253_vm14 }
 0x256   : >> { %v4462_v50 = vsel %vm25239_vm5, %v4461_v17, 0.0  ;;  %v4672_v1 = vmul.f32 %v19729_v46, %v4636_v21  ;;  %v4768_v20 = vrot.slane %v19756_v40, 7  ;;  %v4769_v18 = vrot.slane %v19764_v43, 7  ;;  %vm25255_vm6 = vmmov %vm25254_vm7 }
 0x257   : >> { %v4498_v4 = vmul.f32 %v19725_v22, %v4462_v50  ;;  %v4531_v9 = vadd.f32 %v4499_v56, %v4424_v15  ;;  %v24307_v52 = vrot.slane %v19864_v23, 7  ;;  %v5000_v48 = vrot.slane %v19756_v40, 1  ;;  %14753 = vmatpush3.bf16.msra.mxu0 %v16831_v51  ;;  %vm25256_vm3 = vmmov %vm25255_vm6 }
 0x258   : >> { %v4426_v47 = vadd.f32 %v4394_v24, %v4262_v33  ;;  %v19885_v6 = vsel %vm25254_vm7, %v4768_v20, %v4769_v18  ;;  %v4829_v42 = vsel %vm25255_vm6, %v19795_v7, %v4768_v20  ;;  %v5001_v21 = vrot.slane %v19764_v43, 1  ;;  %14754 = vmatprep.subr.bf16.mxu0 %v16832_v3 }
 0x259   : >> { %v4530_v17 = vadd.f32 %v4498_v4, %v4423_v5  ;;  %v4599_v15 = vadd.f32 %v19762_v10, %v4531_v9  ;;  %v4830_v33 = vsel %vm25256_vm3, %v24307_v52, %v19795_v7  ;;  %v4868_v56 = vmul.f32 %v19731_v61, %v4829_v42 }
 0x25a   : >> { %v4831_v24 = vsel %vm25239_vm5, %v4830_v33, 0.0  ;;  %vm25257_vm14 = vcmp.lt.s32.totalorder %v25211_v59, 7  ;;  %v19913_v52 = vmax.f32 %v17280_v55, 0.0  ;;  %v19916_v50 = vmax.f32 %v25224_v54, 0.0 }
 0x25b   : >> { %v5060_v51 = vsel %vm25257_vm14, %v5000_v48, %v5001_v21  ;;  %vm25258_vm7 = vmmov %vm25257_vm14  ;;  %v4598_v5 = vadd.f32 %v19754_v63, %v4530_v17  ;;  %v4704_v20 = vadd.f32 %v4672_v1, %v4599_v15  ;;  %v4867_v7 = vmul.f32 %v19731_v61, %v4831_v24  ;;  %14755 = vmatpush3.bf16.msra.mxu0 %v16832_v3  ;;  %v25259_v1 = vld [vmem:[#allocation42_spill] sm:$0xff] }
 0x25c   : >> { %v5061_v10 = vsel %vm25258_vm7, %v19835_v30, %v5000_v48  ;;  %v5064_v4 = vsel %vm25249_vm2, %v5060_v51, 0.0  ;;  %v4196_v63 = vmul.f32 %v4829_v42, %v19716_v49  ;;  %vm25260_vm6 = vnez %v25259_v1  ;;  %14756 = vmatprep.subr.bf16.mxu0 %v16833_v39  ;;  %vm25261_vm14 = vmmov %vm25258_vm7 }
 0x25d   : >> { %v5099_v9 = vmul.f32 %v19877_v25, %v5061_v10  ;;  %v5100_v33 = vmul.f32 %v19877_v25, %v5064_v4  ;;  %v4703_v48 = vadd.f32 %v4671_v26, %v4598_v5  ;;  %v4900_v13 = vadd.f32 %v4868_v56, %v4704_v20 }
 0x25e   : >> { %v4360_v17 = vsel %vm25260_vm6, %v5060_v51, 0.0  ;;  %v4395_v15 = vmul.f32 %v5061_v10, %v19720_v53  ;;  %v4464_v55 = vsel %vm25237_vm0, %v19812_v57, 0.0  ;;  %v4501_v54 = vmul.f32 %v4829_v42, %v19725_v22 }
 0x25f   : >> { %v4396_v24 = vmul.f32 %v19720_v53, %v4360_v17  ;;  %v4899_v4 = vadd.f32 %v4867_v7, %v4703_v48  ;;  %v4968_v26 = vadd.f32 %v19777_v45, %v4900_v13  ;;  %v4500_v3 = vmul.f32 %v19725_v22, %v4464_v55  ;;  %14757 = vmatpush3.bf16.msra.mxu0 %v16833_v39 }
 0x260   : >> { %v4638_v56 = vsel %vm25251_vm8, %v5060_v51, 0.0  ;;  %v4533_v5 = vadd.f32 %v4501_v54, %v4426_v47  ;;  %v4673_v20 = vmul.f32 %v5061_v10, %v19729_v46  ;;  %v24312_v17 = vrot.slane %v19913_v52, 7 }
 0x261   : >> { %v4674_v28 = vmul.f32 %v19729_v46, %v4638_v56  ;;  %v4967_v57 = vadd.f32 %v19768_v44, %v4899_v4  ;;  %v5132_v23 = vadd.f32 %v5100_v33, %v4968_v26  ;;  %v4532_v42 = vadd.f32 %v4500_v3, %v4425_v60 }
 0x262   : >> { %v4833_v13 = vsel %vm25237_vm0, %v19885_v6, 0.0  ;;  %v4601_v45 = vadd.f32 %v19781_v11, %v4533_v5  ;;  %v4827_v47 = vsel %vm25256_vm3, %v4769_v18, %v24312_v17  ;;  %v4937_v39 = vmul.f32 %v19735_v32, %v19764_v43 }
 0x263   : >> { %v4869_v51 = vmul.f32 %v19731_v61, %v4833_v13  ;;  %v5131_v10 = vadd.f32 %v5099_v9, %v4967_v57  ;;  %v5164_v44 = vmax.f32 %v5132_v23, 0.0  ;;  %v4600_v60 = vadd.f32 %v19772_v0, %v4532_v42  ;;  %v25262_v42 = vld [vmem:[#allocation88_spill] sm:$0xff] }
 0x264   : >> { %v4870_v7 = vmul.f32 %v19731_v61, %v4827_v47  ;;  %v4706_v33 = vadd.f32 %v4674_v28, %v4601_v45  ;;  %v4938_v11 = vmul.f32 %v19735_v32, %v19913_v52  ;;  %v5002_v48 = vrot.slane %v19913_v52, 1 }
 0x265   : >> { %v5003_v55 = vrot.slane %v19916_v50, 1  ;;  %v5163_v18 = vmax.f32 %v5131_v10, 0.0  ;;  %v4705_v54 = vadd.f32 %v4673_v20, %v4600_v60  ;;  %v19957_v0 = vmax.f32 %v17272_v27, 0.0 }
 0x266   : >> { %v4902_v4 = vadd.f32 %v4870_v7, %v4706_v33  ;;  %v5059_v23 = vsel %vm25258_vm7, %v5001_v21, %v5002_v48  ;;  %v19964_v57 = vmax.f32 %v17268_v34, 0.0  ;;  %vm25263_vm3 = vnez %v25262_v42 }
 0x267   : >> { %v5058_v26 = vsel %vm25261_vm14, %v5002_v48, %v5003_v55  ;;  %v5195_v28 = vpack.c.bf16 %v5164_v44, %v5163_v18  ;;  %v4901_v9 = vadd.f32 %v4869_v51, %v4705_v54  ;;  %v5101_v56 = vmul.f32 %v19877_v25, %v5059_v23  ;;  %v25264_v44 = vld [vmem:[#allocation49_spill] sm:$0xff] }
 0x268   : >> { %v5066_v3 = vsel %vm25251_vm8, %v5058_v26, 0.0  ;;  %v4970_v5 = vadd.f32 %v4938_v11, %v4902_v4  ;;  %v4161_v21 = vsel %vm25263_vm3, %v19885_v6, 0.0  ;;  %v19970_v13 = vmul.f32 %v4827_v47, %v19716_v49 }
 0x269   : >> { %v5102_v20 = vmul.f32 %v19877_v25, %v5066_v3  ;;  %14758 = vmatprep.mubr.bf16.mxu0 %v5195_v28  ;;  %v4969_v27 = vadd.f32 %v4937_v39, %v4901_v9  ;;  %v4231_v45 = vmul.f32 %v19718_v36, %v19746_v8  ;;  %v4232_v51 = vmul.f32 %v19718_v36, %v19756_v40  ;;  %v25267_v9 = vld [vmem:[#allocation156_spill] sm:$0xff] }
 0x26a   : >> { %vm25265_vm14 = vnez %v25264_v44  ;;  %v19979_v60 = vmul.f32 %v5059_v23, %v19720_v53  ;;  %v4466_v39 = vsel %vm25241_vm9, %v19885_v6, 0.0  ;;  %v4503_v28 = vmul.f32 %v4827_v47, %v19725_v22 }
 0x26b   : >> { %v5134_v10 = vadd.f32 %v5102_v20, %v4970_v5  ;;  %v4362_v34 = vsel %vm25265_vm14, %v5058_v26, 0.0  ;;  %v5133_v33 = vadd.f32 %v5101_v56, %v4969_v27  ;;  %v4263_v11 = vadd.f32 %v4231_v45, %v19832_v41 }
 0x26c   : >> { %v4264_v48 = vadd.f32 %v4232_v51, %v4196_v63  ;;  %v4398_v18 = vmul.f32 %v19720_v53, %v4362_v34  ;;  %v4502_v4 = vmul.f32 %v19725_v22, %v4466_v39  ;;  %v4570_v3 = vmul.f32 %v25267_v9, %v19764_v43 }
 0x26d   : >> { %v5166_v54 = vmax.f32 %v5134_v10, 0.0  ;;  %v5165_v5 = vmax.f32 %v5133_v33, 0.0  ;;  %v4427_v20 = vadd.f32 %v4395_v15, %v4263_v11  ;;  %v4571_v6 = vmul.f32 %v25267_v9, %v19913_v52 }
 0x26e   : >> { %v4428_v17 = vadd.f32 %v4396_v24, %v4264_v48  ;;  %v4640_v41 = vsel %vm25260_vm6, %v5058_v26, 0.0  ;;  %v4675_v63 = vmul.f32 %v5059_v23, %v19729_v46  ;;  %v4771_v56 = vrot.slane %v19916_v50, 7 }
 0x26f   : >> { %v4772_v27 = vrot.slane %v19957_v0, 7  ;;  %v5196_v45 = vpack.c.bf16 %v5166_v54, %v5165_v5  ;;  %v4534_v47 = vadd.f32 %v4502_v4, %v4427_v20  ;;  %v4676_v10 = vmul.f32 %v19729_v46, %v4640_v41 }
 0x270   : >> { %v4535_v51 = vadd.f32 %v4503_v28, %v4428_v17  ;;  %vm25268_vm7 = vcmp.lt.s32.totalorder %v25211_v59, 1  ;;  %v25269_v24 = vrot.slane %v19913_v52, 7  ;;  %v4939_v26 = vmul.f32 %v19735_v32, %v19916_v50 }
 0x271   : >> { %v4825_v15 = vsel %vm25268_vm7, %v4771_v56, %v4772_v27  ;;  %vm25270_vm0 = vmmov %vm25268_vm7  ;;  %v4940_v23 = vmul.f32 %v19735_v32, %v19957_v0  ;;  %14759 = vmatmul.mubr.bf16.vlgmr.msra.gmra.mrb[0].mxu0 %v5196_v45  ;;  %v4602_v39 = vadd.f32 %v4570_v3, %v4534_v47  ;;  %v5004_v54 = vrot.slane %v19957_v0, 1 }
 0x272   : >> { %v20004_v34 = vsel %vm25270_vm0, %v25269_v24, %v4771_v56  ;;  %v4603_v17 = vadd.f32 %v4571_v6, %v4535_v51  ;;  %v4872_v11 = vmul.f32 %v19731_v61, %v4825_v15  ;;  %v5005_v4 = vrot.slane %v19964_v57, 1 }
 0x273   : >> { %v4835_v33 = vsel %vm25241_vm9, %v20004_v34, 0.0  ;;  %v4707_v28 = vadd.f32 %v4675_v63, %v4602_v39  ;;  %vm25271_vm0 = vcmp.lt.s32.totalorder %v25211_v59, 7  ;;  %v20022_v6 = vmax.f32 %v17260_v37, 0.0 }
 0x274   : >> { %v4871_v48 = vmul.f32 %v19731_v61, %v4835_v33  ;;  %v4708_v5 = vadd.f32 %v4676_v10, %v4603_v17  ;;  %v5056_v20 = vsel %vm25271_vm0, %v5004_v54, %v5005_v4  ;;  %vm25272_vm7 = vmmov %vm25271_vm0  ;;  %v20029_v63 = vmax.f32 %v17264_v16, 0.0  ;;  %v25273_v10 = vld [vmem:[#allocation91_spill] sm:$0xff] }
 0x275   : >> { %v5057_v3 = vsel %vm25272_vm7, %v5003_v55, %v5004_v54  ;;  %v5068_v45 = vsel %vm25260_vm6, %v5056_v20, 0.0  ;;  %vm25275_vm0 = vnez %v25273_v10  ;;  %v4197_v55 = vmul.f32 %v19716_v49, %v4161_v21  ;;  %v25276_v54 = vld [vmem:[#allocation50_spill] sm:$0xff] }
 0x276   : >> { %v4903_v41 = vadd.f32 %v4871_v48, %v4707_v28  ;;  %v4904_v56 = vadd.f32 %v4872_v11, %v4708_v5  ;;  %v5103_v47 = vmul.f32 %v19877_v25, %v5057_v3  ;;  %v5104_v51 = vmul.f32 %v19877_v25, %v5068_v45 }
 0x277   : >> { %v4163_v39 = vsel %vm25275_vm0, %v20004_v34, 0.0  ;;  %v20036_v33 = vmul.f32 %v4825_v15, %v19716_v49  ;;  %v4233_v11 = vmul.f32 %v19718_v36, %v19764_v43  ;;  %v4234_v48 = vmul.f32 %v19718_v36, %v19913_v52 }
 0x278   : >> { %v4971_v37 = vadd.f32 %v4939_v26, %v4903_v41  ;;  %v4972_v17 = vadd.f32 %v4940_v23, %v4904_v56  ;;  %vm25278_vm7 = vnez %v25276_v54  ;;  %v20045_v5 = vmul.f32 %v5057_v3, %v19720_v53 }
 0x279   : >> { %v4364_v16 = vsel %vm25278_vm7, %v5056_v20, 0.0  ;;  %v4468_v21 = vsel %vm25263_vm3, %v20004_v34, 0.0  ;;  %v4265_v41 = vadd.f32 %v4233_v11, %v4197_v55  ;;  %v4266_v45 = vadd.f32 %v4234_v48, %v19970_v13 }
 0x27a   : >> { %v5135_v26 = vadd.f32 %v5103_v47, %v4971_v37  ;;  %v5136_v23 = vadd.f32 %v5104_v51, %v4972_v17  ;;  %v20051_v56 = vmul.f32 %v19720_v53, %v4364_v16  ;;  %v4504_v10 = vmul.f32 %v19725_v22, %v4468_v21 }
 0x27b   : >> { %v4505_v54 = vmul.f32 %v4825_v15, %v19725_v22  ;;  %v4572_v1 = vmul.f32 %v25267_v9, %v19916_v50  ;;  %v4429_v58 = vadd.f32 %v19979_v60, %v4265_v41  ;;  %v4573_v34 = vmul.f32 %v25267_v9, %v19957_v0 }
 0x27c   : >> { %v5167_v7 = vmax.f32 %v5135_v26, 0.0  ;;  %v5168_v29 = vmax.f32 %v5136_v23, 0.0  ;;  %v4430_v47 = vadd.f32 %v4398_v18, %v4266_v45  ;;  %v4642_v51 = vsel %vm25265_vm14, %v5056_v20, 0.0 }
 0x27d   : >> { %v4677_v13 = vmul.f32 %v5057_v3, %v19729_v46  ;;  %v4773_v55 = vrot.slane %v19964_v57, 7  ;;  %v4536_v15 = vadd.f32 %v4504_v10, %v4429_v58  ;;  %v4678_v17 = vmul.f32 %v19729_v46, %v4642_v51 }
 0x27e   : >> { %v5197_v37 = vpack.c.bf16 %v5168_v29, %v5167_v7  ;;  %v4774_v11 = vrot.slane %v20029_v63, 7  ;;  %v4537_v48 = vadd.f32 %v4505_v54, %v4430_v47  ;;  %vm25279_vm2 = vcmp.lt.s32.totalorder %v25211_v59, 1 }
 0x27f   : >> { %v20069_v60 = vsel %vm25279_vm2, %v4772_v27, %v4773_v55  ;;  %v4941_v18 = vmul.f32 %v19735_v32, %v19964_v57  ;;  %v4942_v20 = vmul.f32 %v19735_v32, %v20029_v63  ;;  %v4604_v3 = vadd.f32 %v4572_v1, %v4536_v15  ;;  %vm25280_vm5 = vmmov %vm25279_vm2 }
 0x280   : >> { %14762 = vmatprep.mubr.bf16.mxu0 %v5197_v37  ;;  %v4823_v29 = vsel %vm25280_vm5, %v4773_v55, %v4774_v11  ;;  %v4837_v58 = vsel %vm25263_vm3, %v20069_v60, 0.0  ;;  %v5006_v7 = vrot.slane %v20029_v63, 1  ;;  %v4605_v16 = vadd.f32 %v4573_v34, %v4537_v48 }
 0x281   : >> { %v4873_v27 = vmul.f32 %v19731_v61, %v4837_v58  ;;  %v4874_v21 = vmul.f32 %v19731_v61, %v4823_v29  ;;  %v5007_v26 = vrot.slane %v20022_v6, 1  ;;  %v4709_v23 = vadd.f32 %v4677_v13, %v4604_v3 }
 0x282   : >> { %vm25281_vm2 = vcmp.lt.s32.totalorder %v25211_v59, 7  ;;  %v4710_v41 = vadd.f32 %v4678_v17, %v4605_v16  ;;  %v20092_v47 = vmax.f32 %v17256_v14, 0.0  ;;  %v20096_v13 = vmax.f32 %v17252_v19, 0.0  ;;  %v25286_v16 = vld [vmem:[#allocation59_spill] sm:$0xff] }
 0x283   : >> { %v5055_v1 = vsel %vm25281_vm2, %v5005_v4, %v5006_v7  ;;  %vm25282_vm5 = vmmov %vm25281_vm2  ;;  %v4905_v54 = vadd.f32 %v4873_v27, %v4709_v23  ;;  %v25283_v4 = vld [vmem:[#allocation93_spill] sm:$0xff]  ;;  %v4199_v48 = vmul.f32 %v19716_v49, %v4163_v39  ;;  %v20103_v3 = vmul.f32 %v4823_v29, %v19716_v49 }
 0x284   : >> { %v5054_v45 = vsel %vm25282_vm5, %v5006_v7, %v5007_v26  ;;  %v5105_v10 = vmul.f32 %v19877_v25, %v5055_v1  ;;  %v4906_v51 = vadd.f32 %v4874_v21, %v4710_v41  ;;  %vm25285_vm2 = vnez %v25283_v4 }
 0x285   : >> { %v5070_v34 = vsel %vm25265_vm14, %v5054_v45, 0.0  ;;  %v4165_v37 = vsel %vm25285_vm2, %v20069_v60, 0.0  ;;  %v4973_v15 = vadd.f32 %v4941_v18, %v4905_v54  ;;  %v4235_v14 = vmul.f32 %v19718_v36, %v19916_v50 }
 0x286   : >> { %v5106_v55 = vmul.f32 %v19877_v25, %v5070_v34  ;;  %v4974_v58 = vadd.f32 %v4942_v20, %v4906_v51  ;;  %v4236_v7 = vmul.f32 %v19718_v36, %v19957_v0  ;;  %vm25288_vm5 = vnez %v25286_v16 }
 0x287   : >> { %v4366_v19 = vsel %vm25288_vm5, %v5054_v45, 0.0  ;;  %v20112_v27 = vmul.f32 %v5055_v1, %v19720_v53  ;;  %v5137_v21 = vadd.f32 %v5105_v10, %v4973_v15  ;;  %v4267_v18 = vadd.f32 %v4235_v14, %v4199_v48 }
 0x288   : >> { %v20115_v39 = vmul.f32 %v19720_v53, %v4366_v19  ;;  %v4470_v23 = vsel %vm25275_vm0, %v20069_v60, 0.0  ;;  %v5138_v41 = vadd.f32 %v5106_v55, %v4974_v58  ;;  %v4268_v20 = vadd.f32 %v4236_v7, %v20036_v33 }
 0x289   : >> { %v4506_v54 = vmul.f32 %v19725_v22, %v4470_v23  ;;  %v4507_v34 = vmul.f32 %v4823_v29, %v19725_v22  ;;  %v5169_v51 = vmax.f32 %v5137_v21, 0.0  ;;  %v4431_v4 = vadd.f32 %v20045_v5, %v4267_v18 }
 0x28a   : >> { %v4574_v10 = vmul.f32 %v25267_v9, %v19964_v57  ;;  %v4575_v15 = vmul.f32 %v25267_v9, %v20029_v63  ;;  %v5170_v48 = vmax.f32 %v5138_v41, 0.0  ;;  %v4432_v14 = vadd.f32 %v20051_v56, %v4268_v20 }
 0x28b   : >> { %v4644_v60 = vsel %vm25278_vm7, %v5054_v45, 0.0  ;;  %v4679_v33 = vmul.f32 %v5055_v1, %v19729_v46  ;;  %v4538_v55 = vadd.f32 %v4506_v54, %v4431_v4  ;;  %v4775_v58 = vrot.slane %v20022_v6, 7 }
 0x28c   : >> { %v4680_v29 = vmul.f32 %v19729_v46, %v4644_v60  ;;  %v4776_v5 = vrot.slane %v20092_v47, 7  ;;  %v5198_v7 = vpack.c.bf16 %v5170_v48, %v5169_v51  ;;  %v4539_v16 = vadd.f32 %v4507_v34, %v4432_v14 }
 0x28d   : >> { %v4943_v19 = vmul.f32 %v19735_v32, %v20022_v6  ;;  %v4944_v56 = vmul.f32 %v19735_v32, %v20092_v47  ;;  %v4606_v21 = vadd.f32 %v4574_v10, %v4538_v55  ;;  %vm25289_vm3 = vcmp.lt.s32.totalorder %v25211_v59, 1 }
 0x28e   : >> { %v4821_v45 = vsel %vm25289_vm3, %v4775_v58, %v4776_v5  ;;  %vm25290_vm6 = vmmov %vm25289_vm3  ;;  %v5008_v18 = vrot.slane %v20092_v47, 1  ;;  %14763 = vmatmul.mubr.bf16.gmra.mrb[4].mxu0 %v5198_v7  ;;  %v4607_v23 = vadd.f32 %v4575_v15, %v4539_v16  ;;  %v5009_v54 = vrot.slane %v20096_v13, 1 }
 0x28f   : >> { %v20143_v1 = vsel %vm25290_vm6, %v4774_v11, %v4775_v58  ;;  %v4876_v20 = vmul.f32 %v19731_v61, %v4821_v45  ;;  %v4711_v34 = vadd.f32 %v4679_v33, %v4606_v21  ;;  %vm25291_vm3 = vcmp.lt.s32.totalorder %v25211_v59, 7 }
 0x290   : >> { %v4839_v41 = vsel %vm25275_vm0, %v20143_v1, 0.0  ;;  %v5053_v4 = vsel %vm25291_vm3, %v5007_v26, %v5008_v18  ;;  %v4712_v11 = vadd.f32 %v4680_v29, %v4607_v23  ;;  %vm25292_vm6 = vmmov %vm25291_vm3  ;;  %v20161_v33 = vmax.f32 %v17248_v31, 0.0  ;;  %v25294_v29 = vld [vmem:[#allocation103_spill] sm:$0xff] }
 0x291   : >> { %v4875_v51 = vmul.f32 %v19731_v61, %v4839_v41  ;;  %v5052_v10 = vsel %vm25292_vm6, %v5008_v18, %v5009_v54  ;;  %v5107_v15 = vmul.f32 %v19877_v25, %v5053_v4  ;;  %v20164_v58 = vmax.f32 %v17244_v12, 0.0  ;;  %v25296_v41 = vld [vmem:[#allocation61_spill] sm:$0xff] }
 0x292   : >> { %v5072_v14 = vsel %vm25278_vm7, %v5052_v10, 0.0  ;;  %v4908_v60 = vadd.f32 %v4876_v20, %v4712_v11  ;;  %25293 = vst [vmem:[#allocation156_spill] sm:$0xff] %v20161_v33  ;;  %vm25295_vm3 = vnez %v25294_v29  ;;  %v4201_v16 = vmul.f32 %v19716_v49, %v4165_v37 }
 0x293   : >> { %v4907_v48 = vadd.f32 %v4875_v51, %v4711_v34  ;;  %v5108_v55 = vmul.f32 %v19877_v25, %v5072_v14  ;;  %v4167_v7 = vsel %vm25295_vm3, %v20143_v1, 0.0  ;;  %v20171_v21 = vmul.f32 %v4821_v45, %v19716_v49 }
 0x294   : >> { %v4976_v18 = vadd.f32 %v4944_v56, %v4908_v60  ;;  %v4237_v23 = vmul.f32 %v19718_v36, %v19964_v57  ;;  %v4238_v31 = vmul.f32 %v19718_v36, %v20029_v63  ;;  %vm25298_vm6 = vnez %v25296_v41 }
 0x295   : >> { %v4975_v26 = vadd.f32 %v4943_v19, %v4907_v48  ;;  %v4368_v12 = vsel %vm25298_vm6, %v5052_v10, 0.0  ;;  %v20180_v34 = vmul.f32 %v5053_v4, %v19720_v53  ;;  %v4472_v37 = vsel %vm25285_vm2, %v20143_v1, 0.0 }
 0x296   : >> { %v20183_v51 = vmul.f32 %v19720_v53, %v4368_v12  ;;  %v5140_v56 = vadd.f32 %v5108_v55, %v4976_v18  ;;  %v4269_v11 = vadd.f32 %v4237_v23, %v4201_v16  ;;  %v4270_v48 = vadd.f32 %v4238_v31, %v20103_v3 }
 0x297   : >> { %v5139_v19 = vadd.f32 %v5107_v15, %v4975_v26  ;;  %v4508_v14 = vmul.f32 %v19725_v22, %v4472_v37  ;;  %v4509_v41 = vmul.f32 %v4821_v45, %v19725_v22  ;;  %v4576_v15 = vmul.f32 %v25267_v9, %v20022_v6 }
 0x298   : >> { %v4577_v26 = vmul.f32 %v25267_v9, %v20092_v47  ;;  %v5172_v12 = vmax.f32 %v5140_v56, 0.0  ;;  %v4433_v24 = vadd.f32 %v20112_v27, %v4269_v11  ;;  %v4434_v1 = vadd.f32 %v20115_v39, %v4270_v48 }
 0x299   : >> { %v5171_v60 = vmax.f32 %v5139_v19, 0.0  ;;  %v4646_v55 = vsel %vm25288_vm5, %v5052_v10, 0.0  ;;  %v4681_v3 = vmul.f32 %v5053_v4, %v19729_v46  ;;  %v4777_v45 = vrot.slane %v20096_v13, 7 }
 0x29a   : >> { %v4682_v16 = vmul.f32 %v19729_v46, %v4646_v55  ;;  %v4778_v18 = vrot.slane %v20161_v33, 7  ;;  %v4540_v31 = vadd.f32 %v4508_v14, %v4433_v24  ;;  %v4541_v19 = vadd.f32 %v4509_v41, %v4434_v1 }
 0x29b   : >> { %v5199_v23 = vpack.c.bf16 %v5172_v12, %v5171_v60  ;;  %v4945_v37 = vmul.f32 %v19735_v32, %v20096_v13  ;;  %vm25299_vm0 = vcmp.lt.s32.totalorder %v25211_v59, 1  ;;  %v4946_v4 = vmul.f32 %v19735_v32, %v20161_v33 }
 0x29c   : >> { %v4819_v27 = vsel %vm25299_vm0, %v4777_v45, %v4778_v18  ;;  %vm25300_vm7 = vmmov %vm25299_vm0  ;;  %v5010_v10 = vrot.slane %v20161_v33, 1  ;;  %v4608_v56 = vadd.f32 %v4576_v15, %v4540_v31  ;;  %v4609_v11 = vadd.f32 %v4577_v26, %v4541_v19  ;;  %v25303_v26 = vld [vmem:[#allocation106_spill] sm:$0xff] }
 0x29d   : >> { %v20209_v39 = vsel %vm25300_vm7, %v4776_v5, %v4777_v45  ;;  %14766 = vmatprep.mubr.bf16.mxu0 %v5199_v23  ;;  %v4878_v48 = vmul.f32 %v19731_v61, %v4819_v27  ;;  %v5011_v60 = vrot.slane %v20164_v58, 1  ;;  %vm25301_vm0 = vcmp.lt.s32.totalorder %v25211_v59, 7 }
 0x29e   : >> { %v4841_v24 = vsel %vm25285_vm2, %v20209_v39, 0.0  ;;  %v5051_v5 = vsel %vm25301_vm0, %v5009_v54, %v5010_v10  ;;  %v4713_v41 = vadd.f32 %v4681_v3, %v4608_v56  ;;  %v4714_v12 = vadd.f32 %v4682_v16, %v4609_v11  ;;  %vm25302_vm7 = vmmov %vm25301_vm0 }
 0x29f   : >> { %v4877_v14 = vmul.f32 %v19731_v61, %v4841_v24  ;;  %v5109_v1 = vmul.f32 %v19877_v25, %v5051_v5  ;;  %v5050_v15 = vsel %vm25302_vm7, %v5010_v10, %v5011_v60  ;;  %vm25304_vm8 = vnez %v25303_v26 }
 0x2a0   : >> { %v4169_v55 = vsel %vm25304_vm8, %v20209_v39, 0.0  ;;  %v4910_v23 = vadd.f32 %v4878_v48, %v4714_v12  ;;  %v5074_v31 = vsel %vm25288_vm5, %v5050_v15, 0.0  ;;  %v20231_v19 = vmax.f32 %v17240_v38, 0.0  ;;  %v25307_v38 = vld [vmem:[#allocation68_spill] sm:$0xff] }
 0x2a1   : >> { %v4909_v45 = vadd.f32 %v4877_v14, %v4713_v41  ;;  %v5110_v54 = vmul.f32 %v19877_v25, %v5074_v31  ;;  %v20235_v3 = vmax.f32 %v17236_v35, 0.0  ;;  %v4203_v16 = vmul.f32 %v19716_v49, %v4167_v7 }
 0x2a2   : >> { %25305 = vst [vmem:[#allocation162_spill] sm:$0xff] %v20231_v19  ;;  %v20239_v10 = vmul.f32 %v4819_v27, %v19716_v49  ;;  %v4978_v11 = vadd.f32 %v4946_v4, %v4910_v23  ;;  %v4239_v24 = vmul.f32 %v19718_v36, %v20022_v6  ;;  %v4240_v48 = vmul.f32 %v19718_v36, %v20092_v47 }
 0x2a3   : >> { %25306 = vst [vmem:[#allocation163_spill] sm:$0xff] %v20235_v3  ;;  %v4977_v56 = vadd.f32 %v4945_v37, %v4909_v45  ;;  %vm25309_vm0 = vnez %v25307_v38  ;;  %v20248_v41 = vmul.f32 %v5051_v5, %v19720_v53  ;;  %v4474_v35 = vsel %vm25295_vm3, %v20209_v39, 0.0 }
 0x2a4   : >> { %v4370_v14 = vsel %vm25309_vm0, %v5050_v15, 0.0  ;;  %v4511_v7 = vmul.f32 %v4819_v27, %v19725_v22  ;;  %v5142_v4 = vadd.f32 %v5110_v54, %v4978_v11  ;;  %v4271_v12 = vadd.f32 %v4239_v24, %v4203_v16 }
 0x2a5   : >> { %v5141_v37 = vadd.f32 %v5109_v1, %v4977_v56  ;;  %v4272_v45 = vadd.f32 %v4240_v48, %v20171_v21  ;;  %v4406_v23 = vmul.f32 %v19720_v53, %v4370_v14  ;;  %v4510_v31 = vmul.f32 %v19725_v22, %v4474_v35 }
 0x2a6   : >> { %v4578_v38 = vmul.f32 %v25267_v9, %v20096_v13  ;;  %v4579_v28 = vmul.f32 %v25267_v9, %v20161_v33  ;;  %v5174_v44 = vmax.f32 %v5142_v4, 0.0  ;;  %v4435_v39 = vadd.f32 %v20180_v34, %v4271_v12 }
 0x2a7   : >> { %v5173_v42 = vmax.f32 %v5141_v37, 0.0  ;;  %v4436_v27 = vadd.f32 %v20183_v51, %v4272_v45  ;;  %v4648_v1 = vsel %vm25298_vm6, %v5050_v15, 0.0  ;;  %v4683_v21 = vmul.f32 %v5051_v5, %v19729_v46 }
 0x2a8   : >> { %v4779_v54 = vrot.slane %v20164_v58, 7  ;;  %v4780_v16 = vrot.slane %v20231_v19, 7  ;;  %v4542_v11 = vadd.f32 %v4510_v31, %v4435_v39  ;;  %v4684_v48 = vmul.f32 %v19729_v46, %v4648_v1 }
 0x2a9   : >> { %v5200_v56 = vpack.c.bf16 %v5174_v44, %v5173_v42  ;;  %v4543_v24 = vadd.f32 %v4511_v7, %v4436_v27  ;;  %vm25310_vm7 = vcmp.lt.s32.totalorder %v25211_v59, 1  ;;  %v4947_v5 = vmul.f32 %v19735_v32, %v20164_v58 }
 0x2aa   : >> { %v4817_v34 = vsel %vm25310_vm7, %v4779_v54, %v4780_v16  ;;  %vm25311_vm2 = vmmov %vm25310_vm7  ;;  %v4948_v15 = vmul.f32 %v19735_v32, %v20231_v19  ;;  %v4610_v42 = vadd.f32 %v4578_v38, %v4542_v11  ;;  %v5013_v37 = vrot.slane %v20235_v3, 1  ;;  %v25317_v11 = vld [vmem:[#allocation109_spill] sm:$0xff] }
 0x2ab   : >> { %v20275_v51 = vsel %vm25311_vm2, %v4778_v18, %v4779_v54  ;;  %14767 = vmatmul.mubr.bf16.gmra.mrb[8].mxu0 %v5200_v56  ;;  %v4611_v44 = vadd.f32 %v4579_v28, %v4543_v24  ;;  %v4880_v35 = vmul.f32 %v19731_v61, %v4817_v34  ;;  %v5012_v18 = vrot.slane %v20231_v19, 1  ;;  %v25315_v54 = vld [vmem:[#allocation155_spill] sm:$0xff] }
 0x2ac   : >> { %v4843_v14 = vsel %vm25295_vm3, %v20275_v51, 0.0  ;;  %v4715_v4 = vadd.f32 %v4683_v21, %v4610_v42  ;;  %vm25312_vm2 = vcmp.lt.s32.totalorder %v25211_v59, 7  ;;  %v20295_v31 = vmax.f32 %v17228_v2, 0.0 }
 0x2ad   : >> { %v4879_v7 = vmul.f32 %v19731_v61, %v4843_v14  ;;  %v4716_v12 = vadd.f32 %v4684_v48, %v4611_v44  ;;  %v5048_v45 = vsel %vm25312_vm2, %v5012_v18, %v5013_v37  ;;  %vm25313_vm7 = vmmov %vm25312_vm2  ;;  %v20302_v56 = vmax.f32 %v25315_v54, 0.0  ;;  %v25319_v14 = vld [vmem:[#allocation70_spill] sm:$0xff] }
 0x2ae   : >> { %v5049_v28 = vsel %vm25313_vm7, %v5011_v60, %v5012_v18  ;;  %25314 = vst [vmem:[#allocation164_spill] sm:$0xff] %v20295_v31  ;;  %v5076_v27 = vsel %vm25298_vm6, %v5048_v45, 0.0  ;;  %vm25318_vm2 = vnez %v25317_v11  ;;  %v4205_v60 = vmul.f32 %v19716_v49, %v4169_v55 }
 0x2af   : >> { %v4911_v38 = vadd.f32 %v4879_v7, %v4715_v4  ;;  %v4912_v39 = vadd.f32 %v4880_v35, %v4716_v12  ;;  %v5111_v1 = vmul.f32 %v19877_v25, %v5049_v28  ;;  %v5112_v21 = vmul.f32 %v19877_v25, %v5076_v27  ;;  %25316 = vst [vmem:[#allocation155_spill] sm:$0xff] %v20302_v56 }
 0x2b0   : >> { %v20309_v42 = vmul.f32 %v4817_v34, %v19716_v49  ;;  %v4241_v44 = vmul.f32 %v19718_v36, %v20096_v13  ;;  %v4242_v25 = vmul.f32 %v19718_v36, %v20161_v33  ;;  %vm25321_vm7 = vnez %v25319_v14 }
 0x2b1   : >> { %v4979_v2 = vadd.f32 %v4947_v5, %v4911_v38  ;;  %v4980_v48 = vadd.f32 %v4948_v15, %v4912_v39  ;;  %v4372_v35 = vsel %vm25321_vm7, %v5048_v45, 0.0  ;;  %v20318_v18 = vmul.f32 %v5049_v28, %v19720_v53 }
 0x2b2   : >> { %v4476_v55 = vsel %vm25304_vm8, %v20275_v51, 0.0  ;;  %v4273_v4 = vadd.f32 %v4241_v44, %v4205_v60  ;;  %v20324_v12 = vmul.f32 %v19720_v53, %v4372_v35  ;;  %v4274_v38 = vadd.f32 %v4242_v25, %v20239_v10  ;;  %v16834_v44 = vld [vmem:[%s19786_s12 + $0x280] sm:$0xff]  }
 0x2b3   : >> { %v5143_v5 = vadd.f32 %v5111_v1, %v4979_v2  ;;  %v5144_v15 = vadd.f32 %v5112_v21, %v4980_v48  ;;  %v4512_v39 = vmul.f32 %v19725_v22, %v4476_v55  ;;  %v4513_v27 = vmul.f32 %v4817_v34, %v19725_v22  ;;  %v16835_v25 = vld [vmem:[%s19786_s12 + $0x340] sm:$0xff]   ;;  %14790 = vmatprep.subr.bf16.mxu0 %v16834_v44 }
 0x2b4   : >> { %v4580_v54 = vmul.f32 %v25267_v9, %v20164_v58  ;;  %v4437_v21 = vadd.f32 %v20248_v41, %v4273_v4  ;;  %v4581_v60 = vmul.f32 %v25267_v9, %v20231_v19  ;;  %v4438_v2 = vadd.f32 %v4406_v23, %v4274_v38  ;;  %v16836_v41 = vld [vmem:[%s19786_s12 + $0x288] sm:$0xff]   ;;  %14982 = vmatprep.subr.bf16.mxu1 %v16835_v25 }
 0x2b5   : >> { %v5175_v14 = vmax.f32 %v5143_v5, 0.0  ;;  %v5176_v1 = vmax.f32 %v5144_v15, 0.0  ;;  %v4650_v10 = vsel %vm25309_vm0, %v5048_v45, 0.0  ;;  %v4685_v48 = vmul.f32 %v5049_v28, %v19729_v46  ;;  %v16837_v4 = vld [vmem:[%s19786_s12 + $0x348] sm:$0xff]   ;;  %14791 = vmatpush3.bf16.msra.mxu0 %v16834_v44  ;;  %14983 = vmatpush3.bf16.msra.mxu1 %v16835_v25  ;;  %v16839_v25 = vld [vmem:[%s19786_s12 + $0x350] sm:$0xff]  }
 0x2b6   : >> { %v4781_v34 = vrot.slane %v20235_v3, 7  ;;  %v4544_v55 = vadd.f32 %v4512_v39, %v4437_v21  ;;  %v4686_v5 = vmul.f32 %v19729_v46, %v4650_v10  ;;  %v24334_v15 = vrot.slane %v20302_v56, 7  ;;  %14792 = vmatprep.subr.bf16.mxu0 %v16836_v41  ;;  %14984 = vmatprep.subr.bf16.mxu1 %v16837_v4 }
 0x2b7   : >> { %v5201_v35 = vpack.c.bf16 %v5176_v1, %v5175_v14  ;;  %v4545_v24 = vadd.f32 %v4513_v27, %v4438_v2  ;;  %vm25322_vm3 = vcmp.lt.s32.totalorder %v25211_v59, 1  ;;  %v4949_v45 = vmul.f32 %v19735_v32, %v20235_v3 }
 0x2b8   : >> { %v20348_v23 = vsel %vm25322_vm3, %v4780_v16, %v4781_v34  ;;  %v4950_v28 = vmul.f32 %v19735_v32, %v20302_v56  ;;  %v4612_v38 = vadd.f32 %v4580_v54, %v4544_v55  ;;  %vm25323_vm5 = vmmov %vm25322_vm3  ;;  %v5014_v27 = vrot.slane %v20302_v56, 1 }
 0x2b9   : >> { %14770 = vmatprep.mubr.bf16.mxu0 %v5201_v35  ;;  %v4815_v39 = vsel %vm25323_vm5, %v4781_v34, %v24334_v15  ;;  %v4845_v16 = vsel %vm25304_vm8, %v20348_v23, 0.0  ;;  %v4613_v14 = vadd.f32 %v4581_v60, %v4545_v24  ;;  %v24335_v54 = vrot.slane %v20295_v31, 1  ;;  %v16838_v34 = vld [vmem:[%s19786_s12 + $0x290] sm:$0xff]   ;;  %v20375_v60 = vld [vmem:[%s19708_s29 + $0x8] ss:$0 sm:$0xff]  ;;  %14793 = vmatpush3.bf16.msra.mxu0 %v16836_v41  ;;  %v25334_v41 = vld [vmem:[#allocation78_spill] sm:$0xff] }
 0x2ba   : >> { %v4881_v1 = vmul.f32 %v19731_v61, %v4845_v16  ;;  %v4882_v21 = vmul.f32 %v19731_v61, %v4815_v39  ;;  %v4717_v2 = vadd.f32 %v4685_v48, %v4612_v38  ;;  %vm25324_vm5 = vcmp.lt.s32.totalorder %v25211_v59, 7  ;;  %v25326_v38 = vld [vmem:[#allocation154_spill] sm:$0xff]  ;;  %14985 = vmatpush3.bf16.msra.mxu1 %v16837_v4  ;;  %14794 = vmatprep.subr.bf16.mxu0 %v16838_v34 }
 0x2bb   : >> { %v5047_v10 = vsel %vm25324_vm5, %v5013_v37, %v5014_v27  ;;  %v4718_v35 = vadd.f32 %v4686_v5, %v4613_v14  ;;  %vm25325_vm3 = vmmov %vm25324_vm5  ;;  %v20382_v37 = vmax.f32 %v25326_v38, 0.0  ;;  %v25328_v14 = vld [vmem:[#allocation153_spill] sm:$0xff]  ;;  %v4244_v38 = vmul.f32 %v19718_v36, %v20231_v19  ;;  %14986 = vmatprep.subr.bf16.mxu1 %v16839_v25 }
 0x2bc   : >> { %v5046_v24 = vsel %vm25325_vm3, %v5014_v27, %v24335_v54  ;;  %v5113_v44 = vmul.f32 %v20375_v60, %v5047_v10  ;;  %v4913_v48 = vadd.f32 %v4881_v1, %v4717_v2  ;;  %v20386_v15 = vmax.f32 %v25328_v14, 0.0  ;;  %v25330_v27 = vld [vmem:[#allocation113_spill] sm:$0xff]  ;;  %v25360_v54 = vld [vmem:[#allocation150_spill] sm:$0xff] }
 0x2bd   : >> { %v5078_v55 = vsel %vm25309_vm0, %v5046_v24, 0.0  ;;  %25327 = vst [vmem:[#allocation154_spill] sm:$0xff] %v20382_v37  ;;  %v4914_v16 = vadd.f32 %v4882_v21, %v4718_v35  ;;  %vm25332_vm5 = vnez %v25330_v27  ;;  %v25333_v1 = vsel %vm25318_vm2, %v20275_v51, 0.0  ;;  %14795 = vmatpush3.bf16.msra.mxu0 %v16838_v34 }
 0x2be   : >> { %v5114_v5 = vmul.f32 %v20375_v60, %v5078_v55  ;;  %25329 = vst [vmem:[#allocation153_spill] sm:$0xff] %v20386_v15  ;;  %v4981_v26 = vadd.f32 %v4949_v45, %v4913_v48  ;;  %v4207_v2 = vmul.f32 %v19716_v49, %v25333_v1  ;;  %v20397_v21 = vmul.f32 %v4815_v39, %v19716_v49 }
 0x2bf   : >> { %v4243_v35 = vmul.f32 %v19718_v36, %v20164_v58  ;;  %v4982_v55 = vadd.f32 %v4950_v28, %v4914_v16  ;;  %vm25336_vm3 = vnez %v25334_v41  ;;  %v20406_v45 = vmul.f32 %v5047_v10, %v19720_v53  ;;  %14987 = vmatpush3.bf16.msra.mxu1 %v16839_v25 }
 0x2c0   : >> { %v4374_v4 = vsel %vm25336_vm3, %v5046_v24, 0.0  ;;  %v5145_v51 = vadd.f32 %v5113_v44, %v4981_v26  ;;  %v4478_v27 = vsel %vm25318_vm2, %v20348_v23, 0.0  ;;  %v4276_v16 = vadd.f32 %v4244_v38, %v20309_v42 }
 0x2c1   : >> { %v4275_v48 = vadd.f32 %v4243_v35, %v4207_v2  ;;  %v20409_v14 = vmul.f32 %v19720_v53, %v4374_v4  ;;  %v5146_v28 = vadd.f32 %v5114_v5, %v4982_v55  ;;  %v4514_v1 = vmul.f32 %v19725_v22, %v4478_v27 }
 0x2c2   : >> { %v4515_v41 = vmul.f32 %v4815_v39, %v19725_v22  ;;  %v5177_v17 = vmax.f32 %v5145_v51, 0.0  ;;  %v4582_v26 = vmul.f32 %v25267_v9, %v20235_v3  ;;  %v4583_v44 = vmul.f32 %v25267_v9, %v20302_v56 }
 0x2c3   : >> { %v4439_v29 = vadd.f32 %v20318_v18, %v4275_v48  ;;  %v5178_v2 = vmax.f32 %v5146_v28, 0.0  ;;  %v4440_v5 = vadd.f32 %v20324_v12, %v4276_v16  ;;  %v4652_v42 = vsel %vm25321_vm7, %v5046_v24, 0.0 }
 0x2c4   : >> { %v4687_v35 = vmul.f32 %v5047_v10, %v19729_v46  ;;  %v4688_v34 = vmul.f32 %v19729_v46, %v4652_v42  ;;  %v4783_v18 = vrot.slane %v20295_v31, 7  ;;  %v24343_v55 = vrot.slane %v20382_v37, 7 }
 0x2c5   : >> { %v4546_v39 = vadd.f32 %v4514_v1, %v4439_v29  ;;  %v5202_v38 = vpack.c.bf16 %v5178_v2, %v5177_v17  ;;  %v4547_v4 = vadd.f32 %v4515_v41, %v4440_v5  ;;  %v4951_v25 = vmul.f32 %v19735_v32, %v20295_v31 }
 0x2c6   : >> { %v4952_v12 = vmul.f32 %v19735_v32, %v20382_v37  ;;  %vm25337_vm0 = vcmp.lt.s32.totalorder %v25211_v59, 1  ;;  %v25338_v10 = vrot.slane %v20302_v56, 7  ;;  %v5016_v17 = vrot.slane %v20382_v37, 1 }
 0x2c7   : >> { %v4614_v51 = vadd.f32 %v4582_v26, %v4546_v39  ;;  %v4813_v29 = vsel %vm25337_vm0, %v4783_v18, %v24343_v55  ;;  %vm25339_vm6 = vmmov %vm25337_vm0  ;;  %14771 = vmatmul.mubr.bf16.gmra.mrb[12].mxu0 %v5202_v38  ;;  %v4615_v48 = vadd.f32 %v4583_v44, %v4547_v4  ;;  %v24342_v16 = vrot.slane %v20386_v15, 1  ;;  %v25343_v4 = vld [vmem:[#allocation152_spill] sm:$0xff] }
 0x2c8   : >> { %v20441_v24 = vsel %vm25339_vm6, %v25338_v10, %v4783_v18  ;;  %v4884_v28 = vmul.f32 %v19731_v61, %v4813_v29  ;;  %v25340_v26 = vrot.slane %v20295_v31, 1  ;;  %vm25341_vm6 = vcmp.lt.s32.totalorder %v25211_v59, 7  ;;  %v25345_v10 = vld [vmem:[#allocation151_spill] sm:$0xff] }
 0x2c9   : >> { %v4847_v27 = vsel %vm25318_vm2, %v20441_v24, 0.0  ;;  %v4719_v1 = vadd.f32 %v4687_v35, %v4614_v51  ;;  %v4720_v5 = vadd.f32 %v4688_v34, %v4615_v48  ;;  %vm25342_vm0 = vmmov %vm25341_vm6  ;;  %v20463_v51 = vmax.f32 %v25343_v4, 0.0  ;;  %v16840_v34 = vld [vmem:[%s19786_s12 + $0x298] sm:$0xff]  }
 0x2ca   : >> { %v4883_v41 = vmul.f32 %v19731_v61, %v4847_v27  ;;  %v5045_v2 = vsel %vm25341_vm6, %v25340_v26, %v5016_v17  ;;  %v5044_v44 = vsel %vm25342_vm0, %v5016_v17, %v24342_v16  ;;  %v20466_v27 = vmax.f32 %v25345_v10, 0.0  ;;  %v16841_v48 = vld [vmem:[%s19786_s12 + $0x358] sm:$0xff]   ;;  %14796 = vmatprep.subr.bf16.mxu0 %v16840_v34  ;;  %v16843_v16 = vld [vmem:[%s19786_s12 + $0x360] sm:$0xff]  }
 0x2cb   : >> { %v5115_v42 = vmul.f32 %v20375_v60, %v5045_v2  ;;  %v5080_v18 = vsel %vm25321_vm7, %v5044_v44, 0.0  ;;  %v4916_v35 = vadd.f32 %v4884_v28, %v4720_v5  ;;  %25344 = vst [vmem:[#allocation152_spill] sm:$0xff] %v20463_v51  ;;  %v25346_v17 = vld [vmem:[#allocation114_spill] sm:$0xff]  ;;  %v25348_v28 = vsel %vm25332_vm5, %v20348_v23, 0.0  ;;  %14988 = vmatprep.subr.bf16.mxu1 %v16841_v48  ;;  %14797 = vmatpush3.bf16.msra.mxu0 %v16840_v34 }
 0x2cc   : >> { %v4915_v39 = vadd.f32 %v4883_v41, %v4719_v1  ;;  %v5116_v38 = vmul.f32 %v20375_v60, %v5080_v18  ;;  %vm25347_vm6 = vnez %v25346_v17  ;;  %v4209_v41 = vmul.f32 %v19716_v49, %v25348_v28  ;;  %14989 = vmatpush3.bf16.msra.mxu1 %v16841_v48 }
 0x2cd   : >> { %v20479_v5 = vmul.f32 %v4813_v29, %v19716_v49  ;;  %v4984_v18 = vadd.f32 %v4952_v12, %v4916_v35  ;;  %v4245_v4 = vmul.f32 %v19718_v36, %v20235_v3  ;;  %v20488_v23 = vmul.f32 %v5045_v2, %v19720_v53  ;;  %v16842_v35 = vld [vmem:[%s19786_s12 + $0x2a0] sm:$0xff]   ;;  %14990 = vmatprep.subr.bf16.mxu1 %v16843_v16 }
 0x2ce   : >> { %v4983_v26 = vadd.f32 %v4951_v25, %v4915_v39  ;;  %v4246_v25 = vmul.f32 %v19718_v36, %v20302_v56  ;;  %v25349_v39 = vld [vmem:[#allocation81_spill] sm:$0xff]  ;;  %v4480_v12 = vsel %vm25332_vm5, %v20441_v24, 0.0  ;;  %v4517_v56 = vmul.f32 %v4813_v29, %v19725_v22  ;;  %14798 = vmatprep.subr.bf16.mxu0 %v16842_v35 }
 0x2cf   : >> { %vm25350_vm0 = vnez %v25349_v39  ;;  %v5148_v55 = vadd.f32 %v5116_v38, %v4984_v18  ;;  %v4277_v7 = vadd.f32 %v4245_v4, %v4209_v41  ;;  %v4585_v3 = vmul.f32 %v25267_v9, %v20382_v37  ;;  %14799 = vmatpush3.bf16.msra.mxu0 %v16842_v35 }
 0x2d0   : >> { %v4376_v10 = vsel %vm25350_vm0, %v5044_v44, 0.0  ;;  %v5147_v1 = vadd.f32 %v5115_v42, %v4983_v26  ;;  %v4278_v11 = vadd.f32 %v4246_v25, %v20397_v21  ;;  %v4516_v42 = vmul.f32 %v19725_v22, %v4480_v12  ;;  %14991 = vmatpush3.bf16.msra.mxu1 %v16843_v16 }
 0x2d1   : >> { %v20491_v28 = vmul.f32 %v19720_v53, %v4376_v10  ;;  %v4584_v10 = vmul.f32 %v25267_v9, %v20295_v31  ;;  %v5180_v34 = vmax.f32 %v5148_v55, 0.0  ;;  %v4441_v48 = vadd.f32 %v20406_v45, %v4277_v7 }
 0x2d2   : >> { %v5179_v26 = vmax.f32 %v5147_v1, 0.0  ;;  %v4442_v38 = vadd.f32 %v20409_v14, %v4278_v11  ;;  %v4654_v21 = vsel %vm25336_vm3, %v5044_v44, 0.0  ;;  %v4689_v1 = vmul.f32 %v5045_v2, %v19729_v46 }
 0x2d3   : >> { %v4690_v29 = vmul.f32 %v19729_v46, %v4654_v21  ;;  %v4785_v41 = vrot.slane %v20386_v15, 7  ;;  %v4786_v18 = vrot.slane %v20463_v51, 7  ;;  %v4548_v25 = vadd.f32 %v4516_v42, %v4441_v48 }
 0x2d4   : >> { %v5203_v4 = vpack.c.bf16 %v5180_v34, %v5179_v26  ;;  %v4549_v55 = vadd.f32 %v4517_v56, %v4442_v38  ;;  %v4953_v7 = vmul.f32 %v19735_v32, %v20386_v15  ;;  %vm25351_vm2 = vcmp.lt.s32.totalorder %v25211_v59, 1 }
 0x2d5   : >> { %v4811_v11 = vsel %vm25351_vm2, %v4785_v41, %v4786_v18  ;;  %v25352_v45 = vrot.slane %v20382_v37, 7  ;;  %vm25353_vm7 = vmmov %vm25351_vm2  ;;  %v4954_v2 = vmul.f32 %v19735_v32, %v20463_v51  ;;  %v5018_v16 = vrot.slane %v20463_v51, 1 }
 0x2d6   : >> { %14774 = vmatprep.mubr.bf16.mxu0 %v5203_v4  ;;  %v4616_v44 = vadd.f32 %v4584_v10, %v4548_v25  ;;  %v4617_v56 = vadd.f32 %v4585_v3, %v4549_v55  ;;  %v4886_v35 = vmul.f32 %v19731_v61, %v4811_v11  ;;  %v5019_v26 = vrot.slane %v20466_v27, 1 }
 0x2d7   : >> { %v20521_v14 = vsel %vm25353_vm7, %v25352_v45, %v4785_v41  ;;  %v25354_v34 = vrot.slane %v20386_v15, 1  ;;  %vm25355_vm2 = vcmp.lt.s32.totalorder %v25211_v59, 7  ;;  %v25357_v41 = vld [vmem:[#allocation121_spill] sm:$0xff]  ;;  %v20545_v33 = vmax.f32 %v25360_v54, 0.0 }
 0x2d8   : >> { %v4849_v12 = vsel %vm25332_vm5, %v20521_v14, 0.0  ;;  %v4721_v38 = vadd.f32 %v4689_v1, %v4616_v44  ;;  %v4722_v21 = vadd.f32 %v4690_v29, %v4617_v56  ;;  %vm25356_vm7 = vmmov %vm25355_vm2  ;;  %vm25359_vm5 = vnez %v25357_v41  ;;  %v25362_v29 = vld [vmem:[#allocation149_spill] sm:$0xff] }
 0x2d9   : >> { %v4885_v42 = vmul.f32 %v19731_v61, %v4849_v12  ;;  %v5043_v48 = vsel %vm25355_vm2, %v25354_v34, %v5018_v16  ;;  %v5042_v3 = vsel %vm25356_vm7, %v5018_v16, %v5019_v26  ;;  %v4177_v4 = vsel %vm25359_vm5, %v20521_v14, 0.0  ;;  %25361 = vst [vmem:[#allocation151_spill] sm:$0xff] %v20545_v33 }
 0x2da   : >> { %v5117_v10 = vmul.f32 %v20375_v60, %v5043_v48  ;;  %v4918_v55 = vadd.f32 %v4886_v35, %v4722_v21  ;;  %v5082_v12 = vsel %vm25336_vm3, %v5042_v3, 0.0  ;;  %v20549_v44 = vmax.f32 %v25362_v29, 0.0  ;;  %v25365_v21 = vld [vmem:[#allocation89_spill] sm:$0xff] }
 0x2db   : >> { %v4917_v25 = vadd.f32 %v4885_v42, %v4721_v38  ;;  %v5118_v1 = vmul.f32 %v20375_v60, %v5082_v12  ;;  %v25364_v16 = vsel %vm25347_vm6, %v20441_v24, 0.0  ;;  %v20557_v42 = vmul.f32 %v4811_v11, %v19716_v49 }
 0x2dc   : >> { %25363 = vst [vmem:[#allocation150_spill] sm:$0xff] %v20549_v44  ;;  %v4211_v56 = vmul.f32 %v19716_v49, %v25364_v16  ;;  %v4986_v34 = vadd.f32 %v4954_v2, %v4918_v55  ;;  %v4247_v54 = vmul.f32 %v19718_v36, %v20295_v31  ;;  %v4248_v38 = vmul.f32 %v19718_v36, %v20382_v37 }
 0x2dd   : >> { %v4985_v35 = vadd.f32 %v4953_v7, %v4917_v25  ;;  %vm25367_vm2 = vnez %v25365_v21  ;;  %v20566_v12 = vmul.f32 %v5043_v48, %v19720_v53  ;;  %v4482_v24 = vsel %vm25347_vm6, %v20521_v14, 0.0 }
 0x2de   : >> { %v4378_v41 = vsel %vm25367_vm2, %v5042_v3, 0.0  ;;  %v4519_v29 = vmul.f32 %v4811_v11, %v19725_v22  ;;  %v5150_v2 = vadd.f32 %v5118_v1, %v4986_v34  ;;  %v4279_v25 = vadd.f32 %v4247_v54, %v4211_v56 }
 0x2df   : >> { %v5149_v7 = vadd.f32 %v5117_v10, %v4985_v35  ;;  %v4280_v55 = vadd.f32 %v4248_v38, %v20479_v5  ;;  %v20574_v16 = vmul.f32 %v19720_v53, %v4378_v41  ;;  %v4518_v21 = vmul.f32 %v19725_v22, %v4482_v24 }
 0x2e0   : >> { %v4586_v37 = vmul.f32 %v25267_v9, %v20386_v15  ;;  %v4587_v31 = vmul.f32 %v25267_v9, %v20463_v51  ;;  %v5182_v14 = vmax.f32 %v5150_v2, 0.0  ;;  %v4443_v11 = vadd.f32 %v20488_v23, %v4279_v25 }
 0x2e1   : >> { %v5181_v19 = vmax.f32 %v5149_v7, 0.0  ;;  %v4444_v10 = vadd.f32 %v20491_v28, %v4280_v55  ;;  %v4656_v5 = vsel %vm25350_vm0, %v5042_v3, 0.0  ;;  %v4691_v1 = vmul.f32 %v5043_v48, %v19729_v46 }
 0x2e2   : >> { %v4787_v56 = vrot.slane %v20466_v27, 7  ;;  %v24359_v35 = vrot.slane %v20545_v33, 7  ;;  %v4550_v54 = vadd.f32 %v4518_v21, %v4443_v11  ;;  %v4692_v41 = vmul.f32 %v19729_v46, %v4656_v5 }
 0x2e3   : >> { %v5204_v34 = vpack.c.bf16 %v5182_v14, %v5181_v19  ;;  %v4551_v38 = vadd.f32 %v4519_v29, %v4444_v10  ;;  %vm25368_vm7 = vcmp.lt.s32.totalorder %v25211_v59, 1  ;;  %v4955_v48 = vmul.f32 %v19735_v32, %v20466_v27  ;;  %v25372_v14 = vld [vmem:[#allocation147_spill] sm:$0xff] }
 0x2e4   : >> { %v4809_v23 = vsel %vm25368_vm7, %v4787_v56, %v24359_v35  ;;  %vm25369_vm3 = vmmov %vm25368_vm7  ;;  %v4956_v3 = vmul.f32 %v19735_v32, %v20545_v33  ;;  %v4618_v19 = vadd.f32 %v4586_v37, %v4550_v54  ;;  %v24358_v25 = vrot.slane %v20549_v44, 1  ;;  %v25374_v54 = vld [vmem:[#allocation148_spill] sm:$0xff] }
 0x2e5   : >> { %v20595_v28 = vsel %vm25369_vm3, %v4786_v18, %v4787_v56  ;;  %14775 = vmatmul.mubr.bf16.gmra.mrb[16].mxu0 %v5204_v34  ;;  %v4619_v24 = vadd.f32 %v4587_v31, %v4551_v38  ;;  %v4888_v7 = vmul.f32 %v19731_v61, %v4809_v23  ;;  %v5020_v18 = vrot.slane %v20545_v33, 1 }
 0x2e6   : >> { %v4851_v29 = vsel %vm25347_vm6, %v20595_v28, 0.0  ;;  %v4723_v55 = vadd.f32 %v4691_v1, %v4618_v19  ;;  %vm25370_vm3 = vcmp.lt.s32.totalorder %v25211_v59, 7  ;;  %v20615_v11 = vmax.f32 %v25372_v14, 0.0  ;;  %v16846_v19 = vld [vmem:[%s19786_s12 + $0x2b0] sm:$0xff]  }
 0x2e7   : >> { %v4887_v2 = vmul.f32 %v19731_v61, %v4851_v29  ;;  %v4724_v21 = vadd.f32 %v4692_v41, %v4619_v24  ;;  %v5040_v31 = vsel %vm25370_vm3, %v5020_v18, %v24358_v25  ;;  %vm25371_vm7 = vmmov %vm25370_vm3  ;;  %v20622_v38 = vmax.f32 %v25374_v54, 0.0  ;;  %v25376_v41 = vld [vmem:[#allocation125_spill] sm:$0xff]  ;;  %v16844_v29 = vld [vmem:[%s19786_s12 + $0x2a8] sm:$0xff]  }
 0x2e8   : >> { %v5041_v37 = vsel %vm25371_vm7, %v5019_v26, %v5020_v18  ;;  %25373 = vst [vmem:[#allocation149_spill] sm:$0xff] %v20615_v11  ;;  %v5084_v56 = vsel %vm25350_vm0, %v5040_v31, 0.0  ;;  %vm25378_vm3 = vnez %v25376_v41  ;;  %v4213_v26 = vmul.f32 %v19716_v49, %v4177_v4  ;;  %v16845_v18 = vld [vmem:[%s19786_s12 + $0x368] sm:$0xff]   ;;  %14800 = vmatprep.subr.bf16.mxu0 %v16844_v29  ;;  %v16847_v25 = vld [vmem:[%s19786_s12 + $0x370] sm:$0xff]   ;;  %v21306_v24 = vld [vmem:[%s19786_s12 + $0x3c0] sm:$0xff]  }
 0x2e9   : >> { %v4919_v10 = vadd.f32 %v4887_v2, %v4723_v55  ;;  %v4920_v5 = vadd.f32 %v4888_v7, %v4724_v21  ;;  %v5119_v34 = vmul.f32 %v20375_v60, %v5041_v37  ;;  %v5120_v1 = vmul.f32 %v20375_v60, %v5084_v56  ;;  %25375 = vst [vmem:[#allocation147_spill] sm:$0xff] %v20622_v38  ;;  %v25379_v56 = vld [vmem:[#allocation92_spill] sm:$0xff] }
 0x2ea   : >> { %v20631_v55 = vmul.f32 %v4809_v23, %v19716_v49  ;;  %v4249_v21 = vmul.f32 %v19718_v36, %v20386_v15  ;;  %v4250_v14 = vmul.f32 %v19718_v36, %v20463_v51  ;;  %vm25380_vm7 = vnez %v25379_v56  ;;  %14992 = vmatprep.subr.bf16.mxu1 %v16845_v18 }
 0x2eb   : >> { %v4987_v7 = vadd.f32 %v4955_v48, %v4919_v10  ;;  %v4988_v2 = vadd.f32 %v4956_v3, %v4920_v5  ;;  %v4380_v54 = vsel %vm25380_vm7, %v5040_v31, 0.0  ;;  %v20640_v4 = vmul.f32 %v5041_v37, %v19720_v53  ;;  %14801 = vmatpush3.bf16.msra.mxu0 %v16844_v29  ;;  %14993 = vmatpush3.bf16.msra.mxu1 %v16845_v18 }
 0x2ec   : >> { %v4484_v48 = vsel %vm25359_vm5, %v20595_v28, 0.0  ;;  %v4281_v5 = vadd.f32 %v4249_v21, %v4213_v26  ;;  %v20646_v41 = vmul.f32 %v19720_v53, %v4380_v54  ;;  %v4282_v35 = vadd.f32 %v4250_v14, %v20557_v42  ;;  %14802 = vmatprep.subr.bf16.mxu0 %v16846_v19  ;;  %14994 = vmatprep.subr.bf16.mxu1 %v16847_v25 }
 0x2ed   : >> { %v5151_v3 = vadd.f32 %v5119_v34, %v4987_v7  ;;  %v5152_v10 = vadd.f32 %v5120_v1, %v4988_v2  ;;  %v4520_v17 = vmul.f32 %v19725_v22, %v4484_v48  ;;  %v4521_v39 = vmul.f32 %v4809_v23, %v19725_v22 }
 0x2ee   : >> { %v4588_v51 = vmul.f32 %v25267_v9, %v20466_v27  ;;  %v4445_v1 = vadd.f32 %v20566_v12, %v4281_v5  ;;  %v4589_v26 = vmul.f32 %v25267_v9, %v20545_v33  ;;  %v4446_v29 = vadd.f32 %v20574_v16, %v4282_v35 }
 0x2ef   : >> { %v5183_v15 = vmax.f32 %v5151_v3, 0.0  ;;  %v5184_v34 = vmax.f32 %v5152_v10, 0.0  ;;  %v4658_v42 = vsel %vm25367_vm2, %v5040_v31, 0.0  ;;  %v4693_v23 = vmul.f32 %v5041_v37, %v19729_v46  ;;  %14803 = vmatpush3.bf16.msra.mxu0 %v16846_v19  ;;  %14995 = vmatpush3.bf16.msra.mxu1 %v16847_v25 }
 0x2f0   : >> { %v4789_v7 = vrot.slane %v20549_v44, 7  ;;  %v4552_v18 = vadd.f32 %v4520_v17, %v4445_v1  ;;  %v4694_v21 = vmul.f32 %v19729_v46, %v4658_v42  ;;  %v24366_v12 = vrot.slane %v20622_v38, 7 }
 0x2f1   : >> { %v5205_v2 = vpack.c.bf16 %v5184_v34, %v5183_v15  ;;  %v4553_v14 = vadd.f32 %v4521_v39, %v4446_v29  ;;  %v25381_v54 = vrot.slane %v20545_v33, 7  ;;  %vm25382_vm0 = vcmp.lt.s32.totalorder %v25211_v59, 1 }
 0x2f2   : >> { %v4957_v35 = vmul.f32 %v19735_v32, %v20549_v44  ;;  %v4958_v31 = vmul.f32 %v19735_v32, %v20622_v38  ;;  %v4620_v15 = vadd.f32 %v4588_v51, %v4552_v18  ;;  %vm25383_vm6 = vmmov %vm25382_vm0  ;;  %v5022_v37 = vrot.slane %v20622_v38, 1 }
 0x2f3   : >> { %v20669_v16 = vsel %vm25382_vm0, %v25381_v54, %v4789_v7  ;;  %14778 = vmatprep.mubr.bf16.mxu0 %v5205_v2  ;;  %v4807_v17 = vsel %vm25383_vm6, %v4789_v7, %v24366_v12  ;;  %v4621_v19 = vadd.f32 %v4589_v26, %v4553_v14  ;;  %v5023_v25 = vrot.slane %v20615_v11, 1  ;;  %v25387_v7 = vld [vmem:[#allocation146_spill] sm:$0xff]  ;;  %v25389_v14 = vld [vmem:[#allocation145_spill] sm:$0xff] }
 0x2f4   : >> { %v4853_v39 = vsel %vm25359_vm5, %v20669_v16, 0.0  ;;  %v4890_v3 = vmul.f32 %v19731_v61, %v4807_v17  ;;  %v4725_v10 = vadd.f32 %v4693_v23, %v4620_v15  ;;  %v25384_v51 = vrot.slane %v20549_v44, 1 }
 0x2f5   : >> { %v4889_v48 = vmul.f32 %v19731_v61, %v4853_v39  ;;  %vm25385_vm0 = vcmp.lt.s32.totalorder %v25211_v59, 7  ;;  %v4726_v34 = vadd.f32 %v4694_v21, %v4621_v19  ;;  %v20696_v2 = vmax.f32 %v25387_v7, 0.0  ;;  %v25390_v21 = vld [vmem:[#allocation134_spill] sm:$0xff] }
 0x2f6   : >> { %v5039_v5 = vsel %vm25385_vm0, %v25384_v51, %v5022_v37  ;;  %vm25386_vm6 = vmmov %vm25385_vm0  ;;  %v20700_v54 = vmax.f32 %v25389_v14, 0.0  ;;  %vm25392_vm0 = vnez %v25390_v21  ;;  %v25393_v19 = vsel %vm25378_vm3, %v20595_v28, 0.0 }
 0x2f7   : >> { %v5038_v1 = vsel %vm25386_vm6, %v5022_v37, %v5023_v25  ;;  %v5121_v29 = vmul.f32 %v20375_v60, %v5039_v5  ;;  %v4921_v42 = vadd.f32 %v4889_v48, %v4725_v10  ;;  %25388 = vst [vmem:[#allocation148_spill] sm:$0xff] %v20696_v2  ;;  %v4922_v18 = vadd.f32 %v4890_v3, %v4726_v34 }
 0x2f8   : >> { %v5086_v26 = vsel %vm25367_vm2, %v5038_v1, 0.0  ;;  %v4181_v15 = vsel %vm25392_vm0, %v20669_v16, 0.0  ;;  %v4215_v48 = vmul.f32 %v19716_v49, %v25393_v19  ;;  %v20711_v10 = vmul.f32 %v4807_v17, %v19716_v49 }
 0x2f9   : >> { %v5122_v23 = vmul.f32 %v20375_v60, %v5086_v26  ;;  %v4989_v37 = vadd.f32 %v4957_v35, %v4921_v42  ;;  %v4251_v3 = vmul.f32 %v19718_v36, %v20466_v27  ;;  %v4990_v51 = vadd.f32 %v4958_v31, %v4922_v18  ;;  %v25394_v26 = vld [vmem:[#allocation94_spill] sm:$0xff] }
 0x2fa   : >> { %v4252_v34 = vmul.f32 %v19718_v36, %v20545_v33  ;;  %vm25395_vm6 = vnez %v25394_v26  ;;  %v20720_v35 = vmul.f32 %v5039_v5, %v19720_v53  ;;  %v4486_v21 = vsel %vm25378_vm3, %v20669_v16, 0.0  ;;  %v20812_v33 = vld [vmem:[#allocation2 + $0xf8] sm:$0xff] }
 0x2fb   : >> { %v4382_v7 = vsel %vm25395_vm6, %v5038_v1, 0.0  ;;  %v5153_v42 = vadd.f32 %v5121_v29, %v4989_v37  ;;  %v4283_v28 = vadd.f32 %v4251_v3, %v4215_v48  ;;  %v5154_v19 = vadd.f32 %v5122_v23, %v4990_v51 }
 0x2fc   : >> { %v20723_v14 = vmul.f32 %v19720_v53, %v4382_v7  ;;  %v4284_v31 = vadd.f32 %v4252_v34, %v20631_v55  ;;  %v4522_v18 = vmul.f32 %v19725_v22, %v4486_v21  ;;  %v4523_v12 = vmul.f32 %v4807_v17, %v19725_v22 }
 0x2fd   : >> { %v5185_v20 = vmax.f32 %v5153_v42, 0.0  ;;  %v4447_v45 = vadd.f32 %v20640_v4, %v4283_v28  ;;  %v4590_v29 = vmul.f32 %v25267_v9, %v20549_v44  ;;  %v4591_v37 = vmul.f32 %v25267_v9, %v20622_v38 }
 0x2fe   : >> { %v5186_v48 = vmax.f32 %v5154_v19, 0.0  ;;  %v4448_v3 = vadd.f32 %v20646_v41, %v4284_v31  ;;  %v4660_v16 = vsel %vm25380_vm7, %v5038_v1, 0.0  ;;  %v4695_v55 = vmul.f32 %v5039_v5, %v19729_v46 }
 0x2ff   : >> { %v4554_v23 = vadd.f32 %v4522_v18, %v4447_v45  ;;  %v4696_v17 = vmul.f32 %v19729_v46, %v4660_v16  ;;  %v4791_v51 = vrot.slane %v20615_v11, 7  ;;  %v24372_v4 = vrot.slane %v20696_v2, 7 }
 0x300   : >> { %v5206_v34 = vpack.c.bf16 %v5186_v48, %v5185_v20  ;;  %v4555_v7 = vadd.f32 %v4523_v12, %v4448_v3  ;;  %v4959_v42 = vmul.f32 %v19735_v32, %v20615_v11  ;;  %v4960_v41 = vmul.f32 %v19735_v32, %v20696_v2 }
 0x301   : >> { %v4622_v28 = vadd.f32 %v4590_v29, %v4554_v23  ;;  %vm25396_vm2 = vcmp.lt.s32.totalorder %v25211_v59, 1  ;;  %v25397_v5 = vrot.slane %v20622_v38, 7  ;;  %v5024_v20 = vrot.slane %v20696_v2, 1 }
 0x302   : >> { %v4805_v45 = vsel %vm25396_vm2, %v4791_v51, %v24372_v4  ;;  %vm25398_vm5 = vmmov %vm25396_vm2  ;;  %14779 = vmatmul.mubr.bf16.gmra.mrb[20].mxu0 %v5206_v34  ;;  %v4623_v12 = vadd.f32 %v4591_v37, %v4555_v7  ;;  %v20763_v31 = vrot.slane %v20700_v54, 1  ;;  %v25401_v34 = vld [vmem:[#allocation144_spill] sm:$0xff]  ;;  %v4254_v4 = vmul.f32 %v19718_v36, %v20622_v38 }
 0x303   : >> { %v20755_v1 = vsel %vm25398_vm5, %v25397_v5, %v4791_v51  ;;  %v4892_v19 = vmul.f32 %v19731_v61, %v4805_v45  ;;  %v4727_v18 = vadd.f32 %v4695_v55, %v4622_v28  ;;  %vm25399_vm5 = vcmp.lt.s32.totalorder %v25211_v59, 7  ;;  %v25402_v55 = vld [vmem:[#allocation135_spill] sm:$0xff] }
 0x304   : >> { %v4855_v21 = vsel %vm25378_vm3, %v20755_v1, 0.0  ;;  %v5037_v48 = vsel %vm25399_vm5, %v5023_v25, %v5024_v20  ;;  %v4728_v3 = vadd.f32 %v4696_v17, %v4623_v12  ;;  %vm25400_vm2 = vmmov %vm25399_vm5  ;;  %v20775_v7 = vmax.f32 %v25401_v34, 0.0  ;;  %v16848_v12 = vld [vmem:[%s19786_s12 + $0x2b8] sm:$0xff]  }
 0x305   : >> { %v4891_v29 = vmul.f32 %v19731_v61, %v4855_v21  ;;  %v5036_v37 = vsel %vm25400_vm2, %v5024_v20, %v20763_v31  ;;  %v5123_v16 = vmul.f32 %v20375_v60, %v5037_v48  ;;  %vm25404_vm3 = vnez %v25402_v55  ;;  %v25405_v55 = vld [vmem:[#allocation104_spill] sm:$0xff]  ;;  %14804 = vmatprep.subr.bf16.mxu0 %v16848_v12 }
 0x306   : >> { %v5088_v51 = vsel %vm25380_vm7, %v5036_v37, 0.0  ;;  %v4183_v5 = vsel %vm25404_vm3, %v20755_v1, 0.0  ;;  %v4924_v21 = vadd.f32 %v4892_v19, %v4728_v3  ;;  %v4217_v17 = vmul.f32 %v19716_v49, %v4181_v15  ;;  %14805 = vmatpush3.bf16.msra.mxu0 %v16848_v12 }
 0x307   : >> { %v4923_v23 = vadd.f32 %v4891_v29, %v4727_v18  ;;  %v5124_v25 = vmul.f32 %v20375_v60, %v5088_v51  ;;  %v20783_v20 = vmul.f32 %v4805_v45, %v19716_v49  ;;  %v16849_v18 = vld [vmem:[%s19786_s12 + $0x378] sm:$0xff]   ;;  %v4253_v34 = vmul.f32 %v19718_v36, %v20549_v44 }
 0x308   : >> { %vm25407_vm5 = vnez %v25405_v55  ;;  %v4992_v3 = vadd.f32 %v4960_v41, %v4924_v21  ;;  %v20794_v51 = vmul.f32 %v5037_v48, %v19720_v53  ;;  %14996 = vmatprep.subr.bf16.mxu1 %v16849_v18  ;;  %v4286_v38 = vadd.f32 %v4254_v4, %v20711_v10  ;;  %v20805_v41 = vld [vmem:[%s19786_s12 + $0x380] sm:$0xff]  }
 0x309   : >> { %v4991_v29 = vadd.f32 %v4959_v42, %v4923_v23  ;;  %v4384_v19 = vsel %vm25407_vm5, %v5036_v37, 0.0  ;;  %v4488_v42 = vsel %vm25392_vm0, %v20755_v1, 0.0  ;;  %v4285_v56 = vadd.f32 %v4253_v34, %v4217_v17  ;;  %14997 = vmatpush3.bf16.msra.mxu1 %v16849_v18 }
 0x30a   : >> { %v20797_v15 = vmul.f32 %v19720_v53, %v4384_v19  ;;  %v4524_v55 = vmul.f32 %v19725_v22, %v4488_v42  ;;  %v5156_v21 = vadd.f32 %v5124_v25, %v4992_v3  ;;  %v4525_v44 = vmul.f32 %v4805_v45, %v19725_v22  ;;  %15030 = vmatprep.subr.bf16.mxu1 %v20805_v41 }
 0x30b   : >> { %v5155_v23 = vadd.f32 %v5123_v16, %v4991_v29  ;;  %v4592_v19 = vmul.f32 %v25267_v9, %v20615_v11  ;;  %v4593_v1 = vmul.f32 %v25267_v9, %v20696_v2  ;;  %v4449_v10 = vadd.f32 %v20720_v35, %v4285_v56 }
 0x30c   : >> { %v4450_v4 = vadd.f32 %v20723_v14, %v4286_v38  ;;  %v4662_v17 = vsel %vm25395_vm6, %v5036_v37, 0.0  ;;  %v5188_v45 = vmax.f32 %v5156_v21, 0.0  ;;  %v4697_v25 = vmul.f32 %v5037_v48, %v19729_v46 }
 0x30d   : >> { %v5187_v16 = vmax.f32 %v5155_v23, 0.0  ;;  %v4698_v12 = vmul.f32 %v19729_v46, %v4662_v17  ;;  %v4793_v29 = vrot.slane %v20700_v54, 7  ;;  %v4556_v34 = vadd.f32 %v4524_v55, %v4449_v10 }
 0x30e   : >> { %v4557_v3 = vadd.f32 %v4525_v44, %v4450_v4  ;;  %v24381_v18 = vrot.slane %v20812_v33, 7  ;;  %v4961_v56 = vmul.f32 %v19735_v32, %v20700_v54  ;;  %v25408_v35 = vrot.slane %v20696_v2, 7 }
 0x30f   : >> { %v5207_v38 = vpack.c.bf16 %v5188_v45, %v5187_v16  ;;  %vm25409_vm2 = vcmp.lt.s32.totalorder %v25211_v59, 1  ;;  %v4962_v48 = vmul.f32 %v19735_v32, %v20812_v33  ;;  %v5026_v37 = vrot.slane %v20812_v33, 1  ;;  %v25412_v45 = vld [vmem:[#allocation159_spill] sm:$0xff] }
 0x310   : >> { %v20829_v14 = vsel %vm25409_vm2, %v25408_v35, %v4793_v29  ;;  %v4624_v42 = vadd.f32 %v4592_v19, %v4556_v34  ;;  %v4625_v23 = vadd.f32 %v4593_v1, %v4557_v3  ;;  %vm25410_vm7 = vmmov %vm25409_vm2  ;;  %v20844_v10 = vrot.slane %v20775_v7, 1 }
 0x311   : >> { %v4803_v44 = vsel %vm25410_vm7, %v4793_v29, %v24381_v18  ;;  %v4857_v55 = vsel %vm25392_vm0, %v20829_v14, 0.0  ;;  %14782 = vmatprep.mubr.bf16.mxu0 %v5207_v38  ;;  %vm25411_vm2 = vcmp.lt.s32.totalorder %v25211_v59, 7  ;;  %v4123_v34 = vsel %vm25410_vm7, %v4793_v29, %v25412_v45  ;;  %v25414_v38 = vld [vmem:[#allocation142_spill] sm:$0xff] }
 0x312   : >> { %v4893_v21 = vmul.f32 %v19731_v61, %v4857_v55  ;;  %v4894_v16 = vmul.f32 %v19731_v61, %v4803_v44  ;;  %v5035_v19 = vsel %vm25411_vm2, %v20763_v31, %v5026_v37  ;;  %v4729_v1 = vadd.f32 %v4697_v25, %v4624_v42  ;;  %vm25413_vm0 = vmmov %vm25411_vm2 }
 0x313   : >> { %v4730_v4 = vadd.f32 %v4698_v12, %v4625_v23  ;;  %v5125_v17 = vmul.f32 %v20375_v60, %v5035_v19  ;;  %v5034_v3 = vsel %vm25413_vm0, %v5026_v37, %v20844_v10  ;;  %vm25416_vm8 = vnez %v25414_v38  ;;  %v16907_v19 = vld [vmem:[#allocation2 + $0xf8] sm:$0xff]  ;;  %vm25417_vm2 = vmmov %vm25413_vm0 }
 0x314   : >> { %v4185_v35 = vsel %vm25416_vm8, %v20829_v14, 0.0  ;;  %v4219_v55 = vmul.f32 %v19716_v49, %v4183_v5  ;;  %v20861_v18 = vmul.f32 %v19716_v49, %v4123_v34  ;;  %v4925_v25 = vadd.f32 %v4893_v21, %v4729_v1 }
 0x315   : >> { %v4926_v12 = vadd.f32 %v4894_v16, %v4730_v4  ;;  %v5090_v42 = vsel %vm25395_vm6, %v5034_v3, 0.0  ;;  %v4255_v29 = vmul.f32 %v19718_v36, %v20615_v11  ;;  %v4256_v37 = vmul.f32 %v19718_v36, %v20696_v2 }
 0x316   : >> { %v5126_v23 = vmul.f32 %v20375_v60, %v5090_v42  ;;  %v4322_v38 = vrot.slane %v16907_v19, 1  ;;  %v4490_v5 = vsel %vm25404_vm3, %v20829_v14, 0.0  ;;  %v4993_v39 = vadd.f32 %v4961_v56, %v4925_v25 }
 0x317   : >> { %v4994_v21 = vadd.f32 %v4962_v48, %v4926_v12  ;;  %v4287_v16 = vadd.f32 %v4255_v29, %v4219_v55  ;;  %v4526_v1 = vmul.f32 %v19725_v22, %v4490_v5  ;;  %v4288_v4 = vadd.f32 %v4256_v37, %v20783_v20  ;;  %v20883_v48 = vld [vmem:[#allocation2 + $0x108] sm:$0xff] }
 0x318   : >> { %v4323_v3 = vsel %vm25413_vm0, %v20763_v31, %v4322_v38  ;;  %v4527_v42 = vmul.f32 %v19725_v22, %v4123_v34  ;;  %v4594_v26 = vmul.f32 %v25267_v9, %v20700_v54  ;;  %v5157_v2 = vadd.f32 %v5125_v17, %v4993_v39  ;;  %vm25419_vm0 = vmmov %vm25410_vm7 }
 0x319   : >> { %v5158_v11 = vadd.f32 %v5126_v23, %v4994_v21  ;;  %v4421_v14 = vmul.f32 %v19720_v53, %v4323_v3  ;;  %v4451_v56 = vadd.f32 %v20794_v51, %v4287_v16  ;;  %v4452_v55 = vadd.f32 %v20797_v15, %v4288_v4  ;;  %v20900_v16 = vld [vmem:[#allocation2 + $0x110] sm:$0xff] }
 0x31a   : >> { %v4595_v20 = vmul.f32 %v16907_v19, %v25267_v9  ;;  %v4633_v31 = vsel %vm25417_vm2, %v4322_v38, %v20844_v10  ;;  %v4699_v34 = vmul.f32 %v19729_v46, %v4323_v3  ;;  %v5189_v25 = vmax.f32 %v5157_v2, 0.0 }
 0x31b   : >> { %v5190_v12 = vmax.f32 %v5158_v11, 0.0  ;;  %v4558_v39 = vadd.f32 %v4526_v1, %v4451_v56  ;;  %v4664_v17 = vsel %vm25407_vm5, %v4633_v31, 0.0  ;;  %v4559_v29 = vadd.f32 %v4527_v42, %v4452_v55 }
 0x31c   : >> { %v4700_v51 = vmul.f32 %v19729_v46, %v4664_v17  ;;  %v4795_v23 = vrot.slane %v20775_v7, 7  ;;  %v4796_v15 = vrot.slane %v20883_v48, 7  ;;  %v4963_v21 = vmul.f32 %v19735_v32, %v20775_v7 }
 0x31d   : >> { %v5208_v37 = vpack.c.bf16 %v5190_v12, %v5189_v25  ;;  %v4626_v5 = vadd.f32 %v4594_v26, %v4558_v39  ;;  %v4964_v2 = vmul.f32 %v19735_v32, %v20883_v48  ;;  %v4627_v11 = vadd.f32 %v4595_v20, %v4559_v29 }
 0x31e   : >> { %v4801_v1 = vsel %vm25410_vm7, %v4795_v23, %v4796_v15  ;;  %v25418_v4 = vrot.slane %v20812_v33, 7  ;;  %v5028_v26 = vrot.slane %v20883_v48, 1  ;;  %v5029_v20 = vrot.slane %v20900_v16, 1  ;;  %vm25420_vm7 = vmmov %vm25417_vm2 }
 0x31f   : >> { %14783 = vmatmul.mubr.bf16.gmra.mrb[24].mxu0 %v5208_v37  ;;  %v4731_v42 = vadd.f32 %v4699_v34, %v4626_v5  ;;  %v4896_v55 = vmul.f32 %v19731_v61, %v4801_v1  ;;  %v4732_v31 = vadd.f32 %v4700_v51, %v4627_v11  ;;  %v4221_v12 = vmul.f32 %v19716_v49, %v4185_v35  ;;  %v25421_v11 = vld [vmem:[#allocation43_spill] sm:$0xff] }
 0x320   : >> { %v4802_v3 = vsel %vm25419_vm0, %v25418_v4, %v4795_v23  ;;  %v5033_v33 = vsel %vm25417_vm2, %v20844_v10, %v5028_v26  ;;  %v5032_v39 = vsel %vm25420_vm7, %v5028_v26, %v5029_v20  ;;  %v4257_v17 = vmul.f32 %v19718_v36, %v20700_v54  ;;  %vm25423_vm0 = vmmov %vm25417_vm2  ;;  %v25424_v26 = vld [vmem:[#allocation107_spill] sm:$0xff] }
 0x321   : >> { %v4859_v56 = vsel %vm25404_vm3, %v4802_v3, 0.0  ;;  %v5127_v34 = vmul.f32 %v20375_v60, %v5033_v33  ;;  %v4258_v29 = vmul.f32 %v16907_v19, %v19718_v36  ;;  %v4928_v51 = vadd.f32 %v4896_v55, %v4732_v31 }
 0x322   : >> { %v4895_v25 = vmul.f32 %v19731_v61, %v4859_v56  ;;  %v5092_v5 = vsel %vm25407_vm5, %v5032_v39, 0.0  ;;  %v25422_v1 = vrot.slane %v25421_v11, 1  ;;  %v4289_v4 = vadd.f32 %v4257_v17, %v4221_v12  ;;  %v16908_v39 = vld [vmem:[#allocation2 + $0x108] sm:$0xff] }
 0x323   : >> { %v5128_v35 = vmul.f32 %v20375_v60, %v5092_v5  ;;  %v4290_v3 = vadd.f32 %v4258_v29, %v20861_v18  ;;  %vm25425_vm2 = vnez %v25424_v26  ;;  %v4996_v36 = vadd.f32 %v4964_v2, %v4928_v51  ;;  %v25432_v11 = vld [vmem:[#allocation160_spill] sm:$0xff] }
 0x324   : >> { %v4927_v37 = vadd.f32 %v4895_v25, %v4731_v42  ;;  %v4354_v49 = vsel %vm25423_vm0, %v4322_v38, %v25422_v1  ;;  %vm25426_vm7 = vcmp.lt.s32.totalorder %v25211_v59, 1  ;;  %v4453_v55 = vadd.f32 %v4421_v14, %v4289_v4 }
 0x325   : >> { %v4386_v56 = vsel %vm25425_vm2, %v4354_v49, 0.0  ;;  %v4459_v42 = vsel %vm25426_vm7, %v4795_v23, %v19858_v62  ;;  %vm25427_vm0 = vmmov %vm25426_vm7  ;;  %v4596_v18 = vmul.f32 %v25267_v9, %v20775_v7  ;;  %v5160_v12 = vadd.f32 %v5128_v35, %v4996_v36 }
 0x326   : >> { %v4995_v33 = vadd.f32 %v4963_v21, %v4927_v37  ;;  %v4422_v19 = vmul.f32 %v19720_v53, %v4386_v56  ;;  %v4460_v38 = vsel %vm25427_vm0, %v25412_v45, %v4795_v23  ;;  %v4529_v31 = vmul.f32 %v19725_v22, %v4459_v42  ;;  %v25428_v45 = vld [vmem:[#allocation161_spill] sm:$0xff] }
 0x327   : >> { %v4492_v53 = vsel %vm25416_vm8, %v4460_v38, 0.0  ;;  %v4597_v62 = vmul.f32 %v16908_v39, %v25267_v9  ;;  %v4631_v14 = vrot.slane %v16908_v39, 1  ;;  %v4797_v17 = vrot.slane %v20900_v16, 7 }
 0x328   : >> { %v5159_v25 = vadd.f32 %v5127_v34, %v4995_v33  ;;  %v4454_v21 = vadd.f32 %v4422_v19, %v4290_v3  ;;  %v4528_v2 = vmul.f32 %v19725_v22, %v4492_v53  ;;  %v25429_v23 = vrot.slane %v25428_v45, 1 }
 0x329   : >> { %vm25430_vm7 = vcmp.lt.s32.totalorder %v25211_v59, 7  ;;  %v5192_v37 = vmax.f32 %v5160_v12, 0.0  ;;  %v25434_v1 = vrot.slane %v25428_v45, 7  ;;  %vm25435_vm5 = vcmp.lt.s32.totalorder %v25211_v59, 1 }
 0x32a   : >> { %v5062_v29 = vsel %vm25430_vm7, %v25429_v23, %v19835_v30  ;;  %v5191_v34 = vmax.f32 %v5159_v25, 0.0  ;;  %v4561_v51 = vadd.f32 %v4529_v31, %v4454_v21  ;;  %v4560_v5 = vadd.f32 %v4528_v2, %v4453_v55  ;;  %vm25431_vm0 = vmmov %vm25430_vm7 }
 0x32b   : >> { %v4632_v22 = vsel %vm25431_vm0, %v20844_v10, %v4631_v14  ;;  %vm25433_vm3 = vmmov %vm25431_vm0  ;;  %v4799_v49 = vsel %vm25435_vm5, %v4797_v17, %v25434_v1  ;;  %v4965_v42 = vmul.f32 %v19735_v32, %v20900_v16  ;;  %v25437_v55 = vmov %v25429_v23 }
 0x32c   : >> { %v4634_v9 = vsel %vm25433_vm3, %v4631_v14, %v25432_v11  ;;  %v5209_v35 = vpack.c.bf16 %v5192_v37, %v5191_v34  ;;  %v4629_v4 = vadd.f32 %v4597_v62, %v4561_v51  ;;  %v4701_v3 = vmul.f32 %v19729_v46, %v4632_v22  ;;  %vm25436_vm7 = vmmov %vm25435_vm5  ;;  %v20989_v14 = vld [vmem:[#allocation2] sm:$0xff]  ;;  %v25439_v51 = vld [vmem:[#allocation157_spill] sm:$0xff] }
 0x32d   : >> { %v4666_v30 = vsel %vm25425_vm2, %v4634_v9, 0.0  ;;  %v4628_v56 = vadd.f32 %v4596_v18, %v4560_v5  ;;  %v4800_v10 = vsel %vm25436_vm7, %v4796_v15, %v4797_v17  ;;  %v4898_v36 = vmul.f32 %v19731_v61, %v4799_v49  ;;  %vm25438_vm3 = vmmov %vm25431_vm0  ;;  %v16909_v18 = vld [vmem:[#allocation2 + $0x118] sm:$0xff]  ;;  %v20991_v17 = vld [vmem:[#allocation2 + $0x8] sm:$0xff] }
 0x32e   : >> { %v4702_v33 = vmul.f32 %v19729_v46, %v4666_v30  ;;  %14786 = vmatprep.mubr.bf16.mxu0 %v5209_v35  ;;  %v4861_v19 = vsel %vm25416_vm8, %v4800_v10, 0.0  ;;  %v5031_v38 = vsel %vm25438_vm3, %v5029_v20, %v25437_v55  ;;  %v5094_v46 = vsel %vm25425_vm2, %v5062_v29, 0.0  ;;  %v21013_v29 = vld [vmem:[%s21007_s20] ss:$0 sm:$0xff]  ;;  %v25440_v35 = vld [vmem:[#allocation158_spill] sm:$0xff]  ;;  %vm25441_vm7 = vmmov %vm25435_vm5 }
 0x32f   : >> { %v4733_v48 = vadd.f32 %v4701_v3, %v4628_v56  ;;  %v4897_v15 = vmul.f32 %v19731_v61, %v4861_v19  ;;  %v4966_v25 = vmul.f32 %v16909_v18, %v19735_v32  ;;  %v5129_v16 = vmul.f32 %v20375_v60, %v5031_v38  ;;  %vm25443_vm3 = vmmov %vm25431_vm0 }
 0x330   : >> { %v4734_v31 = vadd.f32 %v4702_v33, %v4629_v4  ;;  %v5130_v53 = vmul.f32 %v20375_v60, %v5094_v46  ;;  %v5747_v32 = vpack.c.bf16 %v20991_v17, %v20989_v14  ;;  %v21010_v60 = vld [vmem:[%s21001_s16] ss:$0 sm:$0xff]  ;;  %vm25448_vm2 = vcmp.lt.s32.totalorder %v25211_v59, 1 }
 0x331   : >> { %v4929_v12 = vadd.f32 %v4897_v15, %v4733_v48  ;;  %v5456_v34 = vmul.f32 %v21010_v60, %v19746_v8  ;;  %v5454_v5 = vmul.f32 %v21010_v60, %v25439_v51  ;;  %v5457_v9 = vmul.f32 %v21010_v60, %v19756_v40 }
 0x332   : >> { %v4930_v21 = vadd.f32 %v4898_v36, %v4734_v31  ;;  %v5455_v4 = vmul.f32 %v21010_v60, %v25440_v35  ;;  %v5460_v35 = vmul.f32 %v21010_v60, %v19916_v50  ;;  %vm25630_vm6 = vcmp.lt.s32.totalorder %v25211_v59, 7 }
 0x333   : >> { %v4997_v20 = vadd.f32 %v4965_v42, %v4929_v12  ;;  %vm25634_vm9 = vmmov %vm25630_vm6 }
 0x334   : >> { %v4998_v2 = vadd.f32 %v4966_v25, %v4930_v21  ;;  %v16851_v21 = vld [vmem:[%s19786_s12 + $0x388] sm:$0xff]   ;;  %vm25636_vm14 = vmmov %vm25630_vm6 }
 0x335   : >> { %v5161_v39 = vadd.f32 %v5129_v16, %v4997_v20 }
 0x336   : >> { %v5162_v62 = vadd.f32 %v5130_v53, %v4998_v2  ;;  %v16852_v2 = vld [vmem:[%s19786_s12 + $0x390] sm:$0xff]  }
 0x337   : >> { %v5193_v61 = vmax.f32 %v5161_v39, 0.0 }
 0x338   : >> { %v5194_v45 = vmax.f32 %v5162_v62, 0.0 }
 0x33a   : >> { %v5210_v23 = vpack.c.bf16 %v5194_v45, %v5193_v61  ;;  %v24391_v61 = vrot.slane %v20991_v17, 7  ;;  %v24390_v45 = vrot.slane %v20989_v14, 1 }
 0x33c   : >> { %14787 = vmatmul.mubr.bf16.gmra.mrb[28].mxu0 %v5210_v23 }
 0x33d   : >> { %14806 = vmatprep.mubr.bf16.mxu0 %v5747_v32  ;;  %v6202_v32 = vrot.slane %v20991_v17, 1 }
 0x344   : >> { %v14760_v37 = vpop.f32.mrb[0].mxu0 }
 0x345   : >> { %v5328_v22 = vadd.f32 %v14760_v37, %v21013_v29  ;;  %v5319_v11 = vpop.f32.mrb[1].mxu0  ;;  %v21064_v37 = vsel %vm25431_vm0, %v24390_v45, %v6202_v32 }
 0x346   : >> { %v5320_v1 = vadd.f32 %v21013_v29, %v5319_v11  ;;  %v14761_v49 = vpop.f32.mrb[2].mxu0  ;;  %25446 = vst [vmem:[#allocation145_spill] sm:$0xff] %v21064_v37 }
 0x347   : >> { %v5488_v30 = vadd.f32 %v5456_v34, %v5328_v22  ;;  %v5331_v3 = vadd.f32 %v14761_v49, %v21013_v29  ;;  %v5322_v8 = vpop.f32.mrb[3].mxu0 }
 0x348   : >> { %v5486_v56 = vadd.f32 %v5454_v5, %v5320_v1  ;;  %v5323_v33 = vadd.f32 %v21013_v29, %v5322_v8 }
 0x349   : >> { %v5520_v10 = vmax.f32 %v5488_v30, 0.0  ;;  %v5489_v36 = vadd.f32 %v5457_v9, %v5331_v3  ;;  %v16853_v9 = vld [vmem:[%s19786_s12 + $0x398] sm:$0xff]   ;;  %v5458_v30 = vmul.f32 %v21010_v60, %v19764_v43 }
 0x34a   : >> { %v5518_v19 = vmax.f32 %v5486_v56, 0.0  ;;  %v5487_v42 = vadd.f32 %v5455_v4, %v5323_v33  ;;  %v5461_v33 = vmul.f32 %v21010_v60, %v19957_v0 }
 0x34b   : >> { %5553 = vst [vmem:[#allocation2 + $0x20] sm:$0xff] %v5520_v10  ;;  %v21027_v40 = vmax.f32 %v5489_v36, 0.0  ;;  %v6608_v46 = vrot.slane %v5520_v10, 7  ;;  %v6205_v25 = vrot.slane %v5520_v10, 1 }
 0x34c   : >> { %v5519_v55 = vmax.f32 %v5487_v42, 0.0  ;;  %v21046_v62 = vrot.slane %v5518_v19, 7  ;;  %v21051_v23 = vrot.slane %v5518_v19, 1 }
 0x34d   : >> { %5554 = vst [vmem:[#allocation2 + $0x28] sm:$0xff] %v21027_v40  ;;  %v5749_v38 = vpack.c.bf16 %v21027_v40, %v5520_v10  ;;  %v6609_v48 = vrot.slane %v21027_v40, 7  ;;  %v7259_v39 = vrot.slane %v21027_v40, 1 }
 0x34e   : >> { %v5748_v31 = vpack.c.bf16 %v5519_v55, %v5518_v19  ;;  %v6607_v15 = vrot.slane %v5519_v55, 7  ;;  %v7257_v18 = vrot.slane %v5519_v55, 1  ;;  %v5459_v19 = vmul.f32 %v21010_v60, %v19913_v52 }
 0x34f   : >> { %v6666_v12 = vsel %vm25435_vm5, %v6608_v46, %v6609_v48  ;;  %vm25444_vm5 = vmmov %vm25431_vm0 }
 0x350   : >> { %14807 = vmatmul.mubr.bf16.vlgmr.msra.gmra.mrb[32].mxu0 %v5748_v31  ;;  %14998 = vmatprep.mubr.bf16.mxu1 %v5748_v31  ;;  %v6260_v16 = vsel %vm25431_vm0, %v7257_v18, %v6205_v25  ;;  %v6667_v53 = vsel %vm25441_vm7, %v6607_v15, %v6608_v46  ;;  %v21058_v34 = vsel %vm25444_vm5, %v6202_v32, %v21051_v23  ;;  %vm25447_vm7 = vmmov %vm25431_vm0 }
 0x351   : >> { %14810 = vmatprep.mubr.bf16.mxu0 %v5749_v38  ;;  %v21041_v20 = vpack.c.bf16 %v6666_v12, %v6667_v53  ;;  %14999 = vmatmul.mubr.bf16.vlgmr.msra.gmra.mrb[0].mxu1 %v5749_v38  ;;  %25445 = vst [vmem:[#allocation146_spill] sm:$0xff] %v21058_v34  ;;  %v7318_v51 = vsel %vm25447_vm7, %v21051_v23, %v7257_v18  ;;  %v25593_v34 = vrot.slane %v20991_v17, 7 }
 0x352   : >> { %15031 = vmatpush3.bf16.msra.mxu1 %v20805_v41  ;;  %v7316_v41 = vsel %vm25443_vm3, %v6205_v25, %v7259_v39  ;;  %v21072_v5 = vsel %vm25448_vm2, %v21046_v62, %v6607_v15  ;;  %vm25450_vm3 = vmmov %vm25448_vm2  ;;  %v21084_v1 = vpack.c.bf16 %v6260_v16, %v7318_v51  ;;  %v21100_v50 = vld [vmem:[#allocation2 + $0x20] sm:$0xff] }
 0x353   : >> { %25442 = vst [vmem:[#allocation43_spill] sm:$0xff] %v21041_v20  ;;  %15032 = vmatprep.subr.bf16.mxu1 %v16851_v21  ;;  %25449 = vst [vmem:[#allocation144_spill] sm:$0xff] %v21072_v5  ;;  %v21079_v22 = vsel %vm25450_vm3, %v24391_v61, %v21046_v62  ;;  %v25493_v61 = vld [vmem:[#allocation162_spill] sm:$0xff] }
 0x354   : >> { %v21092_v3 = vld [vmem:[#allocation2 + $0x28] sm:$0xff]  ;;  %25452 = vst [vmem:[#allocation161_spill] sm:$0xff] %v21100_v50  ;;  %vm25453_vm2 = vmmov %vm25431_vm0 }
 0x355   : >> { %25451 = vst [vmem:[#allocation159_spill] sm:$0xff] %v21092_v3  ;;  %vm25454_vm5 = vmmov %vm25450_vm3 }
 0x356   : >> { %15033 = vmatpush3.bf16.msra.mxu1 %v16851_v21  ;;  %vm25455_vm0 = vmmov %vm25450_vm3 }
 0x357   : >> { %15034 = vmatprep.subr.bf16.mxu1 %v16852_v2  ;;  %vm25456_vm7 = vmmov %vm25453_vm2 }
 0x358   : >> { %vm25457_vm3 = vmmov %vm25453_vm2 }
 0x35a   : >> { %15035 = vmatpush3.bf16.msra.mxu1 %v16852_v2 }
 0x35b   : >> { %15036 = vmatprep.subr.bf16.mxu1 %v16853_v9 }
 0x35e   : >> { %15037 = vmatpush3.bf16.msra.mxu1 %v16853_v9 }
 0x361   : >> { %v14764_v4 = vpop.f32.mrb[4].mxu0 }
 0x362   : >> { %v5344_v8 = vadd.f32 %v14764_v4, %v21013_v29  ;;  %v5335_v56 = vpop.f32.mrb[5].mxu0 }
 0x363   : >> { %v5336_v10 = vadd.f32 %v21013_v29, %v5335_v56  ;;  %v14765_v36 = vpop.f32.mrb[6].mxu0 }
 0x364   : >> { %v5492_v42 = vadd.f32 %v5460_v35, %v5344_v8  ;;  %v5347_v55 = vadd.f32 %v14765_v36, %v21013_v29  ;;  %v5338_v43 = vpop.f32.mrb[7].mxu0 }
 0x365   : >> { %v5490_v46 = vadd.f32 %v5458_v30, %v5336_v10  ;;  %v5339_v31 = vadd.f32 %v21013_v29, %v5338_v43  ;;  %v8312_v43 = vrot.slane %v21092_v3, 1 }
 0x366   : >> { %v5524_v15 = vmax.f32 %v5492_v42, 0.0  ;;  %v5493_v0 = vadd.f32 %v5461_v33, %v5347_v55 }
 0x367   : >> { %v5522_v18 = vmax.f32 %v5490_v46, 0.0  ;;  %v5491_v25 = vadd.f32 %v5459_v19, %v5339_v31 }
 0x368   : >> { %5557 = vst [vmem:[#allocation2 + $0x40] sm:$0xff] %v5524_v15  ;;  %v21106_v12 = vmax.f32 %v5493_v0, 0.0  ;;  %v7262_v52 = vrot.slane %v5524_v15, 1  ;;  %v5623_v21 = vrot.slane %v5524_v15, 7 }
 0x369   : >> { %5555 = vst [vmem:[#allocation2 + $0x30] sm:$0xff] %v5522_v18  ;;  %v5523_v16 = vmax.f32 %v5491_v25, 0.0  ;;  %v7260_v53 = vrot.slane %v5522_v18, 1  ;;  %v5621_v2 = vrot.slane %v5522_v18, 7  ;;  %v24389_v25 = vrot.slane %v21100_v50, 1 }
 0x36a   : >> { %5558 = vst [vmem:[#allocation2 + $0x48] sm:$0xff] %v21106_v12  ;;  %v5751_v32 = vpack.c.bf16 %v21106_v12, %v5524_v15  ;;  %v5624_v51 = vrot.slane %v21106_v12, 7  ;;  %v7263_v9 = vrot.slane %v21106_v12, 1 }
 0x36b   : >> { %5556 = vst [vmem:[#allocation2 + $0x38] sm:$0xff] %v5523_v16  ;;  %v5750_v35 = vpack.c.bf16 %v5523_v16, %v5522_v18  ;;  %v7315_v4 = vsel %vm25453_vm2, %v7259_v39, %v7260_v53  ;;  %v7261_v30 = vrot.slane %v5523_v16, 1  ;;  %v5622_v8 = vrot.slane %v5523_v16, 7 }
 0x36c   : >> { %v21114_v56 = vpack.c.bf16 %v7315_v4, %v7316_v41  ;;  %v5672_v33 = vsel %vm25454_vm5, %v6609_v48, %v5621_v2  ;;  %v5669_v10 = vsel %vm25455_vm0, %v5623_v21, %v5624_v51  ;;  %v21128_v36 = vsel %vm25456_vm7, %v7262_v52, %v7263_v9  ;;  %vm25458_vm5 = vmmov %vm25455_vm0 }
 0x36d   : >> { %14811 = vmatmul.mubr.bf16.gmra.mrb[36].mxu0 %v5750_v35  ;;  %15002 = vmatprep.mubr.bf16.mxu1 %v5750_v35  ;;  %v7313_v39 = vsel %vm25457_vm3, %v7261_v30, %v7262_v52  ;;  %v7314_v40 = vsel %vm25453_vm2, %v7260_v53, %v7261_v30  ;;  %v5671_v48 = vsel %vm25458_vm5, %v5621_v2, %v5622_v8  ;;  %vm25465_vm7 = vmmov %vm25453_vm2 }
 0x36e   : >> { %14814 = vmatprep.mubr.bf16.mxu0 %v5751_v32  ;;  %15003 = vmatmul.mubr.bf16.gmra.mrb[4].mxu1 %v5751_v32  ;;  %v21136_v41 = vpack.c.bf16 %v7313_v39, %v7314_v40  ;;  %v21138_v19 = vpack.c.bf16 %v5671_v48, %v5672_v33  ;;  %v5670_v42 = vsel %vm25455_vm0, %v5622_v8, %v5623_v21  ;;  %vm25467_vm3 = vmmov %vm25453_vm2  ;;  %v16854_v33 = vld [vmem:[%s19786_s12 + $0x240] sm:$0xff]  }
 0x36f   : >> { %v21142_v55 = vpack.c.bf16 %v5669_v10, %v5670_v42  ;;  %v21147_v31 = vld [vmem:[#allocation2 + $0x40] sm:$0xff]  ;;  %v21165_v2 = vsel %vm25465_vm7, %v24389_v25, %v8312_v43  ;;  %vm25470_vm5 = vmmov %vm25453_vm2  ;;  %14838 = vmatprep.subr.bf16.mxu0 %v16854_v33  ;;  %v5464_v48 = vmul.f32 %v21010_v60, %v20022_v6  ;;  %v16856_v25 = vld [vmem:[%s19786_s12 + $0x248] sm:$0xff]  }
 0x370   : >> { %25459 = vst [vmem:[#allocation160_spill] sm:$0xff] %v21138_v19  ;;  %v21145_v46 = vld [vmem:[#allocation2 + $0x30] sm:$0xff]  ;;  %25462 = vst [vmem:[#allocation165_spill] sm:$0xff] %v21147_v31  ;;  %v8315_v21 = vrot.slane %v21147_v31, 1  ;;  %v16855_v10 = vld [vmem:[%s19786_s12 + $0x3a0] sm:$0xff]   ;;  %14839 = vmatpush3.bf16.msra.mxu0 %v16854_v33  ;;  %v5463_v33 = vmul.f32 %v21010_v60, %v20029_v63 }
 0x371   : >> { %25460 = vst [vmem:[#allocation157_spill] sm:$0xff] %v21142_v55  ;;  %25461 = vst [vmem:[#allocation158_spill] sm:$0xff] %v21145_v46  ;;  %v21149_v15 = vld [vmem:[#allocation2 + $0x48] sm:$0xff]  ;;  %v8313_v16 = vrot.slane %v21145_v46, 1  ;;  %15038 = vmatprep.subr.bf16.mxu1 %v16855_v10  ;;  %14840 = vmatprep.subr.bf16.mxu0 %v16856_v25  ;;  %v25544_v31 = vld [vmem:[#allocation151_spill] sm:$0xff] }
 0x372   : >> { %25463 = vst [vmem:[#allocation166_spill] sm:$0xff] %v21149_v15  ;;  %v21151_v0 = vld [vmem:[#allocation2 + $0x38] sm:$0xff]  ;;  %25466 = vst [vmem:[#allocation168_spill] sm:$0xff] %v21165_v2  ;;  %v8316_v32 = vrot.slane %v21149_v15, 1  ;;  %15039 = vmatpush3.bf16.msra.mxu1 %v16855_v10 }
 0x373   : >> { %25464 = vst [vmem:[#allocation167_spill] sm:$0xff] %v21151_v0  ;;  %v8314_v53 = vrot.slane %v21151_v0, 1  ;;  %v21178_v30 = vsel %vm25470_vm5, %v8312_v43, %v8313_v16  ;;  %vm25472_vm0 = vmmov %vm25453_vm2  ;;  %v5462_v43 = vmul.f32 %v21010_v60, %v19964_v57 }
 0x374   : >> { %25471 = vst [vmem:[#allocation171_spill] sm:$0xff] %v21178_v30  ;;  %v21184_v8 = vsel %vm25472_vm0, %v8315_v21, %v8316_v32  ;;  %14841 = vmatpush3.bf16.msra.mxu0 %v16856_v25  ;;  %v16859_v25 = vld [vmem:[%s19786_s12 + $0x258] sm:$0xff]   ;;  %vm25474_vm7 = vmmov %vm25472_vm0 }
 0x375   : >> { %v21170_v35 = vsel %vm25467_vm3, %v8314_v53, %v8315_v21  ;;  %v21174_v4 = vsel %vm25453_vm2, %v8313_v16, %v8314_v53  ;;  %25473 = vst [vmem:[#allocation172_spill] sm:$0xff] %v21184_v8  ;;  %v5465_v53 = vmul.f32 %v21010_v60, %v20092_v47  ;;  %v16857_v47 = vld [vmem:[%s19786_s12 + $0x250] sm:$0xff]   ;;  %vm25475_vm3 = vcmp.lt.s32.totalorder %v25211_v59, 1  ;;  %vm25477_vm5 = vmmov %vm25472_vm0 }
 0x376   : >> { %25468 = vst [vmem:[#allocation169_spill] sm:$0xff] %v21170_v35  ;;  %25469 = vst [vmem:[#allocation170_spill] sm:$0xff] %v21174_v4  ;;  %14842 = vmatprep.subr.bf16.mxu0 %v16857_v47  ;;  %v25520_v4 = vld [vmem:[#allocation155_spill] sm:$0xff] }
 0x377   : >> { %vm25476_vm2 = vmmov %vm25475_vm3  ;;  %v5471_v35 = vmul.f32 %v21010_v60, %v25520_v4 }
 0x378   : >> { %14843 = vmatpush3.bf16.msra.mxu0 %v16857_v47 }
 0x379   : >> { %14844 = vmatprep.subr.bf16.mxu0 %v16859_v25 }
 0x37c   : >> { %14845 = vmatpush3.bf16.msra.mxu0 %v16859_v25 }
 0x37e   : >> { %v14768_v42 = vpop.f32.mrb[8].mxu0 }
 0x37f   : >> { %v5360_v21 = vadd.f32 %v14768_v42, %v21013_v29  ;;  %v5351_v16 = vpop.f32.mrb[9].mxu0 }
 0x380   : >> { %v5352_v40 = vadd.f32 %v21013_v29, %v5351_v16  ;;  %v14769_v39 = vpop.f32.mrb[10].mxu0 }
 0x381   : >> { %v5496_v10 = vadd.f32 %v5464_v48, %v5360_v21  ;;  %v5363_v6 = vadd.f32 %v14769_v39, %v21013_v29  ;;  %v5354_v18 = vpop.f32.mrb[11].mxu0 }
 0x382   : >> { %v5494_v57 = vadd.f32 %v5462_v43, %v5352_v40  ;;  %v5355_v42 = vadd.f32 %v21013_v29, %v5354_v18 }
 0x383   : >> { %v5528_v52 = vmax.f32 %v5496_v10, 0.0  ;;  %v5497_v38 = vadd.f32 %v5465_v53, %v5363_v6 }
 0x384   : >> { %v5526_v11 = vmax.f32 %v5494_v57, 0.0  ;;  %v5495_v49 = vadd.f32 %v5463_v33, %v5355_v42 }
 0x385   : >> { %5561 = vst [vmem:[#allocation2 + $0x60] sm:$0xff] %v5528_v52  ;;  %v21206_v16 = vmax.f32 %v5497_v38, 0.0  ;;  %v7266_v63 = vrot.slane %v5528_v52, 1  ;;  %v5627_v40 = vrot.slane %v5528_v52, 7 }
 0x386   : >> { %5559 = vst [vmem:[#allocation2 + $0x50] sm:$0xff] %v5526_v11  ;;  %v5527_v48 = vmax.f32 %v5495_v49, 0.0  ;;  %v7264_v39 = vrot.slane %v5526_v11, 1  ;;  %v5625_v21 = vrot.slane %v5526_v11, 7 }
 0x387   : >> { %5562 = vst [vmem:[#allocation2 + $0x68] sm:$0xff] %v21206_v16  ;;  %v5753_v18 = vpack.c.bf16 %v21206_v16, %v5528_v52  ;;  %v24393_v43 = vrot.slane %v21206_v16, 7  ;;  %v24394_v53 = vrot.slane %v21206_v16, 1 }
 0x388   : >> { %5560 = vst [vmem:[#allocation2 + $0x58] sm:$0xff] %v5527_v48  ;;  %v5752_v38 = vpack.c.bf16 %v5527_v48, %v5526_v11  ;;  %v7311_v49 = vsel %vm25474_vm7, %v7263_v9, %v7264_v39  ;;  %v7265_v33 = vrot.slane %v5527_v48, 1  ;;  %v5626_v10 = vrot.slane %v5527_v48, 7  ;;  %vm25478_vm7 = vmmov %vm25472_vm0 }
 0x389   : >> { %v21218_v6 = vpack.c.bf16 %v7311_v49, %v21128_v36  ;;  %v5668_v52 = vsel %vm25475_vm3, %v5624_v51, %v5625_v21  ;;  %v5665_v11 = vsel %vm25476_vm2, %v5627_v40, %v24393_v43  ;;  %v21232_v9 = vsel %vm25477_vm5, %v7266_v63, %v24394_v53  ;;  %v16860_v36 = vld [vmem:[%s19786_s12 + $0x260] sm:$0xff]   ;;  %vm25479_vm3 = vmmov %vm25476_vm2  ;;  %v16862_v49 = vld [vmem:[%s19786_s12 + $0x268] sm:$0xff]  }
 0x38a   : >> { %14815 = vmatmul.mubr.bf16.gmra.mrb[40].mxu0 %v5752_v38  ;;  %15006 = vmatprep.mubr.bf16.mxu1 %v5752_v38  ;;  %v7309_v12 = vsel %vm25472_vm0, %v7265_v33, %v7266_v63  ;;  %v7310_v51 = vsel %vm25478_vm7, %v7264_v39, %v7265_v33  ;;  %v5667_v42 = vsel %vm25479_vm3, %v5625_v21, %v5626_v10  ;;  %vm25486_vm5 = vmmov %vm25472_vm0  ;;  %v16863_v21 = vld [vmem:[%s19786_s12 + $0x270] sm:$0xff]  }
 0x38b   : >> { %14818 = vmatprep.mubr.bf16.mxu0 %v5753_v18  ;;  %15007 = vmatmul.mubr.bf16.gmra.mrb[8].mxu1 %v5753_v18  ;;  %v21239_v57 = vpack.c.bf16 %v7309_v12, %v7310_v51  ;;  %v21243_v47 = vpack.c.bf16 %v5667_v42, %v5668_v52  ;;  %v5666_v48 = vsel %vm25476_vm2, %v5626_v10, %v5627_v40  ;;  %v16858_v40 = vld [vmem:[%s19786_s12 + $0x3a8] sm:$0xff]   ;;  %vm25489_vm7 = vmmov %vm25472_vm0 }
 0x38c   : >> { %14846 = vmatprep.subr.bf16.mxu0 %v16860_v36  ;;  %v21247_v63 = vpack.c.bf16 %v5665_v11, %v5666_v48  ;;  %v21251_v39 = vld [vmem:[#allocation2 + $0x60] sm:$0xff]  ;;  %15040 = vmatprep.subr.bf16.mxu1 %v16858_v40  ;;  %v16861_v48 = vld [vmem:[%s19786_s12 + $0x3b0] sm:$0xff]   ;;  %vm25491_vm3 = vmmov %vm25472_vm0  ;;  %v5466_v10 = vmul.f32 %v21010_v60, %v20096_v13 }
 0x38d   : >> { %25480 = vst [vmem:[#allocation173_spill] sm:$0xff] %v21243_v47  ;;  %v21249_v38 = vld [vmem:[#allocation2 + $0x50] sm:$0xff]  ;;  %25483 = vst [vmem:[#allocation176_spill] sm:$0xff] %v21251_v39  ;;  %14847 = vmatpush3.bf16.msra.mxu0 %v16860_v36  ;;  %v8319_v12 = vrot.slane %v21251_v39, 1  ;;  %15041 = vmatpush3.bf16.msra.mxu1 %v16858_v40  ;;  %v16865_v40 = vld [vmem:[%s19786_s12 + $0x278] sm:$0xff]  }
 0x38e   : >> { %25481 = vst [vmem:[#allocation174_spill] sm:$0xff] %v21247_v63  ;;  %25482 = vst [vmem:[#allocation175_spill] sm:$0xff] %v21249_v38  ;;  %v21253_v18 = vld [vmem:[#allocation2 + $0x68] sm:$0xff]  ;;  %v8317_v25 = vrot.slane %v21249_v38, 1  ;;  %14848 = vmatprep.subr.bf16.mxu0 %v16862_v49  ;;  %15042 = vmatprep.subr.bf16.mxu1 %v16861_v48 }
 0x38f   : >> { %25484 = vst [vmem:[#allocation177_spill] sm:$0xff] %v21253_v18  ;;  %v21256_v33 = vld [vmem:[#allocation2 + $0x58] sm:$0xff]  ;;  %v24392_v51 = vrot.slane %v21253_v18, 1  ;;  %vm25496_vm2 = vmmov %vm25472_vm0 }
 0x390   : >> { %25485 = vst [vmem:[#allocation178_spill] sm:$0xff] %v21256_v33  ;;  %v8318_v52 = vrot.slane %v21256_v33, 1  ;;  %v21269_v11 = vsel %vm25486_vm5, %v8316_v32, %v8317_v25  ;;  %vm25498_vm5 = vcmp.lt.s32.totalorder %v25211_v59, 1 }
 0x391   : >> { %25487 = vst [vmem:[#allocation179_spill] sm:$0xff] %v21269_v11  ;;  %14849 = vmatpush3.bf16.msra.mxu0 %v16862_v49  ;;  %v21291_v36 = vsel %vm25491_vm3, %v8319_v12, %v24392_v51  ;;  %15043 = vmatpush3.bf16.msra.mxu1 %v16861_v48  ;;  %v5468_v49 = vmul.f32 %v21010_v60, %v20164_v58  ;;  %vm25501_vm3 = vmmov %vm25496_vm2 }
 0x392   : >> { %v21277_v42 = vsel %vm25472_vm0, %v8317_v25, %v8318_v52  ;;  %v21283_v32 = vsel %vm25489_vm7, %v8318_v52, %v8319_v12  ;;  %25492 = vst [vmem:[#allocation182_spill] sm:$0xff] %v21291_v36  ;;  %14850 = vmatprep.subr.bf16.mxu0 %v16863_v21  ;;  %v16864_v25 = vld [vmem:[%s19786_s12 + $0x3b8] sm:$0xff]   ;;  %v5469_v51 = vmul.f32 %v21010_v60, %v25493_v61  ;;  %vm25499_vm0 = vmmov %vm25498_vm5  ;;  %v25518_v36 = vld [vmem:[#allocation163_spill] sm:$0xff] }
 0x393   : >> { %25488 = vst [vmem:[#allocation180_spill] sm:$0xff] %v21277_v42  ;;  %25490 = vst [vmem:[#allocation181_spill] sm:$0xff] %v21283_v32  ;;  %15044 = vmatprep.subr.bf16.mxu1 %v16864_v25 }
 0x394   : >> { %vm25500_vm7 = vmmov %vm25496_vm2 }
 0x395   : >> { %14851 = vmatpush3.bf16.msra.mxu0 %v16863_v21  ;;  %15045 = vmatpush3.bf16.msra.mxu1 %v16864_v25  ;;  %v25494_v21 = vld [vmem:[#allocation156_spill] sm:$0xff] }
 0x396   : >> { %14852 = vmatprep.subr.bf16.mxu0 %v16865_v40  ;;  %v5467_v53 = vmul.f32 %v21010_v60, %v25494_v21  ;;  %15078 = vmatprep.subr.bf16.mxu1 %v21306_v24 }
 0x399   : >> { %14853 = vmatpush3.bf16.msra.mxu0 %v16865_v40 }
 0x39a   : >> { %v14772_v52 = vpop.f32.mrb[12].mxu0 }
 0x39b   : >> { %v5376_v12 = vadd.f32 %v14772_v52, %v21013_v29  ;;  %v5367_v45 = vpop.f32.mrb[13].mxu0 }
 0x39c   : >> { %v5368_v48 = vadd.f32 %v21013_v29, %v5367_v45  ;;  %v14773_v43 = vpop.f32.mrb[14].mxu0 }
 0x39d   : >> { %v5500_v58 = vadd.f32 %v5468_v49, %v5376_v12  ;;  %v5379_v26 = vadd.f32 %v14773_v43, %v21013_v29  ;;  %v5370_v13 = vpop.f32.mrb[15].mxu0 }
 0x39e   : >> { %v5498_v25 = vadd.f32 %v5466_v10, %v5368_v48  ;;  %v5371_v52 = vadd.f32 %v21013_v29, %v5370_v13 }
 0x39f   : >> { %v5532_v28 = vmax.f32 %v5500_v58, 0.0  ;;  %v5501_v61 = vadd.f32 %v5469_v51, %v5379_v26 }
 0x3a0   : >> { %v5530_v40 = vmax.f32 %v5498_v25, 0.0  ;;  %v5499_v44 = vadd.f32 %v5467_v53, %v5371_v52  ;;  %v25495_v53 = vrot.slane %v21206_v16, 1  ;;  %v25497_v25 = vrot.slane %v21206_v16, 7 }
 0x3a1   : >> { %5565 = vst [vmem:[#allocation2 + $0x80] sm:$0xff] %v5532_v28  ;;  %v21311_v45 = vmax.f32 %v5501_v61, 0.0  ;;  %v7270_v42 = vrot.slane %v5532_v28, 1  ;;  %v5631_v21 = vrot.slane %v5532_v28, 7 }
 0x3a2   : >> { %5563 = vst [vmem:[#allocation2 + $0x70] sm:$0xff] %v5530_v40  ;;  %v5531_v32 = vmax.f32 %v5499_v44, 0.0  ;;  %v7268_v49 = vrot.slane %v5530_v40, 1  ;;  %v5629_v12 = vrot.slane %v5530_v40, 7 }
 0x3a3   : >> { %5566 = vst [vmem:[#allocation2 + $0x88] sm:$0xff] %v21311_v45  ;;  %v5755_v43 = vpack.c.bf16 %v21311_v45, %v5532_v28  ;;  %v24401_v10 = vrot.slane %v21311_v45, 7  ;;  %v24402_v48 = vrot.slane %v21311_v45, 1 }
 0x3a4   : >> { %5564 = vst [vmem:[#allocation2 + $0x78] sm:$0xff] %v5531_v32  ;;  %v5754_v26 = vpack.c.bf16 %v5531_v32, %v5530_v40  ;;  %v7307_v51 = vsel %vm25496_vm2, %v25495_v53, %v7268_v49  ;;  %v7269_v58 = vrot.slane %v5531_v32, 1  ;;  %v5630_v13 = vrot.slane %v5531_v32, 7 }
 0x3a5   : >> { %v21322_v44 = vpack.c.bf16 %v7307_v51, %v21232_v9  ;;  %v5664_v28 = vsel %vm25498_vm5, %v25497_v25, %v5629_v12  ;;  %v5661_v52 = vsel %vm25499_vm0, %v5631_v21, %v24401_v10  ;;  %v21336_v61 = vsel %vm25500_vm7, %v7270_v42, %v24402_v48  ;;  %vm25502_vm5 = vmmov %vm25499_vm0 }
 0x3a6   : >> { %14819 = vmatmul.mubr.bf16.gmra.mrb[44].mxu0 %v5754_v26  ;;  %15010 = vmatprep.mubr.bf16.mxu1 %v5754_v26  ;;  %v7305_v9 = vsel %vm25501_vm3, %v7269_v58, %v7270_v42  ;;  %v7306_v16 = vsel %vm25496_vm2, %v7268_v49, %v7269_v58  ;;  %v5663_v32 = vsel %vm25502_vm5, %v5629_v12, %v5630_v13  ;;  %vm25510_vm7 = vmmov %vm25496_vm2 }
 0x3a7   : >> { %14822 = vmatprep.mubr.bf16.mxu0 %v5755_v43  ;;  %15011 = vmatmul.mubr.bf16.gmra.mrb[12].mxu1 %v5755_v43  ;;  %v21344_v40 = vpack.c.bf16 %v7305_v9, %v7306_v16  ;;  %v21346_v53 = vpack.c.bf16 %v5663_v32, %v5664_v28  ;;  %v5662_v51 = vsel %vm25499_vm0, %v5630_v13, %v5631_v21  ;;  %v25509_v13 = vrot.slane %v21253_v18, 1  ;;  %vm25512_vm3 = vmmov %vm25496_vm2  ;;  %v25517_v9 = vld [vmem:[#allocation164_spill] sm:$0xff] }
 0x3a8   : >> { %v21350_v25 = vpack.c.bf16 %v5661_v52, %v5662_v51  ;;  %v21352_v26 = vld [vmem:[#allocation2 + $0x80] sm:$0xff]  ;;  %vm25515_vm5 = vmmov %vm25496_vm2  ;;  %v5472_v21 = vmul.f32 %v21010_v60, %v25517_v9 }
 0x3a9   : >> { %25503 = vst [vmem:[#allocation162_spill] sm:$0xff] %v21346_v53  ;;  %25505 = vst [vmem:[#allocation183_spill] sm:$0xff] %v21352_v26  ;;  %v21354_v42 = vld [vmem:[#allocation2 + $0x70] sm:$0xff]  ;;  %v8323_v58 = vrot.slane %v21352_v26, 1 }
 0x3aa   : >> { %25504 = vst [vmem:[#allocation156_spill] sm:$0xff] %v21350_v25  ;;  %25506 = vst [vmem:[#allocation184_spill] sm:$0xff] %v21354_v42  ;;  %v21356_v10 = vld [vmem:[#allocation2 + $0x88] sm:$0xff]  ;;  %v8321_v49 = vrot.slane %v21354_v42, 1 }
 0x3ab   : >> { %25507 = vst [vmem:[#allocation185_spill] sm:$0xff] %v21356_v10  ;;  %v21359_v12 = vld [vmem:[#allocation2 + $0x78] sm:$0xff]  ;;  %v24404_v28 = vrot.slane %v21356_v10, 1  ;;  %vm25522_vm0 = vmmov %vm25496_vm2 }
 0x3ac   : >> { %25508 = vst [vmem:[#allocation186_spill] sm:$0xff] %v21359_v12  ;;  %v21371_v52 = vsel %vm25510_vm7, %v25509_v13, %v8321_v49  ;;  %v8322_v16 = vrot.slane %v21359_v12, 1  ;;  %vm25524_vm7 = vcmp.lt.s32.totalorder %v25211_v59, 1 }
 0x3ad   : >> { %25511 = vst [vmem:[#allocation187_spill] sm:$0xff] %v21371_v52  ;;  %v21380_v32 = vsel %vm25512_vm3, %v8323_v58, %v24404_v28  ;;  %v5470_v28 = vmul.f32 %v21010_v60, %v25518_v36  ;;  %v21405_v36 = vld [vmem:[%s19786_s12 + $0x2c0] sm:$0xff]   ;;  %vm25525_vm3 = vmmov %vm25524_vm7 }
 0x3ae   : >> { %25513 = vst [vmem:[#allocation188_spill] sm:$0xff] %v21380_v32  ;;  %v21384_v51 = vsel %vm25496_vm2, %v8322_v16, %v8323_v58  ;;  %v21388_v43 = vsel %vm25515_vm5, %v8321_v49, %v8322_v16  ;;  %v25519_v58 = vld [vmem:[#allocation154_spill] sm:$0xff]  ;;  %14886 = vmatprep.subr.bf16.mxu0 %v21405_v36  ;;  %vm25526_vm2 = vmmov %vm25522_vm0  ;;  %v25543_v32 = vld [vmem:[#allocation153_spill] sm:$0xff] }
 0x3af   : >> { %25514 = vst [vmem:[#allocation189_spill] sm:$0xff] %v21384_v51  ;;  %25516 = vst [vmem:[#allocation190_spill] sm:$0xff] %v21388_v43  ;;  %v5473_v11 = vmul.f32 %v21010_v60, %v25519_v58 }
 0x3b0   : >> { %vm25527_vm5 = vmmov %vm25522_vm0 }
 0x3b8   : >> { %v14776_v48 = vpop.f32.mrb[16].mxu0 }
 0x3b9   : >> { %v5392_v52 = vadd.f32 %v14776_v48, %v21013_v29  ;;  %v5383_v8 = vpop.f32.mrb[17].mxu0 }
 0x3ba   : >> { %v5384_v49 = vadd.f32 %v21013_v29, %v5383_v8  ;;  %v14777_v16 = vpop.f32.mrb[18].mxu0 }
 0x3bb   : >> { %v5504_v13 = vadd.f32 %v5472_v21, %v5392_v52  ;;  %v5395_v43 = vadd.f32 %v14777_v16, %v21013_v29  ;;  %v5386_v9 = vpop.f32.mrb[19].mxu0 }
 0x3bc   : >> { %v5502_v51 = vadd.f32 %v5470_v28, %v5384_v49  ;;  %v5387_v2 = vadd.f32 %v21013_v29, %v5386_v9  ;;  %v25523_v49 = vrot.slane %v21311_v45, 7 }
 0x3bd   : >> { %v5536_v48 = vmax.f32 %v5504_v13, 0.0  ;;  %v5505_v30 = vadd.f32 %v5473_v11, %v5395_v43 }
 0x3be   : >> { %v5534_v39 = vmax.f32 %v5502_v51, 0.0  ;;  %v5503_v18 = vadd.f32 %v5471_v35, %v5387_v2  ;;  %v25521_v35 = vrot.slane %v21311_v45, 1 }
 0x3bf   : >> { %5569 = vst [vmem:[#allocation2 + $0xa0] sm:$0xff] %v5536_v48  ;;  %v21408_v8 = vmax.f32 %v5505_v30, 0.0  ;;  %v7274_v58 = vrot.slane %v5536_v48, 1  ;;  %v5635_v4 = vrot.slane %v5536_v48, 7 }
 0x3c0   : >> { %5567 = vst [vmem:[#allocation2 + $0x90] sm:$0xff] %v5534_v39  ;;  %v5535_v21 = vmax.f32 %v5503_v18, 0.0  ;;  %v7272_v52 = vrot.slane %v5534_v39, 1  ;;  %v5633_v16 = vrot.slane %v5534_v39, 7 }
 0x3c1   : >> { %5570 = vst [vmem:[#allocation2 + $0xa8] sm:$0xff] %v21408_v8  ;;  %v5757_v28 = vpack.c.bf16 %v21408_v8, %v5536_v48  ;;  %v24416_v13 = vrot.slane %v21408_v8, 7  ;;  %v24417_v11 = vrot.slane %v21408_v8, 1 }
 0x3c2   : >> { %5568 = vst [vmem:[#allocation2 + $0x98] sm:$0xff] %v5535_v21  ;;  %v5756_v2 = vpack.c.bf16 %v5535_v21, %v5534_v39  ;;  %v7303_v30 = vsel %vm25522_vm0, %v25521_v35, %v7272_v52  ;;  %v7273_v43 = vrot.slane %v5535_v21, 1  ;;  %v5634_v51 = vrot.slane %v5535_v21, 7 }
 0x3c3   : >> { %v21419_v18 = vpack.c.bf16 %v7303_v30, %v21336_v61  ;;  %v5660_v9 = vsel %vm25524_vm7, %v25523_v49, %v5633_v16  ;;  %v5657_v39 = vsel %vm25525_vm3, %v5635_v4, %v24416_v13  ;;  %v21433_v48 = vsel %vm25526_vm2, %v7274_v58, %v24417_v11  ;;  %vm25528_vm7 = vmmov %vm25525_vm3 }
 0x3c4   : >> { %14823 = vmatmul.mubr.bf16.gmra.mrb[48].mxu0 %v5756_v2  ;;  %15014 = vmatprep.mubr.bf16.mxu1 %v5756_v2  ;;  %v7301_v61 = vsel %vm25527_vm5, %v7273_v43, %v7274_v58  ;;  %v7302_v45 = vsel %vm25522_vm0, %v7272_v52, %v7273_v43  ;;  %v5659_v21 = vsel %vm25528_vm7, %v5633_v16, %v5634_v51  ;;  %vm25536_vm2 = vmmov %vm25522_vm0 }
 0x3c5   : >> { %14826 = vmatprep.mubr.bf16.mxu0 %v5757_v28  ;;  %15015 = vmatmul.mubr.bf16.gmra.mrb[16].mxu1 %v5757_v28  ;;  %v21441_v35 = vpack.c.bf16 %v7301_v61, %v7302_v45  ;;  %v21443_v30 = vpack.c.bf16 %v5659_v21, %v5660_v9  ;;  %v5658_v49 = vsel %vm25525_vm3, %v5634_v51, %v5635_v4  ;;  %v25535_v51 = vrot.slane %v21356_v10, 1  ;;  %vm25538_vm5 = vmmov %vm25522_vm0 }
 0x3c6   : >> { %v21447_v13 = vpack.c.bf16 %v5657_v39, %v5658_v49  ;;  %v21449_v2 = vld [vmem:[#allocation2 + $0xa0] sm:$0xff]  ;;  %vm25541_vm7 = vmmov %vm25522_vm0  ;;  %v5476_v61 = vmul.f32 %v21010_v60, %v20466_v27 }
 0x3c7   : >> { %25529 = vst [vmem:[#allocation164_spill] sm:$0xff] %v21443_v30  ;;  %25531 = vst [vmem:[#allocation154_spill] sm:$0xff] %v21449_v2  ;;  %v21451_v58 = vld [vmem:[#allocation2 + $0x90] sm:$0xff]  ;;  %v8327_v43 = vrot.slane %v21449_v2, 1 }
 0x3c8   : >> { %25530 = vst [vmem:[#allocation163_spill] sm:$0xff] %v21447_v13  ;;  %25532 = vst [vmem:[#allocation155_spill] sm:$0xff] %v21451_v58  ;;  %v21453_v11 = vld [vmem:[#allocation2 + $0xa8] sm:$0xff]  ;;  %v8325_v52 = vrot.slane %v21451_v58, 1 }
 0x3c9   : >> { %25533 = vst [vmem:[#allocation191_spill] sm:$0xff] %v21453_v11  ;;  %v21456_v16 = vld [vmem:[#allocation2 + $0x98] sm:$0xff]  ;;  %v24420_v9 = vrot.slane %v21453_v11, 1  ;;  %vm25547_vm3 = vmmov %vm25522_vm0 }
 0x3ca   : >> { %25534 = vst [vmem:[#allocation192_spill] sm:$0xff] %v21456_v16  ;;  %v21468_v39 = vsel %vm25536_vm2, %v25535_v51, %v8325_v52  ;;  %v8326_v45 = vrot.slane %v21456_v16, 1  ;;  %vm25549_vm2 = vcmp.lt.s32.totalorder %v25211_v59, 1 }
 0x3cb   : >> { %25537 = vst [vmem:[#allocation193_spill] sm:$0xff] %v21468_v39  ;;  %v21477_v21 = vsel %vm25538_vm5, %v8327_v43, %v24420_v9  ;;  %v5474_v39 = vmul.f32 %v21010_v60, %v25543_v32  ;;  %vm25550_vm5 = vmmov %vm25549_vm2 }
 0x3cc   : >> { %25539 = vst [vmem:[#allocation194_spill] sm:$0xff] %v21477_v21  ;;  %v21481_v49 = vsel %vm25522_vm0, %v8326_v45, %v8327_v43  ;;  %v21485_v28 = vsel %vm25541_vm7, %v8325_v52, %v8326_v45  ;;  %v5477_v43 = vmul.f32 %v21010_v60, %v25544_v31  ;;  %v25545_v45 = vld [vmem:[#allocation152_spill] sm:$0xff]  ;;  %vm25551_vm7 = vmmov %vm25522_vm0 }
 0x3cd   : >> { %25540 = vst [vmem:[#allocation195_spill] sm:$0xff] %v21481_v49  ;;  %25542 = vst [vmem:[#allocation196_spill] sm:$0xff] %v21485_v28  ;;  %v5475_v46 = vmul.f32 %v21010_v60, %v25545_v45 }
 0x3d5   : >> { %v14780_v4 = vpop.f32.mrb[20].mxu0 }
 0x3d6   : >> { %v5408_v9 = vadd.f32 %v14780_v4, %v21013_v29  ;;  %v5399_v38 = vpop.f32.mrb[21].mxu0 }
 0x3d7   : >> { %v5400_v15 = vadd.f32 %v21013_v29, %v5399_v38  ;;  %v14781_v52 = vpop.f32.mrb[22].mxu0 }
 0x3d8   : >> { %v5508_v51 = vadd.f32 %v5476_v61, %v5408_v9  ;;  %v5411_v28 = vadd.f32 %v14781_v52, %v21013_v29  ;;  %v5402_v27 = vpop.f32.mrb[23].mxu0 }
 0x3d9   : >> { %v5506_v49 = vadd.f32 %v5474_v39, %v5400_v15  ;;  %v5403_v0 = vadd.f32 %v21013_v29, %v5402_v27 }
 0x3da   : >> { %v5540_v32 = vmax.f32 %v5508_v51, 0.0  ;;  %v5509_v50 = vadd.f32 %v5477_v43, %v5411_v28  ;;  %v25548_v51 = vrot.slane %v21408_v8, 7 }
 0x3db   : >> { %v5538_v4 = vmax.f32 %v5506_v49, 0.0  ;;  %v5507_v3 = vadd.f32 %v5475_v46, %v5403_v0  ;;  %v25546_v46 = vrot.slane %v21408_v8, 1 }
 0x3dc   : >> { %5573 = vst [vmem:[#allocation2 + $0xc0] sm:$0xff] %v5540_v32  ;;  %v21501_v2 = vmax.f32 %v5509_v50, 0.0  ;;  %v7278_v58 = vrot.slane %v5540_v32, 1  ;;  %v5639_v61 = vrot.slane %v5540_v32, 7 }
 0x3dd   : >> { %5571 = vst [vmem:[#allocation2 + $0xb0] sm:$0xff] %v5538_v4  ;;  %v5539_v31 = vmax.f32 %v5507_v3, 0.0  ;;  %v7276_v38 = vrot.slane %v5538_v4, 1  ;;  %v5637_v16 = vrot.slane %v5538_v4, 7 }
 0x3de   : >> { %5574 = vst [vmem:[#allocation2 + $0xc8] sm:$0xff] %v21501_v2  ;;  %v5759_v9 = vpack.c.bf16 %v21501_v2, %v5540_v32  ;;  %v24437_v15 = vrot.slane %v21501_v2, 7  ;;  %v24438_v39 = vrot.slane %v21501_v2, 1 }
 0x3df   : >> { %5572 = vst [vmem:[#allocation2 + $0xb8] sm:$0xff] %v5539_v31  ;;  %v5758_v28 = vpack.c.bf16 %v5539_v31, %v5538_v4  ;;  %v7299_v50 = vsel %vm25547_vm3, %v25546_v46, %v7276_v38  ;;  %v7277_v3 = vrot.slane %v5539_v31, 1  ;;  %v5638_v0 = vrot.slane %v5539_v31, 7  ;;  %vm25552_vm3 = vmmov %vm25522_vm0 }
 0x3e0   : >> { %v21512_v49 = vpack.c.bf16 %v7299_v50, %v21433_v48  ;;  %v5656_v43 = vsel %vm25549_vm2, %v25548_v51, %v5637_v16  ;;  %v5653_v52 = vsel %vm25550_vm5, %v5639_v61, %v24437_v15  ;;  %v21526_v45 = vsel %vm25522_vm0, %v7278_v58, %v24438_v39  ;;  %vm25554_vm5 = vmmov %vm25549_vm2  ;;  %v25569_v15 = vld [vmem:[#allocation150_spill] sm:$0xff] }
 0x3e1   : >> { %14827 = vmatmul.mubr.bf16.gmra.mrb[52].mxu0 %v5758_v28  ;;  %15018 = vmatprep.mubr.bf16.mxu1 %v5758_v28  ;;  %v7297_v48 = vsel %vm25551_vm7, %v7277_v3, %v7278_v58  ;;  %v7298_v8 = vsel %vm25552_vm3, %v7276_v38, %v7277_v3  ;;  %v5655_v27 = vsel %vm25549_vm2, %v5637_v16, %v5638_v0  ;;  %vm25562_vm7 = vmmov %vm25522_vm0 }
 0x3e2   : >> { %14830 = vmatprep.mubr.bf16.mxu0 %v5759_v9  ;;  %15019 = vmatmul.mubr.bf16.gmra.mrb[20].mxu1 %v5759_v9  ;;  %v21534_v32 = vpack.c.bf16 %v7297_v48, %v7298_v8  ;;  %v21536_v4 = vpack.c.bf16 %v5655_v27, %v5656_v43  ;;  %v5654_v31 = vsel %vm25554_vm5, %v5638_v0, %v5639_v61  ;;  %v25560_v0 = vrot.slane %v21453_v11, 1  ;;  %vm25564_vm3 = vmmov %vm25522_vm0 }
 0x3e3   : >> { %v21540_v46 = vpack.c.bf16 %v5653_v52, %v5654_v31  ;;  %v21542_v28 = vld [vmem:[#allocation2 + $0xc0] sm:$0xff]  ;;  %vm25566_vm2 = vmmov %vm25522_vm0  ;;  %v25568_v52 = vld [vmem:[#allocation149_spill] sm:$0xff]  ;;  %v5478_v39 = vmul.f32 %v21010_v60, %v25569_v15 }
 0x3e4   : >> { %25553 = vst [vmem:[#allocation153_spill] sm:$0xff] %v21536_v4  ;;  %25556 = vst [vmem:[#allocation152_spill] sm:$0xff] %v21542_v28  ;;  %v21544_v58 = vld [vmem:[#allocation2 + $0xb0] sm:$0xff]  ;;  %v8331_v3 = vrot.slane %v21542_v28, 1  ;;  %v5480_v9 = vmul.f32 %v21010_v60, %v25568_v52 }
 0x3e5   : >> { %25555 = vst [vmem:[#allocation151_spill] sm:$0xff] %v21540_v46  ;;  %25557 = vst [vmem:[#allocation197_spill] sm:$0xff] %v21544_v58  ;;  %v21546_v50 = vld [vmem:[#allocation2 + $0xc8] sm:$0xff]  ;;  %v8329_v38 = vrot.slane %v21544_v58, 1 }
 0x3e6   : >> { %25558 = vst [vmem:[#allocation198_spill] sm:$0xff] %v21546_v50  ;;  %v21549_v16 = vld [vmem:[#allocation2 + $0xb8] sm:$0xff]  ;;  %v24439_v51 = vrot.slane %v21546_v50, 1  ;;  %vm25573_vm5 = vmmov %vm25522_vm0 }
 0x3e7   : >> { %25559 = vst [vmem:[#allocation199_spill] sm:$0xff] %v21549_v16  ;;  %v21561_v43 = vsel %vm25522_vm0, %v25560_v0, %v8329_v38  ;;  %v8330_v48 = vrot.slane %v21549_v16, 1  ;;  %vm25575_vm0 = vcmp.lt.s32.totalorder %v25211_v59, 1 }
 0x3e8   : >> { %25561 = vst [vmem:[#allocation200_spill] sm:$0xff] %v21561_v43  ;;  %v21570_v8 = vsel %vm25562_vm7, %v8331_v3, %v24439_v51  ;;  %v25570_v43 = vld [vmem:[#allocation148_spill] sm:$0xff]  ;;  %vm25576_vm7 = vmmov %vm25575_vm0 }
 0x3e9   : >> { %25563 = vst [vmem:[#allocation201_spill] sm:$0xff] %v21570_v8  ;;  %v21574_v27 = vsel %vm25564_vm3, %v8330_v48, %v8331_v3  ;;  %v21578_v31 = vsel %vm25566_vm2, %v8329_v38, %v8330_v48  ;;  %v5481_v3 = vmul.f32 %v21010_v60, %v25570_v43  ;;  %v25571_v48 = vld [vmem:[#allocation147_spill] sm:$0xff]  ;;  %vm25577_vm3 = vmmov %vm25566_vm2 }
 0x3ea   : >> { %25565 = vst [vmem:[#allocation202_spill] sm:$0xff] %v21574_v27  ;;  %25567 = vst [vmem:[#allocation203_spill] sm:$0xff] %v21578_v31  ;;  %v5479_v58 = vmul.f32 %v21010_v60, %v25571_v48 }
 0x3f2   : >> { %v14784_v61 = vpop.f32.mrb[24].mxu0 }
 0x3f3   : >> { %v5424_v51 = vadd.f32 %v14784_v61, %v21013_v29  ;;  %v5415_v21 = vpop.f32.mrb[25].mxu0 }
 0x3f4   : >> { %v5416_v28 = vadd.f32 %v21013_v29, %v5415_v21  ;;  %v14785_v38 = vpop.f32.mrb[26].mxu0 }
 0x3f5   : >> { %v5512_v0 = vadd.f32 %v5480_v9, %v5424_v51  ;;  %v5427_v31 = vadd.f32 %v14785_v38, %v21013_v29  ;;  %v5418_v52 = vpop.f32.mrb[27].mxu0 }
 0x3f6   : >> { %v5510_v27 = vadd.f32 %v5478_v39, %v5416_v28  ;;  %v5419_v16 = vadd.f32 %v21013_v29, %v5418_v52 }
 0x3f7   : >> { %v5544_v15 = vmax.f32 %v5512_v0, 0.0  ;;  %v5513_v11 = vadd.f32 %v5481_v3, %v5427_v31 }
 0x3f8   : >> { %v5542_v61 = vmax.f32 %v5510_v27, 0.0  ;;  %v5511_v26 = vadd.f32 %v5479_v58, %v5419_v16  ;;  %v25572_v58 = vrot.slane %v21501_v2, 1  ;;  %v25574_v27 = vrot.slane %v21501_v2, 7 }
 0x3f9   : >> { %5577 = vst [vmem:[#allocation2 + $0xe0] sm:$0xff] %v5544_v15  ;;  %v21594_v42 = vmax.f32 %v5513_v11, 0.0  ;;  %v7282_v10 = vrot.slane %v5544_v15, 1  ;;  %v5643_v9 = vrot.slane %v5544_v15, 7 }
 0x3fa   : >> { %5575 = vst [vmem:[#allocation2 + $0xd0] sm:$0xff] %v5542_v61  ;;  %v5543_v21 = vmax.f32 %v5511_v26, 0.0  ;;  %v7280_v43 = vrot.slane %v5542_v61, 1  ;;  %v5641_v12 = vrot.slane %v5542_v61, 7 }
 0x3fb   : >> { %5578 = vst [vmem:[#allocation2 + $0xe8] sm:$0xff] %v21594_v42  ;;  %v5761_v60 = vpack.c.bf16 %v21594_v42, %v5544_v15  ;;  %v24461_v39 = vrot.slane %v21594_v42, 7  ;;  %v24462_v29 = vrot.slane %v21594_v42, 1 }
 0x3fc   : >> { %5576 = vst [vmem:[#allocation2 + $0xd8] sm:$0xff] %v5543_v21  ;;  %v5760_v28 = vpack.c.bf16 %v5543_v21, %v5542_v61  ;;  %v7295_v11 = vsel %vm25573_vm5, %v25572_v58, %v7280_v43  ;;  %v7281_v26 = vrot.slane %v5543_v21, 1  ;;  %v5642_v16 = vrot.slane %v5543_v21, 7  ;;  %vm25578_vm5 = vmmov %vm25566_vm2 }
 0x3fd   : >> { %v21605_v51 = vpack.c.bf16 %v7295_v11, %v21526_v45  ;;  %v5652_v31 = vsel %vm25575_vm0, %v25574_v27, %v5641_v12  ;;  %v5649_v0 = vsel %vm25576_vm7, %v5643_v9, %v24461_v39  ;;  %v21619_v3 = vsel %vm25577_vm3, %v7282_v10, %v24462_v29  ;;  %vm25580_vm7 = vmmov %vm25575_vm0  ;;  %v16911_v11 = vld [vmem:[%s21007_s20] ss:$0 sm:$0xff]  ;;  %v16912_v29 = vld [vmem:[#allocation2 + $0x108] sm:$0xff] }
 0x3fe   : >> { %14831 = vmatmul.mubr.bf16.gmra.mrb[56].mxu0 %v5760_v28  ;;  %15022 = vmatprep.mubr.bf16.mxu1 %v5760_v28  ;;  %v7293_v45 = vsel %vm25566_vm2, %v7281_v26, %v7282_v10  ;;  %v7294_v2 = vsel %vm25578_vm5, %v7280_v43, %v7281_v26  ;;  %v5651_v38 = vsel %vm25575_vm0, %v5641_v12, %v5642_v16  ;;  %v25585_v26 = vrot.slane %v21546_v50, 1  ;;  %vm25586_vm3 = vmmov %vm25566_vm2  ;;  %v16914_v50 = vld [vmem:[#allocation2] sm:$0xff] }
 0x3ff   : >> { %14834 = vmatprep.mubr.bf16.mxu0 %v5761_v60  ;;  %15023 = vmatmul.mubr.bf16.gmra.mrb[24].mxu1 %v5761_v60  ;;  %v21627_v48 = vpack.c.bf16 %v7293_v45, %v7294_v2  ;;  %v21629_v52 = vpack.c.bf16 %v5651_v38, %v5652_v31  ;;  %v5650_v15 = vsel %vm25580_vm7, %v5642_v16, %v5643_v9  ;;  %vm25589_vm5 = vmmov %vm25566_vm2  ;;  %v5615_v38 = vrot.slane %v16914_v50, 7 }
 0x400   : >> { %v21633_v61 = vpack.c.bf16 %v5649_v0, %v5650_v15  ;;  %v21635_v21 = vld [vmem:[#allocation2 + $0xe0] sm:$0xff]  ;;  %vm25591_vm0 = vmmov %vm25566_vm2 }
 0x401   : >> { %25579 = vst [vmem:[#allocation149_spill] sm:$0xff] %v21629_v52  ;;  %25582 = vst [vmem:[#allocation148_spill] sm:$0xff] %v21635_v21  ;;  %v21637_v10 = vld [vmem:[#allocation2 + $0xd0] sm:$0xff]  ;;  %v8335_v58 = vrot.slane %v21635_v21, 1  ;;  %v16910_v15 = vld [vmem:[%s21001_s16] ss:$0 sm:$0xff] }
 0x402   : >> { %25581 = vst [vmem:[#allocation150_spill] sm:$0xff] %v21633_v61  ;;  %25583 = vst [vmem:[#allocation147_spill] sm:$0xff] %v21637_v10  ;;  %v21639_v43 = vld [vmem:[#allocation2 + $0xe8] sm:$0xff]  ;;  %v8333_v12 = vrot.slane %v21637_v10, 1  ;;  %v5482_v60 = vmul.f32 %v16910_v15, %v20700_v54  ;;  %v5485_v8 = vmul.f32 %v16912_v29, %v16910_v15  ;;  %v16913_v21 = vld [vmem:[#allocation2 + $0xf8] sm:$0xff] }
 0x403   : >> { %v21642_v28 = vld [vmem:[#allocation2 + $0xd8] sm:$0xff]  ;;  %v24460_v9 = vrot.slane %v21639_v43, 1  ;;  %v5483_v10 = vmul.f32 %v16913_v21, %v16910_v15 }
 0x404   : >> { %25584 = vst [vmem:[#allocation204_spill] sm:$0xff] %v21642_v28  ;;  %v21654_v16 = vsel %vm25586_vm3, %v25585_v26, %v8333_v12  ;;  %v8334_v31 = vrot.slane %v21642_v28, 1  ;;  %v5484_v26 = vmul.f32 %v16910_v15, %v20775_v7  ;;  %vm25595_vm3 = vmmov %vm25591_vm0 }
 0x405   : >> { %25587 = vst [vmem:[#allocation205_spill] sm:$0xff] %v21654_v16  ;;  %v21663_v0 = vsel %vm25566_vm2, %v8335_v58, %v24460_v9  ;;  %vm25598_vm2 = vmmov %vm25580_vm7 }
 0x406   : >> { %25588 = vst [vmem:[#allocation206_spill] sm:$0xff] %v21663_v0  ;;  %v21667_v45 = vsel %vm25589_vm5, %v8334_v31, %v8335_v58  ;;  %v21671_v2 = vsel %vm25591_vm0, %v8333_v12, %v8334_v31  ;;  %vm25599_vm5 = vmmov %vm25591_vm0 }
 0x407   : >> { %25590 = vst [vmem:[#allocation207_spill] sm:$0xff] %v21667_v45  ;;  %25592 = vst [vmem:[#allocation208_spill] sm:$0xff] %v21671_v2 }
 0x40f   : >> { %v14788_v27 = vpop.f32.mrb[28].mxu0 }
 0x410   : >> { %v5440_v9 = vadd.f32 %v16911_v11, %v14788_v27  ;;  %v5431_v39 = vpop.f32.mrb[29].mxu0 }
 0x411   : >> { %v5432_v58 = vadd.f32 %v16911_v11, %v5431_v39  ;;  %v14789_v16 = vpop.f32.mrb[30].mxu0  ;;  %v5677_v39 = vsel %vm25580_vm7, %v5615_v38, %v25593_v34  ;;  %vm25600_vm7 = vmmov %vm25598_vm2 }
 0x412   : >> { %v5516_v12 = vadd.f32 %v5484_v26, %v5440_v9  ;;  %v5443_v31 = vadd.f32 %v16911_v11, %v14789_v16  ;;  %v5434_v28 = vpop.f32.mrb[31].mxu0 }
 0x413   : >> { %v5514_v2 = vadd.f32 %v5482_v60, %v5432_v58  ;;  %v5435_v45 = vadd.f32 %v16911_v11, %v5434_v28 }
 0x414   : >> { %v5548_v7 = vmax.f32 %v5516_v12, 0.0  ;;  %v5517_v33 = vadd.f32 %v5485_v8, %v5443_v31 }
 0x415   : >> { %v5546_v37 = vmax.f32 %v5514_v2, 0.0  ;;  %v5515_v54 = vadd.f32 %v5483_v10, %v5435_v45  ;;  %v25597_v2 = vrot.slane %v21594_v42, 7 }
 0x416   : >> { %5581 = vst [vmem:[#allocation2 + $0x100] sm:$0xff] %v5548_v7  ;;  %v5549_v27 = vmax.f32 %v5517_v33, 0.0  ;;  %v7286_v9 = vrot.slane %v5548_v7, 1  ;;  %v6636_v11 = vrot.slane %v5548_v7, 7  ;;  %v25594_v33 = vrot.slane %v21594_v42, 1 }
 0x417   : >> { %5579 = vst [vmem:[#allocation2 + $0xf0] sm:$0xff] %v5546_v37  ;;  %v5547_v29 = vmax.f32 %v5515_v54, 0.0  ;;  %v7284_v21 = vrot.slane %v5546_v37, 1  ;;  %v5645_v16 = vrot.slane %v5546_v37, 7 }
 0x418   : >> { %5582 = vst [vmem:[#allocation2 + $0x108] sm:$0xff] %v5549_v27  ;;  %v6994_v50 = vpack.c.bf16 %v5549_v27, %v5548_v7  ;;  %v7287_v60 = vrot.slane %v5549_v27, 1  ;;  %v6637_v28 = vrot.slane %v5549_v27, 7  ;;  %v25608_v27 = vrot.slane %v20989_v14, 1 }
 0x419   : >> { %5580 = vst [vmem:[#allocation2 + $0xf8] sm:$0xff] %v5547_v29  ;;  %v5762_v8 = vpack.c.bf16 %v5547_v29, %v5546_v37  ;;  %v5646_v10 = vrot.slane %v5547_v29, 7  ;;  %v7291_v17 = vsel %vm25595_vm3, %v25594_v33, %v7284_v21  ;;  %v7285_v45 = vrot.slane %v5547_v29, 1  ;;  %vm25601_vm3 = vmmov %vm25591_vm0 }
 0x41a   : >> { %v21688_v34 = vpack.c.bf16 %v7291_v17, %v21619_v3  ;;  %v5648_v15 = vsel %vm25598_vm2, %v25597_v2, %v5645_v16  ;;  %v21696_v26 = vsel %vm25599_vm5, %v7286_v9, %v7287_v60  ;;  %v21701_v37 = vsel %vm25591_vm0, %v7287_v60, %v21051_v23  ;;  %vm25602_vm2 = vmmov %vm25591_vm0  ;;  %v25624_v2 = vld [vmem:[#allocation79_spill] sm:$0xff] }
 0x41b   : >> { %14835 = vmatmul.mubr.bf16.gmra.mrb[60].mxu0 %v5762_v8  ;;  %15026 = vmatprep.mubr.bf16.mxu1 %v5762_v8  ;;  %v5678_v3 = vsel %vm25600_vm7, %v5646_v10, %v5615_v38  ;;  %v21707_v42 = vsel %vm25601_vm3, %v7285_v45, %v7286_v9  ;;  %v21711_v58 = vsel %vm25602_vm2, %v7284_v21, %v7285_v45  ;;  %vm25604_vm5 = vmmov %vm25600_vm7  ;;  %v25605_v38 = vld [vmem:[#allocation38_spill] sm:$0xff]  ;;  %v25613_v21 = vld [vmem:[#allocation71_spill] sm:$0xff] }
 0x41c   : >> { %25596 = vst [vmem:[#allocation209_spill] sm:$0xff] %v21688_v34  ;;  %25603 = vst [vmem:[#allocation210_spill] sm:$0xff] %v21711_v58  ;;  %15027 = vmatmul.mubr.bf16.gmra.mrb[28].mxu1 %v6994_v50  ;;  %v12666_v12 = vpack.c.bf16 %v5677_v39, %v5678_v3  ;;  %v5647_v23 = vsel %vm25604_vm5, %v5645_v16, %v5646_v10  ;;  %vm25606_vm0 = vnez %v25605_v38  ;;  %v25620_v3 = vrot.slane %v21639_v43, 1  ;;  %v25626_v16 = vld [vmem:[#allocation85_spill] sm:$0xff] }
 0x41d   : >> { %15046 = vmatprep.mubr.msk.bf16.mxu1 %vm25606_vm0, %v21084_v1  ;;  %v21722_v54 = vpack.c.bf16 %v5647_v23, %v5648_v15  ;;  %vm25609_vm7 = vmmov %vm25602_vm2  ;;  %vm25614_vm2 = vnez %v25613_v21  ;;  %v21743_v50 = vld [vmem:[#allocation2 + $0x100] sm:$0xff]  ;;  %v25623_v15 = vpack.c.bf16 %v21072_v5, %v21079_v22  ;;  %v25686_v5 = vpack.c.bf16 %v21707_v42, %v21711_v58  ;;  %v16917_v42 = vld [vmem:[#allocation2 + $0x38] sm:$0xff] }
 0x41e   : >> { %v21728_v39 = vsel %vm25609_vm7, %v7285_v45, %v25608_v27  ;;  %vm25611_vm3 = vmmov %vm25604_vm5  ;;  %14854 = vmatprep.mubr.msk.bf16.mxu0 %vm25614_vm2, %v12666_v12  ;;  %v21737_v9 = vld [vmem:[#allocation2 + $0xf0] sm:$0xff]  ;;  %v8339_v27 = vrot.slane %v21743_v50, 1  ;;  %v7664_v58 = vrot.slane %v16917_v42, 7  ;;  %v16883_v42 = vld [vmem:[%s19786_s12 + $0x408] sm:$0xff]  }
 0x41f   : >> { %25607 = vst [vmem:[#allocation211_spill] sm:$0xff] %v21722_v54  ;;  %25610 = vst [vmem:[#allocation212_spill] sm:$0xff] %v21728_v39  ;;  %v21733_v29 = vsel %vm25611_vm3, %v6637_v28, %v21046_v62  ;;  %v21745_v60 = vld [vmem:[#allocation2 + $0x108] sm:$0xff]  ;;  %v8337_v33 = vrot.slane %v21737_v9, 1  ;;  %v21758_v45 = vld [vmem:[#allocation2 + $0x110] sm:$0xff] }
 0x420   : >> { %25612 = vst [vmem:[#allocation213_spill] sm:$0xff] %v21733_v29  ;;  %vm25615_vm5 = vmmov %vm25611_vm3  ;;  %v21756_v17 = vld [vmem:[#allocation2 + $0xf8] sm:$0xff]  ;;  %v8340_v14 = vrot.slane %v21745_v60, 1  ;;  %v25628_v12 = vld [vmem:[#allocation45_spill] sm:$0xff] }
 0x421   : >> { %v21749_v62 = vsel %vm25615_vm5, %v6636_v11, %v6637_v28  ;;  %vm25617_vm7 = vmmov %vm25611_vm3  ;;  %25619 = vst [vmem:[#allocation216_spill] sm:$0xff] %v21758_v45  ;;  %vm25621_vm3 = vcmp.lt.s32.totalorder %v25211_v59, 7  ;;  %v8338_v23 = vrot.slane %v21756_v17, 1  ;;  %vm25625_vm5 = vnez %v25624_v2  ;;  %v16872_v28 = vld [vmem:[%s19786_s12 + $0x2c8] sm:$0xff]   ;;  %v25778_v21 = vld [vmem:[#allocation158_spill] sm:$0xff] }
 0x422   : >> { %25616 = vst [vmem:[#allocation214_spill] sm:$0xff] %v21749_v62  ;;  %v21753_v8 = vsel %vm25617_vm7, %v5646_v10, %v6636_v11  ;;  %v21770_v11 = vsel %vm25621_vm3, %v25620_v3, %v8337_v33  ;;  %v16867_v10 = vld [vmem:[%s19786_s12 + $0x3c8] sm:$0xff]   ;;  %v24485_v3 = vrot.slane %v21758_v45, 1  ;;  %vm25627_vm7 = vnez %v25626_v16  ;;  %v25655_v62 = vld [vmem:[#allocation115_spill] sm:$0xff]  ;;  %v16901_v2 = vld [vmem:[%s19786_s12 + $0x458] sm:$0xff]  }
 0x423   : >> { %25618 = vst [vmem:[#allocation215_spill] sm:$0xff] %v21753_v8  ;;  %25622 = vst [vmem:[#allocation217_spill] sm:$0xff] %v21770_v11  ;;  %14855 = vmatmul.mubr.msk.bf16.vlgmr.msra.gmra.mrb[32].mxu0 %vm25625_vm5, %v25623_v15  ;;  %vm25629_vm3 = vnez %v25628_v12  ;;  %v21793_v22 = vsel %vm25630_vm6, %v8338_v23, %v8339_v27  ;;  %v25632_v15 = vld [vmem:[#allocation47_spill] sm:$0xff]  ;;  %v21801_v7 = vsel %vm25634_vm9, %v8337_v33, %v8338_v23  ;;  %v16873_v23 = vld [vmem:[%s19786_s12 + $0x2d0] sm:$0xff]   ;;  %vm25656_vm1 = vnez %v25655_v62 }
 0x424   : >> { %14858 = vmatprep.mubr.msk.bf16.mxu0 %vm25627_vm7, %v21041_v20  ;;  %15047 = vmatmul.mubr.msk.bf16.vlgmr.msra.gmra.mrb[0].mxu1 %vm25629_vm3, %v21114_v56  ;;  %25631 = vst [vmem:[#allocation218_spill] sm:$0xff] %v21793_v22  ;;  %vm25633_vm8 = vnez %v25632_v15  ;;  %25635 = vst [vmem:[#allocation219_spill] sm:$0xff] %v21801_v7  ;;  %v21807_v31 = vsel %vm25636_vm14, %v8340_v14, %v24485_v3  ;;  %v21811_v0 = vsel %vm25630_vm6, %v8339_v27, %v8340_v14  ;;  %v16869_v3 = vld [vmem:[%s19786_s12 + $0x3d8] sm:$0xff]   ;;  %v25639_v14 = vld [vmem:[#allocation95_spill] sm:$0xff] }
 0x425   : >> { %15079 = vmatpush3.bf16.msra.mxu1 %v21306_v24  ;;  %15050 = vmatprep.mubr.msk.bf16.mxu1 %vm25633_vm8, %v21136_v41  ;;  %25637 = vst [vmem:[#allocation220_spill] sm:$0xff] %v21807_v31  ;;  %25638 = vst [vmem:[#allocation221_spill] sm:$0xff] %v21811_v0  ;;  %v16868_v24 = vld [vmem:[%s19786_s12 + $0x3d0] sm:$0xff]   ;;  %vm25640_vm9 = vnez %v25639_v14  ;;  %v25641_v27 = vld [vmem:[#allocation102_spill] sm:$0xff] }
 0x426   : >> { %15080 = vmatprep.subr.bf16.mxu1 %v16867_v10  ;;  %14887 = vmatpush3.bf16.msra.mxu0 %v21405_v36  ;;  %v16875_v36 = vld [vmem:[%s19786_s12 + $0x2d8] sm:$0xff]   ;;  %vm25642_vm14 = vnez %v25641_v27  ;;  %v25643_v33 = vld [vmem:[#allocation52_spill] sm:$0xff]  ;;  %v16876_v11 = vld [vmem:[%s19786_s12 + $0x2e0] sm:$0xff]  }
 0x427   : >> { %14888 = vmatprep.subr.bf16.mxu0 %v16872_v28  ;;  %vm25644_vm6 = vnez %v25643_v33  ;;  %v16874_v0 = vld [vmem:[%s19786_s12 + $0x3e8] sm:$0xff]   ;;  %v16879_v22 = vld [vmem:[%s19786_s12 + $0x2f0] sm:$0xff]   ;;  %v16880_v8 = vld [vmem:[%s19786_s12 + $0x3f8] sm:$0xff]  }
 0x428   : >> { %v25647_v31 = vld [vmem:[#allocation108_spill] sm:$0xff] }
 0x429   : >> { %15081 = vmatpush3.bf16.msra.mxu1 %v16867_v10  ;;  %v25645_v10 = vld [vmem:[#allocation54_spill] sm:$0xff]  ;;  %v16878_v7 = vld [vmem:[%s19786_s12 + $0x2e8] sm:$0xff]  }
 0x42a   : >> { %15082 = vmatprep.subr.bf16.mxu1 %v16868_v24  ;;  %14889 = vmatpush3.bf16.msra.mxu0 %v16872_v28  ;;  %vm25646_vm7 = vnez %v25645_v10  ;;  %v16871_v28 = vld [vmem:[%s19786_s12 + $0x3e0] sm:$0xff]   ;;  %v16915_v20 = vld [vmem:[#allocation2 + $0x28] sm:$0xff] }
 0x42b   : >> { %14859 = vmatmul.mubr.msk.bf16.gmra.mrb[36].mxu0 %vm25640_vm9, %v21138_v19  ;;  %14890 = vmatprep.subr.bf16.mxu0 %v16873_v23  ;;  %v21895_v19 = vld [vmem:[#allocation2 + $0x118] sm:$0xff]  ;;  %v7662_v29 = vrot.slane %v16915_v20, 7  ;;  %v25687_v39 = vld [vmem:[#allocation112_spill] sm:$0xff]  ;;  %v25691_v20 = vld [vmem:[#allocation143_spill] sm:$0xff] }
 0x42c   : >> { %14862 = vmatprep.mubr.msk.bf16.mxu0 %vm25642_vm14, %v21142_v55  ;;  %15051 = vmatmul.mubr.msk.bf16.gmra.mrb[4].mxu1 %vm25644_vm6, %v21218_v6  ;;  %vm25648_vm14 = vnez %v25647_v31  ;;  %v25667_v55 = vld [vmem:[#allocation83_spill] sm:$0xff]  ;;  %25681 = vst [vmem:[#allocation222_spill] sm:$0xff] %v21895_v19  ;;  %v24535_v45 = vrot.slane %v21895_v19, 7  ;;  %v25696_v19 = vpack.c.bf16 %v21701_v37, %v21696_v26 }
 0x42d   : >> { %15054 = vmatprep.mubr.msk.bf16.mxu1 %vm25646_vm7, %v21239_v57  ;;  %15083 = vmatpush3.bf16.msra.mxu1 %v16868_v24  ;;  %v25649_v24 = vld [vmem:[#allocation111_spill] sm:$0xff] }
 0x42e   : >> { %15084 = vmatprep.subr.bf16.mxu1 %v16869_v3  ;;  %14891 = vmatpush3.bf16.msra.mxu0 %v16873_v23  ;;  %vm25650_vm9 = vnez %v25649_v24  ;;  %v25651_v23 = vld [vmem:[#allocation64_spill] sm:$0xff] }
 0x42f   : >> { %14892 = vmatprep.subr.bf16.mxu0 %v16875_v36  ;;  %vm25652_vm7 = vnez %v25651_v23  ;;  %v16897_v23 = vld [vmem:[%s19786_s12 + $0x338] sm:$0xff]  }
 0x431   : >> { %15085 = vmatpush3.bf16.msra.mxu1 %v16869_v3  ;;  %v25653_v3 = vld [vmem:[#allocation66_spill] sm:$0xff] }
 0x432   : >> { %15086 = vmatprep.subr.bf16.mxu1 %v16871_v28  ;;  %14893 = vmatpush3.bf16.msra.mxu0 %v16875_v36  ;;  %vm25654_vm6 = vnez %v25653_v3  ;;  %v16877_v36 = vld [vmem:[%s19786_s12 + $0x3f0] sm:$0xff]  }
 0x433   : >> { %14863 = vmatmul.mubr.msk.bf16.gmra.mrb[40].mxu0 %vm25648_vm14, %v21243_v47  ;;  %14894 = vmatprep.subr.bf16.mxu0 %v16876_v11  ;;  %v25657_v47 = vld [vmem:[#allocation118_spill] sm:$0xff] }
 0x434   : >> { %14866 = vmatprep.mubr.msk.bf16.mxu0 %vm25650_vm9, %v21247_v63  ;;  %15055 = vmatmul.mubr.msk.bf16.gmra.mrb[8].mxu1 %vm25652_vm7, %v21322_v44  ;;  %v16881_v63 = vld [vmem:[%s19786_s12 + $0x2f8] sm:$0xff]   ;;  %vm25658_vm12 = vnez %v25657_v47 }
 0x435   : >> { %15058 = vmatprep.mubr.msk.bf16.mxu1 %vm25654_vm6, %v21344_v40  ;;  %15087 = vmatpush3.bf16.msra.mxu1 %v16871_v28  ;;  %v25661_v28 = vld [vmem:[#allocation75_spill] sm:$0xff] }
 0x436   : >> { %15088 = vmatprep.subr.bf16.mxu1 %v16874_v0  ;;  %14895 = vmatpush3.bf16.msra.mxu0 %v16876_v11  ;;  %v25659_v11 = vld [vmem:[#allocation72_spill] sm:$0xff]  ;;  %vm25662_vm14 = vnez %v25661_v28 }
 0x437   : >> { %14896 = vmatprep.subr.bf16.mxu0 %v16878_v7  ;;  %vm25660_vm9 = vnez %v25659_v11 }
 0x439   : >> { %15089 = vmatpush3.bf16.msra.mxu1 %v16874_v0  ;;  %v16882_v0 = vld [vmem:[%s19786_s12 + $0x400] sm:$0xff]  }
 0x43a   : >> { %15090 = vmatprep.subr.bf16.mxu1 %v16877_v36  ;;  %14897 = vmatpush3.bf16.msra.mxu0 %v16878_v7  ;;  %v16886_v7 = vld [vmem:[%s19786_s12 + $0x300] sm:$0xff]  }
 0x43b   : >> { %14867 = vmatmul.mubr.msk.bf16.gmra.mrb[44].mxu0 %vm25656_vm1, %v21346_v53  ;;  %14898 = vmatprep.subr.bf16.mxu0 %v16879_v22  ;;  %v25663_v53 = vld [vmem:[#allocation119_spill] sm:$0xff] }
 0x43c   : >> { %14870 = vmatprep.mubr.msk.bf16.mxu0 %vm25658_vm12, %v21350_v25  ;;  %15059 = vmatmul.mubr.msk.bf16.gmra.mrb[12].mxu1 %vm25660_vm9, %v21419_v18  ;;  %vm25664_vm15 = vnez %v25663_v53  ;;  %v25665_v25 = vld [vmem:[#allocation120_spill] sm:$0xff]  ;;  %vm25668_vm12 = vnez %v25667_v55 }
 0x43d   : >> { %15062 = vmatprep.mubr.msk.bf16.mxu1 %vm25662_vm14, %v21441_v35  ;;  %15091 = vmatpush3.bf16.msra.mxu1 %v16877_v36  ;;  %vm25666_vm10 = vnez %v25665_v25  ;;  %v25675_v36 = vld [vmem:[#allocation98_spill] sm:$0xff] }
 0x43e   : >> { %15092 = vmatprep.subr.bf16.mxu1 %v16880_v8  ;;  %14899 = vmatpush3.bf16.msra.mxu0 %v16879_v22  ;;  %v25669_v22 = vld [vmem:[#allocation86_spill] sm:$0xff]  ;;  %vm25676_vm14 = vnez %v25675_v36 }
 0x43f   : >> { %14900 = vmatprep.subr.bf16.mxu0 %v16881_v63  ;;  %vm25670_vm1 = vnez %v25669_v22 }
 0x441   : >> { %15093 = vmatpush3.bf16.msra.mxu1 %v16880_v8  ;;  %v25673_v8 = vld [vmem:[#allocation129_spill] sm:$0xff] }
 0x442   : >> { %14901 = vmatpush3.bf16.msra.mxu0 %v16881_v63  ;;  %15126 = vmatprep.subr.bf16.mxu1 %v16882_v0  ;;  %v25671_v63 = vld [vmem:[#allocation127_spill] sm:$0xff] }
 0x443   : >> { %14871 = vmatmul.mubr.msk.bf16.gmra.mrb[48].mxu0 %vm25664_vm15, %v21443_v30  ;;  %14934 = vmatprep.subr.bf16.mxu0 %v16886_v7  ;;  %vm25672_vm4 = vnez %v25671_v63  ;;  %vm25674_vm15 = vnez %v25673_v8  ;;  %v25679_v30 = vld [vmem:[#allocation137_spill] sm:$0xff] }
 0x444   : >> { %14874 = vmatprep.mubr.msk.bf16.mxu0 %vm25666_vm10, %v21447_v13  ;;  %15063 = vmatmul.mubr.msk.bf16.gmra.mrb[16].mxu1 %vm25668_vm12, %v21512_v49  ;;  %v25677_v13 = vld [vmem:[#allocation105_spill] sm:$0xff]  ;;  %vm25680_vm13 = vnez %v25679_v30  ;;  %v16916_v30 = vld [vmem:[#allocation2 + $0x20] sm:$0xff] }
 0x445   : >> { %15066 = vmatprep.mubr.msk.bf16.mxu1 %vm25670_vm1, %v21534_v32  ;;  %vm25678_vm10 = vnez %v25677_v13 }
 0x44b   : >> { %14875 = vmatmul.mubr.msk.bf16.gmra.mrb[52].mxu0 %vm25672_vm4, %v21536_v4  ;;  %v25682_v4 = vld [vmem:[#allocation138_spill] sm:$0xff]  ;;  %vm25688_vm4 = vnez %v25687_v39 }
 0x44c   : >> { %14878 = vmatprep.mubr.msk.bf16.mxu0 %vm25674_vm15, %v21540_v46  ;;  %15067 = vmatmul.mubr.msk.bf16.gmra.mrb[20].mxu1 %vm25676_vm14, %v21605_v51  ;;  %vm25683_vm11 = vnez %v25682_v4  ;;  %v25684_v46 = vld [vmem:[#allocation110_spill] sm:$0xff] }
 0x44d   : >> { %15070 = vmatprep.mubr.msk.bf16.mxu1 %vm25678_vm10, %v21627_v48  ;;  %vm25685_vm15 = vnez %v25684_v46  ;;  %v25693_v39 = vld [vmem:[#allocation146_spill] sm:$0xff]  ;;  %v25697_v46 = vld [vmem:[#allocation117_spill] sm:$0xff] }
 0x453   : >> { %14879 = vmatmul.mubr.msk.bf16.gmra.mrb[56].mxu0 %vm25680_vm13, %v21629_v52  ;;  %v7661_v52 = vrot.slane %v16916_v30, 7  ;;  %vm25689_vm13 = vcmp.lt.s32.totalorder %v25211_v59, 1  ;;  %v25694_v30 = vld [vmem:[#allocation145_spill] sm:$0xff] }
 0x454   : >> { %14882 = vmatprep.mubr.msk.bf16.mxu0 %vm25683_vm11, %v21633_v61  ;;  %15071 = vmatmul.mubr.msk.bf16.gmra.mrb[24].mxu1 %vm25685_vm15, %v21688_v34  ;;  %vm25690_vm11 = vmmov %vm25689_vm13  ;;  %vm25692_vm15 = vnez %v25691_v20  ;;  %v25695_v34 = vpack.c.bf16 %v25693_v39, %v25694_v30 }
 0x455   : >> { %15074 = vmatprep.mubr.msk.bf16.mxu1 %vm25688_vm4, %v25686_v5  ;;  %v7723_v4 = vsel %vm25689_vm13, %v7661_v52, %v7662_v29  ;;  %v7724_v61 = vsel %vm25690_vm11, %v24535_v45, %v7661_v52  ;;  %vm25698_vm13 = vnez %v25697_v46  ;;  %v16918_v52 = vld [vmem:[#allocation2 + $0x48] sm:$0xff] }
 0x456   : >> { %v12983_v5 = vpack.c.bf16 %v7723_v4, %v7724_v61  ;;  %v7666_v45 = vrot.slane %v16918_v52, 7  ;;  %v16920_v4 = vld [vmem:[#allocation2 + $0x40] sm:$0xff]  ;;  %v16888_v52 = vld [vmem:[%s19786_s12 + $0x308] sm:$0xff]  }
 0x457   : >> { %v7665_v61 = vrot.slane %v16920_v4, 7  ;;  %v16923_v4 = vld [vmem:[#allocation2 + $0x60] sm:$0xff] }
 0x45b   : >> { %14883 = vmatmul.mubr.msk.bf16.gmra.mrb[60].mxu0 %vm25692_vm15, %v21722_v54  ;;  %v16919_v54 = vld [vmem:[#allocation2 + $0x30] sm:$0xff] }
 0x45c   : >> { %14902 = vmatprep.mubr.msk.bf16.mxu0 %vm25606_vm0, %v25695_v34  ;;  %15075 = vmatmul.mubr.msk.bf16.gmra.mrb[28].mxu1 %vm25698_vm13, %v25696_v19  ;;  %v7663_v20 = vrot.slane %v16919_v54, 7  ;;  %vm25699_vm0 = vmmov %vm25690_vm11 }
 0x45d   : >> { %15094 = vmatprep.mubr.msk.bf16.mxu1 %vm25614_vm2, %v12983_v5  ;;  %v7719_v34 = vsel %vm25699_vm0, %v7665_v61, %v7666_v45  ;;  %vm25700_vm15 = vmmov %vm25699_vm0  ;;  %v25702_v5 = vld [vmem:[#allocation178_spill] sm:$0xff] }
 0x45e   : >> { %v7721_v39 = vsel %vm25690_vm11, %v7663_v20, %v7664_v58  ;;  %v7720_v26 = vsel %vm25700_vm15, %v7664_v58, %v7665_v61  ;;  %vm25701_vm13 = vmmov %vm25699_vm0  ;;  %v7668_v30 = vrot.slane %v25702_v5, 7  ;;  %v16921_v58 = vld [vmem:[#allocation2 + $0x68] sm:$0xff]  ;;  %vm25703_vm15 = vnez %v25626_v16  ;;  %v25784_v16 = vld [vmem:[#allocation173_spill] sm:$0xff] }
 0x45f   : >> { %v7722_v19 = vsel %vm25701_vm13, %v7662_v29, %v7663_v20  ;;  %v12989_v54 = vpack.c.bf16 %v7719_v34, %v7720_v26  ;;  %v7670_v29 = vrot.slane %v16921_v58, 7  ;;  %v16922_v20 = vld [vmem:[#allocation2 + $0x50] sm:$0xff]  ;;  %v7669_v61 = vrot.slane %v16923_v4, 7  ;;  %vm25704_vm13 = vmmov %vm25699_vm0  ;;  %v25708_v58 = vld [vmem:[#allocation186_spill] sm:$0xff] }
 0x460   : >> { %v12986_v37 = vpack.c.bf16 %v7721_v39, %v7722_v19  ;;  %v16884_v39 = vld [vmem:[%s19786_s12 + $0x410] sm:$0xff]   ;;  %vm25705_vm11 = vmmov %vm25699_vm0  ;;  %v16891_v4 = vld [vmem:[%s19786_s12 + $0x318] sm:$0xff]  }
 0x461   : >> { %v16889_v34 = vld [vmem:[%s19786_s12 + $0x310] sm:$0xff]   ;;  %v7716_v26 = vsel %vm25705_vm11, %v7668_v30, %v7669_v61  ;;  %vm25712_vm11 = vnez %v25641_v27 }
 0x463   : >> { %14903 = vmatmul.mubr.msk.bf16.vlgmr.msra.gmra.mrb[32].mxu0 %vm25629_vm3, %v21084_v1  ;;  %v7667_v1 = vrot.slane %v16922_v20, 7  ;;  %v7672_v20 = vrot.slane %v25708_v58, 7 }
 0x464   : >> { %14906 = vmatprep.mubr.msk.bf16.mxu0 %vm25633_vm8, %v21114_v56  ;;  %15095 = vmatmul.mubr.msk.bf16.vlgmr.msra.gmra.mrb[0].mxu1 %vm25625_vm5, %v12986_v37  ;;  %vm25706_vm8 = vmmov %vm25699_vm0 }
 0x465   : >> { %15127 = vmatpush3.bf16.msra.mxu1 %v16882_v0  ;;  %15098 = vmatprep.mubr.msk.bf16.mxu1 %vm25703_vm15, %v12989_v54  ;;  %v7717_v56 = vsel %vm25699_vm0, %v7667_v1, %v7668_v30  ;;  %v7715_v0 = vsel %vm25704_vm13, %v7669_v61, %v7670_v29  ;;  %v7718_v19 = vsel %vm25706_vm8, %v7666_v45, %v7667_v1  ;;  %v25711_v45 = vld [vmem:[#allocation185_spill] sm:$0xff]  ;;  %v25713_v30 = vld [vmem:[#allocation184_spill] sm:$0xff]  ;;  %v16887_v61 = vld [vmem:[%s19786_s12 + $0x420] sm:$0xff]  }
 0x466   : >> { %15128 = vmatprep.subr.bf16.mxu1 %v16883_v42  ;;  %14935 = vmatpush3.bf16.msra.mxu0 %v16886_v7  ;;  %v12992_v37 = vpack.c.bf16 %v7717_v56, %v7718_v19  ;;  %v16885_v7 = vld [vmem:[%s19786_s12 + $0x418] sm:$0xff]   ;;  %vm25707_vm0 = vnez %v25643_v33  ;;  %v12995_v54 = vpack.c.bf16 %v7715_v0, %v7716_v26  ;;  %vm25709_vm13 = vnez %v25645_v10  ;;  %v16892_v56 = vld [vmem:[%s19786_s12 + $0x320] sm:$0xff]   ;;  %v16894_v33 = vld [vmem:[%s19786_s12 + $0x328] sm:$0xff]  }
 0x467   : >> { %14936 = vmatprep.subr.bf16.mxu0 %v16888_v52  ;;  %vm25710_vm8 = vnez %v25639_v14  ;;  %v16903_v14 = vld [vmem:[%s19786_s12 + $0x468] sm:$0xff]  }
 0x469   : >> { %15129 = vmatpush3.bf16.msra.mxu1 %v16883_v42  ;;  %v7674_v42 = vrot.slane %v25711_v45, 7 }
 0x46a   : >> { %15130 = vmatprep.subr.bf16.mxu1 %v16884_v39  ;;  %14937 = vmatpush3.bf16.msra.mxu0 %v16888_v52  ;;  %v25714_v52 = vld [vmem:[#allocation183_spill] sm:$0xff] }
 0x46b   : >> { %14907 = vmatmul.mubr.msk.bf16.gmra.mrb[36].mxu0 %vm25707_vm0, %v21136_v41  ;;  %14938 = vmatprep.subr.bf16.mxu0 %v16889_v34  ;;  %v7671_v41 = vrot.slane %v25713_v30, 7  ;;  %v7673_v1 = vrot.slane %v25714_v52, 7  ;;  %vm25715_vm0 = vcmp.lt.s32.totalorder %v25211_v59, 1  ;;  %v25773_v59 = vld [vmem:[#allocation161_spill] sm:$0xff] }
 0x46c   : >> { %14910 = vmatprep.mubr.msk.bf16.mxu0 %vm25709_vm13, %v21218_v6  ;;  %15099 = vmatmul.mubr.msk.bf16.gmra.mrb[4].mxu1 %vm25710_vm8, %v12992_v37  ;;  %vm25716_vm13 = vmmov %vm25715_vm0 }
 0x46d   : >> { %15102 = vmatprep.mubr.msk.bf16.mxu1 %vm25712_vm11, %v12995_v54  ;;  %15131 = vmatpush3.bf16.msra.mxu1 %v16884_v39  ;;  %v7713_v6 = vsel %vm25715_vm0, %v7671_v41, %v7672_v20  ;;  %v7711_v0 = vsel %vm25716_vm13, %v7673_v1, %v7674_v42  ;;  %vm25717_vm3 = vmmov %vm25715_vm0  ;;  %v25719_v54 = vld [vmem:[#allocation192_spill] sm:$0xff] }
 0x46e   : >> { %15132 = vmatprep.subr.bf16.mxu1 %v16885_v7  ;;  %14939 = vmatpush3.bf16.msra.mxu0 %v16889_v34  ;;  %v7712_v26 = vsel %vm25717_vm3, %v7672_v20, %v7673_v1  ;;  %vm25718_vm11 = vmmov %vm25715_vm0  ;;  %v16890_v34 = vld [vmem:[%s19786_s12 + $0x428] sm:$0xff]   ;;  %v7676_v10 = vrot.slane %v25719_v54, 7  ;;  %vm25720_vm3 = vnez %v25647_v31  ;;  %vm25722_vm0 = vnez %v25649_v24  ;;  %v25723_v20 = vld [vmem:[#allocation155_spill] sm:$0xff] }
 0x46f   : >> { %14940 = vmatprep.subr.bf16.mxu0 %v16891_v4  ;;  %v7714_v39 = vsel %vm25718_vm11, %v7670_v29, %v7671_v41  ;;  %v13001_v37 = vpack.c.bf16 %v7711_v0, %v7712_v26  ;;  %v25721_v29 = vld [vmem:[#allocation191_spill] sm:$0xff]  ;;  %v16893_v1 = vld [vmem:[%s19786_s12 + $0x430] sm:$0xff]   ;;  %vm25725_vm13 = vmmov %vm25718_vm11 }
 0x470   : >> { %v12998_v19 = vpack.c.bf16 %v7713_v6, %v7714_v39  ;;  %v16895_v6 = vld [vmem:[%s19786_s12 + $0x330] sm:$0xff]   ;;  %v25795_v31 = vld [vmem:[#allocation156_spill] sm:$0xff] }
 0x471   : >> { %15133 = vmatpush3.bf16.msra.mxu1 %v16885_v7  ;;  %v7678_v7 = vrot.slane %v25721_v29, 7  ;;  %v25796_v24 = vld [vmem:[#allocation164_spill] sm:$0xff] }
 0x472   : >> { %15134 = vmatprep.subr.bf16.mxu1 %v16887_v61  ;;  %14941 = vmatpush3.bf16.msra.mxu0 %v16891_v4  ;;  %v25724_v4 = vld [vmem:[#allocation154_spill] sm:$0xff] }
 0x473   : >> { %14911 = vmatmul.mubr.msk.bf16.gmra.mrb[40].mxu0 %vm25652_vm7, %v21239_v57  ;;  %14942 = vmatprep.subr.bf16.mxu0 %v16892_v56  ;;  %v7675_v57 = vrot.slane %v25723_v20, 7  ;;  %v7677_v41 = vrot.slane %v25724_v4, 7 }
 0x474   : >> { %14914 = vmatprep.mubr.msk.bf16.mxu0 %vm25654_vm6, %v21322_v44  ;;  %15103 = vmatmul.mubr.msk.bf16.gmra.mrb[8].mxu1 %vm25720_vm3, %v12998_v19  ;;  %vm25726_vm6 = vmmov %vm25718_vm11 }
 0x475   : >> { %15106 = vmatprep.mubr.msk.bf16.mxu1 %vm25722_vm0, %v13001_v37  ;;  %15135 = vmatpush3.bf16.msra.mxu1 %v16887_v61  ;;  %v7709_v44 = vsel %vm25725_vm13, %v7675_v57, %v7676_v10  ;;  %v7707_v0 = vsel %vm25718_vm11, %v7677_v41, %v7678_v7  ;;  %v7708_v26 = vsel %vm25726_vm6, %v7676_v10, %v7677_v41  ;;  %vm25727_vm7 = vmmov %vm25726_vm6  ;;  %v25728_v37 = vld [vmem:[#allocation199_spill] sm:$0xff]  ;;  %v25731_v10 = vld [vmem:[#allocation198_spill] sm:$0xff] }
 0x476   : >> { %15136 = vmatprep.subr.bf16.mxu1 %v16890_v34  ;;  %14943 = vmatpush3.bf16.msra.mxu0 %v16892_v56  ;;  %v7710_v61 = vsel %vm25727_vm7, %v7674_v42, %v7675_v57  ;;  %v16896_v56 = vld [vmem:[%s19786_s12 + $0x438] sm:$0xff]   ;;  %v13007_v19 = vpack.c.bf16 %v7707_v0, %v7708_v26  ;;  %v7680_v3 = vrot.slane %v25728_v37, 7  ;;  %vm25729_vm6 = vnez %v25661_v28  ;;  %v25733_v42 = vld [vmem:[#allocation197_spill] sm:$0xff]  ;;  %v16898_v41 = vld [vmem:[%s19786_s12 + $0x440] sm:$0xff]  }
 0x477   : >> { %14944 = vmatprep.subr.bf16.mxu0 %v16894_v33  ;;  %v13004_v39 = vpack.c.bf16 %v7709_v44, %v7710_v61  ;;  %vm25730_vm7 = vnez %v25655_v62  ;;  %vm25732_vm13 = vnez %v25657_v47  ;;  %v25738_v61 = vld [vmem:[#allocation204_spill] sm:$0xff]  ;;  %v25801_v62 = vld [vmem:[#allocation153_spill] sm:$0xff] }
 0x479   : >> { %15137 = vmatpush3.bf16.msra.mxu1 %v16890_v34  ;;  %v7679_v34 = vrot.slane %v25733_v42, 7 }
 0x47a   : >> { %15138 = vmatprep.subr.bf16.mxu1 %v16893_v1  ;;  %14945 = vmatpush3.bf16.msra.mxu0 %v16894_v33  ;;  %v7682_v33 = vrot.slane %v25731_v10, 7 }
 0x47b   : >> { %14915 = vmatmul.mubr.msk.bf16.gmra.mrb[44].mxu0 %vm25660_vm9, %v21344_v40  ;;  %14946 = vmatprep.subr.bf16.mxu0 %v16895_v6  ;;  %v25734_v40 = vld [vmem:[#allocation152_spill] sm:$0xff]  ;;  %v7705_v44 = vsel %vm25718_vm11, %v7679_v34, %v7680_v3 }
 0x47c   : >> { %14918 = vmatprep.mubr.msk.bf16.mxu0 %vm25729_vm6, %v21419_v18  ;;  %15107 = vmatmul.mubr.msk.bf16.gmra.mrb[12].mxu1 %vm25730_vm7, %v13004_v39  ;;  %v7681_v57 = vrot.slane %v25734_v40, 7  ;;  %vm25735_vm6 = vmmov %vm25718_vm11  ;;  %v7684_v39 = vrot.slane %v25738_v61, 7 }
 0x47d   : >> { %15110 = vmatprep.mubr.msk.bf16.mxu1 %vm25732_vm13, %v13007_v19  ;;  %15139 = vmatpush3.bf16.msra.mxu1 %v16893_v1  ;;  %vm25736_vm9 = vmmov %vm25735_vm6 }
 0x47e   : >> { %15140 = vmatprep.subr.bf16.mxu1 %v16896_v56  ;;  %14947 = vmatpush3.bf16.msra.mxu0 %v16895_v6  ;;  %v7703_v18 = vsel %vm25735_vm6, %v7681_v57, %v7682_v33  ;;  %v7704_v0 = vsel %vm25736_vm9, %v7680_v3, %v7681_v57  ;;  %vm25737_vm13 = vmmov %vm25735_vm6  ;;  %vm25739_vm9 = vnez %v25663_v53  ;;  %v7686_v3 = vrot.slane %v21639_v43, 7 }
 0x47f   : >> { %14948 = vmatprep.subr.bf16.mxu0 %v16897_v23  ;;  %v7706_v26 = vsel %vm25737_vm13, %v7678_v7, %v7679_v34  ;;  %v13013_v6 = vpack.c.bf16 %v7703_v18, %v7704_v0  ;;  %vm25740_vm6 = vnez %v25665_v25  ;;  %vm25743_vm13 = vmmov %vm25718_vm11  ;;  %v7688_v0 = vrot.slane %v21756_v17, 7 }
 0x480   : >> { %v13010_v1 = vpack.c.bf16 %v7705_v44, %v7706_v26  ;;  %v7690_v26 = vrot.slane %v21745_v60, 7 }
 0x481   : >> { %15141 = vmatpush3.bf16.msra.mxu1 %v16896_v56  ;;  %v25742_v56 = vld [vmem:[#allocation148_spill] sm:$0xff] }
 0x482   : >> { %14949 = vmatpush3.bf16.msra.mxu0 %v16897_v23  ;;  %15174 = vmatprep.subr.bf16.mxu1 %v16898_v41  ;;  %v25741_v23 = vld [vmem:[#allocation147_spill] sm:$0xff]  ;;  %v7685_v19 = vrot.slane %v25742_v56, 7  ;;  %v25808_v25 = vpack.c.bf16 %v21639_v43, %v25742_v56  ;;  %v25825_v56 = vld [vmem:[#allocation172_spill] sm:$0xff] }
 0x483   : >> { %14919 = vmatmul.mubr.msk.bf16.gmra.mrb[48].mxu0 %vm25668_vm12, %v21441_v35  ;;  %v7683_v7 = vrot.slane %v25741_v23, 7  ;;  %v25807_v53 = vpack.c.bf16 %v25738_v61, %v25741_v23  ;;  %v25817_v61 = vld [vmem:[#allocation168_spill] sm:$0xff] }
 0x484   : >> { %14922 = vmatprep.mubr.msk.bf16.mxu0 %vm25670_vm1, %v21512_v49  ;;  %15111 = vmatmul.mubr.msk.bf16.gmra.mrb[16].mxu1 %vm25739_vm9, %v13010_v1  ;;  %v7699_v34 = vsel %vm25718_vm11, %v7685_v19, %v7686_v3  ;;  %vm25744_vm1 = vmmov %vm25718_vm11  ;;  %v7689_v1 = vrot.slane %v21743_v50, 7 }
 0x485   : >> { %15114 = vmatprep.mubr.msk.bf16.mxu1 %vm25740_vm6, %v13013_v6  ;;  %v7701_v35 = vsel %vm25743_vm13, %v7683_v7, %v7684_v39  ;;  %v7700_v49 = vsel %vm25744_vm1, %v7684_v39, %v7685_v19  ;;  %vm25745_vm12 = vmmov %vm25744_vm1  ;;  %vm25746_vm13 = vnez %v25671_v63  ;;  %vm25747_vm1 = vnez %v25673_v8  ;;  %v25751_v19 = vld [vmem:[#allocation110_spill] sm:$0xff] }
 0x486   : >> { %v7702_v57 = vsel %vm25745_vm12, %v7682_v33, %v7683_v7  ;;  %v13019_v18 = vpack.c.bf16 %v7699_v34, %v7700_v49  ;;  %v7687_v33 = vrot.slane %v21737_v9, 7  ;;  %vm25748_vm12 = vmmov %vm25718_vm11  ;;  %v7695_v6 = vsel %vm25718_vm11, %v7689_v1, %v7690_v26  ;;  %v25753_v34 = vld [vmem:[#allocation216_spill] sm:$0xff] }
 0x487   : >> { %v13016_v44 = vpack.c.bf16 %v7701_v35, %v7702_v57  ;;  %v7691_v49 = vrot.slane %v25753_v34, 7  ;;  %v25754_v57 = vld [vmem:[#allocation209_spill] sm:$0xff]  ;;  %v25811_v63 = vpack.c.bf16 %v21756_v17, %v21737_v9  ;;  %v25821_v17 = vld [vmem:[#allocation170_spill] sm:$0xff] }
 0x488   : >> { %v25820_v9 = vld [vmem:[#allocation169_spill] sm:$0xff] }
 0x48b   : >> { %14923 = vmatmul.mubr.msk.bf16.gmra.mrb[52].mxu0 %vm25676_vm14, %v21534_v32  ;;  %v7697_v32 = vsel %vm25748_vm12, %v7687_v33, %v7688_v0 }
 0x48c   : >> { %14926 = vmatprep.mubr.msk.bf16.mxu0 %vm25678_vm10, %v21605_v51  ;;  %15115 = vmatmul.mubr.msk.bf16.gmra.mrb[20].mxu1 %vm25746_vm13, %v13016_v44  ;;  %vm25749_vm10 = vmmov %vm25718_vm11 }
 0x48d   : >> { %15118 = vmatprep.mubr.msk.bf16.mxu1 %vm25747_vm1, %v13019_v18  ;;  %v7696_v51 = vsel %vm25749_vm10, %v7688_v0, %v7689_v1  ;;  %vm25750_vm14 = vmmov %vm25749_vm10  ;;  %vm25752_vm1 = vnez %v25751_v19  ;;  %v25756_v18 = vld [vmem:[#allocation137_spill] sm:$0xff]  ;;  %v25758_v0 = vld [vmem:[#allocation138_spill] sm:$0xff] }
 0x48e   : >> { %v7698_v39 = vsel %vm25750_vm14, %v7686_v3, %v7687_v33  ;;  %v13025_v35 = vpack.c.bf16 %v7695_v6, %v7696_v51  ;;  %vm25757_vm12 = vnez %v25756_v18  ;;  %vm25759_vm10 = vnez %v25758_v0  ;;  %v25760_v3 = vld [vmem:[#allocation222_spill] sm:$0xff]  ;;  %vm25762_vm14 = vmmov %vm25718_vm11  ;;  %v25763_v6 = vld [vmem:[#allocation212_spill] sm:$0xff] }
 0x48f   : >> { %v13022_v7 = vpack.c.bf16 %v7697_v32, %v7698_v39  ;;  %v25761_v33 = vrot.slane %v25760_v3, 7  ;;  %v25764_v51 = vld [vmem:[#allocation210_spill] sm:$0xff]  ;;  %v8049_v43 = vpack.c.bf16 %v25760_v3, %v25753_v34  ;;  %v25828_v0 = vld [vmem:[#allocation181_spill] sm:$0xff] }
 0x490   : >> { %v25765_v39 = vpack.c.bf16 %v25763_v6, %v25764_v51  ;;  %v25777_v6 = vld [vmem:[#allocation167_spill] sm:$0xff]  ;;  %v25781_v51 = vld [vmem:[#allocation165_spill] sm:$0xff] }
 0x491   : >> { %v7693_v1 = vsel %vm25762_vm14, %v7691_v49, %v25761_v33  ;;  %v25772_v33 = vld [vmem:[#allocation159_spill] sm:$0xff]  ;;  %vm25863_vm14 = vnez %v25669_v22  ;;  %v25876_v22 = vld [vmem:[#allocation220_spill] sm:$0xff] }
 0x493   : >> { %14927 = vmatmul.mubr.msk.bf16.gmra.mrb[56].mxu0 %vm25752_vm1, %v21627_v48  ;;  %v7694_v48 = vsel %vm25718_vm11, %v7690_v26, %v7691_v49  ;;  %v25774_v26 = vpack.c.bf16 %v25772_v33, %v25773_v59  ;;  %v16899_v49 = vld [vmem:[%s19786_s12 + $0x448] sm:$0xff]   ;;  %vm25867_vm11 = vnez %v25675_v36  ;;  %v25881_v36 = vrot.slane %v25753_v34, 1 }
 0x494   : >> { %14930 = vmatprep.mubr.msk.bf16.mxu0 %vm25688_vm4, %v25754_v57  ;;  %15119 = vmatmul.mubr.msk.bf16.gmra.mrb[24].mxu1 %vm25757_vm12, %v13022_v7  ;;  %v13028_v32 = vpack.c.bf16 %v7693_v1, %v7694_v48  ;;  %vm25766_vm4 = vnez %v25697_v46  ;;  %v25767_v7 = vld [vmem:[#allocation144_spill] sm:$0xff]  ;;  %v25768_v57 = vld [vmem:[#allocation213_spill] sm:$0xff]  ;;  %v25775_v1 = vld [vmem:[#allocation43_spill] sm:$0xff] }
 0x495   : >> { %15122 = vmatprep.mubr.msk.bf16.mxu1 %vm25759_vm10, %v13025_v35  ;;  %v25769_v44 = vpack.c.bf16 %v25767_v7, %v25768_v57  ;;  %v25770_v35 = vld [vmem:[#allocation143_spill] sm:$0xff]  ;;  %v25776_v48 = vld [vmem:[#allocation160_spill] sm:$0xff]  ;;  %v16900_v7 = vld [vmem:[%s19786_s12 + $0x450] sm:$0xff]  }
 0x496   : >> { %vm25771_vm1 = vnez %v25770_v35  ;;  %v25783_v57 = vld [vmem:[#allocation157_spill] sm:$0xff]  ;;  %v25829_v35 = vld [vmem:[#allocation180_spill] sm:$0xff] }
 0x49b   : >> { %14931 = vmatmul.mubr.msk.bf16.gmra.mrb[60].mxu0 %vm25766_vm4, %v25765_v39 }
 0x49c   : >> { %14950 = vmatprep.mubr.msk.bf16.mxu0 %vm25614_vm2, %v25769_v44  ;;  %15123 = vmatmul.mubr.msk.bf16.gmra.mrb[28].mxu1 %vm25771_vm1, %v13028_v32  ;;  %v25779_v44 = vpack.c.bf16 %v25777_v6, %v25778_v21  ;;  %v25780_v32 = vld [vmem:[#allocation166_spill] sm:$0xff]  ;;  %vm25785_vm2 = vnez %v25641_v27  ;;  %v25794_v21 = vpack.c.bf16 %v25711_v45, %v25714_v52  ;;  %v25799_v45 = vpack.c.bf16 %v25721_v29, %v25724_v4  ;;  %v25805_v29 = vld [vmem:[#allocation149_spill] sm:$0xff]  ;;  %v25810_v4 = vld [vmem:[#allocation211_spill] sm:$0xff] }
 0x49d   : >> { %15142 = vmatprep.mubr.bf16.mxu1 %v25774_v26  ;;  %v25782_v39 = vpack.c.bf16 %v25780_v32, %v25781_v51  ;;  %v25788_v26 = vld [vmem:[#allocation177_spill] sm:$0xff]  ;;  %v25791_v6 = vld [vmem:[#allocation174_spill] sm:$0xff]  ;;  %v25803_v52 = vpack.c.bf16 %v25731_v10, %v25734_v40  ;;  %v25814_v10 = vld [vmem:[#allocation215_spill] sm:$0xff]  ;;  %v25830_v51 = vpack.c.bf16 %v25828_v0, %v25829_v35 }
 0x49e   : >> { %v25792_v27 = vld [vmem:[#allocation162_spill] sm:$0xff]  ;;  %v25816_v40 = vld [vmem:[#allocation171_spill] sm:$0xff] }
 0x49f   : >> { %v16905_v32 = vld [vmem:[%s19786_s12 + $0x478] sm:$0xff]   ;;  %v25818_v23 = vpack.c.bf16 %v25816_v40, %v25817_v61 }
 0x4a3   : >> { %14951 = vmatmul.mubr.msk.bf16.vlgmr.msra.gmra.mrb[32].mxu0 %vm25625_vm5, %v25775_v1  ;;  %v25789_v1 = vld [vmem:[#allocation176_spill] sm:$0xff]  ;;  %vm25797_vm5 = vnez %v25657_v47  ;;  %v25802_v47 = vpack.c.bf16 %v25728_v37, %v25733_v42  ;;  %v25813_v37 = vld [vmem:[#allocation214_spill] sm:$0xff] }
 0x4a4   : >> { %14954 = vmatprep.mubr.msk.bf16.mxu0 %vm25703_vm15, %v25776_v48  ;;  %15143 = vmatmul.mubr.bf16.vlgmr.msra.gmra.mrb[0].mxu1 %v25779_v44  ;;  %v25790_v48 = vpack.c.bf16 %v25788_v26, %v25789_v1  ;;  %v16904_v44 = vld [vmem:[%s19786_s12 + $0x470] sm:$0xff]   ;;  %vm25806_vm15 = vnez %v25673_v8  ;;  %v25812_v8 = vpack.c.bf16 %v21745_v60, %v21743_v50  ;;  %v25815_v42 = vpack.c.bf16 %v25813_v37, %v25814_v10  ;;  %v25824_v60 = vld [vmem:[#allocation179_spill] sm:$0xff]  ;;  %v25844_v26 = vld [vmem:[#allocation188_spill] sm:$0xff] }
 0x4a5   : >> { %15175 = vmatpush3.bf16.msra.mxu1 %v16898_v41  ;;  %15146 = vmatprep.mubr.bf16.mxu1 %v25782_v39  ;;  %v25786_v41 = vld [vmem:[#allocation175_spill] sm:$0xff]  ;;  %v25822_v50 = vpack.c.bf16 %v25820_v9, %v25821_v17  ;;  %v25826_v18 = vpack.c.bf16 %v25824_v60, %v25825_v56  ;;  %v25831_v39 = vld [vmem:[#allocation52_spill] sm:$0xff] }
 0x4a6   : >> { %15176 = vmatprep.subr.bf16.mxu1 %v16899_v49  ;;  %v25787_v33 = vpack.c.bf16 %v25702_v5, %v25786_v41  ;;  %v25793_v5 = vpack.c.bf16 %v25708_v58, %v25713_v30  ;;  %v25798_v58 = vpack.c.bf16 %v25719_v54, %v25723_v20  ;;  %v25800_v30 = vld [vmem:[#allocation163_spill] sm:$0xff]  ;;  %v25809_v20 = vld [vmem:[#allocation150_spill] sm:$0xff] }
 0x4a7   : >> { %v25804_v54 = vld [vmem:[#allocation151_spill] sm:$0xff] }
 0x4a9   : >> { %15177 = vmatpush3.bf16.msra.mxu1 %v16899_v49  ;;  %v16902_v49 = vld [vmem:[%s19786_s12 + $0x460] sm:$0xff]  }
 0x4aa   : >> { %15178 = vmatprep.subr.bf16.mxu1 %v16900_v7 }
 0x4ab   : >> { %14955 = vmatmul.mubr.msk.bf16.gmra.mrb[36].mxu0 %vm25710_vm8, %v25783_v57  ;;  %vm25819_vm8 = vnez %v25605_v38  ;;  %v25833_v38 = vld [vmem:[#allocation187_spill] sm:$0xff]  ;;  %v25836_v57 = vld [vmem:[#allocation54_spill] sm:$0xff] }
 0x4ac   : >> { %14958 = vmatprep.mubr.msk.bf16.mxu0 %vm25785_vm2, %v25784_v16  ;;  %15147 = vmatmul.mubr.bf16.gmra.mrb[4].mxu1 %v25787_v33  ;;  %v25839_v16 = vld [vmem:[#allocation190_spill] sm:$0xff]  ;;  %v25841_v33 = vld [vmem:[#allocation64_spill] sm:$0xff]  ;;  %vm25871_vm2 = vnez %v25677_v13 }
 0x4ad   : >> { %15150 = vmatprep.mubr.bf16.mxu1 %v25790_v48  ;;  %15179 = vmatpush3.bf16.msra.mxu1 %v16900_v7  ;;  %v25834_v7 = vld [vmem:[#allocation182_spill] sm:$0xff] }
 0x4ae   : >> { %15180 = vmatprep.subr.bf16.mxu1 %v16901_v2  ;;  %v25846_v48 = vld [vmem:[#allocation66_spill] sm:$0xff] }
 0x4b1   : >> { %15181 = vmatpush3.bf16.msra.mxu1 %v16901_v2  ;;  %v25835_v2 = vpack.c.bf16 %v25833_v38, %v25834_v7 }
 0x4b2   : >> { %15182 = vmatprep.subr.bf16.mxu1 %v16902_v49 }
 0x4b3   : >> { %14959 = vmatmul.mubr.msk.bf16.gmra.mrb[40].mxu0 %vm25720_vm3, %v25791_v6  ;;  %vm25823_vm3 = vnez %v25628_v12  ;;  %v25838_v12 = vld [vmem:[#allocation189_spill] sm:$0xff] }
 0x4b4   : >> { %14962 = vmatprep.mubr.msk.bf16.mxu0 %vm25722_vm0, %v25792_v27  ;;  %15151 = vmatmul.mubr.bf16.gmra.mrb[8].mxu1 %v25793_v5  ;;  %vm25827_vm0 = vnez %v25632_v15  ;;  %v25840_v41 = vpack.c.bf16 %v25838_v12, %v25839_v16  ;;  %v25843_v15 = vld [vmem:[#allocation193_spill] sm:$0xff]  ;;  %v25852_v27 = vld [vmem:[#allocation200_spill] sm:$0xff]  ;;  %v25853_v5 = vld [vmem:[#allocation194_spill] sm:$0xff] }
 0x4b5   : >> { %15154 = vmatprep.mubr.bf16.mxu1 %v25794_v21  ;;  %15183 = vmatpush3.bf16.msra.mxu1 %v16902_v49  ;;  %v25845_v1 = vpack.c.bf16 %v25843_v15, %v25844_v26  ;;  %v25848_v49 = vld [vmem:[#allocation195_spill] sm:$0xff]  ;;  %v25854_v21 = vpack.c.bf16 %v25852_v27, %v25853_v5 }
 0x4b6   : >> { %15184 = vmatprep.subr.bf16.mxu1 %v16903_v14 }
 0x4b9   : >> { %15185 = vmatpush3.bf16.msra.mxu1 %v16903_v14  ;;  %v25849_v14 = vld [vmem:[#allocation196_spill] sm:$0xff] }
 0x4ba   : >> { %15186 = vmatprep.subr.bf16.mxu1 %v16904_v44  ;;  %v25850_v6 = vpack.c.bf16 %v25848_v49, %v25849_v14 }
 0x4bb   : >> { %14963 = vmatmul.mubr.msk.bf16.gmra.mrb[44].mxu0 %vm25730_vm7, %v25795_v31  ;;  %vm25832_vm7 = vnez %v25831_v39 }
 0x4bc   : >> { %14966 = vmatprep.mubr.msk.bf16.mxu0 %vm25797_vm5, %v25796_v24  ;;  %15155 = vmatmul.mubr.bf16.gmra.mrb[12].mxu1 %v25798_v58  ;;  %v25860_v24 = vld [vmem:[#allocation205_spill] sm:$0xff]  ;;  %vm25875_vm5 = vnez %v25751_v19 }
 0x4bd   : >> { %15158 = vmatprep.mubr.bf16.mxu1 %v25799_v45  ;;  %15187 = vmatpush3.bf16.msra.mxu1 %v16904_v44  ;;  %v25856_v44 = vld [vmem:[#allocation202_spill] sm:$0xff]  ;;  %v25861_v58 = vld [vmem:[#allocation201_spill] sm:$0xff] }
 0x4be   : >> { %15188 = vmatprep.subr.bf16.mxu1 %v16905_v32  ;;  %v25862_v45 = vpack.c.bf16 %v25860_v24, %v25861_v58 }
 0x4c1   : >> { %15189 = vmatpush3.bf16.msra.mxu1 %v16905_v32  ;;  %v25857_v32 = vld [vmem:[#allocation203_spill] sm:$0xff] }
 0x4c2   : >> { %v25858_v31 = vpack.c.bf16 %v25856_v44, %v25857_v32 }
 0x4c3   : >> { %14967 = vmatmul.mubr.msk.bf16.gmra.mrb[48].mxu0 %vm25739_vm9, %v25800_v30  ;;  %vm25837_vm9 = vnez %v25836_v57  ;;  %v25865_v30 = vld [vmem:[#allocation208_spill] sm:$0xff] }
 0x4c4   : >> { %14970 = vmatprep.mubr.msk.bf16.mxu0 %vm25740_vm6, %v25801_v62  ;;  %15159 = vmatmul.mubr.bf16.gmra.mrb[16].mxu1 %v25802_v47  ;;  %vm25842_vm6 = vnez %v25841_v33  ;;  %v25869_v47 = vld [vmem:[#allocation206_spill] sm:$0xff] }
 0x4c5   : >> { %15162 = vmatprep.mubr.bf16.mxu1 %v25803_v52 }
 0x4cb   : >> { %14971 = vmatmul.mubr.msk.bf16.gmra.mrb[52].mxu0 %vm25746_vm13, %v25804_v54  ;;  %vm25847_vm13 = vnez %v25846_v48  ;;  %v25872_v54 = vld [vmem:[#allocation218_spill] sm:$0xff] }
 0x4cc   : >> { %14974 = vmatprep.mubr.msk.bf16.mxu0 %vm25806_vm15, %v25805_v29  ;;  %15163 = vmatmul.mubr.bf16.gmra.mrb[20].mxu1 %v25807_v53  ;;  %v25873_v29 = vld [vmem:[#allocation219_spill] sm:$0xff] }
 0x4cd   : >> { %15166 = vmatprep.mubr.bf16.mxu1 %v25808_v25  ;;  %v25874_v53 = vpack.c.bf16 %v25872_v54, %v25873_v29  ;;  %v25877_v25 = vld [vmem:[#allocation221_spill] sm:$0xff] }
 0x4d3   : >> { %14975 = vmatmul.mubr.msk.bf16.gmra.mrb[56].mxu0 %vm25757_vm12, %v25809_v20  ;;  %vm25855_vm12 = vnez %v25661_v28  ;;  %v25868_v28 = vld [vmem:[#allocation217_spill] sm:$0xff]  ;;  %v25878_v20 = vpack.c.bf16 %v25876_v22, %v25877_v25 }
 0x4d4   : >> { %14978 = vmatprep.mubr.msk.bf16.mxu0 %vm25759_vm10, %v25810_v4  ;;  %15167 = vmatmul.mubr.bf16.gmra.mrb[24].mxu1 %v25811_v63  ;;  %vm25859_vm10 = vnez %v25667_v55  ;;  %v25870_v52 = vpack.c.bf16 %v25868_v28, %v25869_v47  ;;  %v8342_v55 = vrot.slane %v25760_v3, 1  ;;  %v25879_v4 = vld [vmem:[#allocation112_spill] sm:$0xff]  ;;  %v25882_v63 = vld [vmem:[#allocation19_spill] sm:$0xff] }
 0x4d5   : >> { %15170 = vmatprep.mubr.bf16.mxu1 %v25812_v8  ;;  %vm25880_vm15 = vnez %v25879_v4  ;;  %v25884_v8 = vrot.slane %v25773_v59, 1 }
 0x4db   : >> { %14979 = vmatmul.mubr.msk.bf16.gmra.mrb[60].mxu0 %vm25771_vm1, %v25815_v42  ;;  %vm25851_vm1 = vnez %v25659_v11  ;;  %v25864_v11 = vld [vmem:[#allocation207_spill] sm:$0xff] }
 0x4dc   : >> { %15171 = vmatmul.mubr.bf16.gmra.mrb[28].mxu1 %v8049_v43  ;;  %v25866_v62 = vpack.c.bf16 %v25864_v11, %v25865_v30 }
 0x4dd   : >> { %15190 = vmatprep.mubr.msk.bf16.mxu1 %vm25819_vm8, %v25818_v23  ;;  %vm25883_vm8 = vcmp.lt.s32.totalorder %v25882_v63, 7 }
 0x4de   : >> { %v8343_v13 = vsel %vm25883_vm8, %v25881_v36, %v8342_v55 }
 0x4e4   : >> { %15191 = vmatmul.mubr.msk.bf16.vlgmr.msra.gmra.mrb[0].mxu1 %vm25823_vm3, %v25822_v50  ;;  %vm25885_vm3 = vmmov %vm25883_vm8 }
 0x4e5   : >> { %15194 = vmatprep.mubr.msk.bf16.mxu1 %vm25827_vm0, %v25826_v18  ;;  %v8374_v3 = vsel %vm25885_vm3, %v8342_v55, %v25884_v8 }
 0x4e6   : >> { %v13126_v43 = vpack.c.bf16 %v8374_v3, %v8343_v13 }
 0x4ec   : >> { %15195 = vmatmul.mubr.msk.bf16.gmra.mrb[4].mxu1 %vm25832_vm7, %v25830_v51 }
 0x4ed   : >> { %15198 = vmatprep.mubr.msk.bf16.mxu1 %vm25837_vm9, %v25835_v2 }
 0x4f4   : >> { %15199 = vmatmul.mubr.msk.bf16.gmra.mrb[8].mxu1 %vm25842_vm6, %v25840_v41 }
 0x4f5   : >> { %15202 = vmatprep.mubr.msk.bf16.mxu1 %vm25847_vm13, %v25845_v1 }
 0x4fc   : >> { %15203 = vmatmul.mubr.msk.bf16.gmra.mrb[12].mxu1 %vm25851_vm1, %v25850_v6 }
 0x4fd   : >> { %15206 = vmatprep.mubr.msk.bf16.mxu1 %vm25855_vm12, %v25854_v21 }
 0x504   : >> { %15207 = vmatmul.mubr.msk.bf16.gmra.mrb[16].mxu1 %vm25859_vm10, %v25858_v31 }
 0x505   : >> { %15210 = vmatprep.mubr.msk.bf16.mxu1 %vm25863_vm14, %v25862_v45 }
 0x50c   : >> { %15211 = vmatmul.mubr.msk.bf16.gmra.mrb[20].mxu1 %vm25867_vm11, %v25866_v62 }
 0x50d   : >> { %15214 = vmatprep.mubr.msk.bf16.mxu1 %vm25871_vm2, %v25870_v52 }
 0x514   : >> { %15215 = vmatmul.mubr.msk.bf16.gmra.mrb[24].mxu1 %vm25875_vm5, %v25874_v53 }
 0x515   : >> { %15218 = vmatprep.mubr.msk.bf16.mxu1 %vm25880_vm15, %v25878_v20 }
 0x51c   : >> { %15219 = vmatmul.mubr.msk.bf16.gmra.mrb[28].mxu1 %vm25766_vm4, %v13126_v43 }
 0x576   : >> { %v14952_v19 = vpop.f32.mrb[32].mxu0 }
 0x577   : >> { %v6820_v37 = vpop.f32.mrb[33].mxu0 }
 0x578   : >> { %v14953_v10 = vpop.f32.mrb[34].mxu0 }
 0x579   : >> { %v6823_v42 = vpop.f32.mrb[35].mxu0 }
 0x57e   : >> { %v14956_v40 = vpop.f32.mrb[36].mxu0 }
 0x57f   : >> { %v6836_v61 = vpop.f32.mrb[37].mxu0 }
 0x580   : >> { %v14957_v23 = vpop.f32.mrb[38].mxu0 }
 0x581   : >> { %v6839_v34 = vpop.f32.mrb[39].mxu0 }
 0x586   : >> { %v14960_v9 = vpop.f32.mrb[40].mxu0 }
 0x587   : >> { %v6852_v17 = vpop.f32.mrb[41].mxu0 }
 0x588   : >> { %v14961_v50 = vpop.f32.mrb[42].mxu0 }
 0x589   : >> { %v6855_v60 = vpop.f32.mrb[43].mxu0 }
 0x58e   : >> { %v14964_v59 = vpop.f32.mrb[44].mxu0 }
 0x58f   : >> { %v6868_v56 = vpop.f32.mrb[45].mxu0 }
 0x590   : >> { %v14965_v18 = vpop.f32.mrb[46].mxu0 }
 0x591   : >> { %v6871_v0 = vpop.f32.mrb[47].mxu0 }
 0x596   : >> { %v14968_v35 = vpop.f32.mrb[48].mxu0 }
 0x597   : >> { %v6884_v51 = vpop.f32.mrb[49].mxu0 }
 0x598   : >> { %v14969_v46 = vpop.f32.mrb[50].mxu0 }
 0x599   : >> { %v6887_v39 = vpop.f32.mrb[51].mxu0 }
 0x59e   : >> { %v14972_v38 = vpop.f32.mrb[52].mxu0 }
 0x59f   : >> { %v6900_v7 = vpop.f32.mrb[53].mxu0 }
 0x5a0   : >> { %v14973_v2 = vpop.f32.mrb[54].mxu0 }
 0x5a1   : >> { %v6903_v57 = vpop.f32.mrb[55].mxu0 }
 0x5a6   : >> { %v14976_v12 = vpop.f32.mrb[56].mxu0 }
 0x5a7   : >> { %v6916_v16 = vpop.f32.mrb[57].mxu0 }
 0x5a8   : >> { %v14977_v41 = vpop.f32.mrb[58].mxu0 }
 0x5a9   : >> { %v6919_v33 = vpop.f32.mrb[59].mxu0 }
 0x5ae   : >> { %v14980_v15 = vpop.f32.mrb[60].mxu0 }
 0x5af   : >> { %v6932_v26 = vpop.f32.mrb[61].mxu0 }
 0x5b0   : >> { %v22298_v1 = vpop.f32.mrb[62].mxu0 }
 0x5b1   : >> { %v22300_v48 = vpop.f32.mrb[63].mxu0 }
 0x5b7   : >> { %v15192_v49 = vpop.f32.mrb[0].mxu1 }
 0x5b8   : >> { %v22302_v14 = vadd.f32 %v15192_v49, %v14952_v19   ;;  %v8525_v27 = vpop.f32.mrb[1].mxu1 }
 0x5b9   : >> { %v22304_v63 = vadd.f32 %v8525_v27, %v6820_v37   ;;  %v15193_v5 = vpop.f32.mrb[2].mxu1 }
 0x5ba   : >> { %25886 = vst [vmem:[#allocation46_spill] sm:$0xff] %v22302_v14  ;;  %v22306_v21 = vadd.f32 %v15193_v5, %v14953_v10   ;;  %v8528_v31 = vpop.f32.mrb[3].mxu1 }
 0x5bb   : >> { %25887 = vst [vmem:[#allocation53_spill] sm:$0xff] %v22304_v63  ;;  %v22308_v24 = vadd.f32 %v8528_v31, %v6823_v42  }
 0x5bc   : >> { %25888 = vst [vmem:[#allocation56_spill] sm:$0xff] %v22306_v21 }
 0x5bd   : >> { %25889 = vst [vmem:[#allocation101_spill] sm:$0xff] %v22308_v24 }
 0x5bf   : >> { %v15196_v58 = vpop.f32.mrb[4].mxu1 }
 0x5c0   : >> { %v22310_v54 = vadd.f32 %v15196_v58, %v14956_v40   ;;  %v8541_v45 = vpop.f32.mrb[5].mxu1 }
 0x5c1   : >> { %v22312_v25 = vadd.f32 %v8541_v45, %v6836_v61   ;;  %v15197_v30 = vpop.f32.mrb[6].mxu1 }
 0x5c2   : >> { %v22314_v27 = vadd.f32 %v15197_v30, %v14957_v23   ;;  %v8544_v62 = vpop.f32.mrb[7].mxu1  ;;  %25943 = vst [vmem:[#allocation43_spill] sm:$0xff] %v22310_v54 }
 0x5c3   : >> { %25890 = vst [vmem:[#allocation65_spill] sm:$0xff] %v22312_v25  ;;  %v22316_v55 = vadd.f32 %v8544_v62, %v6839_v34  }
 0x5c4   : >> { %v25891_v28 = vmov %v22314_v27 }
 0x5c5   : >> { %v25892_v52 = vmov %v22316_v55 }
 0x5c7   : >> { %v15200_v47 = vpop.f32.mrb[8].mxu1 }
 0x5c8   : >> { %v22318_v37 = vadd.f32 %v15200_v47, %v14960_v9   ;;  %v8557_v53 = vpop.f32.mrb[9].mxu1 }
 0x5c9   : >> { %v22320_v34 = vadd.f32 %v8557_v53, %v6852_v17   ;;  %v15201_v20 = vpop.f32.mrb[10].mxu1 }
 0x5ca   : >> { %v25893_v29 = vmov %v22318_v37  ;;  %v22322_v14 = vadd.f32 %v15201_v20, %v14961_v50   ;;  %v8560_v4 = vpop.f32.mrb[11].mxu1 }
 0x5cb   : >> { %v25894_v22 = vmov %v22320_v34  ;;  %v22324_v63 = vadd.f32 %v8560_v4, %v6855_v60  }
 0x5cc   : >> { %v25895_v36 = vmov %v22322_v14 }
 0x5cd   : >> { %v25896_v13 = vmov %v22324_v63  ;;  %v25949_v63 = vld [vmem:[#allocation53_spill] sm:$0xff] }
 0x5ce   : > { %v16926_v63 = vld [vmem:[%s23863_s1 + $0x1008] sm:$0xff] (%p22371_p5)  }
 0x5cf   : >> { %v15204_v8 = vpop.f32.mrb[12].mxu1 }
 0x5d0   : >> { %v22326_v25 = vadd.f32 %v15204_v8, %v14964_v59   ;;  %v8573_v43 = vpop.f32.mrb[13].mxu1 }
 0x5d1   : >> { %v22328_v19 = vadd.f32 %v8573_v43, %v6868_v56   ;;  %v15205_v10 = vpop.f32.mrb[14].mxu1 }
 0x5d2   : >> { %v25897_v3 = vmov %v22326_v25  ;;  %v22330_v55 = vadd.f32 %v15205_v10, %v14965_v18   ;;  %v8576_v40 = vpop.f32.mrb[15].mxu1  ;;  %v25945_v25 = vld [vmem:[#allocation65_spill] sm:$0xff]  ;;  %v25947_v10 = vld [vmem:[#allocation46_spill] sm:$0xff] }
 0x5d3   : >> { %v25898_v42 = vmov %v22328_v19  ;;  %v22332_v31 = vadd.f32 %v8576_v40, %v6871_v0   ;;  %v25948_v40 = vld [vmem:[#allocation101_spill] sm:$0xff] }
 0x5d4   : >> { %v25899_v61 = vmov %v22330_v55  ;;  %v25944_v55 = vmov %v25892_v52  ;;  %v25955_v25 = vld [vmem:[#allocation65_spill] sm:$0xff] (%p22371_p5)  ;;  %v22530_v40 = vmax.f32 (%p22371_p5), %v25892_v52, 0.0  ;;  %v22545_v52 = vmax.f32 (%p22371_p5), %v25891_v28, 0.0 }
 0x5d5   : >> { %v25900_v49 = vmov %v22332_v31  ;;  %v22524_v10 = vmax.f32 (%p22371_p5), %v25955_v25, 0.0  ;;  %v16933_v55 = vld [vmem:[%s23863_s1 + $0x10e0] sm:$0xff] (%p22371_p5)  }
 0x5d6   : >> { %v25936_v31 = vmov %v25900_v49  ;;  %8721 = vst [vmem:[#allocation2 + $0x38] sm:$0xff] (%p22371_p5), %v22530_v40  ;;  %8723 = vst [vmem:[#allocation2 + $0x48] sm:$0xff] (%p22371_p5), %v22545_v52 }
 0x5d7   : >> { %v15208_v37 = vpop.f32.mrb[16].mxu1  ;;  %v25954_v31 = vld [vmem:[#allocation56_spill] sm:$0xff] (%p22371_p5)  ;;  %8720 = vst [vmem:[#allocation2 + $0x30] sm:$0xff] (%p22371_p5), %v22524_v10 }
 0x5d8   : >> { %v22334_v23 = vadd.f32 %v15208_v37, %v14968_v35   ;;  %v8589_v34 = vpop.f32.mrb[17].mxu1  ;;  %v25939_v37 = vmov %v25893_v29 }
 0x5d9   : >> { %v22336_v35 = vadd.f32 %v8589_v34, %v6884_v51   ;;  %v15209_v9 = vpop.f32.mrb[18].mxu1  ;;  %v25941_v34 = vmov %v25894_v22  ;;  %v16934_v37 = vld [vmem:[%s23863_s1 + $0x1028] sm:$0xff] (%p22371_p5)  }
 0x5da   : >> { %v25901_v17 = vmov %v22334_v23  ;;  %v22338_v50 = vadd.f32 %v15209_v9, %v14969_v46   ;;  %v8592_v60 = vpop.f32.mrb[19].mxu1  ;;  %v22540_v34 = vld [vmem:[#allocation2] sm:$0xff] (%p22371_p5) }
 0x5db   : >> { %v25902_v58 = vmov %v22336_v35  ;;  %v22340_v60 = vadd.f32 %v8592_v60, %v6887_v39  }
 0x5dc   : >> { %v25903_v45 = vmov %v22338_v50 }
 0x5dd   : >> { %v25904_v59 = vmov %v22340_v60 }
 0x5de   : >> { %v25932_v60 = vmov %v25904_v59 }
 0x5df   : >> { %v15212_v56 = vpop.f32.mrb[20].mxu1  ;;  %v16935_v60 = vld [vmem:[%s23863_s1 + $0x10e8] sm:$0xff] (%p22371_p5)  }
 0x5e0   : >> { %v22342_v47 = vadd.f32 %v15212_v56, %v14972_v38   ;;  %v8605_v19 = vpop.f32.mrb[21].mxu1 }
 0x5e1   : >> { %v22344_v5 = vadd.f32 %v8605_v19, %v6900_v7   ;;  %v15213_v18 = vpop.f32.mrb[22].mxu1  ;;  %v25937_v19 = vmov %v25898_v42 }
 0x5e2   : >> { %v25905_v53 = vmov %v22342_v47  ;;  %v22346_v51 = vadd.f32 %v15213_v18, %v14973_v2   ;;  %v8608_v14 = vpop.f32.mrb[23].mxu1 }
 0x5e3   : >> { %v25906_v20 = vmov %v22344_v5  ;;  %v22348_v4 = vadd.f32 %v8608_v14, %v6903_v57   ;;  %v25927_v47 = vmov %v25905_v53  ;;  %v25938_v14 = vmov %v25895_v36 }
 0x5e4   : >> { %v25907_v0 = vmov %v22346_v51  ;;  %v25929_v5 = vmov %v25906_v20  ;;  %v16931_v47 = vld [vmem:[%s23863_s1 + $0x10d8] sm:$0xff] (%p22371_p5)  }
 0x5e5   : >> { %v25908_v8 = vmov %v22348_v4  ;;  %v25953_v5 = vld [vmem:[#allocation46_spill] sm:$0xff] (%p22371_p5) }
 0x5e6   : >> { %v25928_v4 = vmov %v25908_v8 }
 0x5e7   : >> { %v15216_v27 = vpop.f32.mrb[24].mxu1  ;;  %v16932_v4 = vld [vmem:[%s23863_s1 + $0x1020] sm:$0xff] (%p22371_p5)  }
 0x5e8   : >> { %v22350_v21 = vadd.f32 %v15216_v27, %v14976_v12   ;;  %v8621_v35 = vpop.f32.mrb[25].mxu1  ;;  %v25935_v12 = vmov %v25897_v3  ;;  %v25942_v27 = vmov %v25891_v28  ;;  %v22561_v28 = vmax.f32 (%p22371_p5), %v25896_v13, 0.0 }
 0x5e9   : >> { %v22352_v23 = vadd.f32 %v8621_v35, %v6916_v16   ;;  %v15217_v39 = vpop.f32.mrb[26].mxu1  ;;  %v25933_v35 = vmov %v25902_v58  ;;  %v25940_v16 = vmov %v25896_v13  ;;  %v16927_v12 = vld [vmem:[%s23863_s1 + $0x10c8] sm:$0xff] (%p22371_p5)   ;;  %v16936_v27 = vld [vmem:[%s23863_s1 + $0x1030] sm:$0xff] (%p22371_p5)  }
 0x5ea   : >> { %v25909_v43 = vmov %v22350_v21  ;;  %v22354_v18 = vadd.f32 %v15217_v39, %v14977_v41   ;;  %v8624_v38 = vpop.f32.mrb[27].mxu1  ;;  %v25952_v39 = vld [vmem:[#allocation101_spill] sm:$0xff] (%p22371_p5)  ;;  %v22575_v35 = vmax.f32 (%p22371_p5), %v25893_v29, 0.0  ;;  %8725 = vst [vmem:[#allocation2 + $0x58] sm:$0xff] (%p22371_p5), %v22561_v28 }
 0x5eb   : >> { %v25910_v46 = vmov %v22352_v23  ;;  %v22356_v30 = vadd.f32 %v8624_v38, %v6919_v33   ;;  %v25923_v21 = vmov %v25909_v43  ;;  %v25934_v38 = vmov %v25899_v61  ;;  %v16924_v33 = vld [vmem:[%s23863_s1 + $0x1000] sm:$0xff] (%p22371_p5)   ;;  %v16937_v13 = vld [vmem:[%s23863_s1 + $0x10f0] sm:$0xff] (%p22371_p5)  }
 0x5ec   : >> { %v25911_v44 = vmov %v22354_v18  ;;  %v25925_v23 = vmov %v25910_v46  ;;  %15222 = vmatprep.subr.bf16.mxu1 (%p22371_p5), %v16924_v33  ;;  %v22507_v21 = vmax.f32 (%p22371_p5), %v25953_v5, 0.0  ;;  %v22582_v38 = vmax.f32 (%p22371_p5), %v25895_v36, 0.0  ;;  %8726 = vst [vmem:[#allocation2 + $0x60] sm:$0xff] (%p22371_p5), %v22575_v35  ;;  %v16938_v36 = vld [vmem:[%s23863_s1 + $0x1038] sm:$0xff] (%p22371_p5)  }
 0x5ed   : >> { %v25912_v56 = vmov %v22356_v30  ;;  %v25922_v18 = vmov %v25911_v44  ;;  %15223 = vmatpush3.bf16.msra.mxu1 (%p22371_p5), %v16924_v33  ;;  %v22538_v23 = vmax.f32 (%p22371_p5), %v22310_v54, 0.0  ;;  %v8780_v54 = vrot.slane (%p22371_p5), %v22540_v34, 7 }
 0x5ee   : >> { %v25924_v30 = vmov %v25912_v56  ;;  %15224 = vmatprep.subr.bf16.mxu1 (%p22371_p5), %v16926_v63  ;;  %8718 = vst [vmem:[#allocation2 + $0x20] sm:$0xff] (%p22371_p5), %v22507_v21  ;;  %8727 = vst [vmem:[#allocation2 + $0x68] sm:$0xff] (%p22371_p5), %v22582_v38  ;;  %v22599_v33 = vmax.f32 (%p22371_p5), %v25897_v3, 0.0  ;;  %v22614_v3 = vmax.f32 (%p22371_p5), %v25904_v59, 0.0  ;;  %v16941_v59 = vld [vmem:[%s23863_s1 + $0x1100] sm:$0xff] (%p22371_p5)   ;;  %v22668_v5 = vmax.f32 (%p22371_p5), %v25910_v46, 0.0 }
 0x5ef   : >> { %v15220_v7 = vpop.f32.mrb[28].mxu1  ;;  %v22510_v30 = vmax.f32 (%p22371_p5), %v25954_v31, 0.0  ;;  %8722 = vst [vmem:[#allocation2 + $0x40] sm:$0xff] (%p22371_p5), %v22538_v23  ;;  %v22681_v46 = vmax.f32 (%p22371_p5), %v25909_v43, 0.0  ;;  %v22684_v31 = vmax.f32 (%p22371_p5), %v25911_v44, 0.0 }
 0x5f0   : >> { %v22358_v62 = vadd.f32 %v15220_v7, %v14980_v15   ;;  %v8637_v2 = vpop.f32.mrb[29].mxu1  ;;  %v25930_v15 = vmov %v25903_v45  ;;  %3957 = sbr.rel (!%p22371_p5) target bundleno = 573 (0x23d), region = 117  ;;  %v22487_v7 = vmax.f32 (%p22371_p5), %v25952_v39, 0.0  ;;  %8730 = vst [vmem:[#allocation2 + $0x80] sm:$0xff] (%p22371_p5), %v22599_v33  ;;  %8733 = vst [vmem:[#allocation2 + $0x98] sm:$0xff] (%p22371_p5), %v22614_v3  ;;  %v22636_v39 = vmax.f32 (%p22371_p5), %v25903_v45, 0.0 }
 0x5f1   : >> { %v22360_v9 = vadd.f32 %v8637_v2, %v6932_v26   ;;  %v15221_v51 = vpop.f32.mrb[30].mxu1  ;;  %v25931_v2 = vmov %v25901_v17  ;;  %v25951_v26 = vld [vmem:[#allocation53_spill] sm:$0xff] (%p22371_p5)  ;;  %15225 = vmatpush3.bf16.msra.mxu1 (%p22371_p5), %v16926_v63  ;;  %8719 = vst [vmem:[#allocation2 + $0x28] sm:$0xff] (%p22371_p5), %v22510_v30  ;;  %v10133_v63 = vpack.c.bf16 (%p22371_p5), %v22510_v30, %v22507_v21  ;;  %v16942_v45 = vld [vmem:[%s23863_s1 + $0x1108] sm:$0xff] (%p22371_p5)   ;;  %8740 = vst [vmem:[#allocation2 + $0xd0] sm:$0xff] (%p22371_p5), %v22668_v5 }
 0x5f2   : >> { %v25913_v24 = vmov %v22358_v62  ;;  %v22363_v41 = vadd.f32 %v15221_v51, %v22298_v1   ;;  %v8640_v57 = vpop.f32.mrb[31].mxu1  ;;  %v25926_v51 = vmov %v25907_v0  ;;  %v22481_v1 = vmax.f32 (%p22371_p5), %v25951_v26, 0.0  ;;  %v16929_v15 = vld [vmem:[%s23863_s1 + $0x10d0] sm:$0xff] (%p22371_p5)   ;;  %8735 = vst [vmem:[#allocation2 + $0xa8] sm:$0xff] (%p22371_p5), %v22636_v39  ;;  %8742 = vst [vmem:[#allocation2 + $0xe0] sm:$0xff] (%p22371_p5), %v22681_v46 }
 0x5f3   : >> { %v25914_v6 = vmov %v22360_v9  ;;  %v22366_v50 = vadd.f32 %v8640_v57, %v22300_v48   ;;  %v25919_v62 = vmov %v25913_v24  ;;  %v25946_v57 = vld [vmem:[#allocation56_spill] sm:$0xff]  ;;  %v16925_v48 = vld [vmem:[%s23863_s1 + $0x10c0] sm:$0xff] (%p22371_p5)   ;;  %v24557_v2 = vrot.slane (%p22371_p5), %v22540_v34, 1  ;;  %8743 = vst [vmem:[#allocation2 + $0xe8] sm:$0xff] (%p22371_p5), %v22684_v31 }
 0x5f4   : >> { %v25915_v32 = vmov %v22363_v41  ;;  %v25921_v9 = vmov %v25914_v6  ;;  %15414 = vmatprep.subr.bf16.mxu0 (%p22371_p5), %v16925_v48  ;;  %v22497_v16 = vpack.c.bf16 (%p22371_p5), %v22487_v7, %v22481_v1  ;;  %v16930_v62 = vld [vmem:[%s23863_s1 + $0x1018] sm:$0xff] (%p22371_p5)   ;;  %v22587_v51 = vmax.f32 (%p22371_p5), %v25898_v42, 0.0 }
 0x5f5   : >> { %v25916_v11 = vmov %v22366_v50  ;;  %v25918_v41 = vmov %v25915_v32  ;;  %15415 = vmatpush3.bf16.msra.mxu0 (%p22371_p5), %v16925_v48  ;;  %v22542_v9 = vld [vmem:[#allocation2 + $0x8] sm:$0xff] (%p22371_p5)  ;;  %v22592_v57 = vmax.f32 (%p22371_p5), %v25900_v49, 0.0  ;;  %v16939_v42 = vld [vmem:[%s23863_s1 + $0x10f8] sm:$0xff] (%p22371_p5)   ;;  %v22606_v49 = vmax.f32 (%p22371_p5), %v25899_v61, 0.0  ;;  %v16940_v61 = vld [vmem:[%s23863_s1 + $0xfc0] sm:$0xff] (%p22371_p5)  }
 0x5f6   : >> { %v25920_v50 = vmov %v25916_v11  ;;  %v16928_v41 = vld [vmem:[%s23863_s1 + $0x1010] sm:$0xff] (%p22371_p5)   ;;  %15416 = vmatprep.subr.bf16.mxu0 (%p22371_p5), %v16927_v12  ;;  %15430 = vmatprep.mubr.bf16.mxu0 (%p22371_p5), %v22497_v16  ;;  %v24556_v19 = vrot.slane (%p22371_p5), %v22542_v9, 7  ;;  %v8909_v18 = vpack.c.bf16 (%p22371_p5), %v22542_v9, %v22540_v34  ;;  %v24558_v29 = vrot.slane (%p22371_p5), %v22542_v9, 1  ;;  %8728 = vst [vmem:[#allocation2 + $0x70] sm:$0xff] (%p22371_p5), %v22587_v51 }
 0x5f7   : > { %15226 = vmatprep.subr.bf16.mxu1 %v16928_v41  ;;  %v22548_v50 = vmax.f32 %v25894_v22, 0.0  ;;  %v25956_v22 = vld [vmem:[#allocation19_spill] sm:$0xff]  ;;  %8729 = vst [vmem:[#allocation2 + $0x78] sm:$0xff] %v22592_v57  ;;  %v22610_v26 = vmax.f32 %v25902_v58, 0.0  ;;  %8731 = vst [vmem:[#allocation2 + $0x88] sm:$0xff] %v22606_v49  ;;  %v22629_v58 = vmax.f32 %v25901_v17, 0.0 }
 0x5f8   : > { %15227 = vmatpush3.bf16.msra.mxu1 %v16928_v41  ;;  %15238 = vmatprep.mubr.bf16.mxu1 %v8909_v18  ;;  %vm25957_vm4 = vcmp.lt.s32.totalorder %v25956_v22, 1  ;;  %vm25958_vm0 = vcmp.lt.s32.totalorder %v25956_v22, 7  ;;  %v22643_v17 = vmax.f32 %v25906_v20, 0.0  ;;  %v10134_v41 = vpack.c.bf16 %v22530_v40, %v22524_v10 }
 0x5f9   : > { %15417 = vmatpush3.bf16.msra.mxu0 %v16927_v12  ;;  %15228 = vmatprep.subr.bf16.mxu1 %v16930_v62  ;;  %8724 = vst [vmem:[#allocation2 + $0x50] sm:$0xff] %v22548_v50  ;;  %v22569_v14 = vsel %vm25957_vm4, %v8780_v54, %v24556_v19  ;;  %v22622_v48 = vsel %vm25958_vm0, %v24557_v2, %v24558_v29  ;;  %8732 = vst [vmem:[#allocation2 + $0x90] sm:$0xff] %v22610_v26  ;;  %v22646_v12 = vmax.f32 %v25908_v8, 0.0  ;;  %v25973_v19 = vld [vmem:[#allocation45_spill] sm:$0xff] }
 0x5fa   : > { %15418 = vmatprep.subr.bf16.mxu0 %v16929_v15  ;;  %8734 = vst [vmem:[#allocation2 + $0xa0] sm:$0xff] %v22629_v58  ;;  %8736 = vst [vmem:[#allocation2 + $0xb0] sm:$0xff] %v22643_v17  ;;  %v22656_v20 = vmax.f32 %v25905_v53, 0.0  ;;  %v22659_v8 = vmax.f32 %v25907_v0, 0.0  ;;  %v16946_v53 = vld [vmem:[%s23863_s1 + $0xfd0] sm:$0xff]   ;;  %v22674_v0 = vmax.f32 %v25912_v56, 0.0  ;;  %v10135_v56 = vpack.c.bf16 %v22545_v52, %v22538_v23 }
 0x5fb   : > { %8737 = vst [vmem:[#allocation2 + $0xb8] sm:$0xff] %v22646_v12  ;;  %v22694_v43 = vmax.f32 %v25914_v6, 0.0  ;;  %v22697_v44 = vmax.f32 %v25916_v11, 0.0  ;;  %v16947_v11 = vld [vmem:[%s23863_s1 + $0x1120] sm:$0xff]   ;;  %vm25959_vm7 = vmmov %vm25957_vm4  ;;  %v10138_v18 = vpack.c.bf16 %v22592_v57, %v22587_v51  ;;  %vm25974_vm11 = vnez %v25973_v19 }
 0x5fc   : > { %15229 = vmatpush3.bf16.msra.mxu1 %v16930_v62  ;;  %8738 = vst [vmem:[#allocation2 + $0xc0] sm:$0xff] %v22656_v20  ;;  %8739 = vst [vmem:[#allocation2 + $0xc8] sm:$0xff] %v22659_v8  ;;  %v10136_v62 = vpack.c.bf16 %v22561_v28, %v22548_v50  ;;  %v10417_v29 = vrot.slane %v22582_v38, 1 }
 0x5fd   : > { %15419 = vmatpush3.bf16.msra.mxu0 %v16929_v15  ;;  %15230 = vmatprep.subr.bf16.mxu1 %v16932_v4  ;;  %v16943_v15 = vld [vmem:[%s23863_s1 + $0xfc8] sm:$0xff]   ;;  %8741 = vst [vmem:[#allocation2 + $0xd8] sm:$0xff] %v22674_v0  ;;  %8744 = vst [vmem:[#allocation2 + $0xf0] sm:$0xff] %v22694_v43  ;;  %v22708_v6 = vrot.slane %v22697_v44, 7 }
 0x5fe   : > { %15420 = vmatprep.subr.bf16.mxu0 %v16931_v47  ;;  %8745 = vst [vmem:[#allocation2 + $0xf8] sm:$0xff] %v22697_v44  ;;  %vm25960_vm9 = vmmov %vm25958_vm0 }
 0x5ff   : > { %v22718_v25 = vsel %vm25959_vm7, %v22708_v6, %v8780_v54  ;;  %v10407_v54 = vrot.slane %v22487_v7, 1  ;;  %vm25961_vm6 = vmmov %vm25958_vm0 }
 0x600   : > { %15231 = vmatpush3.bf16.msra.mxu1 %v16932_v4  ;;  %v16949_v4 = vld [vmem:[%s23863_s1 + $0xfd8] sm:$0xff]   ;;  %vm25964_vm13 = vmmov %vm25958_vm0 }
 0x601   : > { %15421 = vmatpush3.bf16.msra.mxu0 %v16931_v47  ;;  %15232 = vmatprep.subr.bf16.mxu1 %v16934_v37  ;;  %v16945_v47 = vld [vmem:[%s23863_s1 + $0x1118] sm:$0xff]   ;;  %vm25965_vm1 = vmmov %vm25958_vm0 }
 0x602   : > { %15422 = vmatprep.subr.bf16.mxu0 %v16933_v55  ;;  %vm25968_vm10 = vmmov %vm25958_vm0 }
 0x603   : > { %vm25969_vm14 = vmmov %vm25958_vm0 }
 0x604   : > { %15233 = vmatpush3.bf16.msra.mxu1 %v16934_v37  ;;  %v10415_v37 = vrot.slane %v22561_v28, 1  ;;  %vm25975_vm2 = vmmov %vm25958_vm0 }
 0x605   : > { %15423 = vmatpush3.bf16.msra.mxu0 %v16933_v55  ;;  %15234 = vmatprep.subr.bf16.mxu1 %v16936_v27  ;;  %v16952_v55 = vld [vmem:[%s23863_s1 + $0xfe0] sm:$0xff]   ;;  %vm25976_vm5 = vmmov %vm25958_vm0 }
 0x606   : > { %15424 = vmatprep.subr.bf16.mxu0 %v16935_v60  ;;  %vm25979_vm8 = vmmov %vm25958_vm0 }
 0x607   : > { %vm25980_vm3 = vmmov %vm25958_vm0 }
 0x608   : > { %15235 = vmatpush3.bf16.msra.mxu1 %v16936_v27  ;;  %v22730_v27 = vrot.slane %v22481_v1, 1  ;;  %vm25983_vm4 = vmmov %vm25958_vm0 }
 0x609   : > { %15425 = vmatpush3.bf16.msra.mxu0 %v16935_v60  ;;  %15236 = vmatprep.subr.bf16.mxu1 %v16938_v36  ;;  %v10137_v60 = vpack.c.bf16 %v22582_v38, %v22575_v35 }
 0x60a   : > { %15426 = vmatprep.subr.bf16.mxu0 %v16937_v13 }
 0x60c   : > { %15237 = vmatpush3.bf16.msra.mxu1 %v16938_v36  ;;  %v16948_v36 = vld [vmem:[%s23863_s1 + $0x1128] sm:$0xff]  }
 0x60d   : > { %15427 = vmatpush3.bf16.msra.mxu0 %v16937_v13  ;;  %15270 = vmatprep.subr.bf16.mxu1 %v16940_v61  ;;  %v9364_v13 = vrot.slane %v22507_v21, 1 }
 0x60e   : > { %15428 = vmatprep.subr.bf16.mxu0 %v16939_v42 }
 0x60f   : > { %15239 = vmatmul.mubr.bf16.vlgmr.msra.gmra.mrb[0].mxu1 %v22497_v16  ;;  %v16944_v16 = vld [vmem:[%s23863_s1 + $0x1110] sm:$0xff]  }
 0x610   : > { %15271 = vmatpush3.bf16.msra.mxu1 %v16940_v61  ;;  %15242 = vmatprep.mubr.bf16.mxu1 %v10133_v63  ;;  %v16950_v61 = vld [vmem:[%s23863_s1 + $0x1130] sm:$0xff]  }
 0x611   : > { %15429 = vmatpush3.bf16.msra.mxu0 %v16939_v42  ;;  %15272 = vmatprep.subr.bf16.mxu1 %v16943_v15  ;;  %v16954_v42 = vld [vmem:[%s23863_s1 + $0xfe8] sm:$0xff]  }
 0x612   : > { %15462 = vmatprep.subr.bf16.mxu0 %v16941_v59 }
 0x614   : > { %15431 = vmatmul.mubr.bf16.vlgmr.msra.gmra.mrb[0].mxu0 %v10133_v63  ;;  %15273 = vmatpush3.bf16.msra.mxu1 %v16943_v15  ;;  %v10468_v63 = vsel %vm25961_vm6, %v22730_v27, %v10407_v54  ;;  %v22754_v15 = vmax.f32 %v25913_v24, 0.0  ;;  %v10411_v24 = vrot.slane %v22530_v40, 1  ;;  %vm25990_vm6 = vmmov %vm25965_vm1 }
 0x615   : > { %15463 = vmatpush3.bf16.msra.mxu0 %v16941_v59  ;;  %15434 = vmatprep.mubr.bf16.mxu0 %v10134_v41  ;;  %v9419_v59 = vsel %vm25960_vm9, %v10407_v54, %v9364_v13  ;;  %vm25989_vm9 = vmmov %vm25965_vm1 }
 0x616   : > { %15464 = vmatprep.subr.bf16.mxu0 %v16942_v45  ;;  %15274 = vmatprep.subr.bf16.mxu1 %v16946_v53  ;;  %8746 = vst [vmem:[#allocation2 + $0x100] sm:$0xff] %v22754_v15 }
 0x617   : > { %15243 = vmatmul.mubr.bf16.gmra.mrb[4].mxu1 %v10134_v41  ;;  %v10139_v41 = vpack.c.bf16 %v22606_v49, %v22599_v33 }
 0x618   : > { %15246 = vmatprep.mubr.bf16.mxu1 %v10135_v56  ;;  %15275 = vmatpush3.bf16.msra.mxu1 %v16946_v53  ;;  %v22757_v53 = vrot.slane %v22510_v30, 1 }
 0x619   : > { %15465 = vmatpush3.bf16.msra.mxu0 %v16942_v45  ;;  %15276 = vmatprep.subr.bf16.mxu1 %v16949_v4  ;;  %v16956_v45 = vld [vmem:[%s23863_s1 + $0xff0] sm:$0xff]  }
 0x61a   : > { %15466 = vmatprep.subr.bf16.mxu0 %v16944_v16 }
 0x61c   : > { %15435 = vmatmul.mubr.bf16.gmra.mrb[4].mxu0 %v10135_v56  ;;  %15277 = vmatpush3.bf16.msra.mxu1 %v16949_v4  ;;  %v22762_v56 = vpack.c.bf16 %v9419_v59, %v10468_v63  ;;  %v22772_v4 = vrot.slane %v22538_v23, 1  ;;  %v22812_v59 = vpack.c.bf16 %v22636_v39, %v22629_v58  ;;  %v10413_v63 = vrot.slane %v22545_v52, 1 }
 0x61d   : > { %15467 = vmatpush3.bf16.msra.mxu0 %v16944_v16  ;;  %15438 = vmatprep.mubr.bf16.mxu0 %v10136_v62  ;;  %v22760_v16 = vrot.slane %v22524_v10, 1 }
 0x61e   : > { %15468 = vmatprep.subr.bf16.mxu0 %v16945_v47  ;;  %15278 = vmatprep.subr.bf16.mxu1 %v16952_v55  ;;  %25963 = vst [vmem:[#allocation74_spill] sm:$0xff] %v22772_v4  ;;  %v10463_v54 = vsel %vm25968_vm10, %v10411_v24, %v22772_v4  ;;  %25971 = vst [vmem:[#allocation87_spill] sm:$0xff] %v22812_v59 }
 0x61f   : > { %15247 = vmatmul.mubr.bf16.gmra.mrb[8].mxu1 %v10136_v62  ;;  %25962 = vst [vmem:[#allocation73_spill] sm:$0xff] %v22760_v16  ;;  %v22765_v62 = vmax.f32 %v25915_v32, 0.0  ;;  %v16958_v32 = vld [vmem:[%s23863_s1 + $0xff8] sm:$0xff]  }
 0x620   : > { %15250 = vmatprep.mubr.bf16.mxu1 %v10137_v60  ;;  %15279 = vmatpush3.bf16.msra.mxu1 %v16952_v55  ;;  %v10466_v55 = vsel %vm25965_vm1, %v9364_v13, %v22757_v53  ;;  %v8918_v13 = vpack.c.bf16 %v22614_v3, %v22610_v26 }
 0x621   : > { %15469 = vmatpush3.bf16.msra.mxu0 %v16945_v47  ;;  %15280 = vmatprep.subr.bf16.mxu1 %v16954_v42  ;;  %v16951_v47 = vld [vmem:[%s23863_s1 + $0x1138] sm:$0xff]   ;;  %8747 = vst [vmem:[#allocation2 + $0x108] sm:$0xff] %v22765_v62 }
 0x622   : > { %15470 = vmatprep.subr.bf16.mxu0 %v16947_v11 }
 0x624   : > { %15439 = vmatmul.mubr.bf16.gmra.mrb[8].mxu0 %v10137_v60  ;;  %15281 = vmatpush3.bf16.msra.mxu1 %v16954_v42  ;;  %v25966_v60 = vld [vmem:[#allocation38_spill] sm:$0xff]  ;;  %v22805_v42 = vld [vmem:[%s23863_s1 + $0x1040] sm:$0xff]  }
 0x625   : > { %15471 = vmatpush3.bf16.msra.mxu0 %v16947_v11  ;;  %15442 = vmatprep.mubr.bf16.mxu0 %v10138_v18  ;;  %v22783_v11 = vsel %vm25964_vm13, %v22757_v53, %v22760_v16  ;;  %vm25967_vm12 = vnez %v25966_v60  ;;  %vm25991_vm13 = vmmov %vm25965_vm1 }
 0x626   : > { %15472 = vmatprep.subr.bf16.mxu0 %v16948_v36  ;;  %15282 = vmatprep.subr.bf16.mxu1 %v16956_v45 }
 0x627   : > { %15251 = vmatmul.mubr.bf16.gmra.mrb[12].mxu1 %v10138_v18  ;;  %v16953_v18 = vld [vmem:[%s23863_s1 + $0x1140] sm:$0xff]  }
 0x628   : > { %15254 = vmatprep.mubr.bf16.mxu1 %v10139_v41  ;;  %15283 = vmatpush3.bf16.msra.mxu1 %v16956_v45  ;;  %v10414_v45 = vrot.slane %v22548_v50, 1 }
 0x629   : > { %15473 = vmatpush3.bf16.msra.mxu0 %v16948_v36  ;;  %v10464_v36 = vsel %vm25969_vm14, %v22760_v16, %v10411_v24  ;;  %15284 = vmatprep.subr.bf16.mxu1 %v16958_v32  ;;  %v16955_v24 = vld [vmem:[%s23863_s1 + $0x1148] sm:$0xff]   ;;  %v25982_v16 = vrot.slane %v22542_v9, 1  ;;  %vm25996_vm14 = vmmov %vm25965_vm1 }
 0x62a   : > { %15474 = vmatprep.subr.bf16.mxu0 %v16950_v61  ;;  %v10460_v2 = vsel %vm25980_vm3, %v10414_v45, %v10415_v37  ;;  %vm26003_vm3 = vmmov %vm25965_vm1 }
 0x62c   : > { %15443 = vmatmul.mubr.bf16.gmra.mrb[12].mxu0 %v10139_v41  ;;  %v22816_v41 = vpack.c.bf16 %v10463_v54, %v10464_v36  ;;  %15285 = vmatpush3.bf16.msra.mxu1 %v16958_v32  ;;  %v10462_v54 = vsel %vm25976_vm5, %v22772_v4, %v10413_v63  ;;  %v25977_v36 = vld [vmem:[#allocation47_spill] sm:$0xff]  ;;  %v8920_v32 = vpack.c.bf16 %v22646_v12, %v22643_v17  ;;  %vm25999_vm5 = vmmov %vm25965_vm1 }
 0x62d   : > { %15475 = vmatpush3.bf16.msra.mxu0 %v16950_v61  ;;  %15478 = vmatprep.mubr.msk.bf16.mxu0 %vm25967_vm12, %v22762_v56  ;;  %v22808_v61 = vpack.c.bf16 %v22783_v11, %v10466_v55  ;;  %v10416_v55 = vrot.slane %v22575_v35, 1  ;;  %vm25978_vm15 = vnez %v25977_v36  ;;  %v22855_v4 = vsel %vm25983_vm4, %v25982_v16, %v22730_v27  ;;  %v16959_v36 = vld [vmem:[%s23863_s1 + $0x1158] sm:$0xff]   ;;  %v25985_v16 = vld [vmem:[#allocation52_spill] sm:$0xff]  ;;  %vm26005_vm4 = vmmov %vm25965_vm1 }
 0x62e   : > { %15476 = vmatprep.subr.bf16.mxu0 %v16951_v47  ;;  %25972 = vst [vmem:[#allocation96_spill] sm:$0xff] %v22816_v41  ;;  %15318 = vmatprep.subr.bf16.mxu1 %v22805_v42  ;;  %vm25986_vm0 = vnez %v25985_v16 }
 0x62f   : > { %25970 = vst [vmem:[#allocation84_spill] sm:$0xff] %v22808_v61  ;;  %15255 = vmatmul.mubr.bf16.gmra.mrb[16].mxu1 %v8918_v13  ;;  %v10459_v13 = vsel %vm25979_vm8, %v10415_v37, %v10416_v55  ;;  %v10458_v37 = vsel %vm25990_vm6, %v10416_v55, %v10417_v29  ;;  %vm26000_vm8 = vmmov %vm25965_vm1  ;;  %vm26011_vm6 = vcmp.lt.s32.totalorder %v25956_v22, 1 }
 0x630   : > { %15258 = vmatprep.mubr.bf16.mxu1 %v22812_v59  ;;  %v8921_v59 = vpack.c.bf16 %v22659_v8, %v22656_v20 }
 0x631   : > { %15477 = vmatpush3.bf16.msra.mxu0 %v16951_v47  ;;  %v10461_v47 = vsel %vm25975_vm2, %v10413_v63, %v10414_v45  ;;  %v22859_v45 = vpack.c.bf16 %v10459_v13, %v10460_v2  ;;  %v16961_v2 = vld [vmem:[%s23863_s1 + $0x1160] sm:$0xff]  }
 0x632   : > { %15510 = vmatprep.subr.bf16.mxu0 %v16953_v18  ;;  %v22846_v63 = vpack.c.bf16 %v10461_v47, %v10462_v54  ;;  %v10419_v47 = vrot.slane %v22592_v57, 1  ;;  %v10420_v54 = vrot.slane %v22599_v33, 1 }
 0x633   : > { %25984 = vst [vmem:[#allocation99_spill] sm:$0xff] %v22859_v45 }
 0x634   : > { %15479 = vmatmul.mubr.msk.bf16.vlgmr.msra.gmra.mrb[0].mxu0 %vm25974_vm11, %v22808_v61  ;;  %25981 = vst [vmem:[#allocation97_spill] sm:$0xff] %v22846_v63  ;;  %v25994_v61 = vld [vmem:[#allocation64_spill] sm:$0xff] }
 0x635   : > { %15511 = vmatpush3.bf16.msra.mxu0 %v16953_v18  ;;  %15482 = vmatprep.mubr.msk.bf16.mxu0 %vm25978_vm15, %v22816_v41  ;;  %v16957_v18 = vld [vmem:[%s23863_s1 + $0x1150] sm:$0xff]   ;;  %v10418_v41 = vrot.slane %v22587_v51, 1  ;;  %vm25995_vm10 = vnez %v25994_v61 }
 0x636   : > { %15512 = vmatprep.subr.bf16.mxu0 %v16955_v24 }
 0x637   : > { %15259 = vmatmul.mubr.bf16.gmra.mrb[20].mxu1 %v8920_v32  ;;  %v10457_v13 = vsel %vm25989_vm9, %v10417_v29, %v10418_v41  ;;  %v10455_v32 = vsel %vm25991_vm13, %v10419_v47, %v10420_v54  ;;  %v10422_v29 = vrot.slane %v22610_v26, 1  ;;  %vm26006_vm9 = vmmov %vm25965_vm1 }
 0x638   : > { %15262 = vmatprep.mubr.bf16.mxu1 %v8921_v59  ;;  %v10456_v59 = vsel %vm25965_vm1, %v10418_v41, %v10419_v47  ;;  %v22886_v16 = vpack.c.bf16 %v10457_v13, %v10458_v37  ;;  %v10423_v41 = vrot.slane %v22614_v3, 1  ;;  %v10424_v47 = vrot.slane %v22629_v58, 1  ;;  %v16963_v37 = vld [vmem:[%s23863_s1 + $0x1168] sm:$0xff]   ;;  %vm26014_vm13 = vmmov %vm26011_vm6 }
 0x639   : > { %15513 = vmatpush3.bf16.msra.mxu0 %v16955_v24  ;;  %v25987_v24 = vld [vmem:[#allocation54_spill] sm:$0xff]  ;;  %v22892_v55 = vpack.c.bf16 %v10455_v32, %v10456_v59  ;;  %v24569_v13 = vrot.slane %v22694_v43, 1  ;;  %vm26015_vm1 = vmmov %vm26011_vm6 }
 0x63a   : > { %15514 = vmatprep.subr.bf16.mxu0 %v16957_v18  ;;  %vm25988_vm7 = vnez %v25987_v24  ;;  %25992 = vst [vmem:[#allocation31_spill] sm:$0xff] %v22886_v16  ;;  %v10421_v24 = vrot.slane %v22606_v49, 1  ;;  %v25997_v32 = vld [vmem:[#allocation66_spill] sm:$0xff] }
 0x63b   : > { %25993 = vst [vmem:[#allocation77_spill] sm:$0xff] %v22892_v55  ;;  %vm25998_vm2 = vnez %v25997_v32  ;;  %v22943_v32 = vrot.slane %v22507_v21, 7 }
 0x63c   : > { %15483 = vmatmul.mubr.msk.bf16.gmra.mrb[4].mxu0 %vm25986_vm0, %v22846_v63  ;;  %v8922_v63 = vpack.c.bf16 %v22674_v0, %v22668_v5  ;;  %v10454_v59 = vsel %vm25999_vm5, %v10420_v54, %v10421_v24  ;;  %v10452_v54 = vsel %vm26006_vm9, %v10422_v29, %v10423_v41  ;;  %vm26024_vm9 = vmmov %vm26005_vm4  ;;  %vm26071_vm0 = vcmp.lt.s32.totalorder %v25956_v22, 7 }
 0x63d   : > { %15486 = vmatprep.mubr.msk.bf16.mxu0 %vm25988_vm7, %v22859_v45  ;;  %15515 = vmatpush3.bf16.msra.mxu0 %v16957_v18  ;;  %v8923_v45 = vpack.c.bf16 %v22684_v31, %v22681_v46  ;;  %v22895_v18 = vrot.slane %v22697_v44, 1 }
 0x63e   : > { %15516 = vmatprep.subr.bf16.mxu0 %v16959_v36 }
 0x63f   : > { %15263 = vmatmul.mubr.bf16.gmra.mrb[24].mxu1 %v8922_v63  ;;  %v22918_v63 = vsel %vm26000_vm8, %v24569_v13, %v22895_v18  ;;  %v9763_v13 = vrot.slane %v22487_v7, 7  ;;  %v16967_v7 = vld [vmem:[%s23863_s1 + $0x1178] sm:$0xff]   ;;  %vm26021_vm8 = vmmov %vm26015_vm1 }
 0x640   : > { %15266 = vmatprep.mubr.bf16.mxu1 %v8923_v45  ;;  %26001 = vst [vmem:[#allocation82_spill] sm:$0xff] %v22918_v63  ;;  %v26002_v45 = vrot.slane %v22540_v34, 1  ;;  %v8924_v34 = vpack.c.bf16 %v22697_v44, %v22694_v43  ;;  %v10428_v44 = vrot.slane %v22656_v20, 1 }
 0x641   : > { %15517 = vmatpush3.bf16.msra.mxu0 %v16959_v36  ;;  %v10453_v36 = vsel %vm25996_vm14, %v10421_v24, %v10422_v29  ;;  %v10425_v24 = vrot.slane %v22636_v39, 1 }
 0x642   : > { %15518 = vmatprep.subr.bf16.mxu0 %v16961_v2  ;;  %v22945_v29 = vpack.c.bf16 %v10453_v36, %v10454_v59  ;;  %v26016_v36 = vld [vmem:[#allocation72_spill] sm:$0xff]  ;;  %v26018_v59 = vpack.c.bf16 %v22569_v14, %v22718_v25 }
 0x643   : > { %vm26017_vm14 = vnez %v26016_v36 }
 0x644   : > { %15487 = vmatmul.mubr.msk.bf16.gmra.mrb[8].mxu0 %vm25995_vm10, %v22886_v16  ;;  %v22925_v16 = vsel %vm26003_vm3, %v22895_v18, %v26002_v45  ;;  %v22939_v45 = vrot.slane %v22481_v1, 7  ;;  %26008 = vst [vmem:[#allocation55_spill] sm:$0xff] %v22945_v29  ;;  %v10427_v1 = vrot.slane %v22646_v12, 1 }
 0x645   : > { %15490 = vmatprep.mubr.msk.bf16.mxu0 %vm25998_vm2, %v22892_v55  ;;  %15519 = vmatpush3.bf16.msra.mxu0 %v16961_v2  ;;  %26004 = vst [vmem:[#allocation48_spill] sm:$0xff] %v22925_v16  ;;  %v10451_v55 = vsel %vm26005_vm4, %v10423_v41, %v10424_v47  ;;  %v16965_v2 = vld [vmem:[%s23863_s1 + $0x1170] sm:$0xff]   ;;  %v22948_v41 = vrot.slane %v22510_v30, 7  ;;  %v10426_v16 = vrot.slane %v22643_v17, 1  ;;  %v26013_v30 = vrot.slane %v22542_v9, 7 }
 0x646   : > { %15520 = vmatprep.subr.bf16.mxu0 %v16963_v37  ;;  %26007 = vst [vmem:[#allocation51_spill] sm:$0xff] %v22939_v45  ;;  %v22950_v61 = vpack.c.bf16 %v10451_v55, %v10452_v54  ;;  %v22962_v21 = vsel %vm26011_vm6, %v22939_v45, %v9763_v13  ;;  %v26019_v54 = vld [vmem:[#allocation71_spill] sm:$0xff]  ;;  %vm26025_vm6 = vmmov %vm26005_vm4 }
 0x647   : > { %26009 = vst [vmem:[#allocation116_spill] sm:$0xff] %v22948_v41  ;;  %15267 = vmatmul.mubr.bf16.gmra.mrb[28].mxu1 %v8924_v34  ;;  %26012 = vst [vmem:[#allocation58_spill] sm:$0xff] %v22962_v21  ;;  %v8841_v55 = vsel %vm26014_vm13, %v26013_v30, %v22939_v45  ;;  %vm26020_vm5 = vnez %v26019_v54  ;;  %v22984_v9 = vsel %vm26021_vm8, %v22943_v32, %v22948_v41  ;;  %v26022_v34 = vld [vmem:[#allocation75_spill] sm:$0xff] }
 0x648   : > { %26010 = vst [vmem:[#allocation141_spill] sm:$0xff] %v22950_v61  ;;  %15286 = vmatprep.mubr.msk.bf16.mxu1 %vm26020_vm5, %v26018_v59  ;;  %vm26023_vm3 = vnez %v26022_v34  ;;  %v10450_v30 = vsel %vm26024_vm9, %v10424_v47, %v10425_v24  ;;  %v10447_v14 = vsel %vm26025_vm6, %v10427_v1, %v10428_v44  ;;  %vm26026_vm13 = vmmov %vm26005_vm4  ;;  %v23000_v59 = vld [vmem:[%s23863_s1 + $0x1180] sm:$0xff]   ;;  %v13180_v45 = vpack.c.bf16 %v22962_v21, %v8841_v55 }
 0x649   : > { %15521 = vmatpush3.bf16.msra.mxu0 %v16963_v37  ;;  %v9823_v37 = vsel %vm26015_vm1, %v9763_v13, %v22943_v32  ;;  %v10449_v13 = vsel %vm26005_vm4, %v10425_v24, %v10426_v16  ;;  %v10448_v25 = vsel %vm26026_vm13, %v10426_v16, %v10427_v1  ;;  %v23005_v34 = vrot.slane %v22530_v40, 7  ;;  %vm26033_vm4 = vmmov %vm26021_vm8 }
 0x64a   : > { %15522 = vmatprep.subr.bf16.mxu0 %v16965_v2  ;;  %v23008_v47 = vpack.c.bf16 %v22984_v9, %v9823_v37  ;;  %v10429_v16 = vrot.slane %v22659_v8, 1  ;;  %v23013_v24 = vpack.c.bf16 %v10447_v14, %v10448_v25  ;;  %v10430_v1 = vrot.slane %v22668_v5, 1  ;;  %v26036_v14 = vld [vmem:[#allocation85_spill] sm:$0xff] }
 0x64b   : > { %26027 = vst [vmem:[#allocation63_spill] sm:$0xff] %v23005_v34  ;;  %v8789_v55 = vrot.slane %v22545_v52, 7  ;;  %v10431_v40 = vrot.slane %v22674_v0, 1  ;;  %v10432_v37 = vrot.slane %v22681_v46, 1  ;;  %vm26037_vm13 = vnez %v26036_v14 }
 0x64c   : > { %15491 = vmatmul.mubr.msk.bf16.gmra.mrb[12].mxu0 %vm26017_vm14, %v22945_v29  ;;  %26028 = vst [vmem:[#allocation44_spill] sm:$0xff] %v23008_v47  ;;  %26030 = vst [vmem:[#allocation67_spill] sm:$0xff] %v23013_v24  ;;  %v8788_v29 = vrot.slane %v22538_v23, 7  ;;  %v8790_v21 = vrot.slane %v22548_v50, 7  ;;  %v16966_v50 = vld [vmem:[%s23863_s1 + $0x1058] sm:$0xff]  }
 0x64d   : > { %15494 = vmatprep.mubr.msk.bf16.mxu0 %vm26023_vm3, %v22950_v61  ;;  %15523 = vmatpush3.bf16.msra.mxu0 %v16965_v2  ;;  %v8786_v61 = vrot.slane %v22524_v10, 7  ;;  %v23010_v2 = vpack.c.bf16 %v10449_v13, %v10450_v30  ;;  %v16962_v10 = vld [vmem:[%s23863_s1 + $0x1048] sm:$0xff]   ;;  %v26031_v13 = vld [vmem:[#allocation79_spill] sm:$0xff]  ;;  %v10446_v30 = vsel %vm26025_vm6, %v10428_v44, %v10429_v16  ;;  %vm26040_vm3 = vmmov %vm26025_vm6 }
 0x64e   : > { %15524 = vmatprep.subr.bf16.mxu0 %v16967_v7  ;;  %vm26032_vm1 = vnez %v26031_v13  ;;  %v8834_v25 = vsel %vm26033_vm4, %v8788_v29, %v8789_v55  ;;  %v16964_v44 = vld [vmem:[%s23863_s1 + $0x1050] sm:$0xff]   ;;  %vm26042_vm6 = vmmov %vm26040_vm3 }
 0x64f   : > { %26029 = vst [vmem:[#allocation100_spill] sm:$0xff] %v23010_v2  ;;  %15287 = vmatmul.mubr.msk.bf16.vlgmr.msra.gmra.mrb[0].mxu1 %vm26032_vm1, %v13180_v45  ;;  %v8836_v23 = vsel %vm26021_vm8, %v8786_v61, %v23005_v34  ;;  %v8837_v52 = vsel %vm26033_vm4, %v22948_v41, %v8786_v61  ;;  %v26038_v45 = vld [vmem:[#allocation86_spill] sm:$0xff]  ;;  %v10445_v61 = vsel %vm26040_vm3, %v10429_v16, %v10430_v1 }
 0x650   : > { %15319 = vmatpush3.bf16.msra.mxu1 %v22805_v42  ;;  %15290 = vmatprep.mubr.msk.bf16.mxu1 %vm26037_vm13, %v23008_v47  ;;  %vm26039_vm8 = vnez %v26038_v45  ;;  %v23054_v41 = vpack.c.bf16 %v8836_v23, %v8837_v52  ;;  %v10443_v47 = vsel %vm26042_vm6, %v10431_v40, %v10432_v37  ;;  %v10433_v45 = vrot.slane %v22684_v31, 1 }
 0x651   : > { %15525 = vmatpush3.bf16.msra.mxu0 %v16967_v7  ;;  %v26034_v7 = vld [vmem:[#allocation83_spill] sm:$0xff]  ;;  %15320 = vmatprep.subr.bf16.mxu1 %v16962_v10  ;;  %v8792_v23 = vrot.slane %v22575_v35, 7  ;;  %v8793_v52 = vrot.slane %v22582_v38, 7  ;;  %v26050_v38 = vrot.slane %v22694_v43, 1 }
 0x652   : > { %15558 = vmatprep.subr.bf16.mxu0 %v23000_v59  ;;  %vm26035_vm9 = vnez %v26034_v7 }
 0x654   : > { %15495 = vmatmul.mubr.msk.bf16.gmra.mrb[16].mxu0 %vm26035_vm9, %v23010_v2  ;;  %vm26041_vm9 = vmmov %vm26033_vm4  ;;  %15321 = vmatpush3.bf16.msra.mxu1 %v16962_v10 }
 0x655   : > { %15498 = vmatprep.mubr.msk.bf16.mxu0 %vm26039_vm8, %v23013_v24  ;;  %v8835_v42 = vsel %vm26041_vm9, %v23005_v34, %v8788_v29  ;;  %vm26043_vm8 = vmmov %vm26040_vm3  ;;  %v8791_v24 = vrot.slane %v22561_v28, 7  ;;  %v23065_v34 = vpack.c.bf16 %v10445_v61, %v10446_v30  ;;  %15322 = vmatprep.subr.bf16.mxu1 %v16964_v44  ;;  %v26046_v28 = vld [vmem:[#allocation95_spill] sm:$0xff]  ;;  %v26054_v30 = vld [vmem:[#allocation102_spill] sm:$0xff] }
 0x656   : > { %v10444_v16 = vsel %vm26043_vm8, %v10430_v1, %v10431_v40  ;;  %v23063_v29 = vpack.c.bf16 %v8834_v25, %v8835_v42  ;;  %v10436_v1 = vrot.slane %v22754_v15, 1  ;;  %vm26047_vm3 = vnez %v26046_v28  ;;  %vm26048_vm9 = vmmov %vm26033_vm4  ;;  %v26052_v40 = vld [vmem:[#allocation98_spill] sm:$0xff] }
 0x657   : > { %26044 = vst [vmem:[#allocation124_spill] sm:$0xff] %v23065_v34  ;;  %v23069_v2 = vpack.c.bf16 %v10443_v47, %v10444_v16  ;;  %15291 = vmatmul.mubr.msk.bf16.gmra.mrb[4].mxu1 %vm26047_vm3, %v23054_v41  ;;  %v8832_v10 = vsel %vm26048_vm9, %v8790_v21, %v8791_v24  ;;  %vm26049_vm8 = vmmov %vm26033_vm4  ;;  %vm26055_vm14 = vnez %v26054_v30  ;;  %v17028_v30 = vld [vmem:[%s23863_s1 + $0x10e0] sm:$0xff]  }
 0x658   : > { %v8833_v35 = vsel %vm26049_vm8, %v8789_v55, %v8790_v21  ;;  %vm26051_vm4 = vmmov %vm26042_vm6  ;;  %vm26053_vm6 = vnez %v26052_v40  ;;  %15294 = vmatprep.mubr.msk.bf16.mxu1 %vm26055_vm14, %v23063_v29  ;;  %v8831_v21 = vsel %vm26049_vm8, %v8791_v24, %v8792_v23  ;;  %v26058_v55 = vld [vmem:[#allocation105_spill] sm:$0xff]  ;;  %15323 = vmatpush3.bf16.msra.mxu1 %v16964_v44  ;;  %v23113_v24 = vld [vmem:[#allocation2 + $0x118] sm:$0xff]  ;;  %v8795_v44 = vrot.slane %v22592_v57, 7 }
 0x659   : > { %26045 = vst [vmem:[#allocation122_spill] sm:$0xff] %v23069_v2  ;;  %v10441_v47 = vsel %vm26051_vm4, %v10433_v45, %v26050_v38  ;;  %vm26056_vm2 = vmmov %vm26051_vm4  ;;  %vm26059_vm4 = vnez %v26058_v55  ;;  %15324 = vmatprep.subr.bf16.mxu1 %v16966_v50  ;;  %v26063_v57 = vld [vmem:[#allocation110_spill] sm:$0xff] }
 0x65a   : > { %v10442_v61 = vsel %vm26056_vm2, %v10432_v37, %v10433_v45  ;;  %vm26057_vm9 = vmmov %vm26049_vm8  ;;  %v16968_v37 = vld [vmem:[%s23863_s1 + $0x1060] sm:$0xff]   ;;  %v23107_v45 = vpack.c.bf16 %v8832_v10, %v8833_v35  ;;  %v24590_v10 = vrot.slane %v23113_v24, 7  ;;  %v16970_v35 = vld [vmem:[%s23863_s1 + $0x1068] sm:$0xff]  }
 0x65b   : > { %v8830_v25 = vsel %vm26057_vm9, %v8792_v23, %v8793_v52  ;;  %v23109_v16 = vpack.c.bf16 %v10441_v47, %v10442_v61  ;;  %v8794_v23 = vrot.slane %v22587_v51, 7  ;;  %v26061_v51 = vld [vmem:[#allocation108_spill] sm:$0xff] }
 0x65c   : > { %15499 = vmatmul.mubr.msk.bf16.gmra.mrb[20].mxu0 %vm26053_vm6, %v23065_v34  ;;  %vm26060_vm6 = vmmov %vm26056_vm2  ;;  %v23111_v38 = vpack.c.bf16 %v8830_v25, %v8831_v21  ;;  %v10437_v34 = vrot.slane %v22765_v62, 1  ;;  %15325 = vmatpush3.bf16.msra.mxu1 %v16966_v50  ;;  %vm26062_vm2 = vnez %v26061_v51  ;;  %v26069_v61 = vld [vmem:[#allocation112_spill] sm:$0xff] }
 0x65d   : > { %15502 = vmatprep.mubr.msk.bf16.mxu0 %vm26059_vm4, %v23069_v2  ;;  %v10439_v42 = vsel %vm26060_vm6, %v22895_v18, %v10436_v1  ;;  %v8796_v2 = vrot.slane %v22599_v33, 7  ;;  %v8797_v18 = vrot.slane %v22606_v49, 7  ;;  %15326 = vmatprep.subr.bf16.mxu1 %v16968_v37  ;;  %vm26064_vm6 = vnez %v26063_v57  ;;  %v26065_v33 = vld [vmem:[#allocation111_spill] sm:$0xff]  ;;  %vm26067_vm4 = vmmov %vm26049_vm8 }
 0x65e   : > { %v13459_v55 = vpack.c.bf16 %v10439_v42, %v22918_v63  ;;  %vm26066_vm9 = vnez %v26065_v33  ;;  %v8828_v49 = vsel %vm26049_vm8, %v8794_v23, %v8795_v44  ;;  %v8829_v50 = vsel %vm26067_vm4, %v8793_v52, %v8794_v23  ;;  %vm26068_vm10 = vmmov %vm26067_vm4  ;;  %v17030_v33 = vld [vmem:[%s23863_s1 + $0x10f0] sm:$0xff]  }
 0x65f   : > { %15295 = vmatmul.mubr.msk.bf16.gmra.mrb[8].mxu1 %vm26062_vm2, %v23107_v45  ;;  %v8826_v47 = vsel %vm26068_vm10, %v8796_v2, %v8797_v18  ;;  %vm26070_vm7 = vnez %v26069_v61  ;;  %v10438_v25 = vsel %vm26071_vm0, %v10436_v1, %v10437_v34  ;;  %vm26073_vm15 = vmmov %vm26067_vm4  ;;  %v10871_v52 = vsel %vm26067_vm4, %v24590_v10, %v22943_v32  ;;  %v26126_v10 = vld [vmem:[#allocation66_spill] sm:$0xff]  ;;  %v23512_v61 = vld [vmem:[#allocation2 + $0xa0] sm:$0xff] }
 0x660   : > { %15298 = vmatprep.mubr.msk.bf16.mxu1 %vm26066_vm9, %v23111_v38  ;;  %v8827_v42 = vsel %vm26073_vm15, %v8795_v44, %v8796_v2  ;;  %15327 = vmatpush3.bf16.msra.mxu1 %v16968_v37  ;;  %v23157_v1 = vpack.c.bf16 %v8828_v49, %v8829_v50  ;;  %v13489_v2 = vpack.c.bf16 %v22984_v9, %v10871_v52  ;;  %v8800_v37 = vrot.slane %v22629_v58, 7  ;;  %v16974_v44 = vld [vmem:[%s23863_s1 + $0x1078] sm:$0xff]   ;;  %v26074_v49 = vld [vmem:[#allocation115_spill] sm:$0xff]  ;;  %v26076_v50 = vld [vmem:[#allocation117_spill] sm:$0xff] }
 0x661   : > { %15328 = vmatprep.subr.bf16.mxu1 %v16970_v35  ;;  %v23159_v63 = vpack.c.bf16 %v8826_v47, %v8827_v42  ;;  %v8801_v32 = vrot.slane %v22636_v39, 7  ;;  %vm26075_vm15 = vnez %v26074_v49  ;;  %vm26081_vm8 = vmmov %vm26067_vm4  ;;  %v23181_v39 = vld [vmem:[#allocation2 + $0x20] sm:$0xff]  ;;  %v26123_v42 = vld [vmem:[#allocation64_spill] sm:$0xff] }
 0x662   : > { %26082 = vst [vmem:[#allocation126_spill] sm:$0xff] %v23181_v39  ;;  %v24589_v9 = vrot.slane %v23181_v39, 1 }
 0x664   : > { %15503 = vmatmul.mubr.msk.bf16.gmra.mrb[24].mxu0 %vm26064_vm6, %v23109_v16  ;;  %vm26072_vm6 = vmmov %vm26071_vm0  ;;  %15329 = vmatpush3.bf16.msra.mxu1 %v16970_v35  ;;  %vm26077_vm0 = vnez %v26076_v50  ;;  %v8822_v35 = vsel %vm26067_vm4, %v8800_v37, %v8801_v32 }
 0x665   : > { %15506 = vmatprep.mubr.msk.bf16.mxu0 %vm26070_vm7, %v13459_v55  ;;  %v10469_v21 = vsel %vm26072_vm6, %v10437_v34, %v22730_v27  ;;  %v16972_v55 = vld [vmem:[%s23863_s1 + $0x1070] sm:$0xff]   ;;  %v8798_v27 = vrot.slane %v22610_v26, 7  ;;  %v8799_v34 = vrot.slane %v22614_v3, 7  ;;  %v26078_v26 = vld [vmem:[#allocation118_spill] sm:$0xff]  ;;  %vm26080_vm6 = vmmov %vm26067_vm4 }
 0x666   : > { %v13462_v23 = vpack.c.bf16 %v10469_v21, %v10438_v25  ;;  %15330 = vmatprep.subr.bf16.mxu1 %v16972_v55  ;;  %vm26079_vm10 = vnez %v26078_v26  ;;  %v23193_v25 = vld [vmem:[%s23863_s1 + $0x1080] sm:$0xff]   ;;  %v17031_v26 = vld [vmem:[%s23863_s1 + $0x10f8] sm:$0xff]  }
 0x667   : > { %15299 = vmatmul.mubr.msk.bf16.gmra.mrb[12].mxu1 %vm26075_vm15, %v23157_v1  ;;  %v8824_v3 = vsel %vm26080_vm6, %v8798_v27, %v8799_v34  ;;  %v8825_v58 = vsel %vm26081_vm8, %v8797_v18, %v8798_v27  ;;  %vm26084_vm6 = vcmp.lt.s32.totalorder %v25956_v22, 7  ;;  %v8804_v27 = vrot.slane %v22656_v20, 7 }
 0x668   : > { %15302 = vmatprep.mubr.msk.bf16.mxu1 %vm26079_vm10, %v23159_v63  ;;  %15331 = vmatpush3.bf16.msra.mxu1 %v16972_v55  ;;  %v23200_v18 = vsel %vm26084_vm6, %v24589_v9, %v22757_v53  ;;  %v23202_v21 = vpack.c.bf16 %v8824_v3, %v8825_v58  ;;  %v8802_v55 = vrot.slane %v22643_v17, 7  ;;  %v16971_v53 = vld [vmem:[%s23863_s1 + $0x1188] sm:$0xff]   ;;  %vm26089_vm6 = vmmov %vm26067_vm4  ;;  %v8807_v3 = vrot.slane %v22674_v0, 7  ;;  %v26122_v9 = vld [vmem:[#allocation99_spill] sm:$0xff] }
 0x669   : > { %15332 = vmatprep.subr.bf16.mxu1 %v16974_v44  ;;  %v26087_v17 = vld [vmem:[#allocation120_spill] sm:$0xff]  ;;  %v8808_v58 = vrot.slane %v22681_v46, 7 }
 0x66a   : > { %vm26088_vm8 = vnez %v26087_v17  ;;  %v8821_v20 = vsel %vm26089_vm6, %v8801_v32, %v8802_v55  ;;  %vm26096_vm6 = vmmov %vm26067_vm4 }
 0x66c   : > { %15507 = vmatmul.mubr.msk.bf16.gmra.mrb[28].mxu0 %vm26077_vm0, %v13462_v23  ;;  %vm26083_vm0 = vmmov %vm26067_vm4  ;;  %v8803_v23 = vrot.slane %v22646_v12, 7  ;;  %15333 = vmatpush3.bf16.msra.mxu1 %v16974_v44 }
 0x66d   : > { %15526 = vmatprep.mubr.msk.bf16.mxu0 %vm26020_vm5, %v13489_v2  ;;  %v8823_v47 = vsel %vm26083_vm0, %v8799_v34, %v8800_v37  ;;  %v8805_v34 = vrot.slane %v22659_v8, 7  ;;  %15366 = vmatprep.subr.bf16.mxu1 %v23193_v25  ;;  %v26085_v2 = vld [vmem:[#allocation119_spill] sm:$0xff]  ;;  %vm26090_vm5 = vmmov %vm26067_vm4  ;;  %v16973_v37 = vld [vmem:[%s23863_s1 + $0x1190] sm:$0xff]  }
 0x66e   : > { %v23206_v52 = vpack.c.bf16 %v8822_v35, %v8823_v47  ;;  %vm26086_vm0 = vnez %v26085_v2  ;;  %v8820_v12 = vsel %vm26067_vm4, %v8802_v55, %v8803_v23  ;;  %v8809_v35 = vrot.slane %v22684_v31, 7  ;;  %v16975_v47 = vld [vmem:[%s23863_s1 + $0x1198] sm:$0xff]   ;;  %v26092_v55 = vld [vmem:[#allocation127_spill] sm:$0xff] }
 0x66f   : > { %15303 = vmatmul.mubr.msk.bf16.gmra.mrb[16].mxu1 %vm26086_vm0, %v23202_v21  ;;  %v8818_v8 = vsel %vm26090_vm5, %v8804_v27, %v8805_v34  ;;  %v23240_v44 = vpack.c.bf16 %v8820_v12, %v8821_v20  ;;  %vm26093_vm5 = vnez %v26092_v55  ;;  %v16979_v20 = vld [vmem:[%s23863_s1 + $0x11a8] sm:$0xff]  }
 0x670   : > { %15306 = vmatprep.mubr.msk.bf16.mxu1 %vm26088_vm8, %v23206_v52 }
 0x674   : > { %15527 = vmatmul.mubr.msk.bf16.vlgmr.msra.gmra.mrb[0].mxu0 %vm26032_vm1, %v23054_v41  ;;  %vm26091_vm1 = vmmov %vm26067_vm4 }
 0x675   : > { %15559 = vmatpush3.bf16.msra.mxu0 %v23000_v59  ;;  %15530 = vmatprep.mubr.msk.bf16.mxu0 %vm26037_vm13, %v23063_v29  ;;  %v8819_v41 = vsel %vm26091_vm1, %v8803_v23, %v8804_v27  ;;  %v8806_v59 = vrot.slane %v22668_v5, 7  ;;  %v26094_v5 = vld [vmem:[#allocation129_spill] sm:$0xff]  ;;  %vm26097_vm13 = vmmov %vm26067_vm4  ;;  %v16977_v27 = vld [vmem:[%s23863_s1 + $0x11a0] sm:$0xff]  }
 0x676   : > { %15560 = vmatprep.subr.bf16.mxu0 %v16971_v53  ;;  %v23242_v32 = vpack.c.bf16 %v8818_v8, %v8819_v41  ;;  %vm26095_vm1 = vnez %v26094_v5  ;;  %v8814_v31 = vsel %vm26097_vm13, %v8808_v58, %v8809_v35  ;;  %v26100_v8 = vld [vmem:[#allocation137_spill] sm:$0xff]  ;;  %v26102_v41 = vld [vmem:[#allocation138_spill] sm:$0xff] }
 0x677   : > { %15307 = vmatmul.mubr.msk.bf16.gmra.mrb[20].mxu1 %vm26093_vm5, %v23240_v44  ;;  %v8816_v0 = vsel %vm26067_vm4, %v8806_v59, %v8807_v3  ;;  %v8817_v46 = vsel %vm26096_vm6, %v8805_v34, %v8806_v59  ;;  %v23279_v34 = vrot.slane %v22694_v43, 7  ;;  %vm26101_vm13 = vnez %v26100_v8  ;;  %vm26104_vm6 = vmmov %vm26067_vm4  ;;  %v16981_v59 = vld [vmem:[%s23863_s1 + $0x11b0] sm:$0xff]  }
 0x678   : > { %15310 = vmatprep.mubr.msk.bf16.mxu1 %vm26095_vm1, %v23242_v32  ;;  %v23503_v8 = vld [vmem:[#allocation2 + $0x90] sm:$0xff] }
 0x679   : > { %15561 = vmatpush3.bf16.msra.mxu0 %v16971_v53  ;;  %v23274_v53 = vpack.c.bf16 %v8816_v0, %v8817_v46  ;;  %v8812_v43 = vsel %vm26067_vm4, %v23279_v34, %v22708_v6  ;;  %v23328_v0 = vld [vmem:[%s23863_s1 + $0x11c0] sm:$0xff]   ;;  %v16978_v46 = vld [vmem:[%s23863_s1 + $0x1088] sm:$0xff]  }
 0x67a   : > { %15562 = vmatprep.subr.bf16.mxu0 %v16973_v37 }
 0x67c   : > { %15531 = vmatmul.mubr.msk.bf16.gmra.mrb[4].mxu0 %vm26047_vm3, %v23107_v45  ;;  %vm26098_vm3 = vmmov %vm26067_vm4 }
 0x67d   : > { %15534 = vmatprep.mubr.msk.bf16.mxu0 %vm26055_vm14, %v23111_v38  ;;  %15563 = vmatpush3.bf16.msra.mxu0 %v16973_v37  ;;  %v8815_v23 = vsel %vm26098_vm3, %v8807_v3, %v8808_v58  ;;  %vm26103_vm3 = vnez %v26102_v41  ;;  %v23300_v37 = vsel %vm26104_vm6, %v8809_v35, %v23279_v34  ;;  %v16983_v58 = vld [vmem:[%s23863_s1 + $0x11b8] sm:$0xff]   ;;  %v26106_v35 = vld [vmem:[#allocation143_spill] sm:$0xff] }
 0x67e   : > { %15564 = vmatprep.subr.bf16.mxu0 %v16975_v47  ;;  %v23276_v12 = vpack.c.bf16 %v8814_v31, %v8815_v23  ;;  %26105 = vst [vmem:[#allocation130_spill] sm:$0xff] %v23300_v37  ;;  %v13222_v3 = vpack.c.bf16 %v8812_v43, %v23300_v37  ;;  %vm26107_vm4 = vnez %v26106_v35  ;;  %v16980_v31 = vld [vmem:[%s23863_s1 + $0x1090] sm:$0xff]   ;;  %v16982_v23 = vld [vmem:[%s23863_s1 + $0x1098] sm:$0xff]  }
 0x67f   : > { %15311 = vmatmul.mubr.msk.bf16.gmra.mrb[24].mxu1 %vm26101_vm13, %v23274_v53  ;;  %v26116_v43 = vld [vmem:[#allocation97_spill] sm:$0xff]  ;;  %v23477_v41 = vld [vmem:[#allocation2 + $0x78] sm:$0xff] }
 0x680   : > { %26099 = vst [vmem:[#allocation123_spill] sm:$0xff] %v23276_v12  ;;  %15314 = vmatprep.mubr.msk.bf16.mxu1 %vm26103_vm3, %v23276_v12  ;;  %v26144_v35 = vld [vmem:[#allocation105_spill] sm:$0xff] }
 0x681   : > { %15565 = vmatpush3.bf16.msra.mxu0 %v16975_v47  ;;  %v26108_v47 = vpack.c.bf16 %v22855_v4, %v22622_v48  ;;  %v26109_v48 = vld [vmem:[#allocation84_spill] sm:$0xff]  ;;  %v26110_v4 = vld [vmem:[#allocation47_spill] sm:$0xff] }
 0x682   : > { %15566 = vmatprep.subr.bf16.mxu0 %v16977_v27  ;;  %vm26111_vm6 = vnez %v26110_v4 }
 0x684   : > { %15535 = vmatmul.mubr.msk.bf16.gmra.mrb[8].mxu0 %vm26062_vm2, %v23157_v1 }
 0x685   : > { %15538 = vmatprep.mubr.msk.bf16.mxu0 %vm26066_vm9, %v23159_v63  ;;  %15567 = vmatpush3.bf16.msra.mxu0 %v16977_v27  ;;  %v26113_v27 = vld [vmem:[#allocation96_spill] sm:$0xff] }
 0x686   : > { %15568 = vmatprep.subr.bf16.mxu0 %v16979_v20 }
 0x687   : > { %15315 = vmatmul.mubr.msk.bf16.gmra.mrb[28].mxu1 %vm26107_vm4, %v13222_v3 }
 0x688   : > { %15334 = vmatprep.mubr.msk.bf16.mxu1 %vm25967_vm12, %v26108_v47 }
 0x689   : > { %15569 = vmatpush3.bf16.msra.mxu0 %v16979_v20  ;;  %v26114_v20 = vld [vmem:[#allocation52_spill] sm:$0xff] }
 0x68a   : > { %15570 = vmatprep.subr.bf16.mxu0 %v16981_v59 }
 0x68c   : > { %15539 = vmatmul.mubr.msk.bf16.gmra.mrb[12].mxu0 %vm26075_vm15, %v23202_v21 }
 0x68d   : > { %15542 = vmatprep.mubr.msk.bf16.mxu0 %vm26079_vm10, %v23206_v52  ;;  %15571 = vmatpush3.bf16.msra.mxu0 %v16981_v59  ;;  %v26117_v59 = vld [vmem:[#allocation54_spill] sm:$0xff] }
 0x68e   : > { %15572 = vmatprep.subr.bf16.mxu0 %v16983_v58 }
 0x68f   : > { %15335 = vmatmul.mubr.msk.bf16.vlgmr.msra.gmra.mrb[0].mxu1 %vm25974_vm11, %v22762_v56  ;;  %v23351_v56 = vrot.slane %v22754_v15, 7  ;;  %vm26119_vm11 = vcmp.lt.s32.totalorder %v25956_v22, 1 }
 0x690   : > { %15367 = vmatpush3.bf16.msra.mxu1 %v23193_v25  ;;  %15338 = vmatprep.mubr.msk.bf16.mxu1 %vm26111_vm6, %v26109_v48  ;;  %v23354_v25 = vrot.slane %v22765_v62, 7  ;;  %vm26115_vm6 = vnez %v26114_v20  ;;  %v16984_v48 = vld [vmem:[%s23863_s1 + $0x10a0] sm:$0xff]  }
 0x691   : > { %15573 = vmatpush3.bf16.msra.mxu0 %v16983_v58  ;;  %15368 = vmatprep.subr.bf16.mxu1 %v16978_v46  ;;  %26112 = vst [vmem:[#allocation128_spill] sm:$0xff] %v23351_v56 }
 0x692   : > { %15606 = vmatprep.subr.bf16.mxu0 %v23328_v0  ;;  %v23375_v58 = vsel %vm26119_vm11, %v23351_v56, %v23354_v25 }
 0x693   : > { %26120 = vst [vmem:[#allocation132_spill] sm:$0xff] %v23375_v58 }
 0x694   : > { %15543 = vmatmul.mubr.msk.bf16.gmra.mrb[16].mxu0 %vm26086_vm0, %v23240_v44  ;;  %15369 = vmatpush3.bf16.msra.mxu1 %v16978_v46  ;;  %v23381_v46 = vld [vmem:[#allocation2 + $0x110] sm:$0xff] }
 0x695   : > { %15546 = vmatprep.mubr.msk.bf16.mxu0 %vm26088_vm8, %v23242_v32  ;;  %15370 = vmatprep.subr.bf16.mxu1 %v16980_v31  ;;  %vm26118_vm8 = vnez %v26117_v59 }
 0x697   : > { %15339 = vmatmul.mubr.msk.bf16.gmra.mrb[4].mxu1 %vm26115_vm6, %v26113_v27  ;;  %vm26121_vm6 = vmmov %vm26119_vm11  ;;  %v10838_v27 = vrot.slane %v23381_v46, 7  ;;  %vm26124_vm11 = vnez %v26123_v42  ;;  %v16994_v42 = vld [vmem:[%s23863_s1 + $0x11f0] sm:$0xff]  }
 0x698   : > { %15342 = vmatprep.mubr.msk.bf16.mxu1 %vm26118_vm8, %v26116_v43  ;;  %15371 = vmatpush3.bf16.msra.mxu1 %v16980_v31  ;;  %v10843_v47 = vsel %vm26121_vm6, %v22708_v6, %v23351_v56  ;;  %v16986_v43 = vld [vmem:[%s23863_s1 + $0x10a8] sm:$0xff]   ;;  %v26125_v6 = vld [vmem:[#allocation31_spill] sm:$0xff]  ;;  %vm26127_vm6 = vnez %v26126_v10  ;;  %vm26129_vm8 = vcmp.lt.s32.totalorder %v25956_v22, 1  ;;  %v23475_v56 = vld [vmem:[#allocation2 + $0x70] sm:$0xff] }
 0x699   : > { %15372 = vmatprep.subr.bf16.mxu1 %v16982_v23  ;;  %v13531_v31 = vpack.c.bf16 %v23375_v58, %v10843_v47 }
 0x69c   : > { %15547 = vmatmul.mubr.msk.bf16.gmra.mrb[20].mxu0 %vm26093_vm5, %v23274_v53  ;;  %15373 = vmatpush3.bf16.msra.mxu1 %v16982_v23  ;;  %v26128_v23 = vrot.slane %v23113_v24, 7 }
 0x69d   : > { %15550 = vmatprep.mubr.msk.bf16.mxu0 %vm26095_vm1, %v23276_v12  ;;  %15374 = vmatprep.subr.bf16.mxu1 %v16984_v48  ;;  %vm26130_vm1 = vmmov %vm26129_vm8  ;;  %v26152_v12 = vld [vmem:[#allocation48_spill] sm:$0xff] }
 0x69e   : > { %v10840_v47 = vsel %vm26129_vm8, %v10838_v27, %v26128_v23  ;;  %v10841_v58 = vsel %vm26130_vm1, %v23354_v25, %v10838_v27  ;;  %v26131_v23 = vld [vmem:[#allocation77_spill] sm:$0xff]  ;;  %vm26132_vm8 = vnez %v26016_v36  ;;  %v26134_v27 = vld [vmem:[#allocation75_spill] sm:$0xff]  ;;  %v23453_v36 = vld [vmem:[#allocation2 + $0x58] sm:$0xff] }
 0x69f   : > { %15343 = vmatmul.mubr.msk.bf16.gmra.mrb[8].mxu1 %vm26124_vm11, %v26122_v9  ;;  %v16988_v9 = vld [vmem:[%s23863_s1 + $0x10b0] sm:$0xff]   ;;  %vm26135_vm1 = vnez %v26134_v27  ;;  %v26139_v27 = vld [vmem:[#allocation86_spill] sm:$0xff] }
 0x6a0   : > { %15346 = vmatprep.mubr.msk.bf16.mxu1 %vm26127_vm6, %v26125_v6  ;;  %15375 = vmatpush3.bf16.msra.mxu1 %v16984_v48  ;;  %v16997_v6 = vld [vmem:[#allocation2 + $0x28] sm:$0xff]  ;;  %v26133_v48 = vld [vmem:[#allocation55_spill] sm:$0xff] }
 0x6a1   : > { %15376 = vmatprep.subr.bf16.mxu1 %v16986_v43  ;;  %v11178_v10 = vpack.c.bf16 %v16997_v6, %v23181_v39  ;;  %v17000_v6 = vld [vmem:[#allocation2 + $0x40] sm:$0xff]  ;;  %v23429_v39 = vld [vmem:[#allocation2 + $0x48] sm:$0xff] }
 0x6a4   : > { %15551 = vmatmul.mubr.msk.bf16.gmra.mrb[24].mxu0 %vm26101_vm13, %v13222_v3  ;;  %v13534_v3 = vpack.c.bf16 %v10840_v47, %v10841_v58  ;;  %15377 = vmatpush3.bf16.msra.mxu1 %v16986_v43  ;;  %v23423_v58 = vld [vmem:[#allocation2 + $0x30] sm:$0xff]  ;;  %v23425_v43 = vld [vmem:[#allocation2 + $0x38] sm:$0xff] }
 0x6a5   : > { %15554 = vmatprep.mubr.msk.bf16.mxu0 %vm26103_vm3, %v13531_v31  ;;  %15378 = vmatprep.subr.bf16.mxu1 %v16988_v9  ;;  %v16990_v31 = vld [vmem:[%s23863_s1 + $0x10b8] sm:$0xff]   ;;  %v11179_v47 = vpack.c.bf16 %v23425_v43, %v23423_v58 }
 0x6a7   : > { %15347 = vmatmul.mubr.msk.bf16.gmra.mrb[12].mxu1 %vm26132_vm8, %v26131_v23  ;;  %v11180_v23 = vpack.c.bf16 %v23429_v39, %v17000_v6  ;;  %vm26140_vm8 = vnez %v26139_v27  ;;  %v23451_v6 = vld [vmem:[#allocation2 + $0x50] sm:$0xff]  ;;  %v23459_v27 = vld [vmem:[#allocation2 + $0x68] sm:$0xff] }
 0x6a8   : > { %15350 = vmatprep.mubr.msk.bf16.mxu1 %vm26135_vm1, %v26133_v48  ;;  %15379 = vmatpush3.bf16.msra.mxu1 %v16988_v9  ;;  %v26136_v9 = vld [vmem:[#allocation141_spill] sm:$0xff]  ;;  %vm26137_vm1 = vnez %v26034_v7  ;;  %v26138_v48 = vld [vmem:[#allocation100_spill] sm:$0xff]  ;;  %v11458_v51 = vrot.slane %v23451_v6, 1 }
 0x6a9   : > { %15380 = vmatprep.subr.bf16.mxu1 %v16990_v31  ;;  %v26143_v7 = vld [vmem:[#allocation124_spill] sm:$0xff] }
 0x6ac   : > { %15555 = vmatmul.mubr.msk.bf16.gmra.mrb[28].mxu0 %vm26107_vm4, %v13534_v3  ;;  %15381 = vmatpush3.bf16.msra.mxu1 %v16990_v31  ;;  %v16987_v3 = vld [vmem:[%s23863_s1 + $0x11c8] sm:$0xff]   ;;  %v16989_v31 = vld [vmem:[%s23863_s1 + $0x11d0] sm:$0xff]  }
 0x6ad   : > { %15574 = vmatprep.mubr.bf16.mxu0 %v11178_v10  ;;  %v23438_v10 = vld [vmem:[%s23863_s1 + $0x10c0] sm:$0xff]  }
 0x6ae   : > { %16182 = vmatprep.subr.bf16.mxu1 %v23438_v10 }
 0x6af   : > { %15351 = vmatmul.mubr.msk.bf16.gmra.mrb[16].mxu1 %vm26137_vm1, %v26136_v9  ;;  %v11181_v9 = vpack.c.bf16 %v23453_v36, %v23451_v6  ;;  %vm26145_vm1 = vnez %v26144_v35  ;;  %v26148_v35 = vld [vmem:[#allocation51_spill] sm:$0xff] }
 0x6b0   : > { %15354 = vmatprep.mubr.msk.bf16.mxu1 %vm26140_vm8, %v26138_v48  ;;  %v26141_v48 = vld [vmem:[#allocation67_spill] sm:$0xff]  ;;  %vm26142_vm8 = vnez %v26052_v40  ;;  %v11183_v40 = vpack.c.bf16 %v23477_v41, %v23475_v56 }
 0x6b4   : > { %15575 = vmatmul.mubr.bf16.vlgmr.msra.gmra.mrb[0].mxu0 %v11179_v47  ;;  %v23457_v47 = vld [vmem:[#allocation2 + $0x60] sm:$0xff] }
 0x6b5   : > { %15607 = vmatpush3.bf16.msra.mxu0 %v23328_v0  ;;  %15578 = vmatprep.mubr.bf16.mxu0 %v11180_v23  ;;  %v11182_v0 = vpack.c.bf16 %v23459_v27, %v23457_v47  ;;  %v16991_v23 = vld [vmem:[%s23863_s1 + $0x11d8] sm:$0xff]   ;;  %v11460_v60 = vrot.slane %v23457_v47, 1 }
 0x6b6   : > { %15608 = vmatprep.subr.bf16.mxu0 %v16987_v3 }
 0x6b7   : > { %15355 = vmatmul.mubr.msk.bf16.gmra.mrb[20].mxu1 %vm26142_vm8, %v26141_v48  ;;  %v23481_v48 = vld [vmem:[#allocation2 + $0x80] sm:$0xff]  ;;  %vm26149_vm8 = vcmp.lt.s32.totalorder %v25956_v22, 1 }
 0x6b8   : > { %15358 = vmatprep.mubr.msk.bf16.mxu1 %vm26145_vm1, %v26143_v7  ;;  %vm26147_vm1 = vnez %v26063_v57  ;;  %v23514_v57 = vld [vmem:[#allocation2 + $0xa8] sm:$0xff] }
 0x6b9   : > { %15609 = vmatpush3.bf16.msra.mxu0 %v16987_v3  ;;  %v16992_v3 = vld [vmem:[%s23863_s1 + $0x11e0] sm:$0xff]  }
 0x6ba   : > { %15610 = vmatprep.subr.bf16.mxu0 %v16989_v31 }
 0x6bc   : > { %15579 = vmatmul.mubr.bf16.gmra.mrb[4].mxu0 %v11181_v9  ;;  %v23483_v9 = vld [vmem:[#allocation2 + $0x88] sm:$0xff] }
 0x6bd   : > { %15582 = vmatprep.mubr.bf16.mxu0 %v11182_v0  ;;  %15611 = vmatpush3.bf16.msra.mxu0 %v16989_v31  ;;  %v11184_v7 = vpack.c.bf16 %v23483_v9, %v23481_v48  ;;  %v16993_v31 = vld [vmem:[%s23863_s1 + $0x11e8] sm:$0xff]   ;;  %v26146_v0 = vld [vmem:[#allocation122_spill] sm:$0xff]  ;;  %v11465_v47 = vrot.slane %v23483_v9, 1 }
 0x6be   : > { %15612 = vmatprep.subr.bf16.mxu0 %v16991_v23 }
 0x6bf   : > { %15359 = vmatmul.mubr.msk.bf16.gmra.mrb[24].mxu1 %vm26147_vm1, %v26146_v0  ;;  %v23505_v0 = vld [vmem:[#allocation2 + $0x98] sm:$0xff]  ;;  %vm26158_vm1 = vcmp.lt.s32.totalorder %v25956_v22, 1 }
 0x6c0   : > { %15362 = vmatprep.mubr.msk.bf16.mxu1 %vm26070_vm7, %v23109_v16  ;;  %26150 = vst [vmem:[#allocation133_spill] sm:$0xff] %v23505_v0  ;;  %v26151_v16 = vld [vmem:[#allocation58_spill] sm:$0xff]  ;;  %vm26156_vm7 = vnez %v26019_v54  ;;  %vm26160_vm4 = vmmov %vm26158_vm1 }
 0x6c1   : > { %15613 = vmatpush3.bf16.msra.mxu0 %v16991_v23  ;;  %v9825_v23 = vsel %vm26149_vm8, %v23354_v25, %v26148_v35  ;;  %v11186_v35 = vpack.c.bf16 %v23514_v57, %v23512_v61  ;;  %v9766_v25 = vrot.slane %v23423_v58, 7  ;;  %vm26155_vm8 = vnez %v26076_v50 }
 0x6c2   : > { %15614 = vmatprep.subr.bf16.mxu0 %v16992_v3 }
 0x6c4   : > { %15583 = vmatmul.mubr.bf16.gmra.mrb[8].mxu0 %v11183_v40  ;;  %v23509_v40 = vpack.c.bf16 %v23505_v0, %v23503_v8  ;;  %v26153_v0 = vld [vmem:[#allocation82_spill] sm:$0xff] }
 0x6c5   : > { %15586 = vmatprep.mubr.bf16.mxu0 %v11184_v7  ;;  %15615 = vmatpush3.bf16.msra.mxu0 %v16992_v3  ;;  %v13321_v7 = vpack.c.bf16 %v26151_v16, %v9825_v23  ;;  %v16995_v3 = vld [vmem:[%s23863_s1 + $0x11f8] sm:$0xff]   ;;  %v26154_v37 = vpack.c.bf16 %v26152_v12, %v26153_v0  ;;  %v26159_v23 = vld [vmem:[#allocation116_spill] sm:$0xff]  ;;  %v23536_v12 = vld [vmem:[#allocation2 + $0xb0] sm:$0xff] }
 0x6c6   : > { %15616 = vmatprep.subr.bf16.mxu0 %v16993_v31  ;;  %v9821_v16 = vsel %vm26160_vm4, %v26159_v23, %v9766_v25  ;;  %v23538_v0 = vld [vmem:[#allocation2 + $0xb8] sm:$0xff]  ;;  %vm26163_vm4 = vnez %v26036_v14  ;;  %v23573_v14 = vld [vmem:[#allocation2 + $0xe8] sm:$0xff] }
 0x6c7   : > { %15363 = vmatmul.mubr.msk.bf16.gmra.mrb[28].mxu1 %vm26155_vm8, %v26154_v37  ;;  %v23542_v37 = vpack.c.bf16 %v23538_v0, %v23536_v12  ;;  %v26188_v9 = vld [vmem:[#allocation133_spill] sm:$0xff] }
 0x6c8   : > { %15382 = vmatprep.mubr.msk.bf16.mxu1 %vm26156_vm7, %v13321_v7  ;;  %v23544_v7 = vld [vmem:[#allocation2 + $0xc0] sm:$0xff]  ;;  %vm26162_vm7 = vnez %v26031_v13 }
 0x6c9   : > { %15617 = vmatpush3.bf16.msra.mxu0 %v16993_v31  ;;  %v26157_v31 = vld [vmem:[#allocation63_spill] sm:$0xff] }
 0x6ca   : > { %15618 = vmatprep.subr.bf16.mxu0 %v16994_v42  ;;  %v9820_v58 = vsel %vm26158_vm1, %v9766_v25, %v26157_v31  ;;  %v26161_v25 = vld [vmem:[#allocation44_spill] sm:$0xff]  ;;  %vm26164_vm1 = vnez %v26046_v28  ;;  %v23603_v28 = vpack.c.bf16 %v22765_v62, %v22754_v15  ;;  %v11193_v62 = vpack.c.bf16 %v23113_v24, %v23381_v46 }
 0x6cb   : > { %v13327_v54 = vpack.c.bf16 %v9820_v58, %v9821_v16  ;;  %v17019_v31 = vld [vmem:[%s23863_s1 + $0x10c8] sm:$0xff]   ;;  %v23563_v58 = vld [vmem:[#allocation2 + $0xd0] sm:$0xff] }
 0x6cc   : > { %15587 = vmatmul.mubr.bf16.gmra.mrb[12].mxu0 %v23509_v40  ;;  %v17024_v16 = vld [vmem:[%s23863_s1 + $0x10d0] sm:$0xff]   ;;  %v17029_v15 = vld [vmem:[%s23863_s1 + $0x10e8] sm:$0xff]  }
 0x6cd   : > { %15590 = vmatprep.mubr.bf16.mxu0 %v11186_v35  ;;  %15619 = vmatpush3.bf16.msra.mxu0 %v16994_v42  ;;  %v23546_v42 = vld [vmem:[#allocation2 + $0xc8] sm:$0xff] }
 0x6ce   : > { %15620 = vmatprep.subr.bf16.mxu0 %v16995_v3  ;;  %v23550_v35 = vpack.c.bf16 %v23546_v42, %v23544_v7 }
 0x6cf   : > { %15383 = vmatmul.mubr.msk.bf16.vlgmr.msra.gmra.mrb[0].mxu1 %vm26162_vm7, %v26161_v25  ;;  %v23593_v25 = vld [vmem:[#allocation2 + $0xf0] sm:$0xff]  ;;  %vm26174_vm7 = vnez %v26110_v4 }
 0x6d0   : > { %16190 = vmatpush3.bf16.msra.mxu1 %v23438_v10  ;;  %15386 = vmatprep.mubr.msk.bf16.mxu1 %vm26163_vm4, %v13327_v54  ;;  %v23571_v10 = vld [vmem:[#allocation2 + $0xe0] sm:$0xff]  ;;  %v17025_v54 = vld [vmem:[%s23863_s1 + $0x10d8] sm:$0xff]  }
 0x6d1   : > { %15621 = vmatpush3.bf16.msra.mxu0 %v16995_v3  ;;  %16183 = vmatprep.subr.bf16.mxu1 %v17019_v31  ;;  %v23565_v3 = vld [vmem:[#allocation2 + $0xd8] sm:$0xff]  ;;  %v23577_v23 = vpack.c.bf16 %v23573_v14, %v23571_v10 }
 0x6d2   : > { %v23569_v13 = vpack.c.bf16 %v23565_v3, %v23563_v58 }
 0x6d4   : > { %15591 = vmatmul.mubr.bf16.gmra.mrb[16].mxu0 %v23542_v37  ;;  %16191 = vmatpush3.bf16.msra.mxu1 %v17019_v31  ;;  %v23595_v31 = vld [vmem:[#allocation2 + $0xf8] sm:$0xff] }
 0x6d5   : > { %15594 = vmatprep.mubr.bf16.mxu0 %v23550_v35  ;;  %16184 = vmatprep.subr.bf16.mxu1 %v17024_v16  ;;  %v9791_v4 = vrot.slane %v23595_v31, 7 }
 0x6d7   : > { %15387 = vmatmul.mubr.msk.bf16.gmra.mrb[4].mxu1 %vm26164_vm1, %v23063_v29  ;;  %v23599_v29 = vpack.c.bf16 %v23595_v31, %v23593_v25 }
 0x6d8   : > { %15390 = vmatprep.mubr.msk.bf16.mxu1 %vm26055_vm14, %v23107_v45  ;;  %16192 = vmatpush3.bf16.msra.mxu1 %v17024_v16  ;;  %v11455_v45 = vrot.slane %v23425_v43, 1  ;;  %vm26166_vm14 = vcmp.lt.s32.totalorder %v25956_v22, 7  ;;  %v26167_v43 = vld [vmem:[#allocation73_spill] sm:$0xff]  ;;  %v26169_v16 = vpack.c.bf16 %v22783_v11, %v23200_v18  ;;  %v11459_v11 = vrot.slane %v23453_v36, 1 }
 0x6d9   : > { %16185 = vmatprep.subr.bf16.mxu1 %v17025_v54  ;;  %v11461_v18 = vrot.slane %v23459_v27, 1 }
 0x6dc   : > { %15595 = vmatmul.mubr.bf16.gmra.mrb[20].mxu0 %v23569_v13  ;;  %16193 = vmatpush3.bf16.msra.mxu1 %v17025_v54 }
 0x6dd   : > { %15598 = vmatprep.mubr.bf16.mxu0 %v23577_v23  ;;  %16186 = vmatprep.subr.bf16.mxu1 %v17028_v30 }
 0x6df   : > { %15391 = vmatmul.mubr.msk.bf16.gmra.mrb[8].mxu1 %vm26062_vm2, %v23111_v38  ;;  %v11457_v38 = vrot.slane %v23429_v39, 1  ;;  %vm26168_vm2 = vmmov %vm26166_vm14 }
 0x6e0   : > { %15394 = vmatprep.mubr.msk.bf16.mxu1 %vm26066_vm9, %v23157_v1  ;;  %16194 = vmatpush3.bf16.msra.mxu1 %v17028_v30  ;;  %v26165_v1 = vld [vmem:[#allocation74_spill] sm:$0xff]  ;;  %v11512_v6 = vsel %vm26168_vm2, %v26167_v43, %v11455_v45  ;;  %vm26170_vm9 = vmmov %vm26168_vm2  ;;  %v11462_v30 = vrot.slane %v23475_v56, 1  ;;  %v26193_v43 = vld [vmem:[#allocation128_spill] sm:$0xff] }
 0x6e1   : > { %16187 = vmatprep.subr.bf16.mxu1 %v17029_v15  ;;  %v11511_v39 = vsel %vm26166_vm14, %v11455_v45, %v26165_v1  ;;  %vm26175_vm4 = vmmov %vm26168_vm2  ;;  %v11468_v45 = vrot.slane %v23512_v61, 1 }
 0x6e2   : > { %v11507_v36 = vsel %vm26175_vm4, %v11459_v11, %v11460_v60  ;;  %vm26176_vm1 = vmmov %vm26168_vm2 }
 0x6e3   : > { %v11508_v56 = vsel %vm26176_vm1, %v11458_v51, %v11459_v11  ;;  %vm26177_vm14 = vmmov %vm26176_vm1  ;;  %v11471_v11 = vrot.slane %v23538_v0, 1 }
 0x6e4   : > { %15599 = vmatmul.mubr.bf16.gmra.mrb[24].mxu0 %v23599_v29  ;;  %16195 = vmatpush3.bf16.msra.mxu1 %v17029_v15  ;;  %v11505_v2 = vsel %vm26177_vm14, %v11461_v18, %v11462_v30  ;;  %v11466_v15 = vrot.slane %v23503_v8, 1 }
 0x6e5   : > { %15602 = vmatprep.mubr.bf16.mxu0 %v23603_v28  ;;  %16188 = vmatprep.subr.bf16.mxu1 %v17030_v33 }
 0x6e7   : > { %15395 = vmatmul.mubr.msk.bf16.gmra.mrb[12].mxu1 %vm26075_vm15, %v23159_v63  ;;  %v11509_v63 = vsel %vm26170_vm9, %v11457_v38, %v11458_v51  ;;  %vm26171_vm15 = vmmov %vm26168_vm2  ;;  %vm26179_vm2 = vnez %v26114_v20  ;;  %vm26180_vm9 = vnez %v26094_v5  ;;  %v26187_v20 = vld [vmem:[#allocation130_spill] sm:$0xff]  ;;  %v11470_v51 = vrot.slane %v23536_v12, 1 }
 0x6e8   : > { %15398 = vmatprep.mubr.msk.bf16.mxu1 %vm26079_vm10, %v23202_v21  ;;  %16196 = vmatpush3.bf16.msra.mxu1 %v17030_v33  ;;  %v11510_v49 = vsel %vm26171_vm15, %v26165_v1, %v11457_v38  ;;  %v13588_v21 = vpack.c.bf16 %v11511_v39, %v11512_v6  ;;  %vm26173_vm10 = vnez %v26087_v17  ;;  %v11463_v17 = vrot.slane %v23477_v41, 1  ;;  %v26189_v33 = vld [vmem:[#allocation123_spill] sm:$0xff] }
 0x6e9   : > { %16189 = vmatprep.subr.bf16.mxu1 %v17031_v26  ;;  %v13591_v54 = vpack.c.bf16 %v11509_v63, %v11510_v49  ;;  %vm26181_vm15 = vnez %v26117_v59  ;;  %v11469_v38 = vrot.slane %v23514_v57, 1  ;;  %v26199_v49 = vld [vmem:[#allocation132_spill] sm:$0xff] }
 0x6ec   : > { %15603 = vmatmul.mubr.bf16.gmra.mrb[28].mxu0 %v11193_v62  ;;  %16197 = vmatpush3.bf16.msra.mxu1 %v17031_v26  ;;  %v11467_v62 = vrot.slane %v26188_v9, 1 }
 0x6ed   : > { %15622 = vmatprep.mubr.msk.bf16.mxu0 %vm25967_vm12, %v26169_v16  ;;  %vm26172_vm12 = vnez %v25973_v19 }
 0x6ef   : > { %15399 = vmatmul.mubr.msk.bf16.gmra.mrb[16].mxu1 %vm26086_vm0, %v23206_v52  ;;  %vm26178_vm0 = vmmov %vm26176_vm1  ;;  %v13594_v52 = vpack.c.bf16 %v11507_v36, %v11508_v56  ;;  %v26200_v36 = vld [vmem:[#allocation143_spill] sm:$0xff]  ;;  %v26202_v56 = vld [vmem:[#allocation72_spill] sm:$0xff] }
 0x6f0   : > { %15402 = vmatprep.mubr.msk.bf16.mxu1 %vm26173_vm10, %v23240_v44  ;;  %v11506_v19 = vsel %vm26178_vm0, %v11460_v60, %v11461_v18  ;;  %v11464_v44 = vrot.slane %v23481_v48, 1  ;;  %vm26183_vm10 = vmmov %vm26178_vm0  ;;  %v11500_v61 = vsel %vm26178_vm0, %v11466_v15, %v11467_v62  ;;  %v11472_v60 = vrot.slane %v23544_v7, 1 }
 0x6f1   : > { %v13597_v27 = vpack.c.bf16 %v11505_v2, %v11506_v19  ;;  %v11504_v8 = vsel %vm26183_vm10, %v11462_v30, %v11463_v17  ;;  %vm26186_vm4 = vmmov %vm26178_vm0  ;;  %v11473_v18 = vrot.slane %v23546_v42, 1  ;;  %v11474_v30 = vrot.slane %v23563_v58, 1  ;;  %v26204_v2 = vld [vmem:[#allocation75_spill] sm:$0xff] }
 0x6f2   : > { %v11502_v5 = vsel %vm26186_vm4, %v11464_v44, %v11465_v47  ;;  %vm26196_vm14 = vmmov %vm26178_vm0 }
 0x6f3   : > { %v11499_v57 = vsel %vm26196_vm14, %v11467_v62, %v11468_v45  ;;  %vm26209_vm10 = vmmov %vm26178_vm0 }
 0x6f4   : > { %15623 = vmatmul.mubr.msk.bf16.vlgmr.msra.gmra.mrb[0].mxu0 %vm26172_vm12, %v13588_v21  ;;  %vm26182_vm12 = vmmov %vm26178_vm0  ;;  %v13606_v21 = vpack.c.bf16 %v11499_v57, %v11500_v61  ;;  %v11494_v58 = vsel %vm26209_vm10, %v11472_v60, %v11473_v18 }
 0x6f5   : > { %15626 = vmatprep.mubr.msk.bf16.mxu0 %vm26174_vm7, %v13591_v54  ;;  %v11503_v41 = vsel %vm26182_vm12, %v11463_v17, %v11464_v44  ;;  %vm26184_vm7 = vcmp.lt.s32.totalorder %v25956_v22, 1  ;;  %vm26208_vm12 = vmmov %vm26178_vm0  ;;  %v11477_v17 = vrot.slane %v23573_v14, 1  ;;  %v11478_v44 = vrot.slane %v23593_v25, 1 }
 0x6f6   : > { %vm26194_vm1 = vmmov %vm26184_vm7  ;;  %v11493_v42 = vsel %vm26208_vm12, %v11473_v18, %v11474_v30 }
 0x6f7   : > { %15403 = vmatmul.mubr.msk.bf16.gmra.mrb[20].mxu1 %vm26093_vm5, %v23242_v32  ;;  %v9796_v32 = vsel %vm26184_vm7, %v23279_v34, %v9791_v4  ;;  %vm26185_vm5 = vmmov %vm26178_vm0  ;;  %v9795_v6 = vsel %vm26194_vm1, %v9791_v4, %v26193_v43  ;;  %v26210_v4 = vld [vmem:[#allocation87_spill] sm:$0xff]  ;;  %v26231_v34 = vld [vmem:[#allocation126_spill] sm:$0xff] }
 0x6f8   : > { %15406 = vmatprep.mubr.msk.bf16.mxu1 %vm26180_vm9, %v23274_v53  ;;  %v11501_v55 = vsel %vm26185_vm5, %v11465_v47, %v11466_v15  ;;  %v13600_v53 = vpack.c.bf16 %v11503_v41, %v11504_v8  ;;  %v13363_v59 = vpack.c.bf16 %v9796_v32, %v26187_v20  ;;  %v13366_v26 = vpack.c.bf16 %v26199_v49, %v9795_v6  ;;  %vm26206_vm9 = vmmov %vm26178_vm0  ;;  %v26211_v47 = vld [vmem:[#allocation83_spill] sm:$0xff]  ;;  %v26213_v15 = vld [vmem:[#allocation86_spill] sm:$0xff] }
 0x6f9   : > { %v13603_v48 = vpack.c.bf16 %v11501_v55, %v11502_v5  ;;  %v11495_v0 = vsel %vm26206_vm9, %v11471_v11, %v11472_v60  ;;  %vm26212_vm7 = vnez %v26211_v47  ;;  %vm26214_vm5 = vnez %v26213_v15  ;;  %vm26215_vm4 = vmmov %vm26178_vm0  ;;  %v17033_v5 = vld [vmem:[#allocation2 + $0x108] sm:$0xff] }
 0x6fa   : > { %vm26216_vm1 = vmmov %vm26178_vm0  ;;  %v11479_v32 = vrot.slane %v23595_v31, 1  ;;  %v11482_v20 = vrot.slane %v23381_v46, 1  ;;  %v26232_v1 = vrot.slane %v26231_v34, 1  ;;  %v26244_v34 = vld [vmem:[#allocation14_spill] sm:$0xff] }
 0x6fb   : > { %vm26217_vm14 = vmmov %vm26178_vm0 }
 0x6fc   : > { %15627 = vmatmul.mubr.msk.bf16.gmra.mrb[4].mxu0 %vm26179_vm2, %v13594_v52  ;;  %vm26205_vm2 = vnez %v26204_v2  ;;  %v13615_v52 = vpack.c.bf16 %v11493_v42, %v11494_v58  ;;  %vm26225_vm9 = vmmov %vm26178_vm0  ;;  %v26235_v42 = vld [vmem:[#allocation3_spill] sm:$0xff] }
 0x6fd   : > { %15630 = vmatprep.mubr.msk.bf16.mxu0 %vm26181_vm15, %v13597_v27  ;;  %vm26207_vm15 = vmmov %vm26178_vm0  ;;  %v11475_v27 = vrot.slane %v23565_v3, 1 }
 0x6fe   : > { %v11496_v7 = vsel %vm26207_vm15, %v11470_v51, %v11471_v11  ;;  %vm26230_vm10 = vmmov %vm26178_vm0 }
 0x6ff   : > { %15407 = vmatmul.mubr.msk.bf16.gmra.mrb[24].mxu1 %vm26101_vm13, %v26189_v33  ;;  %vm26197_vm13 = vmmov %vm26178_vm0  ;;  %v13612_v19 = vpack.c.bf16 %v11495_v0, %v11496_v7  ;;  %v11492_v3 = vsel %vm26216_vm1, %v11474_v30, %v11475_v27 }
 0x700   : > { %15410 = vmatprep.mubr.msk.bf16.mxu1 %vm26103_vm3, %v13363_v59  ;;  %v11497_v12 = vsel %vm26197_vm13, %v11469_v38, %v11470_v51  ;;  %vm26201_vm3 = vnez %v26200_v36  ;;  %v26218_v59 = vld [vmem:[#allocation98_spill] sm:$0xff]  ;;  %v26228_v51 = vld [vmem:[#allocation112_spill] sm:$0xff] }
 0x701   : > { %vm26219_vm13 = vnez %v26218_v59  ;;  %vm26229_vm12 = vnez %v26228_v51 }
 0x704   : > { %15631 = vmatmul.mubr.msk.bf16.gmra.mrb[8].mxu0 %vm26124_vm11, %v13600_v53  ;;  %vm26198_vm11 = vmmov %vm26178_vm0  ;;  %v11481_v53 = vrot.slane %v17033_v5, 1 }
 0x705   : > { %15634 = vmatprep.mubr.msk.bf16.mxu0 %vm26127_vm6, %v13603_v48  ;;  %v11498_v63 = vsel %vm26198_vm11, %v11468_v45, %v11469_v38  ;;  %vm26203_vm6 = vnez %v26202_v56  ;;  %v26220_v48 = vld [vmem:[#allocation105_spill] sm:$0xff]  ;;  %v11483_v38 = vrot.slane %v23113_v24, 1 }
 0x706   : > { %v13609_v54 = vpack.c.bf16 %v11497_v12, %v11498_v63  ;;  %vm26221_vm11 = vnez %v26220_v48  ;;  %v26234_v56 = vld [vmem:[#allocation5_spill] sm:$0xff] }
 0x707   : > { %15411 = vmatmul.mubr.msk.bf16.gmra.mrb[28].mxu1 %vm26201_vm3, %v13366_v26  ;;  %vm26222_vm3 = vmmov %vm26178_vm0  ;;  %v11484_v33 = vsel %vm26230_vm10, %v11482_v20, %v11483_v38 }
 0x708   : > { %15446 = vmatprep.mubr.bf16.mxu1 %v23509_v40  ;;  %v11476_v40 = vrot.slane %v23571_v10, 1  ;;  %v11489_v10 = vsel %vm26217_vm14, %v11477_v17, %v11478_v44 }
 0x70a   : > { %v11491_v41 = vsel %vm26215_vm4, %v11475_v27, %v11476_v40  ;;  %v11490_v14 = vsel %vm26178_vm0, %v11476_v40, %v11477_v17  ;;  %v26237_v40 = vld [vmem:[#allocation4_spill] sm:$0xff] }
 0x70b   : > { %v13618_v25 = vpack.c.bf16 %v11491_v41, %v11492_v3  ;;  %v13621_v8 = vpack.c.bf16 %v11489_v10, %v11490_v14  ;;  %v26238_v3 = vld [vmem:[#allocation9_spill] sm:$0xff] }
 0x70c   : > { %15635 = vmatmul.mubr.msk.bf16.gmra.mrb[12].mxu0 %vm26203_vm6, %v13606_v21  ;;  %vm26223_vm6 = vmmov %vm26178_vm0 }
 0x70d   : > { %15638 = vmatprep.mubr.msk.bf16.mxu0 %vm26205_vm2, %v13609_v54  ;;  %v11488_v31 = vsel %vm26223_vm6, %v11478_v44, %v11479_v32  ;;  %vm26224_vm2 = vmmov %vm26178_vm0 }
 0x70e   : > { %v11485_v62 = vsel %vm26224_vm2, %v11481_v53, %v11482_v20 }
 0x70f   : > { %15447 = vmatmul.mubr.bf16.vlgmr.msra.gmra.mrb[16].mxu1 %v26210_v4 }
 0x710   : > { %15450 = vmatprep.mubr.bf16.mxu1 %v23542_v37  ;;  %v17032_v37 = vld [vmem:[#allocation2 + $0x100] sm:$0xff] }
 0x711   : > { %v11480_v55 = vrot.slane %v17032_v37, 1 }
 0x713   : > { %v11487_v9 = vsel %vm26222_vm3, %v11479_v32, %v11480_v55  ;;  %v11486_v46 = vsel %vm26225_vm9, %v11480_v55, %v11481_v53  ;;  %v26240_v55 = vld [vmem:[#allocation10_spill] sm:$0xff]  ;;  %v26241_v53 = vld [vmem:[#allocation8_spill] sm:$0xff] }
 0x714   : > { %15639 = vmatmul.mubr.msk.bf16.gmra.mrb[16].mxu0 %vm26212_vm7, %v13612_v19  ;;  %v13627_v45 = vpack.c.bf16 %v11485_v62, %v11486_v46  ;;  %vm26233_vm7 = vmmov %vm26178_vm0  ;;  %v26242_v46 = vld [vmem:[#allocation13_spill] sm:$0xff] }
 0x715   : > { %15642 = vmatprep.mubr.msk.bf16.mxu0 %vm26214_vm5, %v13615_v52  ;;  %v11515_v39 = vsel %vm26233_vm7, %v11483_v38, %v26232_v1  ;;  %v26236_v52 = vld [vmem:[#allocation6_spill] sm:$0xff] }
 0x716   : > { %v13630_v43 = vpack.c.bf16 %v11515_v39, %v11484_v33  ;;  %v26245_v39 = vld [vmem:[#allocation12_spill] sm:$0xff] }
 0x717   : > { %15451 = vmatmul.mubr.bf16.gmra.mrb[20].mxu1 %v23550_v35  ;;  %v13624_v35 = vpack.c.bf16 %v11487_v9, %v11488_v31 }
 0x718   : > { %15454 = vmatprep.mubr.bf16.mxu1 %v23569_v13  ;;  %v26226_v13 = vld [vmem:[#allocation110_spill] sm:$0xff] }
 0x719   : > { %vm26227_vm15 = vnez %v26226_v13  ;;  %v26243_v13 = vld [vmem:[#allocation11_spill] sm:$0xff] }
 0x71c   : > { %15643 = vmatmul.mubr.msk.bf16.gmra.mrb[20].mxu0 %vm26219_vm13, %v13618_v25 }
 0x71d   : > { %15646 = vmatprep.mubr.msk.bf16.mxu0 %vm26221_vm11, %v13621_v8  ;;  %v26239_v8 = vld [vmem:[#allocation7_spill] sm:$0xff] }
 0x71f   : > { %15455 = vmatmul.mubr.bf16.gmra.mrb[24].mxu1 %v23577_v23 }
 0x720   : > { %15458 = vmatprep.mubr.bf16.mxu1 %v23599_v29 }
 0x724   : > { %15647 = vmatmul.mubr.msk.bf16.gmra.mrb[24].mxu0 %vm26227_vm15, %v13624_v35 }
 0x725   : > { %15650 = vmatprep.mubr.msk.bf16.mxu0 %vm26229_vm12, %v13627_v45 }
 0x727   : > { %15459 = vmatmul.mubr.bf16.gmra.mrb[28].mxu1 %v23603_v28 }
 0x72c   : > { %15651 = vmatmul.mubr.msk.bf16.gmra.mrb[28].mxu0 %vm26155_vm8, %v13630_v43 }
 0x7a2   : > { %v15384_v24 = vpop.f32.mrb[0].mxu1 }
 0x7a3   : > { %v9973_v23 = vpop.f32.mrb[1].mxu1 }
 0x7a4   : > { %v15385_v29 = vpop.f32.mrb[2].mxu1 }
 0x7a5   : > { %v9976_v6 = vpop.f32.mrb[3].mxu1 }
 0x7aa   : > { %v15388_v16 = vpop.f32.mrb[4].mxu1 }
 0x7ab   : > { %v9989_v57 = vpop.f32.mrb[5].mxu1 }
 0x7ac   : > { %v15389_v61 = vpop.f32.mrb[6].mxu1 }
 0x7ad   : > { %v9992_v12 = vpop.f32.mrb[7].mxu1 }
 0x7b2   : > { %v15392_v63 = vpop.f32.mrb[8].mxu1 }
 0x7b3   : > { %v10005_v49 = vpop.f32.mrb[9].mxu1 }
 0x7b4   : > { %v15393_v26 = vpop.f32.mrb[10].mxu1 }
 0x7b5   : > { %v10008_v22 = vpop.f32.mrb[11].mxu1 }
 0x7ba   : > { %v15396_v21 = vpop.f32.mrb[12].mxu1 }
 0x7bb   : > { %v10021_v54 = vpop.f32.mrb[13].mxu1 }
 0x7bc   : > { %v15397_v28 = vpop.f32.mrb[14].mxu1 }
 0x7bd   : > { %v10024_v50 = vpop.f32.mrb[15].mxu1 }
 0x7c7   : > { %v15624_v11 = vpop.f32.mrb[0].mxu0 }
 0x7c8   : > { %v16198_v60 = vadd.f32 %v15624_v11, %v15384_v24  ;;  %v11663_v18 = vpop.f32.mrb[1].mxu0  ;;  %v26248_v11 = vld [vmem:[#allocation18_spill] sm:$0xff] }
 0x7c9   : > { %v16199_v30 = vadd.f32 %v11663_v18, %v9973_v23  ;;  %v15625_v36 = vpop.f32.mrb[2].mxu0  ;;  %v26249_v18 = vld [vmem:[#allocation16_spill] sm:$0xff] }
 0x7ca   : > { %v11824_v2 = vadd.f32 %v16198_v60, %v26234_v56  ;;  %v16200_v0 = vadd.f32 %v15625_v36, %v15385_v29  ;;  %v11666_v7 = vpop.f32.mrb[3].mxu0 }
 0x7cb   : > { %v11822_v58 = vadd.f32 %v16199_v30, %v26235_v42  ;;  %v16201_v19 = vadd.f32 %v11666_v7, %v9976_v6  ;;  %v26250_v42 = vld [vmem:[#allocation22_spill] sm:$0xff] }
 0x7cc   : > { %11856 = vst [vmem:[%s17403_s7 + $0x10] sm:$0xff] %v11824_v2  ;;  %v11825_v27 = vadd.f32 %v16200_v0, %v26236_v52 }
 0x7cd   : > { %11854 = vst [vmem:[%s17403_s7] sm:$0xff] %v11822_v58  ;;  %v11823_v17 = vadd.f32 %v16201_v19, %v26237_v40 }
 0x7ce   : > { %11857 = vst [vmem:[%s17403_s7 + $0x18] sm:$0xff] %v11825_v27  ;;  %v26251_v27 = vld [vmem:[#allocation20_spill] sm:$0xff] }
 0x7cf   : > { %11855 = vst [vmem:[%s17403_s7 + $0x8] sm:$0xff] %v11823_v17  ;;  %v15628_v44 = vpop.f32.mrb[4].mxu0 }
 0x7d0   : > { %v16202_v4 = vadd.f32 %v15628_v44, %v15388_v16  ;;  %v11679_v47 = vpop.f32.mrb[5].mxu0  ;;  %v26252_v44 = vld [vmem:[#allocation23_spill] sm:$0xff] }
 0x7d1   : > { %v16203_v15 = vadd.f32 %v11679_v47, %v9989_v57  ;;  %v15629_v41 = vpop.f32.mrb[6].mxu0  ;;  %v26246_v57 = vld [vmem:[#allocation17_spill] sm:$0xff] }
 0x7d2   : > { %v11828_v10 = vadd.f32 %v16202_v4, %v26238_v3  ;;  %v16204_v14 = vadd.f32 %v15629_v41, %v15389_v61  ;;  %v11682_v25 = vpop.f32.mrb[7].mxu0  ;;  %v26253_v47 = vld [vmem:[#allocation21_spill] sm:$0xff] }
 0x7d3   : > { %v11826_v32 = vadd.f32 %v16203_v15, %v26239_v8  ;;  %v16205_v37 = vadd.f32 %v11682_v25, %v9992_v12 }
 0x7d4   : > { %11860 = vst [vmem:[%s17403_s7 + $0x30] sm:$0xff] %v11828_v10  ;;  %v11829_v5 = vadd.f32 %v16204_v14, %v26240_v55 }
 0x7d5   : > { %11858 = vst [vmem:[%s17403_s7 + $0x20] sm:$0xff] %v11826_v32  ;;  %v11827_v20 = vadd.f32 %v16205_v37, %v26241_v53 }
 0x7d6   : > { %11861 = vst [vmem:[%s17403_s7 + $0x38] sm:$0xff] %v11829_v5  ;;  %v26254_v5 = vld [vmem:[#allocation27_spill] sm:$0xff] }
 0x7d7   : > { %11859 = vst [vmem:[%s17403_s7 + $0x28] sm:$0xff] %v11827_v20  ;;  %v15632_v59 = vpop.f32.mrb[8].mxu0 }
 0x7d8   : > { %v16206_v48 = vadd.f32 %v15632_v59, %v15392_v63  ;;  %v11695_v9 = vpop.f32.mrb[9].mxu0 }
 0x7d9   : > { %v16207_v31 = vadd.f32 %v11695_v9, %v10005_v49  ;;  %v15633_v62 = vpop.f32.mrb[10].mxu0  ;;  %v26247_v49 = vld [vmem:[#allocation15_spill] sm:$0xff] }
 0x7da   : > { %v11832_v35 = vadd.f32 %v16206_v48, %v26242_v46  ;;  %v16208_v45 = vadd.f32 %v15633_v62, %v15393_v26  ;;  %v11698_v38 = vpop.f32.mrb[11].mxu0  ;;  %v26255_v48 = vld [vmem:[#allocation24_spill] sm:$0xff] }
 0x7db   : > { %v11830_v51 = vadd.f32 %v16207_v31, %v26243_v13  ;;  %v16209_v33 = vadd.f32 %v11698_v38, %v10008_v22  ;;  %v26256_v62 = vld [vmem:[#allocation28_spill] sm:$0xff] }
 0x7dc   : > { %11864 = vst [vmem:[%s17403_s7 + $0x50] sm:$0xff] %v11832_v35  ;;  %v11833_v1 = vadd.f32 %v16208_v45, %v26244_v34  ;;  %v26257_v35 = vld [vmem:[#allocation25_spill] sm:$0xff] }
 0x7dd   : > { %11862 = vst [vmem:[%s17403_s7 + $0x40] sm:$0xff] %v11830_v51  ;;  %v11831_v43 = vadd.f32 %v16209_v33, %v26245_v39 }
 0x7de   : > { %11865 = vst [vmem:[%s17403_s7 + $0x58] sm:$0xff] %v11833_v1 }
 0x7df   : > { %11863 = vst [vmem:[%s17403_s7 + $0x48] sm:$0xff] %v11831_v43  ;;  %v15636_v24 = vpop.f32.mrb[12].mxu0 }
 0x7e0   : > { %v16210_v23 = vadd.f32 %v15636_v24, %v15396_v21  ;;  %v11711_v29 = vpop.f32.mrb[13].mxu0 }
 0x7e1   : > { %v16211_v6 = vadd.f32 %v11711_v29, %v10021_v54  ;;  %v15637_v16 = vpop.f32.mrb[14].mxu0 }
 0x7e2   : > { %v11836_v61 = vadd.f32 %v16210_v23, %v26246_v57  ;;  %v16212_v12 = vadd.f32 %v15637_v16, %v15397_v28  ;;  %v11714_v63 = vpop.f32.mrb[15].mxu0  ;;  %v15448_v36 = vpop.f32.mrb[16].mxu1  ;;  %v26258_v23 = vld [vmem:[#allocation34_spill] sm:$0xff]  ;;  %v26259_v57 = vld [vmem:[#allocation29_spill] sm:$0xff] }
 0x7e3   : > { %v11834_v26 = vadd.f32 %v16211_v6, %v26247_v49  ;;  %v16213_v22 = vadd.f32 %v11714_v63, %v10024_v50  ;;  %v10311_v54 = vpop.f32.mrb[17].mxu1  ;;  %v26260_v63 = vld [vmem:[#allocation35_spill] sm:$0xff] }
 0x7e4   : > { %11868 = vst [vmem:[%s17403_s7 + $0x70] sm:$0xff] %v11836_v61  ;;  %v11837_v60 = vadd.f32 %v16212_v12, %v26248_v11  ;;  %v15449_v2 = vpop.f32.mrb[18].mxu1 }
 0x7e5   : > { %11866 = vst [vmem:[%s17403_s7 + $0x60] sm:$0xff] %v11834_v26  ;;  %v11835_v30 = vadd.f32 %v16213_v22, %v26249_v18  ;;  %v10314_v7 = vpop.f32.mrb[19].mxu1  ;;  %v26261_v26 = vld [vmem:[#allocation30_spill] sm:$0xff] }
 0x7e6   : > { %11869 = vst [vmem:[%s17403_s7 + $0x78] sm:$0xff] %v11837_v60 }
 0x7e7   : > { %11867 = vst [vmem:[%s17403_s7 + $0x68] sm:$0xff] %v11835_v30  ;;  %v15640_v21 = vpop.f32.mrb[16].mxu0 }
 0x7e8   : > { %v16214_v56 = vadd.f32 %v15640_v21, %v15448_v36  ;;  %v11727_v28 = vpop.f32.mrb[17].mxu0 }
 0x7e9   : > { %v16215_v0 = vadd.f32 %v11727_v28, %v10311_v54  ;;  %v15641_v50 = vpop.f32.mrb[18].mxu0 }
 0x7ea   : > { %v11840_v58 = vadd.f32 %v16214_v56, %v26250_v42  ;;  %v16216_v19 = vadd.f32 %v15641_v50, %v15449_v2  ;;  %v11730_v52 = vpop.f32.mrb[19].mxu0  ;;  %v15452_v41 = vpop.f32.mrb[20].mxu1  ;;  %v26262_v2 = vld [vmem:[#allocation57_spill] sm:$0xff]  ;;  %v26263_v42 = vld [vmem:[#allocation36_spill] sm:$0xff] }
 0x7eb   : > { %v11838_v40 = vadd.f32 %v16215_v0, %v26251_v27  ;;  %v16217_v17 = vadd.f32 %v11730_v52, %v10314_v7  ;;  %v10327_v10 = vpop.f32.mrb[21].mxu1  ;;  %v26264_v52 = vld [vmem:[#allocation60_spill] sm:$0xff] }
 0x7ec   : > { %11872 = vst [vmem:[%s17403_s7 + $0x90] sm:$0xff] %v11840_v58  ;;  %v11841_v4 = vadd.f32 %v16216_v19, %v26252_v44  ;;  %v15453_v8 = vpop.f32.mrb[22].mxu1 }
 0x7ed   : > { %11870 = vst [vmem:[%s17403_s7 + $0x80] sm:$0xff] %v11838_v40  ;;  %v11839_v15 = vadd.f32 %v16217_v17, %v26253_v47  ;;  %v10330_v55 = vpop.f32.mrb[23].mxu1  ;;  %v26265_v40 = vld [vmem:[#allocation37_spill] sm:$0xff] }
 0x7ee   : > { %11873 = vst [vmem:[%s17403_s7 + $0x98] sm:$0xff] %v11841_v4 }
 0x7ef   : > { %11871 = vst [vmem:[%s17403_s7 + $0x88] sm:$0xff] %v11839_v15  ;;  %v15644_v3 = vpop.f32.mrb[20].mxu0 }
 0x7f0   : > { %v16218_v14 = vadd.f32 %v15644_v3, %v15452_v41  ;;  %v11743_v25 = vpop.f32.mrb[21].mxu0 }
 0x7f1   : > { %v16219_v32 = vadd.f32 %v11743_v25, %v10327_v10  ;;  %v15645_v37 = vpop.f32.mrb[22].mxu0 }
 0x7f2   : > { %v11844_v53 = vadd.f32 %v16218_v14, %v26254_v5  ;;  %v16220_v20 = vadd.f32 %v15645_v37, %v15453_v8  ;;  %v11746_v59 = vpop.f32.mrb[23].mxu0  ;;  %v15456_v38 = vpop.f32.mrb[24].mxu1 }
 0x7f3   : > { %v11842_v9 = vadd.f32 %v16219_v32, %v26255_v48  ;;  %v16221_v31 = vadd.f32 %v11746_v59, %v10330_v55  ;;  %v10343_v51 = vpop.f32.mrb[25].mxu1 }
 0x7f4   : > { %11876 = vst [vmem:[%s17403_s7 + $0xb0] sm:$0xff] %v11844_v53  ;;  %v11845_v46 = vadd.f32 %v16220_v20, %v26256_v62  ;;  %v15457_v1 = vpop.f32.mrb[26].mxu1 }
 0x7f5   : > { %11874 = vst [vmem:[%s17403_s7 + $0xa0] sm:$0xff] %v11842_v9  ;;  %v11843_v45 = vadd.f32 %v16221_v31, %v26257_v35  ;;  %v10346_v24 = vpop.f32.mrb[27].mxu1 }
 0x7f6   : > { %11877 = vst [vmem:[%s17403_s7 + $0xb8] sm:$0xff] %v11845_v46 }
 0x7f7   : > { %11875 = vst [vmem:[%s17403_s7 + $0xa8] sm:$0xff] %v11843_v45  ;;  %v15648_v13 = vpop.f32.mrb[24].mxu0 }
 0x7f8   : > { %v16222_v33 = vadd.f32 %v15648_v13, %v15456_v38  ;;  %v11759_v34 = vpop.f32.mrb[25].mxu0 }
 0x7f9   : > { %v16223_v39 = vadd.f32 %v11759_v34, %v10343_v51  ;;  %v15649_v43 = vpop.f32.mrb[26].mxu0 }
 0x7fa   : > { %v11848_v29 = vadd.f32 %v16222_v33, %v26258_v23  ;;  %v16224_v6 = vadd.f32 %v15649_v43, %v15457_v1  ;;  %v11762_v16 = vpop.f32.mrb[27].mxu0  ;;  %v15460_v11 = vpop.f32.mrb[28].mxu1 }
 0x7fb   : > { %v11846_v61 = vadd.f32 %v16223_v39, %v26259_v57  ;;  %v16225_v12 = vadd.f32 %v11762_v16, %v10346_v24  ;;  %v10359_v18 = vpop.f32.mrb[29].mxu1 }
 0x7fc   : > { %11880 = vst [vmem:[%s17403_s7 + $0xd0] sm:$0xff] %v11848_v29  ;;  %v11849_v49 = vadd.f32 %v16224_v6, %v26260_v63  ;;  %v15461_v21 = vpop.f32.mrb[30].mxu1 }
 0x7fd   : > { %11878 = vst [vmem:[%s17403_s7 + $0xc0] sm:$0xff] %v11846_v61  ;;  %v11847_v22 = vadd.f32 %v16225_v12, %v26261_v26  ;;  %v10362_v28 = vpop.f32.mrb[31].mxu1 }
 0x7fe   : > { %11881 = vst [vmem:[%s17403_s7 + $0xd8] sm:$0xff] %v11849_v49 }
 0x7ff   : > { %11879 = vst [vmem:[%s17403_s7 + $0xc8] sm:$0xff] %v11847_v22  ;;  %v15652_v60 = vpop.f32.mrb[28].mxu0 }
 0x800   : > { %v16226_v30 = vadd.f32 %v15652_v60, %v15460_v11  ;;  %v11775_v36 = vpop.f32.mrb[29].mxu0 }
 0x801   : > { %v16227_v54 = vadd.f32 %v11775_v36, %v10359_v18  ;;  %v15653_v56 = vpop.f32.mrb[30].mxu0 }
 0x802   : > { %v11852_v0 = vadd.f32 %v16226_v30, %v26262_v2  ;;  %v16228_v50 = vadd.f32 %v15653_v56, %v15461_v21  ;;  %v11778_v7 = vpop.f32.mrb[31].mxu0 }
 0x803   : > { %v11850_v58 = vadd.f32 %v16227_v54, %v26263_v42  ;;  %v16229_v19 = vadd.f32 %v11778_v7, %v10362_v28 }
 0x804   : > { %11884 = vst [vmem:[%s17403_s7 + $0xf0] sm:$0xff] %v11852_v0  ;;  %v11853_v27 = vadd.f32 %v16228_v50, %v26264_v52 }
 0x805   : > { %11882 = vst [vmem:[%s17403_s7 + $0xe0] sm:$0xff] %v11850_v58  ;;  %v11851_v17 = vadd.f32 %v16229_v19, %v26265_v40 }
 0x806   : > { %11885 = vst [vmem:[%s17403_s7 + $0xf8] sm:$0xff] %v11853_v27 }
 0x807   : > { %11883 = vst [vmem:[%s17403_s7 + $0xe8] sm:$0xff] %v11851_v17 }
 0x808 PF: > { %s16_s21 = sadd.s32 1, %s17172_s21  }
 0x809   : > { %p13_p6 = scmp.ge.s32.totalorder %s16_s21, 4  }
 0x80b   :  { %15 = sbr.rel (!%p13_p6) target bundleno = 1 (0x1), region = 128 }

</bundles_post_ra>
